<compile_context>
chip_gen: v7x
topology: tpu7x:2x2x1
jax: 0.10.0
libtpu: 0.0.40
codegen_flags: <defaults>
</compile_context>

<pallas_src>
import math
from functools import partial

import jax
import jax.numpy as jnp
from jax.experimental import pallas as pl
from jax.experimental.pallas import tpu as pltpu


# Matmul operand dtype.  float32 keeps numerical parity with the PyTorch
# reference at these tiny shapes; flip to jnp.bfloat16 on v6e/v7x at larger D
# (accumulation stays float32 via preferred_element_type).
MM_DTYPE = jnp.float32


# ----------------------------------------------------------------------------
# small in-kernel helpers (operate on loaded values)
# ----------------------------------------------------------------------------

def _mm(a, b):
    return jnp.dot(a.astype(MM_DTYPE), b.astype(MM_DTYPE),
                   preferred_element_type=jnp.float32)


def _mm_t(a, b):
    # a @ b.T  (contract the last dim of both operands)
    return jax.lax.dot_general(a.astype(MM_DTYPE), b.astype(MM_DTYPE),
                               (((1,), (1,)), ((), ())),
                               preferred_element_type=jnp.float32)


def _silu(x):
    return x * (1.0 / (1.0 + jnp.exp(-x)))


def _softplus(x):
    # stable softplus == torch.nn.functional.softplus (log form lowers cleanly)
    return jnp.maximum(x, 0.0) + jnp.log(1.0 + jnp.exp(-jnp.abs(x)))


def _torch_layer_norm(x, g, b, eps=1e-5):
    # torch.nn.LayerNorm: biased variance, eps inside rsqrt.
    mean = jnp.mean(x, axis=-1, keepdims=True)
    var = jnp.mean((x - mean) ** 2, axis=-1, keepdims=True)
    return (x - mean) * jax.lax.rsqrt(var + eps) * g + b


def _custom_layer_norm(y, g, b, eps=1e-6):
    # LayerNormalization from the reference: unbiased std, (x-mean)/(std+eps).
    d = y.shape[-1]
    mean = jnp.mean(y, axis=-1, keepdims=True)
    var = jnp.sum((y - mean) ** 2, axis=-1, keepdims=True) / float(d - 1)
    return g * (y - mean) / (jnp.sqrt(var) + eps) + b


# ----------------------------------------------------------------------------
# fused building blocks (values in, values out; all rows = B*S flattened)
# ----------------------------------------------------------------------------

def _mamba_block(xf, num_b, S, wi, cw, cb, wxdt, wxbT, wxcT, wdt, bdt,
                 alogT, dpar, wo, g, b):
    """LayerNorm(x + Mamba(x)) on flattened rows xf: (num_b*S, D)."""
    R, d_model = xf.shape
    di = wi.shape[1] // 2                        # d_inner
    K = cw.shape[0]                              # d_conv
    ds = alogT.shape[0]                          # d_state

    # ---- in_proj (no bias): conv path + gate, all rows in one matmul ----
    xz = _mm(xf, wi)                             # (R, 2*di)
    xc = xz[:, :di]
    z = xz[:, di:]

    # ---- causal depthwise conv1d + SiLU.  Shift-by-s built by prepending
    #      zero rows per batch (no MXU work, no wraparound, no iota masks). ----
    conv_rows = []
    for bb in range(num_b):
        xcb = xc[bb * S:(bb + 1) * S, :]                       # (S, di)
        acc = xcb * cw[K - 1:K, :]                             # zero-shift tap
        for s in range(1, K):
            shifted = jnp.concatenate(
                [jnp.zeros((s, di), jnp.float32), xcb[:S - s, :]], axis=0)
            acc = acc + shifted * cw[K - 1 - s:K - s, :]
        conv_rows.append(acc)
    u = _silu(jnp.concatenate(conv_rows, axis=0) + cb)         # (R, di)

    # ---- x_proj / dt_proj (position-wise, all rows at once) ----
    dt_low = _mm(u, wxdt)                                      # (R, dt_rank)
    dt = _softplus(_mm(dt_low, wdt) + bdt)                     # (R, di)
    bT = _mm_t(wxbT, u)                                        # (ds, R)
    cT = _mm_t(wxcT, u)                                        # (ds, R)

    negA_T = -jnp.exp(alogT)                                   # (ds, di)
    dtu = dt * u                                               # (R, di)
    gate = _silu(z)                                            # (R, di)
    ydelta = u * dpar                                          # (R, di)

    # ---- discretization hoisted out of the recurrence (EUP/VPU work done
    #      up front; only h = dA*h + dBu remains on the serial chain) ----
    dA = [jnp.exp(dt[r:r + 1, :] * negA_T) for r in range(R)]          # (ds, di)
    dBu = [bT[:, r:r + 1] * dtu[r:r + 1, :] for r in range(R)]         # (ds, di)

    # ---- selective scan (per-batch, fully unrolled); rows collected as
    #      values and concatenated once (no per-row masked scratch stores) ----
    ys = []
    for bb in range(num_b):
        h = jnp.zeros((ds, di), jnp.float32)
        for t in range(S):
            r = bb * S + t
            h = dA[r] * h + dBu[r]
            y_r = jnp.sum(h * cT[:, r:r + 1], axis=0, keepdims=True) \
                + ydelta[r:r + 1, :]
            ys.append(y_r * gate[r:r + 1, :])
    y = jnp.concatenate(ys, axis=0)                            # (R, di)

    # ---- out_proj (no bias) + residual + LayerNorm ----
    out = _mm(y, wo)                                           # (R, D)
    return _torch_layer_norm(xf + out, g, b)


def _mha_block(qs, ks, num_b, S, H, wq, bq, wkv, bkv, wo, bo, sg, sb,
               norm_g, norm_b):
    """norm_shared( srb1 + MHA(LN_sub(srb1), LN_sub(srb2)) ) on (num_b*S, D)."""
    R, d_model = qs.shape
    hd = d_model // H
    scale = 1.0 / math.sqrt(hd)

    n1 = _torch_layer_norm(qs, sg, sb)
    n2 = _torch_layer_norm(ks, sg, sb)
    q = _mm(n1, wq) + bq                                       # (R, D)
    kv = _mm(n2, wkv) + bkv                                    # (R, 2D)
    k = kv[:, :d_model]
    v = kv[:, d_model:]

    outs = []
    for bb in range(num_b):
        r0, r1 = bb * S, (bb + 1) * S
        heads = []
        for hh in range(H):
            lo, hi = hh * hd, (hh + 1) * hd
            qh = q[r0:r1, lo:hi]
            kh = k[r0:r1, lo:hi]
            vh = v[r0:r1, lo:hi]
            s = _mm_t(qh, kh) * scale                          # (S, S)
            s = s - jnp.max(s, axis=-1, keepdims=True)
            p = jnp.exp(s)
            p = p / jnp.sum(p, axis=-1, keepdims=True)         # exact softmax
            heads.append(_mm(p, vh))                           # (S, hd)
        outs.append(jnp.concatenate(heads, axis=-1))           # (S, D)
    o_all = jnp.concatenate(outs, axis=0)                      # (R, D)
    proj = _mm(o_all, wo) + bo                                 # one Wo matmul
    return _torch_layer_norm(qs + proj, norm_g, norm_b)


def _ffn_block(x, w1, b1, w2, b2, g, b):
    h = jnp.maximum(_mm(x, w1) + b1, 0.0)
    y = x + _mm(h, w2) + b2
    return _custom_layer_norm(y, g, b)


# ----------------------------------------------------------------------------
# kernels (grid axes: modality or batch; batch folded into each block)
# ----------------------------------------------------------------------------

def _stage1_kernel(x_ref, *refs, B, S, H):
    mamba_vals = [r[...] for r in refs[0:13]]
    mha_vals = [r[...] for r in refs[13:21]]
    outer_g = refs[21][...]
    outer_b = refs[22][...]
    o_ref = refs[23]

    x = x_ref[...]                                             # (B, S, D)
    d_model = x.shape[-1]
    xf = x.reshape(B * S, d_model)
    m1 = _mamba_block(xf, B, S, *mamba_vals)
    out = _mha_block(m1, m1, B, S, H, *mha_vals, outer_g, outer_b)
    o_ref[...] = out.reshape(x.shape)


def _cross_kernel(q_ref, kv_ref, *refs, NB, S, H):
    mha_vals = [r[...] for r in refs[0:8]]
    outer_g = refs[8][...]
    outer_b = refs[9][...]
    o_ref = refs[10]

    q = q_ref[...]
    d_model = q.shape[-1]
    qs = q.reshape(NB * S, d_model)
    ks = kv_ref[...].reshape(NB * S, d_model)
    out = _mha_block(qs, ks, NB, S, H, *mha_vals, outer_g, outer_b)
    o_ref[...] = out.reshape(q.shape)


def _stage2_kernel(x_ref, *refs, B, S, H):
    mamba_vals = [r[...] for r in refs[0:13]]
    mha_vals = [r[...] for r in refs[13:21]]
    outer_g = refs[21][...]
    outer_b = refs[22][...]
    ffn_vals = [r[...] for r in refs[23:29]]
    o_ref = refs[29]

    x = x_ref[...]                                             # (B, S, D)
    d_model = x.shape[-1]
    xf = x.reshape(B * S, d_model)
    m = _mamba_block(xf, B, S, *mamba_vals)
    a = _mha_block(m, m, B, S, H, *mha_vals, outer_g, outer_b)
    out = _ffn_block(a, *ffn_vals)
    o_ref[...] = out.reshape(x.shape)


# ----------------------------------------------------------------------------
# BlockSpec helpers & pallas_call wrappers
# ----------------------------------------------------------------------------

_PARALLEL1 = pltpu.CompilerParams(dimension_semantics=("parallel",))


def _ws_modality(*tail):
    """Weight stacked over the grid (modality) axis: array (M, *tail)."""
    zeros = (0,) * len(tail)
    return pl.BlockSpec((None,) + tuple(tail), lambda m, _z=zeros: (m,) + _z)


def _ws_fixed(idx, *tail):
    """Weight stacked with a fixed block index along the leading axis."""
    zeros = (0,) * len(tail)
    return pl.BlockSpec((None,) + tuple(tail),
                        lambda g, _i=idx, _z=zeros: (_i,) + _z)


def _mamba_arg_list(p):
    return [p['in_proj_w'], p['conv_w'], p['conv_b'], p['x_dt_w'], p['x_B_wT'],
            p['x_C_wT'], p['dt_proj_w'], p['dt_proj_b'], p['A_logT'], p['D'],
            p['out_proj_w'], p['ln_g'], p['ln_b']]


def _mamba_specs(D, di, K, ds, dt_rank, ws):
    return [ws(D, 2 * di), ws(K, di), ws(1, di), ws(di, dt_rank), ws(ds, di),
            ws(ds, di), ws(dt_rank, di), ws(1, di), ws(ds, di), ws(1, di),
            ws(di, D), ws(1, D), ws(1, D)]


def _mha_arg_list(p):
    return [p['wq'], p['bq'], p['wkv'], p['bkv'], p['wo'], p['bo'],
            p['sub_g'], p['sub_b']]


def _mha_specs(D, ws):
    return [ws(D, D), ws(1, D), ws(D, 2 * D), ws(1, 2 * D),
            ws(D, D), ws(1, D), ws(1, D), ws(1, D)]


def _ffn_arg_list(p):
    return [p['w1'], p['b1'], p['w2'], p['b2'], p['ln_g'], p['ln_b']]


def _ffn_specs(D, dff, ws):
    return [ws(D, dff), ws(1, dff), ws(dff, D), ws(1, D), ws(1, D), ws(1, D)]


def _stage1_call(x0, mamba_p, mha_p, norm_p, H):
    M, B, S, D = x0.shape
    di = mamba_p['conv_w'].shape[-1]
    K = mamba_p['conv_w'].shape[-2]
    ds = mamba_p['A_logT'].shape[-2]
    dt_rank = mamba_p['x_dt_w'].shape[-1]

    io_spec = pl.BlockSpec((None, B, S, D), lambda m: (m, 0, 0, 0))
    shared_spec = pl.BlockSpec((1, D), lambda m: (0, 0))
    in_specs = ([io_spec]
                + _mamba_specs(D, di, K, ds, dt_rank, _ws_modality)
                + _mha_specs(D, _ws_modality)
                + [shared_spec, shared_spec])

    return pl.pallas_call(
        partial(_stage1_kernel, B=B, S=S, H=H),
        out_shape=jax.ShapeDtypeStruct((M, B, S, D), jnp.float32),
        grid=(M,),
        in_specs=in_specs,
        out_specs=io_spec,
        compiler_params=_PARALLEL1,
    )(x0, *_mamba_arg_list(mamba_p), *_mha_arg_list(mha_p),
      norm_p['g'], norm_p['b'])


def _cross_text_call(x1, cross_p, norm_p, H):
    """text (m=0) attends to video (m=1); result written in place at m=0."""
    M, B, S, D = x1.shape
    q_spec = pl.BlockSpec((None, None, S, D), lambda b: (0, b, 0, 0))
    kv_spec = pl.BlockSpec((None, None, S, D), lambda b: (1, b, 0, 0))
    shared_spec = pl.BlockSpec((1, D), lambda b: (0, 0))
    ws = partial(_ws_fixed, 0)
    in_specs = [q_spec, kv_spec] + _mha_specs(D, ws) + [shared_spec, shared_spec]

    return pl.pallas_call(
        partial(_cross_kernel, NB=1, S=S, H=H),
        out_shape=jax.ShapeDtypeStruct((M, B, S, D), jnp.float32),
        grid=(B,),
        in_specs=in_specs,
        out_specs=q_spec,
        input_output_aliases={0: 0},     # video/audio slabs pass through untouched
        compiler_params=_PARALLEL1,
    )(x1, x1, *_mha_arg_list(cross_p), norm_p['g'], norm_p['b'])


def _cross_va_call(x2, cross_p, norm_p, H):
    """video (m=1) and audio (m=2) attend to the UPDATED text (m=0)."""
    M, B, S, D = x2.shape
    q_spec = pl.BlockSpec((None, B, S, D), lambda m: (m + 1, 0, 0, 0))
    kv_spec = pl.BlockSpec((None, B, S, D), lambda m: (0, 0, 0, 0))
    shared_spec = pl.BlockSpec((1, D), lambda m: (0, 0))
    in_specs = [q_spec, kv_spec] + _mha_specs(D, _ws_modality) \
        + [shared_spec, shared_spec]

    return pl.pallas_call(
        partial(_cross_kernel, NB=B, S=S, H=H),
        out_shape=jax.ShapeDtypeStruct((M, B, S, D), jnp.float32),
        grid=(2,),
        in_specs=in_specs,
        out_specs=q_spec,
        input_output_aliases={0: 0},     # updated-text slab passes through untouched
        compiler_params=_PARALLEL1,
    )(x2, x2, *_mha_arg_list(cross_p), norm_p['g'], norm_p['b'])


def _stage2_call(x3, mamba_p, mha_p, norm_p, ffn_p, H):
    M, B, S, D = x3.shape
    di = mamba_p['conv_w'].shape[-1]
    K = mamba_p['conv_w'].shape[-2]
    ds = mamba_p['A_logT'].shape[-2]
    dt_rank = mamba_p['x_dt_w'].shape[-1]
    dff = ffn_p['w1'].shape[-1]

    io_spec = pl.BlockSpec((None, B, S, D), lambda m: (m, 0, 0, 0))
    shared_spec = pl.BlockSpec((1, D), lambda m: (0, 0))
    in_specs = ([io_spec]
                + _mamba_specs(D, di, K, ds, dt_rank, _ws_modality)
                + _mha_specs(D, _ws_modality)
                + [shared_spec, shared_spec]
                + _ffn_specs(D, dff, _ws_modality))

    return pl.pallas_call(
        partial(_stage2_kernel, B=B, S=S, H=H),
        out_shape=jax.ShapeDtypeStruct((M, B, S, D), jnp.float32),
        grid=(M,),
        in_specs=in_specs,
        out_specs=io_spec,
        compiler_params=_PARALLEL1,
    )(x3, *_mamba_arg_list(mamba_p), *_mha_arg_list(mha_p),
      norm_p['g'], norm_p['b'], *_ffn_arg_list(ffn_p))


# ----------------------------------------------------------------------------
# Full CrossMambaformer forward (4 pallas_call launches)
# ----------------------------------------------------------------------------

def cross_mambaformer_forward(params, text, video, audio, *, num_heads):
    x0 = jnp.stack([text, video, audio], axis=0)          # (3, B, S, D)

    # 1) Mamba layer 1 + self-MHA sublayer 1 + shared outer norm
    x1 = _stage1_call(x0, params['mamba1'], params['self_mha1'],
                      params['norm'], num_heads)
    # 2) cross-attention: text attends to video (written in place at m=0)
    x2 = _cross_text_call(x1, params['cross_text'], params['norm'], num_heads)
    # 3) cross-attention: video & audio attend to the updated text
    x3 = _cross_va_call(x2, params['cross_va'], params['norm'], num_heads)
    # 4) Mamba layer 2 + self-MHA sublayer 2 + FFN + custom LayerNormalization
    x4 = _stage2_call(x3, params['mamba2'], params['self_mha2'],
                      params['norm'], params['ffn'], num_heads)
    return x4[0], x4[1], x4[2]


# ----------------------------------------------------------------------------
# Deterministic synthetic parameters
# ----------------------------------------------------------------------------

class KeyGen:
    def __init__(self, key):
        self._key = key

    def __call__(self):
        self._key, k = jax.random.split(self._key)
        return k


def xavier(key, shape):
    fan_in, fan_out = shape
    limit = math.sqrt(6.0 / (fan_in + fan_out))
    return jax.random.uniform(key, shape, jnp.float32, -limit, limit)


def stack_params(dicts):
    return jax.tree_util.tree_map(lambda *xs: jnp.stack(xs, axis=0), *dicts)


def make_mamba_layer_params(kg, D, d_state=16, d_conv=4):
    d_inner = 2 * D
    dt_rank = math.ceil(D / 16)
    x_proj_w = xavier(kg(), (d_inner, dt_rank + 2 * d_state))
    A_log = jnp.log(jnp.tile(jnp.arange(1, d_state + 1, dtype=jnp.float32)[None, :],
                             (d_inner, 1)))                   # (d_inner, d_state)
    return dict(
        in_proj_w=xavier(kg(), (D, 2 * d_inner)),
        conv_w=0.1 * jax.random.normal(kg(), (d_conv, d_inner), jnp.float32),
        conv_b=jnp.zeros((1, d_inner), jnp.float32),
        # x_proj split & pre-transposed into the layouts the kernel consumes:
        x_dt_w=x_proj_w[:, :dt_rank],                                   # (di, dt_rank)
        x_B_wT=jnp.transpose(x_proj_w[:, dt_rank:dt_rank + d_state]),   # (ds, di)
        x_C_wT=jnp.transpose(x_proj_w[:, dt_rank + d_state:]),          # (ds, di)
        dt_proj_w=xavier(kg(), (dt_rank, d_inner)),
        dt_proj_b=0.01 * jnp.ones((1, d_inner), jnp.float32),
        A_logT=jnp.transpose(A_log),                                    # (ds, di)
        D=jnp.ones((1, d_inner), jnp.float32),
        out_proj_w=xavier(kg(), (d_inner, D)),
        ln_g=jnp.ones((1, D), jnp.float32),
        ln_b=jnp.zeros((1, D), jnp.float32),
    )


def make_mha_sublayer_params(kg, D):
    wk = xavier(kg(), (D, D))
    wv = xavier(kg(), (D, D))
    return dict(
        wq=xavier(kg(), (D, D)), bq=jnp.zeros((1, D), jnp.float32),
        wkv=jnp.concatenate([wk, wv], axis=1),
        bkv=jnp.zeros((1, 2 * D), jnp.float32),
        wo=xavier(kg(), (D, D)), bo=jnp.zeros((1, D), jnp.float32),
        sub_g=jnp.ones((1, D), jnp.float32), sub_b=jnp.zeros((1, D), jnp.float32),
    )


def make_ffn_params(kg, D):
    return dict(
        w1=xavier(kg(), (D, 2 * D)), b1=jnp.zeros((1, 2 * D), jnp.float32),
        w2=xavier(kg(), (2 * D, D)), b2=jnp.zeros((1, D), jnp.float32),
        ln_g=jnp.ones((1, D), jnp.float32), ln_b=jnp.zeros((1, D), jnp.float32),
    )


def build_params(key, D, d_state=16, d_conv=4):
    kg = KeyGen(key)
    p = {}
    # modality order everywhere: (text, video, audio)
    p['mamba1'] = stack_params([make_mamba_layer_params(kg, D, d_state, d_conv)
                                for _ in range(3)])
    p['mamba2'] = stack_params([make_mamba_layer_params(kg, D, d_state, d_conv)
                                for _ in range(3)])
    p['self_mha1'] = stack_params([make_mha_sublayer_params(kg, D) for _ in range(3)])
    p['self_mha2'] = stack_params([make_mha_sublayer_params(kg, D) for _ in range(3)])
    cross = [make_mha_sublayer_params(kg, D) for _ in range(3)]   # text, video, audio
    p['cross_text'] = stack_params(cross[:1])
    p['cross_va'] = stack_params(cross[1:])
    p['ffn'] = stack_params([make_ffn_params(kg, D) for _ in range(3)])
    p['norm'] = dict(g=jnp.ones((1, D), jnp.float32), b=jnp.zeros((1, D), jnp.float32))
    return p


# ----------------------------------------------------------------------------

if __name__ == "__main__":
    D = 32          # model_dimension
    H = 4           # number_of_heads
    B = 2           # batch
    S = 8           # sequence length
    D_STATE = 16
    D_CONV = 4

    params = build_params(jax.random.PRNGKey(0), D, D_STATE, D_CONV)

    k1, k2, k3 = jax.random.split(jax.random.PRNGKey(0), 3)
    text_input = jax.random.normal(k1, (B, S, D), jnp.float32)
    video_input = jax.random.normal(k2, (B, S, D), jnp.float32)
    audio_input = jax.random.normal(k3, (B, S, D), jnp.float32)

    fwd = jax.jit(partial(cross_mambaformer_forward, num_heads=H))
    t_out, v_out, a_out = fwd(params, text_input, video_input, audio_input)
    jax.block_until_ready((t_out, v_out, a_out))

    assert t_out.shape == (B, S, D)
    assert v_out.shape == (B, S, D)
    assert a_out.shape == (B, S, D)
    assert bool(jnp.all(jnp.isfinite(t_out)))
    assert bool(jnp.all(jnp.isfinite(v_out)))
    assert bool(jnp.all(jnp.isfinite(a_out)))
    print("KERNEL_OK")
</pallas_src>

<mosaic_0001>
module attributes {stable_mosaic.version = 11 : i64} {
  func.func @_stage1_kernel(%arg0: i32, %arg1: memref<1x2x8x32xf32, #tpu.memory_space<vmem>>, %arg2: memref<1x32x128xf32, #tpu.memory_space<vmem>>, %arg3: memref<1x4x64xf32, #tpu.memory_space<vmem>>, %arg4: memref<1x1x64xf32, #tpu.memory_space<vmem>>, %arg5: memref<1x64x2xf32, #tpu.memory_space<vmem>>, %arg6: memref<1x16x64xf32, #tpu.memory_space<vmem>>, %arg7: memref<1x16x64xf32, #tpu.memory_space<vmem>>, %arg8: memref<1x2x64xf32, #tpu.memory_space<vmem>>, %arg9: memref<1x1x64xf32, #tpu.memory_space<vmem>>, %arg10: memref<1x16x64xf32, #tpu.memory_space<vmem>>, %arg11: memref<1x1x64xf32, #tpu.memory_space<vmem>>, %arg12: memref<1x64x32xf32, #tpu.memory_space<vmem>>, %arg13: memref<1x1x32xf32, #tpu.memory_space<vmem>>, %arg14: memref<1x1x32xf32, #tpu.memory_space<vmem>>, %arg15: memref<1x32x32xf32, #tpu.memory_space<vmem>>, %arg16: memref<1x1x32xf32, #tpu.memory_space<vmem>>, %arg17: memref<1x32x64xf32, #tpu.memory_space<vmem>>, %arg18: memref<1x1x64xf32, #tpu.memory_space<vmem>>, %arg19: memref<1x32x32xf32, #tpu.memory_space<vmem>>, %arg20: memref<1x1x32xf32, #tpu.memory_space<vmem>>, %arg21: memref<1x1x32xf32, #tpu.memory_space<vmem>>, %arg22: memref<1x1x32xf32, #tpu.memory_space<vmem>>, %arg23: memref<1x32xf32, #tpu.memory_space<vmem>>, %arg24: memref<1x32xf32, #tpu.memory_space<vmem>>, %arg25: memref<1x2x8x32xf32, #tpu.memory_space<vmem>>) attributes {dimension_semantics = [#tpu.dimension_semantics<parallel>], iteration_bounds = array<i64: 3>, scalar_prefetch = 0 : i64, scratch_operands = 0 : i64, tpu.core_type = #tpu.core_type<tc>, window_params = [{transform_indices = @transform_0, window_bounds = array<i64: 1, 2, 8, 32>}, {transform_indices = @transform_1, window_bounds = array<i64: 1, 32, 128>}, {transform_indices = @transform_2, window_bounds = array<i64: 1, 4, 64>}, {transform_indices = @transform_3, window_bounds = array<i64: 1, 1, 64>}, {transform_indices = @transform_4, window_bounds = array<i64: 1, 64, 2>}, {transform_indices = @transform_5, window_bounds = array<i64: 1, 16, 64>}, {transform_indices = @transform_6, window_bounds = array<i64: 1, 16, 64>}, {transform_indices = @transform_7, window_bounds = array<i64: 1, 2, 64>}, {transform_indices = @transform_8, window_bounds = array<i64: 1, 1, 64>}, {transform_indices = @transform_9, window_bounds = array<i64: 1, 16, 64>}, {transform_indices = @transform_10, window_bounds = array<i64: 1, 1, 64>}, {transform_indices = @transform_11, window_bounds = array<i64: 1, 64, 32>}, {transform_indices = @transform_12, window_bounds = array<i64: 1, 1, 32>}, {transform_indices = @transform_13, window_bounds = array<i64: 1, 1, 32>}, {transform_indices = @transform_14, window_bounds = array<i64: 1, 32, 32>}, {transform_indices = @transform_15, window_bounds = array<i64: 1, 1, 32>}, {transform_indices = @transform_16, window_bounds = array<i64: 1, 32, 64>}, {transform_indices = @transform_17, window_bounds = array<i64: 1, 1, 64>}, {transform_indices = @transform_18, window_bounds = array<i64: 1, 32, 32>}, {transform_indices = @transform_19, window_bounds = array<i64: 1, 1, 32>}, {transform_indices = @transform_20, window_bounds = array<i64: 1, 1, 32>}, {transform_indices = @transform_21, window_bounds = array<i64: 1, 1, 32>}, {pipeline_mode = #tpu.pipeline_mode<synchronous>, transform_indices = @transform_22, window_bounds = array<i64: 1, 32>}, {pipeline_mode = #tpu.pipeline_mode<synchronous>, transform_indices = @transform_23, window_bounds = array<i64: 1, 32>}, {transform_indices = @transform_24, window_bounds = array<i64: 1, 2, 8, 32>}]} {
    %c0 = arith.constant 0 : index
    %c0_0 = arith.constant 0 : index
    %c0_1 = arith.constant 0 : index
    %0 = vector.load %arg2[%c0, %c0_0, %c0_1] : memref<1x32x128xf32, #tpu.memory_space<vmem>>, vector<1x32x128xf32>
    %1 = vector.shape_cast %0 : vector<1x32x128xf32> to vector<32x128xf32>
    %c0_2 = arith.constant 0 : index
    %c0_3 = arith.constant 0 : index
    %c0_4 = arith.constant 0 : index
    %2 = vector.load %arg3[%c0_2, %c0_3, %c0_4] : memref<1x4x64xf32, #tpu.memory_space<vmem>>, vector<1x4x64xf32>
    %3 = vector.shape_cast %2 : vector<1x4x64xf32> to vector<4x64xf32>
    %c0_5 = arith.constant 0 : index
    %c0_6 = arith.constant 0 : index
    %c0_7 = arith.constant 0 : index
    %4 = vector.load %arg4[%c0_5, %c0_6, %c0_7] : memref<1x1x64xf32, #tpu.memory_space<vmem>>, vector<1x1x64xf32>
    %5 = vector.shape_cast %4 : vector<1x1x64xf32> to vector<1x64xf32>
    %c0_8 = arith.constant 0 : index
    %c0_9 = arith.constant 0 : index
    %c0_10 = arith.constant 0 : index
    %6 = vector.load %arg5[%c0_8, %c0_9, %c0_10] : memref<1x64x2xf32, #tpu.memory_space<vmem>>, vector<1x64x2xf32>
    %7 = vector.shape_cast %6 : vector<1x64x2xf32> to vector<64x2xf32>
    %c0_11 = arith.constant 0 : index
    %c0_12 = arith.constant 0 : index
    %c0_13 = arith.constant 0 : index
    %8 = vector.load %arg6[%c0_11, %c0_12, %c0_13] : memref<1x16x64xf32, #tpu.memory_space<vmem>>, vector<1x16x64xf32>
    %9 = vector.shape_cast %8 : vector<1x16x64xf32> to vector<16x64xf32>
    %c0_14 = arith.constant 0 : index
    %c0_15 = arith.constant 0 : index
    %c0_16 = arith.constant 0 : index
    %10 = vector.load %arg7[%c0_14, %c0_15, %c0_16] : memref<1x16x64xf32, #tpu.memory_space<vmem>>, vector<1x16x64xf32>
    %11 = vector.shape_cast %10 : vector<1x16x64xf32> to vector<16x64xf32>
    %c0_17 = arith.constant 0 : index
    %c0_18 = arith.constant 0 : index
    %c0_19 = arith.constant 0 : index
    %12 = vector.load %arg8[%c0_17, %c0_18, %c0_19] : memref<1x2x64xf32, #tpu.memory_space<vmem>>, vector<1x2x64xf32>
    %13 = vector.shape_cast %12 : vector<1x2x64xf32> to vector<2x64xf32>
    %c0_20 = arith.constant 0 : index
    %c0_21 = arith.constant 0 : index
    %c0_22 = arith.constant 0 : index
    %14 = vector.load %arg9[%c0_20, %c0_21, %c0_22] : memref<1x1x64xf32, #tpu.memory_space<vmem>>, vector<1x1x64xf32>
    %15 = vector.shape_cast %14 : vector<1x1x64xf32> to vector<1x64xf32>
    %c0_23 = arith.constant 0 : index
    %c0_24 = arith.constant 0 : index
    %c0_25 = arith.constant 0 : index
    %16 = vector.load %arg10[%c0_23, %c0_24, %c0_25] : memref<1x16x64xf32, #tpu.memory_space<vmem>>, vector<1x16x64xf32>
    %17 = vector.shape_cast %16 : vector<1x16x64xf32> to vector<16x64xf32>
    %c0_26 = arith.constant 0 : index
    %c0_27 = arith.constant 0 : index
    %c0_28 = arith.constant 0 : index
    %18 = vector.load %arg11[%c0_26, %c0_27, %c0_28] : memref<1x1x64xf32, #tpu.memory_space<vmem>>, vector<1x1x64xf32>
    %19 = vector.shape_cast %18 : vector<1x1x64xf32> to vector<1x64xf32>
    %c0_29 = arith.constant 0 : index
    %c0_30 = arith.constant 0 : index
    %c0_31 = arith.constant 0 : index
    %20 = vector.load %arg12[%c0_29, %c0_30, %c0_31] : memref<1x64x32xf32, #tpu.memory_space<vmem>>, vector<1x64x32xf32>
    %21 = vector.shape_cast %20 : vector<1x64x32xf32> to vector<64x32xf32>
    %c0_32 = arith.constant 0 : index
    %c0_33 = arith.constant 0 : index
    %c0_34 = arith.constant 0 : index
    %22 = vector.load %arg13[%c0_32, %c0_33, %c0_34] : memref<1x1x32xf32, #tpu.memory_space<vmem>>, vector<1x1x32xf32>
    %23 = vector.shape_cast %22 : vector<1x1x32xf32> to vector<1x32xf32>
    %c0_35 = arith.constant 0 : index
    %c0_36 = arith.constant 0 : index
    %c0_37 = arith.constant 0 : index
    %24 = vector.load %arg14[%c0_35, %c0_36, %c0_37] : memref<1x1x32xf32, #tpu.memory_space<vmem>>, vector<1x1x32xf32>
    %25 = vector.shape_cast %24 : vector<1x1x32xf32> to vector<1x32xf32>
    %c0_38 = arith.constant 0 : index
    %c0_39 = arith.constant 0 : index
    %c0_40 = arith.constant 0 : index
    %26 = vector.load %arg15[%c0_38, %c0_39, %c0_40] : memref<1x32x32xf32, #tpu.memory_space<vmem>>, vector<1x32x32xf32>
    %27 = vector.shape_cast %26 : vector<1x32x32xf32> to vector<32x32xf32>
    %c0_41 = arith.constant 0 : index
    %c0_42 = arith.constant 0 : index
    %c0_43 = arith.constant 0 : index
    %28 = vector.load %arg16[%c0_41, %c0_42, %c0_43] : memref<1x1x32xf32, #tpu.memory_space<vmem>>, vector<1x1x32xf32>
    %29 = vector.shape_cast %28 : vector<1x1x32xf32> to vector<1x32xf32>
    %c0_44 = arith.constant 0 : index
    %c0_45 = arith.constant 0 : index
    %c0_46 = arith.constant 0 : index
    %30 = vector.load %arg17[%c0_44, %c0_45, %c0_46] : memref<1x32x64xf32, #tpu.memory_space<vmem>>, vector<1x32x64xf32>
    %31 = vector.shape_cast %30 : vector<1x32x64xf32> to vector<32x64xf32>
    %c0_47 = arith.constant 0 : index
    %c0_48 = arith.constant 0 : index
    %c0_49 = arith.constant 0 : index
    %32 = vector.load %arg18[%c0_47, %c0_48, %c0_49] : memref<1x1x64xf32, #tpu.memory_space<vmem>>, vector<1x1x64xf32>
    %33 = vector.shape_cast %32 : vector<1x1x64xf32> to vector<1x64xf32>
    %c0_50 = arith.constant 0 : index
    %c0_51 = arith.constant 0 : index
    %c0_52 = arith.constant 0 : index
    %34 = vector.load %arg19[%c0_50, %c0_51, %c0_52] : memref<1x32x32xf32, #tpu.memory_space<vmem>>, vector<1x32x32xf32>
    %35 = vector.shape_cast %34 : vector<1x32x32xf32> to vector<32x32xf32>
    %c0_53 = arith.constant 0 : index
    %c0_54 = arith.constant 0 : index
    %c0_55 = arith.constant 0 : index
    %36 = vector.load %arg20[%c0_53, %c0_54, %c0_55] : memref<1x1x32xf32, #tpu.memory_space<vmem>>, vector<1x1x32xf32>
    %37 = vector.shape_cast %36 : vector<1x1x32xf32> to vector<1x32xf32>
    %c0_56 = arith.constant 0 : index
    %c0_57 = arith.constant 0 : index
    %c0_58 = arith.constant 0 : index
    %38 = vector.load %arg21[%c0_56, %c0_57, %c0_58] : memref<1x1x32xf32, #tpu.memory_space<vmem>>, vector<1x1x32xf32>
    %39 = vector.shape_cast %38 : vector<1x1x32xf32> to vector<1x32xf32>
    %c0_59 = arith.constant 0 : index
    %c0_60 = arith.constant 0 : index
    %c0_61 = arith.constant 0 : index
    %40 = vector.load %arg22[%c0_59, %c0_60, %c0_61] : memref<1x1x32xf32, #tpu.memory_space<vmem>>, vector<1x1x32xf32>
    %41 = vector.shape_cast %40 : vector<1x1x32xf32> to vector<1x32xf32>
    %c0_62 = arith.constant 0 : index
    %c0_63 = arith.constant 0 : index
    %42 = vector.load %arg23[%c0_62, %c0_63] : memref<1x32xf32, #tpu.memory_space<vmem>>, vector<1x32xf32>
    %c0_64 = arith.constant 0 : index
    %c0_65 = arith.constant 0 : index
    %43 = vector.load %arg24[%c0_64, %c0_65] : memref<1x32xf32, #tpu.memory_space<vmem>>, vector<1x32xf32>
    %c0_66 = arith.constant 0 : index
    %c0_67 = arith.constant 0 : index
    %c0_68 = arith.constant 0 : index
    %c0_69 = arith.constant 0 : index
    %44 = vector.load %arg1[%c0_66, %c0_67, %c0_68, %c0_69] : memref<1x2x8x32xf32, #tpu.memory_space<vmem>>, vector<1x2x8x32xf32>
    %45 = vector.shape_cast %44 : vector<1x2x8x32xf32> to vector<2x8x32xf32>
    %46 = vector.shape_cast %45 : vector<2x8x32xf32> to vector<16x32xf32>
    %cst = arith.constant dense<0.000000e+00> : vector<16x128xf32>
    %47 = tpu.matmul %46, %1, %cst {dimension_numbers = #tpu.dot_dimension_numbers<[1], [0], [0], [1], [0, 0, 1, 1], [], []>} : vector<16x32xf32>, vector<32x128xf32>, vector<16x128xf32> -> vector<16x128xf32>
    %48 = vector.extract_strided_slice %47 {offsets = [0, 0], sizes = [16, 64], strides = [1, 1]} : vector<16x128xf32> to vector<16x64xf32>
    %49 = vector.extract_strided_slice %47 {offsets = [0, 64], sizes = [16, 64], strides = [1, 1]} : vector<16x128xf32> to vector<16x64xf32>
    %50 = vector.extract_strided_slice %48 {offsets = [0, 0], sizes = [8, 64], strides = [1, 1]} : vector<16x64xf32> to vector<8x64xf32>
    %51 = vector.extract_strided_slice %3 {offsets = [3, 0], sizes = [1, 64], strides = [1, 1]} : vector<4x64xf32> to vector<1x64xf32>
    %52 = vector.broadcast %51 : vector<1x64xf32> to vector<8x64xf32>
    %53 = arith.mulf %50, %52 : vector<8x64xf32>
    %cst_70 = arith.constant 0.000000e+00 : f32
    %54 = vector.broadcast %cst_70 : f32 to vector<1x64xf32>
    %55 = vector.extract_strided_slice %50 {offsets = [0, 0], sizes = [7, 64], strides = [1, 1]} : vector<8x64xf32> to vector<7x64xf32>
    %56 = tpu.concatenate %54, %55 in 0 : vector<1x64xf32>, vector<7x64xf32> -> vector<8x64xf32>
    %57 = vector.extract_strided_slice %3 {offsets = [2, 0], sizes = [1, 64], strides = [1, 1]} : vector<4x64xf32> to vector<1x64xf32>
    %58 = vector.broadcast %57 : vector<1x64xf32> to vector<8x64xf32>
    %59 = arith.mulf %56, %58 : vector<8x64xf32>
    %60 = arith.addf %53, %59 : vector<8x64xf32>
    %cst_71 = arith.constant 0.000000e+00 : f32
    %61 = vector.broadcast %cst_71 : f32 to vector<2x64xf32>
    %62 = vector.extract_strided_slice %50 {offsets = [0, 0], sizes = [6, 64], strides = [1, 1]} : vector<8x64xf32> to vector<6x64xf32>
    %63 = tpu.concatenate %61, %62 in 0 : vector<2x64xf32>, vector<6x64xf32> -> vector<8x64xf32>
    %64 = vector.extract_strided_slice %3 {offsets = [1, 0], sizes = [1, 64], strides = [1, 1]} : vector<4x64xf32> to vector<1x64xf32>
    %65 = vector.broadcast %64 : vector<1x64xf32> to vector<8x64xf32>
    %66 = arith.mulf %63, %65 : vector<8x64xf32>
    %67 = arith.addf %60, %66 : vector<8x64xf32>
    %cst_72 = arith.constant 0.000000e+00 : f32
    %68 = vector.broadcast %cst_72 : f32 to vector<3x64xf32>
    %69 = vector.extract_strided_slice %50 {offsets = [0, 0], sizes = [5, 64], strides = [1, 1]} : vector<8x64xf32> to vector<5x64xf32>
    %70 = tpu.concatenate %68, %69 in 0 : vector<3x64xf32>, vector<5x64xf32> -> vector<8x64xf32>
    %71 = vector.extract_strided_slice %3 {offsets = [0, 0], sizes = [1, 64], strides = [1, 1]} : vector<4x64xf32> to vector<1x64xf32>
    %72 = vector.broadcast %71 : vector<1x64xf32> to vector<8x64xf32>
    %73 = arith.mulf %70, %72 : vector<8x64xf32>
    %74 = arith.addf %67, %73 : vector<8x64xf32>
    %75 = vector.extract_strided_slice %48 {offsets = [8, 0], sizes = [8, 64], strides = [1, 1]} : vector<16x64xf32> to vector<8x64xf32>
    %76 = vector.extract_strided_slice %3 {offsets = [3, 0], sizes = [1, 64], strides = [1, 1]} : vector<4x64xf32> to vector<1x64xf32>
    %77 = vector.broadcast %76 : vector<1x64xf32> to vector<8x64xf32>
    %78 = arith.mulf %75, %77 : vector<8x64xf32>
    %cst_73 = arith.constant 0.000000e+00 : f32
    %79 = vector.broadcast %cst_73 : f32 to vector<1x64xf32>
    %80 = vector.extract_strided_slice %75 {offsets = [0, 0], sizes = [7, 64], strides = [1, 1]} : vector<8x64xf32> to vector<7x64xf32>
    %81 = tpu.concatenate %79, %80 in 0 : vector<1x64xf32>, vector<7x64xf32> -> vector<8x64xf32>
    %82 = vector.extract_strided_slice %3 {offsets = [2, 0], sizes = [1, 64], strides = [1, 1]} : vector<4x64xf32> to vector<1x64xf32>
    %83 = vector.broadcast %82 : vector<1x64xf32> to vector<8x64xf32>
    %84 = arith.mulf %81, %83 : vector<8x64xf32>
    %85 = arith.addf %78, %84 : vector<8x64xf32>
    %cst_74 = arith.constant 0.000000e+00 : f32
    %86 = vector.broadcast %cst_74 : f32 to vector<2x64xf32>
    %87 = vector.extract_strided_slice %75 {offsets = [0, 0], sizes = [6, 64], strides = [1, 1]} : vector<8x64xf32> to vector<6x64xf32>
    %88 = tpu.concatenate %86, %87 in 0 : vector<2x64xf32>, vector<6x64xf32> -> vector<8x64xf32>
    %89 = vector.extract_strided_slice %3 {offsets = [1, 0], sizes = [1, 64], strides = [1, 1]} : vector<4x64xf32> to vector<1x64xf32>
    %90 = vector.broadcast %89 : vector<1x64xf32> to vector<8x64xf32>
    %91 = arith.mulf %88, %90 : vector<8x64xf32>
    %92 = arith.addf %85, %91 : vector<8x64xf32>
    %cst_75 = arith.constant 0.000000e+00 : f32
    %93 = vector.broadcast %cst_75 : f32 to vector<3x64xf32>
    %94 = vector.extract_strided_slice %75 {offsets = [0, 0], sizes = [5, 64], strides = [1, 1]} : vector<8x64xf32> to vector<5x64xf32>
    %95 = tpu.concatenate %93, %94 in 0 : vector<3x64xf32>, vector<5x64xf32> -> vector<8x64xf32>
    %96 = vector.extract_strided_slice %3 {offsets = [0, 0], sizes = [1, 64], strides = [1, 1]} : vector<4x64xf32> to vector<1x64xf32>
    %97 = vector.broadcast %96 : vector<1x64xf32> to vector<8x64xf32>
    %98 = arith.mulf %95, %97 : vector<8x64xf32>
    %99 = arith.addf %92, %98 : vector<8x64xf32>
    %100 = tpu.concatenate %74, %99 in 0 : vector<8x64xf32>, vector<8x64xf32> -> vector<16x64xf32>
    %101 = vector.broadcast %5 : vector<1x64xf32> to vector<16x64xf32>
    %102 = arith.addf %100, %101 : vector<16x64xf32>
    %cst_76 = arith.constant 0.000000e+00 : f32
    %103 = vector.broadcast %cst_76 : f32 to vector<16x64xf32>
    %104 = arith.subf %103, %102 : vector<16x64xf32>
    %105 = math.exp %104 : vector<16x64xf32>
    %cst_77 = arith.constant 1.000000e+00 : f32
    %106 = vector.broadcast %cst_77 : f32 to vector<16x64xf32>
    %107 = arith.addf %106, %105 : vector<16x64xf32>
    %cst_78 = arith.constant 1.000000e+00 : f32
    %108 = vector.broadcast %cst_78 : f32 to vector<16x64xf32>
    %109 = arith.divf %108, %107 : vector<16x64xf32>
    %110 = arith.mulf %102, %109 : vector<16x64xf32>
    %cst_79 = arith.constant dense<0.000000e+00> : vector<16x2xf32>
    %111 = tpu.matmul %110, %7, %cst_79 {dimension_numbers = #tpu.dot_dimension_numbers<[1], [0], [0], [1], [0, 0, 1, 1], [], []>} : vector<16x64xf32>, vector<64x2xf32>, vector<16x2xf32> -> vector<16x2xf32>
    %cst_80 = arith.constant dense<0.000000e+00> : vector<16x64xf32>
    %112 = tpu.matmul %111, %13, %cst_80 {dimension_numbers = #tpu.dot_dimension_numbers<[1], [0], [0], [1], [0, 0, 1, 1], [], []>} : vector<16x2xf32>, vector<2x64xf32>, vector<16x64xf32> -> vector<16x64xf32>
    %113 = vector.broadcast %15 : vector<1x64xf32> to vector<16x64xf32>
    %114 = arith.addf %112, %113 : vector<16x64xf32>
    %cst_81 = arith.constant 0.000000e+00 : f32
    %115 = vector.broadcast %cst_81 : f32 to vector<16x64xf32>
    %116 = arith.maximumf %114, %115 : vector<16x64xf32>
    %117 = math.absf %114 : vector<16x64xf32>
    %cst_82 = arith.constant 0.000000e+00 : f32
    %118 = vector.broadcast %cst_82 : f32 to vector<16x64xf32>
    %119 = arith.subf %118, %117 : vector<16x64xf32>
    %120 = math.exp %119 : vector<16x64xf32>
    %cst_83 = arith.constant 1.000000e+00 : f32
    %121 = vector.broadcast %cst_83 : f32 to vector<16x64xf32>
    %122 = arith.addf %121, %120 : vector<16x64xf32>
    %123 = math.log %122 : vector<16x64xf32>
    %124 = arith.addf %116, %123 : vector<16x64xf32>
    %cst_84 = arith.constant dense<0.000000e+00> : vector<16x16xf32>
    %125 = tpu.matmul %9, %110, %cst_84 {dimension_numbers = #tpu.dot_dimension_numbers<[1], [1], [0], [0], [0, 0, 1, 0], [], []>} : vector<16x64xf32>, vector<16x64xf32>, vector<16x16xf32> -> vector<16x16xf32>
    %cst_85 = arith.constant dense<0.000000e+00> : vector<16x16xf32>
    %126 = tpu.matmul %11, %110, %cst_85 {dimension_numbers = #tpu.dot_dimension_numbers<[1], [1], [0], [0], [0, 0, 1, 0], [], []>} : vector<16x64xf32>, vector<16x64xf32>, vector<16x16xf32> -> vector<16x16xf32>
    %127 = math.exp %17 : vector<16x64xf32>
    %cst_86 = arith.constant 0.000000e+00 : f32
    %128 = vector.broadcast %cst_86 : f32 to vector<16x64xf32>
    %129 = arith.subf %128, %127 : vector<16x64xf32>
    %130 = arith.mulf %124, %110 : vector<16x64xf32>
    %cst_87 = arith.constant 0.000000e+00 : f32
    %131 = vector.broadcast %cst_87 : f32 to vector<16x64xf32>
    %132 = arith.subf %131, %49 : vector<16x64xf32>
    %133 = math.exp %132 : vector<16x64xf32>
    %cst_88 = arith.constant 1.000000e+00 : f32
    %134 = vector.broadcast %cst_88 : f32 to vector<16x64xf32>
    %135 = arith.addf %134, %133 : vector<16x64xf32>
    %cst_89 = arith.constant 1.000000e+00 : f32
    %136 = vector.broadcast %cst_89 : f32 to vector<16x64xf32>
    %137 = arith.divf %136, %135 : vector<16x64xf32>
    %138 = arith.mulf %49, %137 : vector<16x64xf32>
    %139 = vector.broadcast %19 : vector<1x64xf32> to vector<16x64xf32>
    %140 = arith.mulf %110, %139 : vector<16x64xf32>
    %141 = vector.extract_strided_slice %124 {offsets = [0, 0], sizes = [1, 64], strides = [1, 1]} : vector<16x64xf32> to vector<1x64xf32>
    %142 = vector.broadcast %141 : vector<1x64xf32> to vector<16x64xf32>
    %143 = arith.mulf %142, %129 : vector<16x64xf32>
    %144 = math.exp %143 : vector<16x64xf32>
    %145 = vector.extract_strided_slice %124 {offsets = [1, 0], sizes = [1, 64], strides = [1, 1]} : vector<16x64xf32> to vector<1x64xf32>
    %146 = vector.broadcast %145 : vector<1x64xf32> to vector<16x64xf32>
    %147 = arith.mulf %146, %129 : vector<16x64xf32>
    %148 = math.exp %147 : vector<16x64xf32>
    %149 = vector.extract_strided_slice %124 {offsets = [2, 0], sizes = [1, 64], strides = [1, 1]} : vector<16x64xf32> to vector<1x64xf32>
    %150 = vector.broadcast %149 : vector<1x64xf32> to vector<16x64xf32>
    %151 = arith.mulf %150, %129 : vector<16x64xf32>
    %152 = math.exp %151 : vector<16x64xf32>
    %153 = vector.extract_strided_slice %124 {offsets = [3, 0], sizes = [1, 64], strides = [1, 1]} : vector<16x64xf32> to vector<1x64xf32>
    %154 = vector.broadcast %153 : vector<1x64xf32> to vector<16x64xf32>
    %155 = arith.mulf %154, %129 : vector<16x64xf32>
    %156 = math.exp %155 : vector<16x64xf32>
    %157 = vector.extract_strided_slice %124 {offsets = [4, 0], sizes = [1, 64], strides = [1, 1]} : vector<16x64xf32> to vector<1x64xf32>
    %158 = vector.broadcast %157 : vector<1x64xf32> to vector<16x64xf32>
    %159 = arith.mulf %158, %129 : vector<16x64xf32>
    %160 = math.exp %159 : vector<16x64xf32>
    %161 = vector.extract_strided_slice %124 {offsets = [5, 0], sizes = [1, 64], strides = [1, 1]} : vector<16x64xf32> to vector<1x64xf32>
    %162 = vector.broadcast %161 : vector<1x64xf32> to vector<16x64xf32>
    %163 = arith.mulf %162, %129 : vector<16x64xf32>
    %164 = math.exp %163 : vector<16x64xf32>
    %165 = vector.extract_strided_slice %124 {offsets = [6, 0], sizes = [1, 64], strides = [1, 1]} : vector<16x64xf32> to vector<1x64xf32>
    %166 = vector.broadcast %165 : vector<1x64xf32> to vector<16x64xf32>
    %167 = arith.mulf %166, %129 : vector<16x64xf32>
    %168 = math.exp %167 : vector<16x64xf32>
    %169 = vector.extract_strided_slice %124 {offsets = [7, 0], sizes = [1, 64], strides = [1, 1]} : vector<16x64xf32> to vector<1x64xf32>
    %170 = vector.broadcast %169 : vector<1x64xf32> to vector<16x64xf32>
    %171 = arith.mulf %170, %129 : vector<16x64xf32>
    %172 = math.exp %171 : vector<16x64xf32>
    %173 = vector.extract_strided_slice %124 {offsets = [8, 0], sizes = [1, 64], strides = [1, 1]} : vector<16x64xf32> to vector<1x64xf32>
    %174 = vector.broadcast %173 : vector<1x64xf32> to vector<16x64xf32>
    %175 = arith.mulf %174, %129 : vector<16x64xf32>
    %176 = math.exp %175 : vector<16x64xf32>
    %177 = vector.extract_strided_slice %124 {offsets = [9, 0], sizes = [1, 64], strides = [1, 1]} : vector<16x64xf32> to vector<1x64xf32>
    %178 = vector.broadcast %177 : vector<1x64xf32> to vector<16x64xf32>
    %179 = arith.mulf %178, %129 : vector<16x64xf32>
    %180 = math.exp %179 : vector<16x64xf32>
    %181 = vector.extract_strided_slice %124 {offsets = [10, 0], sizes = [1, 64], strides = [1, 1]} : vector<16x64xf32> to vector<1x64xf32>
    %182 = vector.broadcast %181 : vector<1x64xf32> to vector<16x64xf32>
    %183 = arith.mulf %182, %129 : vector<16x64xf32>
    %184 = math.exp %183 : vector<16x64xf32>
    %185 = vector.extract_strided_slice %124 {offsets = [11, 0], sizes = [1, 64], strides = [1, 1]} : vector<16x64xf32> to vector<1x64xf32>
    %186 = vector.broadcast %185 : vector<1x64xf32> to vector<16x64xf32>
    %187 = arith.mulf %186, %129 : vector<16x64xf32>
    %188 = math.exp %187 : vector<16x64xf32>
    %189 = vector.extract_strided_slice %124 {offsets = [12, 0], sizes = [1, 64], strides = [1, 1]} : vector<16x64xf32> to vector<1x64xf32>
    %190 = vector.broadcast %189 : vector<1x64xf32> to vector<16x64xf32>
    %191 = arith.mulf %190, %129 : vector<16x64xf32>
    %192 = math.exp %191 : vector<16x64xf32>
    %193 = vector.extract_strided_slice %124 {offsets = [13, 0], sizes = [1, 64], strides = [1, 1]} : vector<16x64xf32> to vector<1x64xf32>
    %194 = vector.broadcast %193 : vector<1x64xf32> to vector<16x64xf32>
    %195 = arith.mulf %194, %129 : vector<16x64xf32>
    %196 = math.exp %195 : vector<16x64xf32>
    %197 = vector.extract_strided_slice %124 {offsets = [14, 0], sizes = [1, 64], strides = [1, 1]} : vector<16x64xf32> to vector<1x64xf32>
    %198 = vector.broadcast %197 : vector<1x64xf32> to vector<16x64xf32>
    %199 = arith.mulf %198, %129 : vector<16x64xf32>
    %200 = math.exp %199 : vector<16x64xf32>
    %201 = vector.extract_strided_slice %124 {offsets = [15, 0], sizes = [1, 64], strides = [1, 1]} : vector<16x64xf32> to vector<1x64xf32>
    %202 = vector.broadcast %201 : vector<1x64xf32> to vector<16x64xf32>
    %203 = arith.mulf %202, %129 : vector<16x64xf32>
    %204 = math.exp %203 : vector<16x64xf32>
    %205 = vector.extract_strided_slice %125 {offsets = [0, 0], sizes = [16, 1], strides = [1, 1]} : vector<16x16xf32> to vector<16x1xf32>
    %206 = vector.extract_strided_slice %130 {offsets = [0, 0], sizes = [1, 64], strides = [1, 1]} : vector<16x64xf32> to vector<1x64xf32>
    %207 = vector.broadcast %205 : vector<16x1xf32> to vector<16x64xf32>
    %208 = vector.broadcast %206 : vector<1x64xf32> to vector<16x64xf32>
    %209 = arith.mulf %207, %208 : vector<16x64xf32>
    %210 = vector.extract_strided_slice %125 {offsets = [0, 1], sizes = [16, 1], strides = [1, 1]} : vector<16x16xf32> to vector<16x1xf32>
    %211 = vector.extract_strided_slice %130 {offsets = [1, 0], sizes = [1, 64], strides = [1, 1]} : vector<16x64xf32> to vector<1x64xf32>
    %212 = vector.broadcast %210 : vector<16x1xf32> to vector<16x64xf32>
    %213 = vector.broadcast %211 : vector<1x64xf32> to vector<16x64xf32>
    %214 = arith.mulf %212, %213 : vector<16x64xf32>
    %215 = vector.extract_strided_slice %125 {offsets = [0, 2], sizes = [16, 1], strides = [1, 1]} : vector<16x16xf32> to vector<16x1xf32>
    %216 = vector.extract_strided_slice %130 {offsets = [2, 0], sizes = [1, 64], strides = [1, 1]} : vector<16x64xf32> to vector<1x64xf32>
    %217 = vector.broadcast %215 : vector<16x1xf32> to vector<16x64xf32>
    %218 = vector.broadcast %216 : vector<1x64xf32> to vector<16x64xf32>
    %219 = arith.mulf %217, %218 : vector<16x64xf32>
    %220 = vector.extract_strided_slice %125 {offsets = [0, 3], sizes = [16, 1], strides = [1, 1]} : vector<16x16xf32> to vector<16x1xf32>
    %221 = vector.extract_strided_slice %130 {offsets = [3, 0], sizes = [1, 64], strides = [1, 1]} : vector<16x64xf32> to vector<1x64xf32>
    %222 = vector.broadcast %220 : vector<16x1xf32> to vector<16x64xf32>
    %223 = vector.broadcast %221 : vector<1x64xf32> to vector<16x64xf32>
    %224 = arith.mulf %222, %223 : vector<16x64xf32>
    %225 = vector.extract_strided_slice %125 {offsets = [0, 4], sizes = [16, 1], strides = [1, 1]} : vector<16x16xf32> to vector<16x1xf32>
    %226 = vector.extract_strided_slice %130 {offsets = [4, 0], sizes = [1, 64], strides = [1, 1]} : vector<16x64xf32> to vector<1x64xf32>
    %227 = vector.broadcast %225 : vector<16x1xf32> to vector<16x64xf32>
    %228 = vector.broadcast %226 : vector<1x64xf32> to vector<16x64xf32>
    %229 = arith.mulf %227, %228 : vector<16x64xf32>
    %230 = vector.extract_strided_slice %125 {offsets = [0, 5], sizes = [16, 1], strides = [1, 1]} : vector<16x16xf32> to vector<16x1xf32>
    %231 = vector.extract_strided_slice %130 {offsets = [5, 0], sizes = [1, 64], strides = [1, 1]} : vector<16x64xf32> to vector<1x64xf32>
    %232 = vector.broadcast %230 : vector<16x1xf32> to vector<16x64xf32>
    %233 = vector.broadcast %231 : vector<1x64xf32> to vector<16x64xf32>
    %234 = arith.mulf %232, %233 : vector<16x64xf32>
    %235 = vector.extract_strided_slice %125 {offsets = [0, 6], sizes = [16, 1], strides = [1, 1]} : vector<16x16xf32> to vector<16x1xf32>
    %236 = vector.extract_strided_slice %130 {offsets = [6, 0], sizes = [1, 64], strides = [1, 1]} : vector<16x64xf32> to vector<1x64xf32>
    %237 = vector.broadcast %235 : vector<16x1xf32> to vector<16x64xf32>
    %238 = vector.broadcast %236 : vector<1x64xf32> to vector<16x64xf32>
    %239 = arith.mulf %237, %238 : vector<16x64xf32>
    %240 = vector.extract_strided_slice %125 {offsets = [0, 7], sizes = [16, 1], strides = [1, 1]} : vector<16x16xf32> to vector<16x1xf32>
    %241 = vector.extract_strided_slice %130 {offsets = [7, 0], sizes = [1, 64], strides = [1, 1]} : vector<16x64xf32> to vector<1x64xf32>
    %242 = vector.broadcast %240 : vector<16x1xf32> to vector<16x64xf32>
    %243 = vector.broadcast %241 : vector<1x64xf32> to vector<16x64xf32>
    %244 = arith.mulf %242, %243 : vector<16x64xf32>
    %245 = vector.extract_strided_slice %125 {offsets = [0, 8], sizes = [16, 1], strides = [1, 1]} : vector<16x16xf32> to vector<16x1xf32>
    %246 = vector.extract_strided_slice %130 {offsets = [8, 0], sizes = [1, 64], strides = [1, 1]} : vector<16x64xf32> to vector<1x64xf32>
    %247 = vector.broadcast %245 : vector<16x1xf32> to vector<16x64xf32>
    %248 = vector.broadcast %246 : vector<1x64xf32> to vector<16x64xf32>
    %249 = arith.mulf %247, %248 : vector<16x64xf32>
    %250 = vector.extract_strided_slice %125 {offsets = [0, 9], sizes = [16, 1], strides = [1, 1]} : vector<16x16xf32> to vector<16x1xf32>
    %251 = vector.extract_strided_slice %130 {offsets = [9, 0], sizes = [1, 64], strides = [1, 1]} : vector<16x64xf32> to vector<1x64xf32>
    %252 = vector.broadcast %250 : vector<16x1xf32> to vector<16x64xf32>
    %253 = vector.broadcast %251 : vector<1x64xf32> to vector<16x64xf32>
    %254 = arith.mulf %252, %253 : vector<16x64xf32>
    %255 = vector.extract_strided_slice %125 {offsets = [0, 10], sizes = [16, 1], strides = [1, 1]} : vector<16x16xf32> to vector<16x1xf32>
    %256 = vector.extract_strided_slice %130 {offsets = [10, 0], sizes = [1, 64], strides = [1, 1]} : vector<16x64xf32> to vector<1x64xf32>
    %257 = vector.broadcast %255 : vector<16x1xf32> to vector<16x64xf32>
    %258 = vector.broadcast %256 : vector<1x64xf32> to vector<16x64xf32>
    %259 = arith.mulf %257, %258 : vector<16x64xf32>
    %260 = vector.extract_strided_slice %125 {offsets = [0, 11], sizes = [16, 1], strides = [1, 1]} : vector<16x16xf32> to vector<16x1xf32>
    %261 = vector.extract_strided_slice %130 {offsets = [11, 0], sizes = [1, 64], strides = [1, 1]} : vector<16x64xf32> to vector<1x64xf32>
    %262 = vector.broadcast %260 : vector<16x1xf32> to vector<16x64xf32>
    %263 = vector.broadcast %261 : vector<1x64xf32> to vector<16x64xf32>
    %264 = arith.mulf %262, %263 : vector<16x64xf32>
    %265 = vector.extract_strided_slice %125 {offsets = [0, 12], sizes = [16, 1], strides = [1, 1]} : vector<16x16xf32> to vector<16x1xf32>
    %266 = vector.extract_strided_slice %130 {offsets = [12, 0], sizes = [1, 64], strides = [1, 1]} : vector<16x64xf32> to vector<1x64xf32>
    %267 = vector.broadcast %265 : vector<16x1xf32> to vector<16x64xf32>
    %268 = vector.broadcast %266 : vector<1x64xf32> to vector<16x64xf32>
    %269 = arith.mulf %267, %268 : vector<16x64xf32>
    %270 = vector.extract_strided_slice %125 {offsets = [0, 13], sizes = [16, 1], strides = [1, 1]} : vector<16x16xf32> to vector<16x1xf32>
    %271 = vector.extract_strided_slice %130 {offsets = [13, 0], sizes = [1, 64], strides = [1, 1]} : vector<16x64xf32> to vector<1x64xf32>
    %272 = vector.broadcast %270 : vector<16x1xf32> to vector<16x64xf32>
    %273 = vector.broadcast %271 : vector<1x64xf32> to vector<16x64xf32>
    %274 = arith.mulf %272, %273 : vector<16x64xf32>
    %275 = vector.extract_strided_slice %125 {offsets = [0, 14], sizes = [16, 1], strides = [1, 1]} : vector<16x16xf32> to vector<16x1xf32>
    %276 = vector.extract_strided_slice %130 {offsets = [14, 0], sizes = [1, 64], strides = [1, 1]} : vector<16x64xf32> to vector<1x64xf32>
    %277 = vector.broadcast %275 : vector<16x1xf32> to vector<16x64xf32>
    %278 = vector.broadcast %276 : vector<1x64xf32> to vector<16x64xf32>
    %279 = arith.mulf %277, %278 : vector<16x64xf32>
    %280 = vector.extract_strided_slice %125 {offsets = [0, 15], sizes = [16, 1], strides = [1, 1]} : vector<16x16xf32> to vector<16x1xf32>
    %281 = vector.extract_strided_slice %130 {offsets = [15, 0], sizes = [1, 64], strides = [1, 1]} : vector<16x64xf32> to vector<1x64xf32>
    %282 = vector.broadcast %280 : vector<16x1xf32> to vector<16x64xf32>
    %283 = vector.broadcast %281 : vector<1x64xf32> to vector<16x64xf32>
    %284 = arith.mulf %282, %283 : vector<16x64xf32>
    %cst_90 = arith.constant 0.000000e+00 : f32
    %285 = vector.broadcast %cst_90 : f32 to vector<16x64xf32>
    %286 = arith.mulf %144, %285 : vector<16x64xf32>
    %287 = arith.addf %286, %209 : vector<16x64xf32>
    %288 = vector.extract_strided_slice %126 {offsets = [0, 0], sizes = [16, 1], strides = [1, 1]} : vector<16x16xf32> to vector<16x1xf32>
    %289 = vector.broadcast %288 : vector<16x1xf32> to vector<16x64xf32>
    %290 = arith.mulf %287, %289 : vector<16x64xf32>
    %cst_91 = arith.constant dense<0.000000e+00> : vector<64xf32>
    %291 = vector.multi_reduction <add>, %290, %cst_91 [0] : vector<16x64xf32> to vector<64xf32>
    %292 = vector.shape_cast %291 : vector<64xf32> to vector<1x64xf32>
    %293 = vector.extract_strided_slice %140 {offsets = [0, 0], sizes = [1, 64], strides = [1, 1]} : vector<16x64xf32> to vector<1x64xf32>
    %294 = arith.addf %292, %293 : vector<1x64xf32>
    %295 = vector.extract_strided_slice %138 {offsets = [0, 0], sizes = [1, 64], strides = [1, 1]} : vector<16x64xf32> to vector<1x64xf32>
    %296 = arith.mulf %294, %295 : vector<1x64xf32>
    %297 = arith.mulf %148, %287 : vector<16x64xf32>
    %298 = arith.addf %297, %214 : vector<16x64xf32>
    %299 = vector.extract_strided_slice %126 {offsets = [0, 1], sizes = [16, 1], strides = [1, 1]} : vector<16x16xf32> to vector<16x1xf32>
    %300 = vector.broadcast %299 : vector<16x1xf32> to vector<16x64xf32>
    %301 = arith.mulf %298, %300 : vector<16x64xf32>
    %cst_92 = arith.constant dense<0.000000e+00> : vector<64xf32>
    %302 = vector.multi_reduction <add>, %301, %cst_92 [0] : vector<16x64xf32> to vector<64xf32>
    %303 = vector.shape_cast %302 : vector<64xf32> to vector<1x64xf32>
    %304 = vector.extract_strided_slice %140 {offsets = [1, 0], sizes = [1, 64], strides = [1, 1]} : vector<16x64xf32> to vector<1x64xf32>
    %305 = arith.addf %303, %304 : vector<1x64xf32>
    %306 = vector.extract_strided_slice %138 {offsets = [1, 0], sizes = [1, 64], strides = [1, 1]} : vector<16x64xf32> to vector<1x64xf32>
    %307 = arith.mulf %305, %306 : vector<1x64xf32>
    %308 = arith.mulf %152, %298 : vector<16x64xf32>
    %309 = arith.addf %308, %219 : vector<16x64xf32>
    %310 = vector.extract_strided_slice %126 {offsets = [0, 2], sizes = [16, 1], strides = [1, 1]} : vector<16x16xf32> to vector<16x1xf32>
    %311 = vector.broadcast %310 : vector<16x1xf32> to vector<16x64xf32>
    %312 = arith.mulf %309, %311 : vector<16x64xf32>
    %cst_93 = arith.constant dense<0.000000e+00> : vector<64xf32>
    %313 = vector.multi_reduction <add>, %312, %cst_93 [0] : vector<16x64xf32> to vector<64xf32>
    %314 = vector.shape_cast %313 : vector<64xf32> to vector<1x64xf32>
    %315 = vector.extract_strided_slice %140 {offsets = [2, 0], sizes = [1, 64], strides = [1, 1]} : vector<16x64xf32> to vector<1x64xf32>
    %316 = arith.addf %314, %315 : vector<1x64xf32>
    %317 = vector.extract_strided_slice %138 {offsets = [2, 0], sizes = [1, 64], strides = [1, 1]} : vector<16x64xf32> to vector<1x64xf32>
    %318 = arith.mulf %316, %317 : vector<1x64xf32>
    %319 = arith.mulf %156, %309 : vector<16x64xf32>
    %320 = arith.addf %319, %224 : vector<16x64xf32>
    %321 = vector.extract_strided_slice %126 {offsets = [0, 3], sizes = [16, 1], strides = [1, 1]} : vector<16x16xf32> to vector<16x1xf32>
    %322 = vector.broadcast %321 : vector<16x1xf32> to vector<16x64xf32>
    %323 = arith.mulf %320, %322 : vector<16x64xf32>
    %cst_94 = arith.constant dense<0.000000e+00> : vector<64xf32>
    %324 = vector.multi_reduction <add>, %323, %cst_94 [0] : vector<16x64xf32> to vector<64xf32>
    %325 = vector.shape_cast %324 : vector<64xf32> to vector<1x64xf32>
    %326 = vector.extract_strided_slice %140 {offsets = [3, 0], sizes = [1, 64], strides = [1, 1]} : vector<16x64xf32> to vector<1x64xf32>
    %327 = arith.addf %325, %326 : vector<1x64xf32>
    %328 = vector.extract_strided_slice %138 {offsets = [3, 0], sizes = [1, 64], strides = [1, 1]} : vector<16x64xf32> to vector<1x64xf32>
    %329 = arith.mulf %327, %328 : vector<1x64xf32>
    %330 = arith.mulf %160, %320 : vector<16x64xf32>
    %331 = arith.addf %330, %229 : vector<16x64xf32>
    %332 = vector.extract_strided_slice %126 {offsets = [0, 4], sizes = [16, 1], strides = [1, 1]} : vector<16x16xf32> to vector<16x1xf32>
    %333 = vector.broadcast %332 : vector<16x1xf32> to vector<16x64xf32>
    %334 = arith.mulf %331, %333 : vector<16x64xf32>
    %cst_95 = arith.constant dense<0.000000e+00> : vector<64xf32>
    %335 = vector.multi_reduction <add>, %334, %cst_95 [0] : vector<16x64xf32> to vector<64xf32>
    %336 = vector.shape_cast %335 : vector<64xf32> to vector<1x64xf32>
    %337 = vector.extract_strided_slice %140 {offsets = [4, 0], sizes = [1, 64], strides = [1, 1]} : vector<16x64xf32> to vector<1x64xf32>
    %338 = arith.addf %336, %337 : vector<1x64xf32>
    %339 = vector.extract_strided_slice %138 {offsets = [4, 0], sizes = [1, 64], strides = [1, 1]} : vector<16x64xf32> to vector<1x64xf32>
    %340 = arith.mulf %338, %339 : vector<1x64xf32>
    %341 = arith.mulf %164, %331 : vector<16x64xf32>
    %342 = arith.addf %341, %234 : vector<16x64xf32>
    %343 = vector.extract_strided_slice %126 {offsets = [0, 5], sizes = [16, 1], strides = [1, 1]} : vector<16x16xf32> to vector<16x1xf32>
    %344 = vector.broadcast %343 : vector<16x1xf32> to vector<16x64xf32>
    %345 = arith.mulf %342, %344 : vector<16x64xf32>
    %cst_96 = arith.constant dense<0.000000e+00> : vector<64xf32>
    %346 = vector.multi_reduction <add>, %345, %cst_96 [0] : vector<16x64xf32> to vector<64xf32>
    %347 = vector.shape_cast %346 : vector<64xf32> to vector<1x64xf32>
    %348 = vector.extract_strided_slice %140 {offsets = [5, 0], sizes = [1, 64], strides = [1, 1]} : vector<16x64xf32> to vector<1x64xf32>
    %349 = arith.addf %347, %348 : vector<1x64xf32>
    %350 = vector.extract_strided_slice %138 {offsets = [5, 0], sizes = [1, 64], strides = [1, 1]} : vector<16x64xf32> to vector<1x64xf32>
    %351 = arith.mulf %349, %350 : vector<1x64xf32>
    %352 = arith.mulf %168, %342 : vector<16x64xf32>
    %353 = arith.addf %352, %239 : vector<16x64xf32>
    %354 = vector.extract_strided_slice %126 {offsets = [0, 6], sizes = [16, 1], strides = [1, 1]} : vector<16x16xf32> to vector<16x1xf32>
    %355 = vector.broadcast %354 : vector<16x1xf32> to vector<16x64xf32>
    %356 = arith.mulf %353, %355 : vector<16x64xf32>
    %cst_97 = arith.constant dense<0.000000e+00> : vector<64xf32>
    %357 = vector.multi_reduction <add>, %356, %cst_97 [0] : vector<16x64xf32> to vector<64xf32>
    %358 = vector.shape_cast %357 : vector<64xf32> to vector<1x64xf32>
    %359 = vector.extract_strided_slice %140 {offsets = [6, 0], sizes = [1, 64], strides = [1, 1]} : vector<16x64xf32> to vector<1x64xf32>
    %360 = arith.addf %358, %359 : vector<1x64xf32>
    %361 = vector.extract_strided_slice %138 {offsets = [6, 0], sizes = [1, 64], strides = [1, 1]} : vector<16x64xf32> to vector<1x64xf32>
    %362 = arith.mulf %360, %361 : vector<1x64xf32>
    %363 = arith.mulf %172, %353 : vector<16x64xf32>
    %364 = arith.addf %363, %244 : vector<16x64xf32>
    %365 = vector.extract_strided_slice %126 {offsets = [0, 7], sizes = [16, 1], strides = [1, 1]} : vector<16x16xf32> to vector<16x1xf32>
    %366 = vector.broadcast %365 : vector<16x1xf32> to vector<16x64xf32>
    %367 = arith.mulf %364, %366 : vector<16x64xf32>
    %cst_98 = arith.constant dense<0.000000e+00> : vector<64xf32>
    %368 = vector.multi_reduction <add>, %367, %cst_98 [0] : vector<16x64xf32> to vector<64xf32>
    %369 = vector.shape_cast %368 : vector<64xf32> to vector<1x64xf32>
    %370 = vector.extract_strided_slice %140 {offsets = [7, 0], sizes = [1, 64], strides = [1, 1]} : vector<16x64xf32> to vector<1x64xf32>
    %371 = arith.addf %369, %370 : vector<1x64xf32>
    %372 = vector.extract_strided_slice %138 {offsets = [7, 0], sizes = [1, 64], strides = [1, 1]} : vector<16x64xf32> to vector<1x64xf32>
    %373 = arith.mulf %371, %372 : vector<1x64xf32>
    %cst_99 = arith.constant 0.000000e+00 : f32
    %374 = vector.broadcast %cst_99 : f32 to vector<16x64xf32>
    %375 = arith.mulf %176, %374 : vector<16x64xf32>
    %376 = arith.addf %375, %249 : vector<16x64xf32>
    %377 = vector.extract_strided_slice %126 {offsets = [0, 8], sizes = [16, 1], strides = [1, 1]} : vector<16x16xf32> to vector<16x1xf32>
    %378 = vector.broadcast %377 : vector<16x1xf32> to vector<16x64xf32>
    %379 = arith.mulf %376, %378 : vector<16x64xf32>
    %cst_100 = arith.constant dense<0.000000e+00> : vector<64xf32>
    %380 = vector.multi_reduction <add>, %379, %cst_100 [0] : vector<16x64xf32> to vector<64xf32>
    %381 = vector.shape_cast %380 : vector<64xf32> to vector<1x64xf32>
    %382 = vector.extract_strided_slice %140 {offsets = [8, 0], sizes = [1, 64], strides = [1, 1]} : vector<16x64xf32> to vector<1x64xf32>
    %383 = arith.addf %381, %382 : vector<1x64xf32>
    %384 = vector.extract_strided_slice %138 {offsets = [8, 0], sizes = [1, 64], strides = [1, 1]} : vector<16x64xf32> to vector<1x64xf32>
    %385 = arith.mulf %383, %384 : vector<1x64xf32>
    %386 = arith.mulf %180, %376 : vector<16x64xf32>
    %387 = arith.addf %386, %254 : vector<16x64xf32>
    %388 = vector.extract_strided_slice %126 {offsets = [0, 9], sizes = [16, 1], strides = [1, 1]} : vector<16x16xf32> to vector<16x1xf32>
    %389 = vector.broadcast %388 : vector<16x1xf32> to vector<16x64xf32>
    %390 = arith.mulf %387, %389 : vector<16x64xf32>
    %cst_101 = arith.constant dense<0.000000e+00> : vector<64xf32>
    %391 = vector.multi_reduction <add>, %390, %cst_101 [0] : vector<16x64xf32> to vector<64xf32>
    %392 = vector.shape_cast %391 : vector<64xf32> to vector<1x64xf32>
    %393 = vector.extract_strided_slice %140 {offsets = [9, 0], sizes = [1, 64], strides = [1, 1]} : vector<16x64xf32> to vector<1x64xf32>
    %394 = arith.addf %392, %393 : vector<1x64xf32>
    %395 = vector.extract_strided_slice %138 {offsets = [9, 0], sizes = [1, 64], strides = [1, 1]} : vector<16x64xf32> to vector<1x64xf32>
    %396 = arith.mulf %394, %395 : vector<1x64xf32>
    %397 = arith.mulf %184, %387 : vector<16x64xf32>
    %398 = arith.addf %397, %259 : vector<16x64xf32>
    %399 = vector.extract_strided_slice %126 {offsets = [0, 10], sizes = [16, 1], strides = [1, 1]} : vector<16x16xf32> to vector<16x1xf32>
    %400 = vector.broadcast %399 : vector<16x1xf32> to vector<16x64xf32>
    %401 = arith.mulf %398, %400 : vector<16x64xf32>
    %cst_102 = arith.constant dense<0.000000e+00> : vector<64xf32>
    %402 = vector.multi_reduction <add>, %401, %cst_102 [0] : vector<16x64xf32> to vector<64xf32>
    %403 = vector.shape_cast %402 : vector<64xf32> to vector<1x64xf32>
    %404 = vector.extract_strided_slice %140 {offsets = [10, 0], sizes = [1, 64], strides = [1, 1]} : vector<16x64xf32> to vector<1x64xf32>
    %405 = arith.addf %403, %404 : vector<1x64xf32>
    %406 = vector.extract_strided_slice %138 {offsets = [10, 0], sizes = [1, 64], strides = [1, 1]} : vector<16x64xf32> to vector<1x64xf32>
    %407 = arith.mulf %405, %406 : vector<1x64xf32>
    %408 = arith.mulf %188, %398 : vector<16x64xf32>
    %409 = arith.addf %408, %264 : vector<16x64xf32>
    %410 = vector.extract_strided_slice %126 {offsets = [0, 11], sizes = [16, 1], strides = [1, 1]} : vector<16x16xf32> to vector<16x1xf32>
    %411 = vector.broadcast %410 : vector<16x1xf32> to vector<16x64xf32>
    %412 = arith.mulf %409, %411 : vector<16x64xf32>
    %cst_103 = arith.constant dense<0.000000e+00> : vector<64xf32>
    %413 = vector.multi_reduction <add>, %412, %cst_103 [0] : vector<16x64xf32> to vector<64xf32>
    %414 = vector.shape_cast %413 : vector<64xf32> to vector<1x64xf32>
    %415 = vector.extract_strided_slice %140 {offsets = [11, 0], sizes = [1, 64], strides = [1, 1]} : vector<16x64xf32> to vector<1x64xf32>
    %416 = arith.addf %414, %415 : vector<1x64xf32>
    %417 = vector.extract_strided_slice %138 {offsets = [11, 0], sizes = [1, 64], strides = [1, 1]} : vector<16x64xf32> to vector<1x64xf32>
    %418 = arith.mulf %416, %417 : vector<1x64xf32>
    %419 = arith.mulf %192, %409 : vector<16x64xf32>
    %420 = arith.addf %419, %269 : vector<16x64xf32>
    %421 = vector.extract_strided_slice %126 {offsets = [0, 12], sizes = [16, 1], strides = [1, 1]} : vector<16x16xf32> to vector<16x1xf32>
    %422 = vector.broadcast %421 : vector<16x1xf32> to vector<16x64xf32>
    %423 = arith.mulf %420, %422 : vector<16x64xf32>
    %cst_104 = arith.constant dense<0.000000e+00> : vector<64xf32>
    %424 = vector.multi_reduction <add>, %423, %cst_104 [0] : vector<16x64xf32> to vector<64xf32>
    %425 = vector.shape_cast %424 : vector<64xf32> to vector<1x64xf32>
    %426 = vector.extract_strided_slice %140 {offsets = [12, 0], sizes = [1, 64], strides = [1, 1]} : vector<16x64xf32> to vector<1x64xf32>
    %427 = arith.addf %425, %426 : vector<1x64xf32>
    %428 = vector.extract_strided_slice %138 {offsets = [12, 0], sizes = [1, 64], strides = [1, 1]} : vector<16x64xf32> to vector<1x64xf32>
    %429 = arith.mulf %427, %428 : vector<1x64xf32>
    %430 = arith.mulf %196, %420 : vector<16x64xf32>
    %431 = arith.addf %430, %274 : vector<16x64xf32>
    %432 = vector.extract_strided_slice %126 {offsets = [0, 13], sizes = [16, 1], strides = [1, 1]} : vector<16x16xf32> to vector<16x1xf32>
    %433 = vector.broadcast %432 : vector<16x1xf32> to vector<16x64xf32>
    %434 = arith.mulf %431, %433 : vector<16x64xf32>
    %cst_105 = arith.constant dense<0.000000e+00> : vector<64xf32>
    %435 = vector.multi_reduction <add>, %434, %cst_105 [0] : vector<16x64xf32> to vector<64xf32>
    %436 = vector.shape_cast %435 : vector<64xf32> to vector<1x64xf32>
    %437 = vector.extract_strided_slice %140 {offsets = [13, 0], sizes = [1, 64], strides = [1, 1]} : vector<16x64xf32> to vector<1x64xf32>
    %438 = arith.addf %436, %437 : vector<1x64xf32>
    %439 = vector.extract_strided_slice %138 {offsets = [13, 0], sizes = [1, 64], strides = [1, 1]} : vector<16x64xf32> to vector<1x64xf32>
    %440 = arith.mulf %438, %439 : vector<1x64xf32>
    %441 = arith.mulf %200, %431 : vector<16x64xf32>
    %442 = arith.addf %441, %279 : vector<16x64xf32>
    %443 = vector.extract_strided_slice %126 {offsets = [0, 14], sizes = [16, 1], strides = [1, 1]} : vector<16x16xf32> to vector<16x1xf32>
    %444 = vector.broadcast %443 : vector<16x1xf32> to vector<16x64xf32>
    %445 = arith.mulf %442, %444 : vector<16x64xf32>
    %cst_106 = arith.constant dense<0.000000e+00> : vector<64xf32>
    %446 = vector.multi_reduction <add>, %445, %cst_106 [0] : vector<16x64xf32> to vector<64xf32>
    %447 = vector.shape_cast %446 : vector<64xf32> to vector<1x64xf32>
    %448 = vector.extract_strided_slice %140 {offsets = [14, 0], sizes = [1, 64], strides = [1, 1]} : vector<16x64xf32> to vector<1x64xf32>
    %449 = arith.addf %447, %448 : vector<1x64xf32>
    %450 = vector.extract_strided_slice %138 {offsets = [14, 0], sizes = [1, 64], strides = [1, 1]} : vector<16x64xf32> to vector<1x64xf32>
    %451 = arith.mulf %449, %450 : vector<1x64xf32>
    %452 = arith.mulf %204, %442 : vector<16x64xf32>
    %453 = arith.addf %452, %284 : vector<16x64xf32>
    %454 = vector.extract_strided_slice %126 {offsets = [0, 15], sizes = [16, 1], strides = [1, 1]} : vector<16x16xf32> to vector<16x1xf32>
    %455 = vector.broadcast %454 : vector<16x1xf32> to vector<16x64xf32>
    %456 = arith.mulf %453, %455 : vector<16x64xf32>
    %cst_107 = arith.constant dense<0.000000e+00> : vector<64xf32>
    %457 = vector.multi_reduction <add>, %456, %cst_107 [0] : vector<16x64xf32> to vector<64xf32>
    %458 = vector.shape_cast %457 : vector<64xf32> to vector<1x64xf32>
    %459 = vector.extract_strided_slice %140 {offsets = [15, 0], sizes = [1, 64], strides = [1, 1]} : vector<16x64xf32> to vector<1x64xf32>
    %460 = arith.addf %458, %459 : vector<1x64xf32>
    %461 = vector.extract_strided_slice %138 {offsets = [15, 0], sizes = [1, 64], strides = [1, 1]} : vector<16x64xf32> to vector<1x64xf32>
    %462 = arith.mulf %460, %461 : vector<1x64xf32>
    %463 = tpu.concatenate %296, %307, %318, %329, %340, %351, %362, %373, %385, %396, %407, %418, %429, %440, %451, %462 in 0 : vector<1x64xf32>, vector<1x64xf32>, vector<1x64xf32>, vector<1x64xf32>, vector<1x64xf32>, vector<1x64xf32>, vector<1x64xf32>, vector<1x64xf32>, vector<1x64xf32>, vector<1x64xf32>, vector<1x64xf32>, vector<1x64xf32>, vector<1x64xf32>, vector<1x64xf32>, vector<1x64xf32>, vector<1x64xf32> -> vector<16x64xf32>
    %cst_108 = arith.constant dense<0.000000e+00> : vector<16x32xf32>
    %464 = tpu.matmul %463, %21, %cst_108 {dimension_numbers = #tpu.dot_dimension_numbers<[1], [0], [0], [1], [0, 0, 1, 1], [], []>} : vector<16x64xf32>, vector<64x32xf32>, vector<16x32xf32> -> vector<16x32xf32>
    %465 = arith.addf %46, %464 : vector<16x32xf32>
    %cst_109 = arith.constant dense<0.000000e+00> : vector<16xf32>
    %466 = vector.multi_reduction <add>, %465, %cst_109 [1] : vector<16x32xf32> to vector<16xf32>
    %467 = vector.shape_cast %466 : vector<16xf32> to vector<16x1xf32>
    %cst_110 = arith.constant 3.200000e+01 : f32
    %468 = vector.broadcast %cst_110 : f32 to vector<16x1xf32>
    %469 = arith.divf %467, %468 : vector<16x1xf32>
    %470 = vector.broadcast %469 : vector<16x1xf32> to vector<16x32xf32>
    %471 = arith.subf %465, %470 : vector<16x32xf32>
    %472 = arith.mulf %471, %471 : vector<16x32xf32>
    %cst_111 = arith.constant dense<0.000000e+00> : vector<16xf32>
    %473 = vector.multi_reduction <add>, %472, %cst_111 [1] : vector<16x32xf32> to vector<16xf32>
    %474 = vector.shape_cast %473 : vector<16xf32> to vector<16x1xf32>
    %cst_112 = arith.constant 3.200000e+01 : f32
    %475 = vector.broadcast %cst_112 : f32 to vector<16x1xf32>
    %476 = arith.divf %474, %475 : vector<16x1xf32>
    %477 = vector.broadcast %469 : vector<16x1xf32> to vector<16x32xf32>
    %478 = arith.subf %465, %477 : vector<16x32xf32>
    %cst_113 = arith.constant 9.99999974E-6 : f32
    %479 = vector.broadcast %cst_113 : f32 to vector<16x1xf32>
    %480 = arith.addf %476, %479 : vector<16x1xf32>
    %481 = math.rsqrt %480 : vector<16x1xf32>
    %482 = vector.broadcast %481 : vector<16x1xf32> to vector<16x32xf32>
    %483 = arith.mulf %478, %482 : vector<16x32xf32>
    %484 = vector.broadcast %23 : vector<1x32xf32> to vector<16x32xf32>
    %485 = arith.mulf %483, %484 : vector<16x32xf32>
    %486 = vector.broadcast %25 : vector<1x32xf32> to vector<16x32xf32>
    %487 = arith.addf %485, %486 : vector<16x32xf32>
    %cst_114 = arith.constant dense<0.000000e+00> : vector<16xf32>
    %488 = vector.multi_reduction <add>, %487, %cst_114 [1] : vector<16x32xf32> to vector<16xf32>
    %489 = vector.shape_cast %488 : vector<16xf32> to vector<16x1xf32>
    %cst_115 = arith.constant 3.200000e+01 : f32
    %490 = vector.broadcast %cst_115 : f32 to vector<16x1xf32>
    %491 = arith.divf %489, %490 : vector<16x1xf32>
    %492 = vector.broadcast %491 : vector<16x1xf32> to vector<16x32xf32>
    %493 = arith.subf %487, %492 : vector<16x32xf32>
    %494 = arith.mulf %493, %493 : vector<16x32xf32>
    %cst_116 = arith.constant dense<0.000000e+00> : vector<16xf32>
    %495 = vector.multi_reduction <add>, %494, %cst_116 [1] : vector<16x32xf32> to vector<16xf32>
    %496 = vector.shape_cast %495 : vector<16xf32> to vector<16x1xf32>
    %cst_117 = arith.constant 3.200000e+01 : f32
    %497 = vector.broadcast %cst_117 : f32 to vector<16x1xf32>
    %498 = arith.divf %496, %497 : vector<16x1xf32>
    %499 = vector.broadcast %491 : vector<16x1xf32> to vector<16x32xf32>
    %500 = arith.subf %487, %499 : vector<16x32xf32>
    %cst_118 = arith.constant 9.99999974E-6 : f32
    %501 = vector.broadcast %cst_118 : f32 to vector<16x1xf32>
    %502 = arith.addf %498, %501 : vector<16x1xf32>
    %503 = math.rsqrt %502 : vector<16x1xf32>
    %504 = vector.broadcast %503 : vector<16x1xf32> to vector<16x32xf32>
    %505 = arith.mulf %500, %504 : vector<16x32xf32>
    %506 = vector.broadcast %39 : vector<1x32xf32> to vector<16x32xf32>
    %507 = arith.mulf %505, %506 : vector<16x32xf32>
    %508 = vector.broadcast %41 : vector<1x32xf32> to vector<16x32xf32>
    %509 = arith.addf %507, %508 : vector<16x32xf32>
    %cst_119 = arith.constant dense<0.000000e+00> : vector<16xf32>
    %510 = vector.multi_reduction <add>, %487, %cst_119 [1] : vector<16x32xf32> to vector<16xf32>
    %511 = vector.shape_cast %510 : vector<16xf32> to vector<16x1xf32>
    %cst_120 = arith.constant 3.200000e+01 : f32
    %512 = vector.broadcast %cst_120 : f32 to vector<16x1xf32>
    %513 = arith.divf %511, %512 : vector<16x1xf32>
    %514 = vector.broadcast %513 : vector<16x1xf32> to vector<16x32xf32>
    %515 = arith.subf %487, %514 : vector<16x32xf32>
    %516 = arith.mulf %515, %515 : vector<16x32xf32>
    %cst_121 = arith.constant dense<0.000000e+00> : vector<16xf32>
    %517 = vector.multi_reduction <add>, %516, %cst_121 [1] : vector<16x32xf32> to vector<16xf32>
    %518 = vector.shape_cast %517 : vector<16xf32> to vector<16x1xf32>
    %cst_122 = arith.constant 3.200000e+01 : f32
    %519 = vector.broadcast %cst_122 : f32 to vector<16x1xf32>
    %520 = arith.divf %518, %519 : vector<16x1xf32>
    %521 = vector.broadcast %513 : vector<16x1xf32> to vector<16x32xf32>
    %522 = arith.subf %487, %521 : vector<16x32xf32>
    %cst_123 = arith.constant 9.99999974E-6 : f32
    %523 = vector.broadcast %cst_123 : f32 to vector<16x1xf32>
    %524 = arith.addf %520, %523 : vector<16x1xf32>
    %525 = math.rsqrt %524 : vector<16x1xf32>
    %526 = vector.broadcast %525 : vector<16x1xf32> to vector<16x32xf32>
    %527 = arith.mulf %522, %526 : vector<16x32xf32>
    %528 = vector.broadcast %39 : vector<1x32xf32> to vector<16x32xf32>
    %529 = arith.mulf %527, %528 : vector<16x32xf32>
    %530 = vector.broadcast %41 : vector<1x32xf32> to vector<16x32xf32>
    %531 = arith.addf %529, %530 : vector<16x32xf32>
    %cst_124 = arith.constant dense<0.000000e+00> : vector<16x32xf32>
    %532 = tpu.matmul %509, %27, %cst_124 {dimension_numbers = #tpu.dot_dimension_numbers<[1], [0], [0], [1], [0, 0, 1, 1], [], []>} : vector<16x32xf32>, vector<32x32xf32>, vector<16x32xf32> -> vector<16x32xf32>
    %533 = vector.broadcast %29 : vector<1x32xf32> to vector<16x32xf32>
    %534 = arith.addf %532, %533 : vector<16x32xf32>
    %cst_125 = arith.constant dense<0.000000e+00> : vector<16x64xf32>
    %535 = tpu.matmul %531, %31, %cst_125 {dimension_numbers = #tpu.dot_dimension_numbers<[1], [0], [0], [1], [0, 0, 1, 1], [], []>} : vector<16x32xf32>, vector<32x64xf32>, vector<16x64xf32> -> vector<16x64xf32>
    %536 = vector.broadcast %33 : vector<1x64xf32> to vector<16x64xf32>
    %537 = arith.addf %535, %536 : vector<16x64xf32>
    %538 = vector.extract_strided_slice %537 {offsets = [0, 0], sizes = [16, 32], strides = [1, 1]} : vector<16x64xf32> to vector<16x32xf32>
    %539 = vector.extract_strided_slice %537 {offsets = [0, 32], sizes = [16, 32], strides = [1, 1]} : vector<16x64xf32> to vector<16x32xf32>
    %540 = vector.extract_strided_slice %534 {offsets = [0, 0], sizes = [8, 8], strides = [1, 1]} : vector<16x32xf32> to vector<8x8xf32>
    %541 = vector.extract_strided_slice %538 {offsets = [0, 0], sizes = [8, 8], strides = [1, 1]} : vector<16x32xf32> to vector<8x8xf32>
    %542 = vector.extract_strided_slice %539 {offsets = [0, 0], sizes = [8, 8], strides = [1, 1]} : vector<16x32xf32> to vector<8x8xf32>
    %cst_126 = arith.constant dense<0.000000e+00> : vector<8x8xf32>
    %543 = tpu.matmul %540, %541, %cst_126 {dimension_numbers = #tpu.dot_dimension_numbers<[1], [1], [0], [0], [0, 0, 1, 0], [], []>} : vector<8x8xf32>, vector<8x8xf32>, vector<8x8xf32> -> vector<8x8xf32>
    %cst_127 = arith.constant 0.353553385 : f32
    %544 = vector.broadcast %cst_127 : f32 to vector<8x8xf32>
    %545 = arith.mulf %543, %544 : vector<8x8xf32>
    %cst_128 = arith.constant dense<0xFF800000> : vector<8xf32>
    %546 = vector.multi_reduction <maximumf>, %545, %cst_128 [1] : vector<8x8xf32> to vector<8xf32>
    %547 = vector.shape_cast %546 : vector<8xf32> to vector<8x1xf32>
    %548 = vector.broadcast %547 : vector<8x1xf32> to vector<8x8xf32>
    %549 = arith.subf %545, %548 : vector<8x8xf32>
    %550 = math.exp %549 : vector<8x8xf32>
    %cst_129 = arith.constant dense<0.000000e+00> : vector<8xf32>
    %551 = vector.multi_reduction <add>, %550, %cst_129 [1] : vector<8x8xf32> to vector<8xf32>
    %552 = vector.shape_cast %551 : vector<8xf32> to vector<8x1xf32>
    %553 = vector.broadcast %552 : vector<8x1xf32> to vector<8x8xf32>
    %554 = arith.divf %550, %553 : vector<8x8xf32>
    %cst_130 = arith.constant dense<0.000000e+00> : vector<8x8xf32>
    %555 = tpu.matmul %554, %542, %cst_130 {dimension_numbers = #tpu.dot_dimension_numbers<[1], [0], [0], [1], [0, 0, 1, 1], [], []>} : vector<8x8xf32>, vector<8x8xf32>, vector<8x8xf32> -> vector<8x8xf32>
    %556 = vector.extract_strided_slice %534 {offsets = [0, 8], sizes = [8, 8], strides = [1, 1]} : vector<16x32xf32> to vector<8x8xf32>
    %557 = vector.extract_strided_slice %538 {offsets = [0, 8], sizes = [8, 8], strides = [1, 1]} : vector<16x32xf32> to vector<8x8xf32>
    %558 = vector.extract_strided_slice %539 {offsets = [0, 8], sizes = [8, 8], strides = [1, 1]} : vector<16x32xf32> to vector<8x8xf32>
    %cst_131 = arith.constant dense<0.000000e+00> : vector<8x8xf32>
    %559 = tpu.matmul %556, %557, %cst_131 {dimension_numbers = #tpu.dot_dimension_numbers<[1], [1], [0], [0], [0, 0, 1, 0], [], []>} : vector<8x8xf32>, vector<8x8xf32>, vector<8x8xf32> -> vector<8x8xf32>
    %cst_132 = arith.constant 0.353553385 : f32
    %560 = vector.broadcast %cst_132 : f32 to vector<8x8xf32>
    %561 = arith.mulf %559, %560 : vector<8x8xf32>
    %cst_133 = arith.constant dense<0xFF800000> : vector<8xf32>
    %562 = vector.multi_reduction <maximumf>, %561, %cst_133 [1] : vector<8x8xf32> to vector<8xf32>
    %563 = vector.shape_cast %562 : vector<8xf32> to vector<8x1xf32>
    %564 = vector.broadcast %563 : vector<8x1xf32> to vector<8x8xf32>
    %565 = arith.subf %561, %564 : vector<8x8xf32>
    %566 = math.exp %565 : vector<8x8xf32>
    %cst_134 = arith.constant dense<0.000000e+00> : vector<8xf32>
    %567 = vector.multi_reduction <add>, %566, %cst_134 [1] : vector<8x8xf32> to vector<8xf32>
    %568 = vector.shape_cast %567 : vector<8xf32> to vector<8x1xf32>
    %569 = vector.broadcast %568 : vector<8x1xf32> to vector<8x8xf32>
    %570 = arith.divf %566, %569 : vector<8x8xf32>
    %cst_135 = arith.constant dense<0.000000e+00> : vector<8x8xf32>
    %571 = tpu.matmul %570, %558, %cst_135 {dimension_numbers = #tpu.dot_dimension_numbers<[1], [0], [0], [1], [0, 0, 1, 1], [], []>} : vector<8x8xf32>, vector<8x8xf32>, vector<8x8xf32> -> vector<8x8xf32>
    %572 = vector.extract_strided_slice %534 {offsets = [0, 16], sizes = [8, 8], strides = [1, 1]} : vector<16x32xf32> to vector<8x8xf32>
    %573 = vector.extract_strided_slice %538 {offsets = [0, 16], sizes = [8, 8], strides = [1, 1]} : vector<16x32xf32> to vector<8x8xf32>
    %574 = vector.extract_strided_slice %539 {offsets = [0, 16], sizes = [8, 8], strides = [1, 1]} : vector<16x32xf32> to vector<8x8xf32>
    %cst_136 = arith.constant dense<0.000000e+00> : vector<8x8xf32>
    %575 = tpu.matmul %572, %573, %cst_136 {dimension_numbers = #tpu.dot_dimension_numbers<[1], [1], [0], [0], [0, 0, 1, 0], [], []>} : vector<8x8xf32>, vector<8x8xf32>, vector<8x8xf32> -> vector<8x8xf32>
    %cst_137 = arith.constant 0.353553385 : f32
    %576 = vector.broadcast %cst_137 : f32 to vector<8x8xf32>
    %577 = arith.mulf %575, %576 : vector<8x8xf32>
    %cst_138 = arith.constant dense<0xFF800000> : vector<8xf32>
    %578 = vector.multi_reduction <maximumf>, %577, %cst_138 [1] : vector<8x8xf32> to vector<8xf32>
    %579 = vector.shape_cast %578 : vector<8xf32> to vector<8x1xf32>
    %580 = vector.broadcast %579 : vector<8x1xf32> to vector<8x8xf32>
    %581 = arith.subf %577, %580 : vector<8x8xf32>
    %582 = math.exp %581 : vector<8x8xf32>
    %cst_139 = arith.constant dense<0.000000e+00> : vector<8xf32>
    %583 = vector.multi_reduction <add>, %582, %cst_139 [1] : vector<8x8xf32> to vector<8xf32>
    %584 = vector.shape_cast %583 : vector<8xf32> to vector<8x1xf32>
    %585 = vector.broadcast %584 : vector<8x1xf32> to vector<8x8xf32>
    %586 = arith.divf %582, %585 : vector<8x8xf32>
    %cst_140 = arith.constant dense<0.000000e+00> : vector<8x8xf32>
    %587 = tpu.matmul %586, %574, %cst_140 {dimension_numbers = #tpu.dot_dimension_numbers<[1], [0], [0], [1], [0, 0, 1, 1], [], []>} : vector<8x8xf32>, vector<8x8xf32>, vector<8x8xf32> -> vector<8x8xf32>
    %588 = vector.extract_strided_slice %534 {offsets = [0, 24], sizes = [8, 8], strides = [1, 1]} : vector<16x32xf32> to vector<8x8xf32>
    %589 = vector.extract_strided_slice %538 {offsets = [0, 24], sizes = [8, 8], strides = [1, 1]} : vector<16x32xf32> to vector<8x8xf32>
    %590 = vector.extract_strided_slice %539 {offsets = [0, 24], sizes = [8, 8], strides = [1, 1]} : vector<16x32xf32> to vector<8x8xf32>
    %cst_141 = arith.constant dense<0.000000e+00> : vector<8x8xf32>
    %591 = tpu.matmul %588, %589, %cst_141 {dimension_numbers = #tpu.dot_dimension_numbers<[1], [1], [0], [0], [0, 0, 1, 0], [], []>} : vector<8x8xf32>, vector<8x8xf32>, vector<8x8xf32> -> vector<8x8xf32>
    %cst_142 = arith.constant 0.353553385 : f32
    %592 = vector.broadcast %cst_142 : f32 to vector<8x8xf32>
    %593 = arith.mulf %591, %592 : vector<8x8xf32>
    %cst_143 = arith.constant dense<0xFF800000> : vector<8xf32>
    %594 = vector.multi_reduction <maximumf>, %593, %cst_143 [1] : vector<8x8xf32> to vector<8xf32>
    %595 = vector.shape_cast %594 : vector<8xf32> to vector<8x1xf32>
    %596 = vector.broadcast %595 : vector<8x1xf32> to vector<8x8xf32>
    %597 = arith.subf %593, %596 : vector<8x8xf32>
    %598 = math.exp %597 : vector<8x8xf32>
    %cst_144 = arith.constant dense<0.000000e+00> : vector<8xf32>
    %599 = vector.multi_reduction <add>, %598, %cst_144 [1] : vector<8x8xf32> to vector<8xf32>
    %600 = vector.shape_cast %599 : vector<8xf32> to vector<8x1xf32>
    %601 = vector.broadcast %600 : vector<8x1xf32> to vector<8x8xf32>
    %602 = arith.divf %598, %601 : vector<8x8xf32>
    %cst_145 = arith.constant dense<0.000000e+00> : vector<8x8xf32>
    %603 = tpu.matmul %602, %590, %cst_145 {dimension_numbers = #tpu.dot_dimension_numbers<[1], [0], [0], [1], [0, 0, 1, 1], [], []>} : vector<8x8xf32>, vector<8x8xf32>, vector<8x8xf32> -> vector<8x8xf32>
    %604 = tpu.concatenate %555, %571, %587, %603 in 1 : vector<8x8xf32>, vector<8x8xf32>, vector<8x8xf32>, vector<8x8xf32> -> vector<8x32xf32>
    %605 = vector.extract_strided_slice %534 {offsets = [8, 0], sizes = [8, 8], strides = [1, 1]} : vector<16x32xf32> to vector<8x8xf32>
    %606 = vector.extract_strided_slice %538 {offsets = [8, 0], sizes = [8, 8], strides = [1, 1]} : vector<16x32xf32> to vector<8x8xf32>
    %607 = vector.extract_strided_slice %539 {offsets = [8, 0], sizes = [8, 8], strides = [1, 1]} : vector<16x32xf32> to vector<8x8xf32>
    %cst_146 = arith.constant dense<0.000000e+00> : vector<8x8xf32>
    %608 = tpu.matmul %605, %606, %cst_146 {dimension_numbers = #tpu.dot_dimension_numbers<[1], [1], [0], [0], [0, 0, 1, 0], [], []>} : vector<8x8xf32>, vector<8x8xf32>, vector<8x8xf32> -> vector<8x8xf32>
    %cst_147 = arith.constant 0.353553385 : f32
    %609 = vector.broadcast %cst_147 : f32 to vector<8x8xf32>
    %610 = arith.mulf %608, %609 : vector<8x8xf32>
    %cst_148 = arith.constant dense<0xFF800000> : vector<8xf32>
    %611 = vector.multi_reduction <maximumf>, %610, %cst_148 [1] : vector<8x8xf32> to vector<8xf32>
    %612 = vector.shape_cast %611 : vector<8xf32> to vector<8x1xf32>
    %613 = vector.broadcast %612 : vector<8x1xf32> to vector<8x8xf32>
    %614 = arith.subf %610, %613 : vector<8x8xf32>
    %615 = math.exp %614 : vector<8x8xf32>
    %cst_149 = arith.constant dense<0.000000e+00> : vector<8xf32>
    %616 = vector.multi_reduction <add>, %615, %cst_149 [1] : vector<8x8xf32> to vector<8xf32>
    %617 = vector.shape_cast %616 : vector<8xf32> to vector<8x1xf32>
    %618 = vector.broadcast %617 : vector<8x1xf32> to vector<8x8xf32>
    %619 = arith.divf %615, %618 : vector<8x8xf32>
    %cst_150 = arith.constant dense<0.000000e+00> : vector<8x8xf32>
    %620 = tpu.matmul %619, %607, %cst_150 {dimension_numbers = #tpu.dot_dimension_numbers<[1], [0], [0], [1], [0, 0, 1, 1], [], []>} : vector<8x8xf32>, vector<8x8xf32>, vector<8x8xf32> -> vector<8x8xf32>
    %621 = vector.extract_strided_slice %534 {offsets = [8, 8], sizes = [8, 8], strides = [1, 1]} : vector<16x32xf32> to vector<8x8xf32>
    %622 = vector.extract_strided_slice %538 {offsets = [8, 8], sizes = [8, 8], strides = [1, 1]} : vector<16x32xf32> to vector<8x8xf32>
    %623 = vector.extract_strided_slice %539 {offsets = [8, 8], sizes = [8, 8], strides = [1, 1]} : vector<16x32xf32> to vector<8x8xf32>
    %cst_151 = arith.constant dense<0.000000e+00> : vector<8x8xf32>
    %624 = tpu.matmul %621, %622, %cst_151 {dimension_numbers = #tpu.dot_dimension_numbers<[1], [1], [0], [0], [0, 0, 1, 0], [], []>} : vector<8x8xf32>, vector<8x8xf32>, vector<8x8xf32> -> vector<8x8xf32>
    %cst_152 = arith.constant 0.353553385 : f32
    %625 = vector.broadcast %cst_152 : f32 to vector<8x8xf32>
    %626 = arith.mulf %624, %625 : vector<8x8xf32>
    %cst_153 = arith.constant dense<0xFF800000> : vector<8xf32>
    %627 = vector.multi_reduction <maximumf>, %626, %cst_153 [1] : vector<8x8xf32> to vector<8xf32>
    %628 = vector.shape_cast %627 : vector<8xf32> to vector<8x1xf32>
    %629 = vector.broadcast %628 : vector<8x1xf32> to vector<8x8xf32>
    %630 = arith.subf %626, %629 : vector<8x8xf32>
    %631 = math.exp %630 : vector<8x8xf32>
    %cst_154 = arith.constant dense<0.000000e+00> : vector<8xf32>
    %632 = vector.multi_reduction <add>, %631, %cst_154 [1] : vector<8x8xf32> to vector<8xf32>
    %633 = vector.shape_cast %632 : vector<8xf32> to vector<8x1xf32>
    %634 = vector.broadcast %633 : vector<8x1xf32> to vector<8x8xf32>
    %635 = arith.divf %631, %634 : vector<8x8xf32>
    %cst_155 = arith.constant dense<0.000000e+00> : vector<8x8xf32>
    %636 = tpu.matmul %635, %623, %cst_155 {dimension_numbers = #tpu.dot_dimension_numbers<[1], [0], [0], [1], [0, 0, 1, 1], [], []>} : vector<8x8xf32>, vector<8x8xf32>, vector<8x8xf32> -> vector<8x8xf32>
    %637 = vector.extract_strided_slice %534 {offsets = [8, 16], sizes = [8, 8], strides = [1, 1]} : vector<16x32xf32> to vector<8x8xf32>
    %638 = vector.extract_strided_slice %538 {offsets = [8, 16], sizes = [8, 8], strides = [1, 1]} : vector<16x32xf32> to vector<8x8xf32>
    %639 = vector.extract_strided_slice %539 {offsets = [8, 16], sizes = [8, 8], strides = [1, 1]} : vector<16x32xf32> to vector<8x8xf32>
    %cst_156 = arith.constant dense<0.000000e+00> : vector<8x8xf32>
    %640 = tpu.matmul %637, %638, %cst_156 {dimension_numbers = #tpu.dot_dimension_numbers<[1], [1], [0], [0], [0, 0, 1, 0], [], []>} : vector<8x8xf32>, vector<8x8xf32>, vector<8x8xf32> -> vector<8x8xf32>
    %cst_157 = arith.constant 0.353553385 : f32
    %641 = vector.broadcast %cst_157 : f32 to vector<8x8xf32>
    %642 = arith.mulf %640, %641 : vector<8x8xf32>
    %cst_158 = arith.constant dense<0xFF800000> : vector<8xf32>
    %643 = vector.multi_reduction <maximumf>, %642, %cst_158 [1] : vector<8x8xf32> to vector<8xf32>
    %644 = vector.shape_cast %643 : vector<8xf32> to vector<8x1xf32>
    %645 = vector.broadcast %644 : vector<8x1xf32> to vector<8x8xf32>
    %646 = arith.subf %642, %645 : vector<8x8xf32>
    %647 = math.exp %646 : vector<8x8xf32>
    %cst_159 = arith.constant dense<0.000000e+00> : vector<8xf32>
    %648 = vector.multi_reduction <add>, %647, %cst_159 [1] : vector<8x8xf32> to vector<8xf32>
    %649 = vector.shape_cast %648 : vector<8xf32> to vector<8x1xf32>
    %650 = vector.broadcast %649 : vector<8x1xf32> to vector<8x8xf32>
    %651 = arith.divf %647, %650 : vector<8x8xf32>
    %cst_160 = arith.constant dense<0.000000e+00> : vector<8x8xf32>
    %652 = tpu.matmul %651, %639, %cst_160 {dimension_numbers = #tpu.dot_dimension_numbers<[1], [0], [0], [1], [0, 0, 1, 1], [], []>} : vector<8x8xf32>, vector<8x8xf32>, vector<8x8xf32> -> vector<8x8xf32>
    %653 = vector.extract_strided_slice %534 {offsets = [8, 24], sizes = [8, 8], strides = [1, 1]} : vector<16x32xf32> to vector<8x8xf32>
    %654 = vector.extract_strided_slice %538 {offsets = [8, 24], sizes = [8, 8], strides = [1, 1]} : vector<16x32xf32> to vector<8x8xf32>
    %655 = vector.extract_strided_slice %539 {offsets = [8, 24], sizes = [8, 8], strides = [1, 1]} : vector<16x32xf32> to vector<8x8xf32>
    %cst_161 = arith.constant dense<0.000000e+00> : vector<8x8xf32>
    %656 = tpu.matmul %653, %654, %cst_161 {dimension_numbers = #tpu.dot_dimension_numbers<[1], [1], [0], [0], [0, 0, 1, 0], [], []>} : vector<8x8xf32>, vector<8x8xf32>, vector<8x8xf32> -> vector<8x8xf32>
    %cst_162 = arith.constant 0.353553385 : f32
    %657 = vector.broadcast %cst_162 : f32 to vector<8x8xf32>
    %658 = arith.mulf %656, %657 : vector<8x8xf32>
    %cst_163 = arith.constant dense<0xFF800000> : vector<8xf32>
    %659 = vector.multi_reduction <maximumf>, %658, %cst_163 [1] : vector<8x8xf32> to vector<8xf32>
    %660 = vector.shape_cast %659 : vector<8xf32> to vector<8x1xf32>
    %661 = vector.broadcast %660 : vector<8x1xf32> to vector<8x8xf32>
    %662 = arith.subf %658, %661 : vector<8x8xf32>
    %663 = math.exp %662 : vector<8x8xf32>
    %cst_164 = arith.constant dense<0.000000e+00> : vector<8xf32>
    %664 = vector.multi_reduction <add>, %663, %cst_164 [1] : vector<8x8xf32> to vector<8xf32>
    %665 = vector.shape_cast %664 : vector<8xf32> to vector<8x1xf32>
    %666 = vector.broadcast %665 : vector<8x1xf32> to vector<8x8xf32>
    %667 = arith.divf %663, %666 : vector<8x8xf32>
    %cst_165 = arith.constant dense<0.000000e+00> : vector<8x8xf32>
    %668 = tpu.matmul %667, %655, %cst_165 {dimension_numbers = #tpu.dot_dimension_numbers<[1], [0], [0], [1], [0, 0, 1, 1], [], []>} : vector<8x8xf32>, vector<8x8xf32>, vector<8x8xf32> -> vector<8x8xf32>
    %669 = tpu.concatenate %620, %636, %652, %668 in 1 : vector<8x8xf32>, vector<8x8xf32>, vector<8x8xf32>, vector<8x8xf32> -> vector<8x32xf32>
    %670 = tpu.concatenate %604, %669 in 0 : vector<8x32xf32>, vector<8x32xf32> -> vector<16x32xf32>
    %cst_166 = arith.constant dense<0.000000e+00> : vector<16x32xf32>
    %671 = tpu.matmul %670, %35, %cst_166 {dimension_numbers = #tpu.dot_dimension_numbers<[1], [0], [0], [1], [0, 0, 1, 1], [], []>} : vector<16x32xf32>, vector<32x32xf32>, vector<16x32xf32> -> vector<16x32xf32>
    %672 = vector.broadcast %37 : vector<1x32xf32> to vector<16x32xf32>
    %673 = arith.addf %671, %672 : vector<16x32xf32>
    %674 = arith.addf %487, %673 : vector<16x32xf32>
    %cst_167 = arith.constant dense<0.000000e+00> : vector<16xf32>
    %675 = vector.multi_reduction <add>, %674, %cst_167 [1] : vector<16x32xf32> to vector<16xf32>
    %676 = vector.shape_cast %675 : vector<16xf32> to vector<16x1xf32>
    %cst_168 = arith.constant 3.200000e+01 : f32
    %677 = vector.broadcast %cst_168 : f32 to vector<16x1xf32>
    %678 = arith.divf %676, %677 : vector<16x1xf32>
    %679 = vector.broadcast %678 : vector<16x1xf32> to vector<16x32xf32>
    %680 = arith.subf %674, %679 : vector<16x32xf32>
    %681 = arith.mulf %680, %680 : vector<16x32xf32>
    %cst_169 = arith.constant dense<0.000000e+00> : vector<16xf32>
    %682 = vector.multi_reduction <add>, %681, %cst_169 [1] : vector<16x32xf32> to vector<16xf32>
    %683 = vector.shape_cast %682 : vector<16xf32> to vector<16x1xf32>
    %cst_170 = arith.constant 3.200000e+01 : f32
    %684 = vector.broadcast %cst_170 : f32 to vector<16x1xf32>
    %685 = arith.divf %683, %684 : vector<16x1xf32>
    %686 = vector.broadcast %678 : vector<16x1xf32> to vector<16x32xf32>
    %687 = arith.subf %674, %686 : vector<16x32xf32>
    %cst_171 = arith.constant 9.99999974E-6 : f32
    %688 = vector.broadcast %cst_171 : f32 to vector<16x1xf32>
    %689 = arith.addf %685, %688 : vector<16x1xf32>
    %690 = math.rsqrt %689 : vector<16x1xf32>
    %691 = vector.broadcast %690 : vector<16x1xf32> to vector<16x32xf32>
    %692 = arith.mulf %687, %691 : vector<16x32xf32>
    %693 = vector.broadcast %42 : vector<1x32xf32> to vector<16x32xf32>
    %694 = arith.mulf %692, %693 : vector<16x32xf32>
    %695 = vector.broadcast %43 : vector<1x32xf32> to vector<16x32xf32>
    %696 = arith.addf %694, %695 : vector<16x32xf32>
    %697 = vector.shape_cast %696 : vector<16x32xf32> to vector<2x8x32xf32>
    %c0_172 = arith.constant 0 : index
    %c0_173 = arith.constant 0 : index
    %c0_174 = arith.constant 0 : index
    %c0_175 = arith.constant 0 : index
    %698 = vector.load %arg25[%c0_172, %c0_173, %c0_174, %c0_175] : memref<1x2x8x32xf32, #tpu.memory_space<vmem>>, vector<1x2x8x32xf32>
    %699 = vector.shape_cast %698 : vector<1x2x8x32xf32> to vector<2x8x32xf32>
    %700 = vector.shape_cast %697 : vector<2x8x32xf32> to vector<1x2x8x32xf32>
    tpu.vector_store %arg25[%c0_172, %c0_173, %c0_174, %c0_175], %700 {strides = array<i32>} : memref<1x2x8x32xf32, #tpu.memory_space<vmem>>, vector<1x2x8x32xf32>,
    return
  }
  func.func @transform_0(%arg0: i32) -> (i32, i32, i32, i32) {
    %c0_i32 = arith.constant 0 : i32
    %c0_i32_0 = arith.constant 0 : i32
    %c0_i32_1 = arith.constant 0 : i32
    %c0_i32_2 = arith.constant 0 : i32
    return %arg0, %c0_i32, %c0_i32_0, %c0_i32_1 : i32, i32, i32, i32
  }
  func.func @transform_1(%arg0: i32) -> (i32, i32, i32) {
    %c0_i32 = arith.constant 0 : i32
    %c0_i32_0 = arith.constant 0 : i32
    %c0_i32_1 = arith.constant 0 : i32
    return %arg0, %c0_i32, %c0_i32_0 : i32, i32, i32
  }
  func.func @transform_2(%arg0: i32) -> (i32, i32, i32) {
    %c0_i32 = arith.constant 0 : i32
    %c0_i32_0 = arith.constant 0 : i32
    %c0_i32_1 = arith.constant 0 : i32
    return %arg0, %c0_i32, %c0_i32_0 : i32, i32, i32
  }
  func.func @transform_3(%arg0: i32) -> (i32, i32, i32) {
    %c0_i32 = arith.constant 0 : i32
    %c0_i32_0 = arith.constant 0 : i32
    %c0_i32_1 = arith.constant 0 : i32
    return %arg0, %c0_i32, %c0_i32_0 : i32, i32, i32
  }
  func.func @transform_4(%arg0: i32) -> (i32, i32, i32) {
    %c0_i32 = arith.constant 0 : i32
    %c0_i32_0 = arith.constant 0 : i32
    %c0_i32_1 = arith.constant 0 : i32
    return %arg0, %c0_i32, %c0_i32_0 : i32, i32, i32
  }
  func.func @transform_5(%arg0: i32) -> (i32, i32, i32) {
    %c0_i32 = arith.constant 0 : i32
    %c0_i32_0 = arith.constant 0 : i32
    %c0_i32_1 = arith.constant 0 : i32
    return %arg0, %c0_i32, %c0_i32_0 : i32, i32, i32
  }
  func.func @transform_6(%arg0: i32) -> (i32, i32, i32) {
    %c0_i32 = arith.constant 0 : i32
    %c0_i32_0 = arith.constant 0 : i32
    %c0_i32_1 = arith.constant 0 : i32
    return %arg0, %c0_i32, %c0_i32_0 : i32, i32, i32
  }
  func.func @transform_7(%arg0: i32) -> (i32, i32, i32) {
    %c0_i32 = arith.constant 0 : i32
    %c0_i32_0 = arith.constant 0 : i32
    %c0_i32_1 = arith.constant 0 : i32
    return %arg0, %c0_i32, %c0_i32_0 : i32, i32, i32
  }
  func.func @transform_8(%arg0: i32) -> (i32, i32, i32) {
    %c0_i32 = arith.constant 0 : i32
    %c0_i32_0 = arith.constant 0 : i32
    %c0_i32_1 = arith.constant 0 : i32
    return %arg0, %c0_i32, %c0_i32_0 : i32, i32, i32
  }
  func.func @transform_9(%arg0: i32) -> (i32, i32, i32) {
    %c0_i32 = arith.constant 0 : i32
    %c0_i32_0 = arith.constant 0 : i32
    %c0_i32_1 = arith.constant 0 : i32
    return %arg0, %c0_i32, %c0_i32_0 : i32, i32, i32
  }
  func.func @transform_10(%arg0: i32) -> (i32, i32, i32) {
    %c0_i32 = arith.constant 0 : i32
    %c0_i32_0 = arith.constant 0 : i32
    %c0_i32_1 = arith.constant 0 : i32
    return %arg0, %c0_i32, %c0_i32_0 : i32, i32, i32
  }
  func.func @transform_11(%arg0: i32) -> (i32, i32, i32) {
    %c0_i32 = arith.constant 0 : i32
    %c0_i32_0 = arith.constant 0 : i32
    %c0_i32_1 = arith.constant 0 : i32
    return %arg0, %c0_i32, %c0_i32_0 : i32, i32, i32
  }
  func.func @transform_12(%arg0: i32) -> (i32, i32, i32) {
    %c0_i32 = arith.constant 0 : i32
    %c0_i32_0 = arith.constant 0 : i32
    %c0_i32_1 = arith.constant 0 : i32
    return %arg0, %c0_i32, %c0_i32_0 : i32, i32, i32
  }
  func.func @transform_13(%arg0: i32) -> (i32, i32, i32) {
    %c0_i32 = arith.constant 0 : i32
    %c0_i32_0 = arith.constant 0 : i32
    %c0_i32_1 = arith.constant 0 : i32
    return %arg0, %c0_i32, %c0_i32_0 : i32, i32, i32
  }
  func.func @transform_14(%arg0: i32) -> (i32, i32, i32) {
    %c0_i32 = arith.constant 0 : i32
    %c0_i32_0 = arith.constant 0 : i32
    %c0_i32_1 = arith.constant 0 : i32
    return %arg0, %c0_i32, %c0_i32_0 : i32, i32, i32
  }
  func.func @transform_15(%arg0: i32) -> (i32, i32, i32) {
    %c0_i32 = arith.constant 0 : i32
    %c0_i32_0 = arith.constant 0 : i32
    %c0_i32_1 = arith.constant 0 : i32
    return %arg0, %c0_i32, %c0_i32_0 : i32, i32, i32
  }
  func.func @transform_16(%arg0: i32) -> (i32, i32, i32) {
    %c0_i32 = arith.constant 0 : i32
    %c0_i32_0 = arith.constant 0 : i32
    %c0_i32_1 = arith.constant 0 : i32
    return %arg0, %c0_i32, %c0_i32_0 : i32, i32, i32
  }
  func.func @transform_17(%arg0: i32) -> (i32, i32, i32) {
    %c0_i32 = arith.constant 0 : i32
    %c0_i32_0 = arith.constant 0 : i32
    %c0_i32_1 = arith.constant 0 : i32
    return %arg0, %c0_i32, %c0_i32_0 : i32, i32, i32
  }
  func.func @transform_18(%arg0: i32) -> (i32, i32, i32) {
    %c0_i32 = arith.constant 0 : i32
    %c0_i32_0 = arith.constant 0 : i32
    %c0_i32_1 = arith.constant 0 : i32
    return %arg0, %c0_i32, %c0_i32_0 : i32, i32, i32
  }
  func.func @transform_19(%arg0: i32) -> (i32, i32, i32) {
    %c0_i32 = arith.constant 0 : i32
    %c0_i32_0 = arith.constant 0 : i32
    %c0_i32_1 = arith.constant 0 : i32
    return %arg0, %c0_i32, %c0_i32_0 : i32, i32, i32
  }
  func.func @transform_20(%arg0: i32) -> (i32, i32, i32) {
    %c0_i32 = arith.constant 0 : i32
    %c0_i32_0 = arith.constant 0 : i32
    %c0_i32_1 = arith.constant 0 : i32
    return %arg0, %c0_i32, %c0_i32_0 : i32, i32, i32
  }
  func.func @transform_21(%arg0: i32) -> (i32, i32, i32) {
    %c0_i32 = arith.constant 0 : i32
    %c0_i32_0 = arith.constant 0 : i32
    %c0_i32_1 = arith.constant 0 : i32
    return %arg0, %c0_i32, %c0_i32_0 : i32, i32, i32
  }
  func.func @transform_22(%arg0: i32) -> (i32, i32) {
    %c0_i32 = arith.constant 0 : i32
    %c0_i32_0 = arith.constant 0 : i32
    %c0_i32_1 = arith.constant 0 : i32
    return %c0_i32, %c0_i32_0 : i32, i32
  }
  func.func @transform_23(%arg0: i32) -> (i32, i32) {
    %c0_i32 = arith.constant 0 : i32
    %c0_i32_0 = arith.constant 0 : i32
    %c0_i32_1 = arith.constant 0 : i32
    return %c0_i32, %c0_i32_0 : i32, i32
  }
  func.func @transform_24(%arg0: i32) -> (i32, i32, i32, i32) {
    %c0_i32 = arith.constant 0 : i32
    %c0_i32_0 = arith.constant 0 : i32
    %c0_i32_1 = arith.constant 0 : i32
    %c0_i32_2 = arith.constant 0 : i32
    return %arg0, %c0_i32, %c0_i32_0, %c0_i32_1 : i32, i32, i32, i32
  }
}

module attributes {stable_mosaic.version = 11 : i64} {
  func.func @_cross_kernel(%arg0: i32, %arg1: memref<1x1x8x32xf32, #tpu.memory_space<vmem>>, %arg2: memref<1x1x8x32xf32, #tpu.memory_space<vmem>>, %arg3: memref<1x32x32xf32, #tpu.memory_space<vmem>>, %arg4: memref<1x1x32xf32, #tpu.memory_space<vmem>>, %arg5: memref<1x32x64xf32, #tpu.memory_space<vmem>>, %arg6: memref<1x1x64xf32, #tpu.memory_space<vmem>>, %arg7: memref<1x32x32xf32, #tpu.memory_space<vmem>>, %arg8: memref<1x1x32xf32, #tpu.memory_space<vmem>>, %arg9: memref<1x1x32xf32, #tpu.memory_space<vmem>>, %arg10: memref<1x1x32xf32, #tpu.memory_space<vmem>>, %arg11: memref<1x32xf32, #tpu.memory_space<vmem>>, %arg12: memref<1x32xf32, #tpu.memory_space<vmem>>, %arg13: memref<1x1x8x32xf32, #tpu.memory_space<vmem>>) attributes {dimension_semantics = [#tpu.dimension_semantics<parallel>], iteration_bounds = array<i64: 2>, scalar_prefetch = 0 : i64, scratch_operands = 0 : i64, tpu.core_type = #tpu.core_type<tc>, window_params = [{transform_indices = @transform_0, window_bounds = array<i64: 1, 1, 8, 32>}, {transform_indices = @transform_1, window_bounds = array<i64: 1, 1, 8, 32>}, {pipeline_mode = #tpu.pipeline_mode<synchronous>, transform_indices = @transform_2, window_bounds = array<i64: 1, 32, 32>}, {pipeline_mode = #tpu.pipeline_mode<synchronous>, transform_indices = @transform_3, window_bounds = array<i64: 1, 1, 32>}, {pipeline_mode = #tpu.pipeline_mode<synchronous>, transform_indices = @transform_4, window_bounds = array<i64: 1, 32, 64>}, {pipeline_mode = #tpu.pipeline_mode<synchronous>, transform_indices = @transform_5, window_bounds = array<i64: 1, 1, 64>}, {pipeline_mode = #tpu.pipeline_mode<synchronous>, transform_indices = @transform_6, window_bounds = array<i64: 1, 32, 32>}, {pipeline_mode = #tpu.pipeline_mode<synchronous>, transform_indices = @transform_7, window_bounds = array<i64: 1, 1, 32>}, {pipeline_mode = #tpu.pipeline_mode<synchronous>, transform_indices = @transform_8, window_bounds = array<i64: 1, 1, 32>}, {pipeline_mode = #tpu.pipeline_mode<synchronous>, transform_indices = @transform_9, window_bounds = array<i64: 1, 1, 32>}, {pipeline_mode = #tpu.pipeline_mode<synchronous>, transform_indices = @transform_10, window_bounds = array<i64: 1, 32>}, {pipeline_mode = #tpu.pipeline_mode<synchronous>, transform_indices = @transform_11, window_bounds = array<i64: 1, 32>}, {transform_indices = @transform_12, window_bounds = array<i64: 1, 1, 8, 32>}]} {
    %c0 = arith.constant 0 : index
    %c0_0 = arith.constant 0 : index
    %c0_1 = arith.constant 0 : index
    %0 = vector.load %arg3[%c0, %c0_0, %c0_1] : memref<1x32x32xf32, #tpu.memory_space<vmem>>, vector<1x32x32xf32>
    %1 = vector.shape_cast %0 : vector<1x32x32xf32> to vector<32x32xf32>
    %c0_2 = arith.constant 0 : index
    %c0_3 = arith.constant 0 : index
    %c0_4 = arith.constant 0 : index
    %2 = vector.load %arg4[%c0_2, %c0_3, %c0_4] : memref<1x1x32xf32, #tpu.memory_space<vmem>>, vector<1x1x32xf32>
    %3 = vector.shape_cast %2 : vector<1x1x32xf32> to vector<1x32xf32>
    %c0_5 = arith.constant 0 : index
    %c0_6 = arith.constant 0 : index
    %c0_7 = arith.constant 0 : index
    %4 = vector.load %arg5[%c0_5, %c0_6, %c0_7] : memref<1x32x64xf32, #tpu.memory_space<vmem>>, vector<1x32x64xf32>
    %5 = vector.shape_cast %4 : vector<1x32x64xf32> to vector<32x64xf32>
    %c0_8 = arith.constant 0 : index
    %c0_9 = arith.constant 0 : index
    %c0_10 = arith.constant 0 : index
    %6 = vector.load %arg6[%c0_8, %c0_9, %c0_10] : memref<1x1x64xf32, #tpu.memory_space<vmem>>, vector<1x1x64xf32>
    %7 = vector.shape_cast %6 : vector<1x1x64xf32> to vector<1x64xf32>
    %c0_11 = arith.constant 0 : index
    %c0_12 = arith.constant 0 : index
    %c0_13 = arith.constant 0 : index
    %8 = vector.load %arg7[%c0_11, %c0_12, %c0_13] : memref<1x32x32xf32, #tpu.memory_space<vmem>>, vector<1x32x32xf32>
    %9 = vector.shape_cast %8 : vector<1x32x32xf32> to vector<32x32xf32>
    %c0_14 = arith.constant 0 : index
    %c0_15 = arith.constant 0 : index
    %c0_16 = arith.constant 0 : index
    %10 = vector.load %arg8[%c0_14, %c0_15, %c0_16] : memref<1x1x32xf32, #tpu.memory_space<vmem>>, vector<1x1x32xf32>
    %11 = vector.shape_cast %10 : vector<1x1x32xf32> to vector<1x32xf32>
    %c0_17 = arith.constant 0 : index
    %c0_18 = arith.constant 0 : index
    %c0_19 = arith.constant 0 : index
    %12 = vector.load %arg9[%c0_17, %c0_18, %c0_19] : memref<1x1x32xf32, #tpu.memory_space<vmem>>, vector<1x1x32xf32>
    %13 = vector.shape_cast %12 : vector<1x1x32xf32> to vector<1x32xf32>
    %c0_20 = arith.constant 0 : index
    %c0_21 = arith.constant 0 : index
    %c0_22 = arith.constant 0 : index
    %14 = vector.load %arg10[%c0_20, %c0_21, %c0_22] : memref<1x1x32xf32, #tpu.memory_space<vmem>>, vector<1x1x32xf32>
    %15 = vector.shape_cast %14 : vector<1x1x32xf32> to vector<1x32xf32>
    %c0_23 = arith.constant 0 : index
    %c0_24 = arith.constant 0 : index
    %16 = vector.load %arg11[%c0_23, %c0_24] : memref<1x32xf32, #tpu.memory_space<vmem>>, vector<1x32xf32>
    %c0_25 = arith.constant 0 : index
    %c0_26 = arith.constant 0 : index
    %17 = vector.load %arg12[%c0_25, %c0_26] : memref<1x32xf32, #tpu.memory_space<vmem>>, vector<1x32xf32>
    %c0_27 = arith.constant 0 : index
    %c0_28 = arith.constant 0 : index
    %c0_29 = arith.constant 0 : index
    %c0_30 = arith.constant 0 : index
    %18 = vector.load %arg1[%c0_27, %c0_28, %c0_29, %c0_30] : memref<1x1x8x32xf32, #tpu.memory_space<vmem>>, vector<1x1x8x32xf32>
    %19 = vector.shape_cast %18 : vector<1x1x8x32xf32> to vector<8x32xf32>
    %c0_31 = arith.constant 0 : index
    %c0_32 = arith.constant 0 : index
    %c0_33 = arith.constant 0 : index
    %c0_34 = arith.constant 0 : index
    %20 = vector.load %arg2[%c0_31, %c0_32, %c0_33, %c0_34] : memref<1x1x8x32xf32, #tpu.memory_space<vmem>>, vector<1x1x8x32xf32>
    %21 = vector.shape_cast %20 : vector<1x1x8x32xf32> to vector<8x32xf32>
    %cst = arith.constant dense<0.000000e+00> : vector<8xf32>
    %22 = vector.multi_reduction <add>, %19, %cst [1] : vector<8x32xf32> to vector<8xf32>
    %23 = vector.shape_cast %22 : vector<8xf32> to vector<8x1xf32>
    %cst_35 = arith.constant 3.200000e+01 : f32
    %24 = vector.broadcast %cst_35 : f32 to vector<8x1xf32>
    %25 = arith.divf %23, %24 : vector<8x1xf32>
    %26 = vector.broadcast %25 : vector<8x1xf32> to vector<8x32xf32>
    %27 = arith.subf %19, %26 : vector<8x32xf32>
    %28 = arith.mulf %27, %27 : vector<8x32xf32>
    %cst_36 = arith.constant dense<0.000000e+00> : vector<8xf32>
    %29 = vector.multi_reduction <add>, %28, %cst_36 [1] : vector<8x32xf32> to vector<8xf32>
    %30 = vector.shape_cast %29 : vector<8xf32> to vector<8x1xf32>
    %cst_37 = arith.constant 3.200000e+01 : f32
    %31 = vector.broadcast %cst_37 : f32 to vector<8x1xf32>
    %32 = arith.divf %30, %31 : vector<8x1xf32>
    %33 = vector.broadcast %25 : vector<8x1xf32> to vector<8x32xf32>
    %34 = arith.subf %19, %33 : vector<8x32xf32>
    %cst_38 = arith.constant 9.99999974E-6 : f32
    %35 = vector.broadcast %cst_38 : f32 to vector<8x1xf32>
    %36 = arith.addf %32, %35 : vector<8x1xf32>
    %37 = math.rsqrt %36 : vector<8x1xf32>
    %38 = vector.broadcast %37 : vector<8x1xf32> to vector<8x32xf32>
    %39 = arith.mulf %34, %38 : vector<8x32xf32>
    %40 = vector.broadcast %13 : vector<1x32xf32> to vector<8x32xf32>
    %41 = arith.mulf %39, %40 : vector<8x32xf32>
    %42 = vector.broadcast %15 : vector<1x32xf32> to vector<8x32xf32>
    %43 = arith.addf %41, %42 : vector<8x32xf32>
    %cst_39 = arith.constant dense<0.000000e+00> : vector<8xf32>
    %44 = vector.multi_reduction <add>, %21, %cst_39 [1] : vector<8x32xf32> to vector<8xf32>
    %45 = vector.shape_cast %44 : vector<8xf32> to vector<8x1xf32>
    %cst_40 = arith.constant 3.200000e+01 : f32
    %46 = vector.broadcast %cst_40 : f32 to vector<8x1xf32>
    %47 = arith.divf %45, %46 : vector<8x1xf32>
    %48 = vector.broadcast %47 : vector<8x1xf32> to vector<8x32xf32>
    %49 = arith.subf %21, %48 : vector<8x32xf32>
    %50 = arith.mulf %49, %49 : vector<8x32xf32>
    %cst_41 = arith.constant dense<0.000000e+00> : vector<8xf32>
    %51 = vector.multi_reduction <add>, %50, %cst_41 [1] : vector<8x32xf32> to vector<8xf32>
    %52 = vector.shape_cast %51 : vector<8xf32> to vector<8x1xf32>
    %cst_42 = arith.constant 3.200000e+01 : f32
    %53 = vector.broadcast %cst_42 : f32 to vector<8x1xf32>
    %54 = arith.divf %52, %53 : vector<8x1xf32>
    %55 = vector.broadcast %47 : vector<8x1xf32> to vector<8x32xf32>
    %56 = arith.subf %21, %55 : vector<8x32xf32>
    %cst_43 = arith.constant 9.99999974E-6 : f32
    %57 = vector.broadcast %cst_43 : f32 to vector<8x1xf32>
    %58 = arith.addf %54, %57 : vector<8x1xf32>
    %59 = math.rsqrt %58 : vector<8x1xf32>
    %60 = vector.broadcast %59 : vector<8x1xf32> to vector<8x32xf32>
    %61 = arith.mulf %56, %60 : vector<8x32xf32>
    %62 = vector.broadcast %13 : vector<1x32xf32> to vector<8x32xf32>
    %63 = arith.mulf %61, %62 : vector<8x32xf32>
    %64 = vector.broadcast %15 : vector<1x32xf32> to vector<8x32xf32>
    %65 = arith.addf %63, %64 : vector<8x32xf32>
    %cst_44 = arith.constant dense<0.000000e+00> : vector<8x32xf32>
    %66 = tpu.matmul %43, %1, %cst_44 {dimension_numbers = #tpu.dot_dimension_numbers<[1], [0], [0], [1], [0, 0, 1, 1], [], []>} : vector<8x32xf32>, vector<32x32xf32>, vector<8x32xf32> -> vector<8x32xf32>
    %67 = vector.broadcast %3 : vector<1x32xf32> to vector<8x32xf32>
    %68 = arith.addf %66, %67 : vector<8x32xf32>
    %cst_45 = arith.constant dense<0.000000e+00> : vector<8x64xf32>
    %69 = tpu.matmul %65, %5, %cst_45 {dimension_numbers = #tpu.dot_dimension_numbers<[1], [0], [0], [1], [0, 0, 1, 1], [], []>} : vector<8x32xf32>, vector<32x64xf32>, vector<8x64xf32> -> vector<8x64xf32>
    %70 = vector.broadcast %7 : vector<1x64xf32> to vector<8x64xf32>
    %71 = arith.addf %69, %70 : vector<8x64xf32>
    %72 = vector.extract_strided_slice %71 {offsets = [0, 0], sizes = [8, 32], strides = [1, 1]} : vector<8x64xf32> to vector<8x32xf32>
    %73 = vector.extract_strided_slice %71 {offsets = [0, 32], sizes = [8, 32], strides = [1, 1]} : vector<8x64xf32> to vector<8x32xf32>
    %74 = vector.extract_strided_slice %68 {offsets = [0, 0], sizes = [8, 8], strides = [1, 1]} : vector<8x32xf32> to vector<8x8xf32>
    %75 = vector.extract_strided_slice %72 {offsets = [0, 0], sizes = [8, 8], strides = [1, 1]} : vector<8x32xf32> to vector<8x8xf32>
    %76 = vector.extract_strided_slice %73 {offsets = [0, 0], sizes = [8, 8], strides = [1, 1]} : vector<8x32xf32> to vector<8x8xf32>
    %cst_46 = arith.constant dense<0.000000e+00> : vector<8x8xf32>
    %77 = tpu.matmul %74, %75, %cst_46 {dimension_numbers = #tpu.dot_dimension_numbers<[1], [1], [0], [0], [0, 0, 1, 0], [], []>} : vector<8x8xf32>, vector<8x8xf32>, vector<8x8xf32> -> vector<8x8xf32>
    %cst_47 = arith.constant 0.353553385 : f32
    %78 = vector.broadcast %cst_47 : f32 to vector<8x8xf32>
    %79 = arith.mulf %77, %78 : vector<8x8xf32>
    %cst_48 = arith.constant dense<0xFF800000> : vector<8xf32>
    %80 = vector.multi_reduction <maximumf>, %79, %cst_48 [1] : vector<8x8xf32> to vector<8xf32>
    %81 = vector.shape_cast %80 : vector<8xf32> to vector<8x1xf32>
    %82 = vector.broadcast %81 : vector<8x1xf32> to vector<8x8xf32>
    %83 = arith.subf %79, %82 : vector<8x8xf32>
    %84 = math.exp %83 : vector<8x8xf32>
    %cst_49 = arith.constant dense<0.000000e+00> : vector<8xf32>
    %85 = vector.multi_reduction <add>, %84, %cst_49 [1] : vector<8x8xf32> to vector<8xf32>
    %86 = vector.shape_cast %85 : vector<8xf32> to vector<8x1xf32>
    %87 = vector.broadcast %86 : vector<8x1xf32> to vector<8x8xf32>
    %88 = arith.divf %84, %87 : vector<8x8xf32>
    %cst_50 = arith.constant dense<0.000000e+00> : vector<8x8xf32>
    %89 = tpu.matmul %88, %76, %cst_50 {dimension_numbers = #tpu.dot_dimension_numbers<[1], [0], [0], [1], [0, 0, 1, 1], [], []>} : vector<8x8xf32>, vector<8x8xf32>, vector<8x8xf32> -> vector<8x8xf32>
    %90 = vector.extract_strided_slice %68 {offsets = [0, 8], sizes = [8, 8], strides = [1, 1]} : vector<8x32xf32> to vector<8x8xf32>
    %91 = vector.extract_strided_slice %72 {offsets = [0, 8], sizes = [8, 8], strides = [1, 1]} : vector<8x32xf32> to vector<8x8xf32>
    %92 = vector.extract_strided_slice %73 {offsets = [0, 8], sizes = [8, 8], strides = [1, 1]} : vector<8x32xf32> to vector<8x8xf32>
    %cst_51 = arith.constant dense<0.000000e+00> : vector<8x8xf32>
    %93 = tpu.matmul %90, %91, %cst_51 {dimension_numbers = #tpu.dot_dimension_numbers<[1], [1], [0], [0], [0, 0, 1, 0], [], []>} : vector<8x8xf32>, vector<8x8xf32>, vector<8x8xf32> -> vector<8x8xf32>
    %cst_52 = arith.constant 0.353553385 : f32
    %94 = vector.broadcast %cst_52 : f32 to vector<8x8xf32>
    %95 = arith.mulf %93, %94 : vector<8x8xf32>
    %cst_53 = arith.constant dense<0xFF800000> : vector<8xf32>
    %96 = vector.multi_reduction <maximumf>, %95, %cst_53 [1] : vector<8x8xf32> to vector<8xf32>
    %97 = vector.shape_cast %96 : vector<8xf32> to vector<8x1xf32>
    %98 = vector.broadcast %97 : vector<8x1xf32> to vector<8x8xf32>
    %99 = arith.subf %95, %98 : vector<8x8xf32>
    %100 = math.exp %99 : vector<8x8xf32>
    %cst_54 = arith.constant dense<0.000000e+00> : vector<8xf32>
    %101 = vector.multi_reduction <add>, %100, %cst_54 [1] : vector<8x8xf32> to vector<8xf32>
    %102 = vector.shape_cast %101 : vector<8xf32> to vector<8x1xf32>
    %103 = vector.broadcast %102 : vector<8x1xf32> to vector<8x8xf32>
    %104 = arith.divf %100, %103 : vector<8x8xf32>
    %cst_55 = arith.constant dense<0.000000e+00> : vector<8x8xf32>
    %105 = tpu.matmul %104, %92, %cst_55 {dimension_numbers = #tpu.dot_dimension_numbers<[1], [0], [0], [1], [0, 0, 1, 1], [], []>} : vector<8x8xf32>, vector<8x8xf32>, vector<8x8xf32> -> vector<8x8xf32>
    %106 = vector.extract_strided_slice %68 {offsets = [0, 16], sizes = [8, 8], strides = [1, 1]} : vector<8x32xf32> to vector<8x8xf32>
    %107 = vector.extract_strided_slice %72 {offsets = [0, 16], sizes = [8, 8], strides = [1, 1]} : vector<8x32xf32> to vector<8x8xf32>
    %108 = vector.extract_strided_slice %73 {offsets = [0, 16], sizes = [8, 8], strides = [1, 1]} : vector<8x32xf32> to vector<8x8xf32>
    %cst_56 = arith.constant dense<0.000000e+00> : vector<8x8xf32>
    %109 = tpu.matmul %106, %107, %cst_56 {dimension_numbers = #tpu.dot_dimension_numbers<[1], [1], [0], [0], [0, 0, 1, 0], [], []>} : vector<8x8xf32>, vector<8x8xf32>, vector<8x8xf32> -> vector<8x8xf32>
    %cst_57 = arith.constant 0.353553385 : f32
    %110 = vector.broadcast %cst_57 : f32 to vector<8x8xf32>
    %111 = arith.mulf %109, %110 : vector<8x8xf32>
    %cst_58 = arith.constant dense<0xFF800000> : vector<8xf32>
    %112 = vector.multi_reduction <maximumf>, %111, %cst_58 [1] : vector<8x8xf32> to vector<8xf32>
    %113 = vector.shape_cast %112 : vector<8xf32> to vector<8x1xf32>
    %114 = vector.broadcast %113 : vector<8x1xf32> to vector<8x8xf32>
    %115 = arith.subf %111, %114 : vector<8x8xf32>
    %116 = math.exp %115 : vector<8x8xf32>
    %cst_59 = arith.constant dense<0.000000e+00> : vector<8xf32>
    %117 = vector.multi_reduction <add>, %116, %cst_59 [1] : vector<8x8xf32> to vector<8xf32>
    %118 = vector.shape_cast %117 : vector<8xf32> to vector<8x1xf32>
    %119 = vector.broadcast %118 : vector<8x1xf32> to vector<8x8xf32>
    %120 = arith.divf %116, %119 : vector<8x8xf32>
    %cst_60 = arith.constant dense<0.000000e+00> : vector<8x8xf32>
    %121 = tpu.matmul %120, %108, %cst_60 {dimension_numbers = #tpu.dot_dimension_numbers<[1], [0], [0], [1], [0, 0, 1, 1], [], []>} : vector<8x8xf32>, vector<8x8xf32>, vector<8x8xf32> -> vector<8x8xf32>
    %122 = vector.extract_strided_slice %68 {offsets = [0, 24], sizes = [8, 8], strides = [1, 1]} : vector<8x32xf32> to vector<8x8xf32>
    %123 = vector.extract_strided_slice %72 {offsets = [0, 24], sizes = [8, 8], strides = [1, 1]} : vector<8x32xf32> to vector<8x8xf32>
    %124 = vector.extract_strided_slice %73 {offsets = [0, 24], sizes = [8, 8], strides = [1, 1]} : vector<8x32xf32> to vector<8x8xf32>
    %cst_61 = arith.constant dense<0.000000e+00> : vector<8x8xf32>
    %125 = tpu.matmul %122, %123, %cst_61 {dimension_numbers = #tpu.dot_dimension_numbers<[1], [1], [0], [0], [0, 0, 1, 0], [], []>} : vector<8x8xf32>, vector<8x8xf32>, vector<8x8xf32> -> vector<8x8xf32>
    %cst_62 = arith.constant 0.353553385 : f32
    %126 = vector.broadcast %cst_62 : f32 to vector<8x8xf32>
    %127 = arith.mulf %125, %126 : vector<8x8xf32>
    %cst_63 = arith.constant dense<0xFF800000> : vector<8xf32>
    %128 = vector.multi_reduction <maximumf>, %127, %cst_63 [1] : vector<8x8xf32> to vector<8xf32>
    %129 = vector.shape_cast %128 : vector<8xf32> to vector<8x1xf32>
    %130 = vector.broadcast %129 : vector<8x1xf32> to vector<8x8xf32>
    %131 = arith.subf %127, %130 : vector<8x8xf32>
    %132 = math.exp %131 : vector<8x8xf32>
    %cst_64 = arith.constant dense<0.000000e+00> : vector<8xf32>
    %133 = vector.multi_reduction <add>, %132, %cst_64 [1] : vector<8x8xf32> to vector<8xf32>
    %134 = vector.shape_cast %133 : vector<8xf32> to vector<8x1xf32>
    %135 = vector.broadcast %134 : vector<8x1xf32> to vector<8x8xf32>
    %136 = arith.divf %132, %135 : vector<8x8xf32>
    %cst_65 = arith.constant dense<0.000000e+00> : vector<8x8xf32>
    %137 = tpu.matmul %136, %124, %cst_65 {dimension_numbers = #tpu.dot_dimension_numbers<[1], [0], [0], [1], [0, 0, 1, 1], [], []>} : vector<8x8xf32>, vector<8x8xf32>, vector<8x8xf32> -> vector<8x8xf32>
    %138 = tpu.concatenate %89, %105, %121, %137 in 1 : vector<8x8xf32>, vector<8x8xf32>, vector<8x8xf32>, vector<8x8xf32> -> vector<8x32xf32>
    %cst_66 = arith.constant dense<0.000000e+00> : vector<8x32xf32>
    %139 = tpu.matmul %138, %9, %cst_66 {dimension_numbers = #tpu.dot_dimension_numbers<[1], [0], [0], [1], [0, 0, 1, 1], [], []>} : vector<8x32xf32>, vector<32x32xf32>, vector<8x32xf32> -> vector<8x32xf32>
    %140 = vector.broadcast %11 : vector<1x32xf32> to vector<8x32xf32>
    %141 = arith.addf %139, %140 : vector<8x32xf32>
    %142 = arith.addf %19, %141 : vector<8x32xf32>
    %cst_67 = arith.constant dense<0.000000e+00> : vector<8xf32>
    %143 = vector.multi_reduction <add>, %142, %cst_67 [1] : vector<8x32xf32> to vector<8xf32>
    %144 = vector.shape_cast %143 : vector<8xf32> to vector<8x1xf32>
    %cst_68 = arith.constant 3.200000e+01 : f32
    %145 = vector.broadcast %cst_68 : f32 to vector<8x1xf32>
    %146 = arith.divf %144, %145 : vector<8x1xf32>
    %147 = vector.broadcast %146 : vector<8x1xf32> to vector<8x32xf32>
    %148 = arith.subf %142, %147 : vector<8x32xf32>
    %149 = arith.mulf %148, %148 : vector<8x32xf32>
    %cst_69 = arith.constant dense<0.000000e+00> : vector<8xf32>
    %150 = vector.multi_reduction <add>, %149, %cst_69 [1] : vector<8x32xf32> to vector<8xf32>
    %151 = vector.shape_cast %150 : vector<8xf32> to vector<8x1xf32>
    %cst_70 = arith.constant 3.200000e+01 : f32
    %152 = vector.broadcast %cst_70 : f32 to vector<8x1xf32>
    %153 = arith.divf %151, %152 : vector<8x1xf32>
    %154 = vector.broadcast %146 : vector<8x1xf32> to vector<8x32xf32>
    %155 = arith.subf %142, %154 : vector<8x32xf32>
    %cst_71 = arith.constant 9.99999974E-6 : f32
    %156 = vector.broadcast %cst_71 : f32 to vector<8x1xf32>
    %157 = arith.addf %153, %156 : vector<8x1xf32>
    %158 = math.rsqrt %157 : vector<8x1xf32>
    %159 = vector.broadcast %158 : vector<8x1xf32> to vector<8x32xf32>
    %160 = arith.mulf %155, %159 : vector<8x32xf32>
    %161 = vector.broadcast %16 : vector<1x32xf32> to vector<8x32xf32>
    %162 = arith.mulf %160, %161 : vector<8x32xf32>
    %163 = vector.broadcast %17 : vector<1x32xf32> to vector<8x32xf32>
    %164 = arith.addf %162, %163 : vector<8x32xf32>
    %c0_72 = arith.constant 0 : index
    %c0_73 = arith.constant 0 : index
    %c0_74 = arith.constant 0 : index
    %c0_75 = arith.constant 0 : index
    %165 = vector.load %arg13[%c0_72, %c0_73, %c0_74, %c0_75] : memref<1x1x8x32xf32, #tpu.memory_space<vmem>>, vector<1x1x8x32xf32>
    %166 = vector.shape_cast %165 : vector<1x1x8x32xf32> to vector<8x32xf32>
    %167 = vector.shape_cast %164 : vector<8x32xf32> to vector<1x1x8x32xf32>
    tpu.vector_store %arg13[%c0_72, %c0_73, %c0_74, %c0_75], %167 {strides = array<i32>} : memref<1x1x8x32xf32, #tpu.memory_space<vmem>>, vector<1x1x8x32xf32>,
    return
  }
  func.func @transform_0(%arg0: i32) -> (i32, i32, i32, i32) {
    %c0_i32 = arith.constant 0 : i32
    %c0_i32_0 = arith.constant 0 : i32
    %c0_i32_1 = arith.constant 0 : i32
    %c0_i32_2 = arith.constant 0 : i32
    return %c0_i32, %arg0, %c0_i32_0, %c0_i32_1 : i32, i32, i32, i32
  }
  func.func @transform_1(%arg0: i32) -> (i32, i32, i32, i32) {
    %c1_i32 = arith.constant 1 : i32
    %c0_i32 = arith.constant 0 : i32
    %c0_i32_0 = arith.constant 0 : i32
    %c0_i32_1 = arith.constant 0 : i32
    return %c1_i32, %arg0, %c0_i32, %c0_i32_0 : i32, i32, i32, i32
  }
  func.func @transform_2(%arg0: i32) -> (i32, i32, i32) {
    %c0_i32 = arith.constant 0 : i32
    %c0_i32_0 = arith.constant 0 : i32
    %c0_i32_1 = arith.constant 0 : i32
    %c0_i32_2 = arith.constant 0 : i32
    return %c0_i32, %c0_i32_0, %c0_i32_1 : i32, i32, i32
  }
  func.func @transform_3(%arg0: i32) -> (i32, i32, i32) {
    %c0_i32 = arith.constant 0 : i32
    %c0_i32_0 = arith.constant 0 : i32
    %c0_i32_1 = arith.constant 0 : i32
    %c0_i32_2 = arith.constant 0 : i32
    return %c0_i32, %c0_i32_0, %c0_i32_1 : i32, i32, i32
  }
  func.func @transform_4(%arg0: i32) -> (i32, i32, i32) {
    %c0_i32 = arith.constant 0 : i32
    %c0_i32_0 = arith.constant 0 : i32
    %c0_i32_1 = arith.constant 0 : i32
    %c0_i32_2 = arith.constant 0 : i32
    return %c0_i32, %c0_i32_0, %c0_i32_1 : i32, i32, i32
  }
  func.func @transform_5(%arg0: i32) -> (i32, i32, i32) {
    %c0_i32 = arith.constant 0 : i32
    %c0_i32_0 = arith.constant 0 : i32
    %c0_i32_1 = arith.constant 0 : i32
    %c0_i32_2 = arith.constant 0 : i32
    return %c0_i32, %c0_i32_0, %c0_i32_1 : i32, i32, i32
  }
  func.func @transform_6(%arg0: i32) -> (i32, i32, i32) {
    %c0_i32 = arith.constant 0 : i32
    %c0_i32_0 = arith.constant 0 : i32
    %c0_i32_1 = arith.constant 0 : i32
    %c0_i32_2 = arith.constant 0 : i32
    return %c0_i32, %c0_i32_0, %c0_i32_1 : i32, i32, i32
  }
  func.func @transform_7(%arg0: i32) -> (i32, i32, i32) {
    %c0_i32 = arith.constant 0 : i32
    %c0_i32_0 = arith.constant 0 : i32
    %c0_i32_1 = arith.constant 0 : i32
    %c0_i32_2 = arith.constant 0 : i32
    return %c0_i32, %c0_i32_0, %c0_i32_1 : i32, i32, i32
  }
  func.func @transform_8(%arg0: i32) -> (i32, i32, i32) {
    %c0_i32 = arith.constant 0 : i32
    %c0_i32_0 = arith.constant 0 : i32
    %c0_i32_1 = arith.constant 0 : i32
    %c0_i32_2 = arith.constant 0 : i32
    return %c0_i32, %c0_i32_0, %c0_i32_1 : i32, i32, i32
  }
  func.func @transform_9(%arg0: i32) -> (i32, i32, i32) {
    %c0_i32 = arith.constant 0 : i32
    %c0_i32_0 = arith.constant 0 : i32
    %c0_i32_1 = arith.constant 0 : i32
    %c0_i32_2 = arith.constant 0 : i32
    return %c0_i32, %c0_i32_0, %c0_i32_1 : i32, i32, i32
  }
  func.func @transform_10(%arg0: i32) -> (i32, i32) {
    %c0_i32 = arith.constant 0 : i32
    %c0_i32_0 = arith.constant 0 : i32
    %c0_i32_1 = arith.constant 0 : i32
    return %c0_i32, %c0_i32_0 : i32, i32
  }
  func.func @transform_11(%arg0: i32) -> (i32, i32) {
    %c0_i32 = arith.constant 0 : i32
    %c0_i32_0 = arith.constant 0 : i32
    %c0_i32_1 = arith.constant 0 : i32
    return %c0_i32, %c0_i32_0 : i32, i32
  }
  func.func @transform_12(%arg0: i32) -> (i32, i32, i32, i32) {
    %c0_i32 = arith.constant 0 : i32
    %c0_i32_0 = arith.constant 0 : i32
    %c0_i32_1 = arith.constant 0 : i32
    %c0_i32_2 = arith.constant 0 : i32
    return %c0_i32, %arg0, %c0_i32_0, %c0_i32_1 : i32, i32, i32, i32
  }
}

module attributes {stable_mosaic.version = 11 : i64} {
  func.func @_cross_kernel(%arg0: i32, %arg1: memref<1x2x8x32xf32, #tpu.memory_space<vmem>>, %arg2: memref<1x2x8x32xf32, #tpu.memory_space<vmem>>, %arg3: memref<1x32x32xf32, #tpu.memory_space<vmem>>, %arg4: memref<1x1x32xf32, #tpu.memory_space<vmem>>, %arg5: memref<1x32x64xf32, #tpu.memory_space<vmem>>, %arg6: memref<1x1x64xf32, #tpu.memory_space<vmem>>, %arg7: memref<1x32x32xf32, #tpu.memory_space<vmem>>, %arg8: memref<1x1x32xf32, #tpu.memory_space<vmem>>, %arg9: memref<1x1x32xf32, #tpu.memory_space<vmem>>, %arg10: memref<1x1x32xf32, #tpu.memory_space<vmem>>, %arg11: memref<1x32xf32, #tpu.memory_space<vmem>>, %arg12: memref<1x32xf32, #tpu.memory_space<vmem>>, %arg13: memref<1x2x8x32xf32, #tpu.memory_space<vmem>>) attributes {dimension_semantics = [#tpu.dimension_semantics<parallel>], iteration_bounds = array<i64: 2>, scalar_prefetch = 0 : i64, scratch_operands = 0 : i64, tpu.core_type = #tpu.core_type<tc>, window_params = [{transform_indices = @transform_0, window_bounds = array<i64: 1, 2, 8, 32>}, {transform_indices = @transform_1, window_bounds = array<i64: 1, 2, 8, 32>}, {transform_indices = @transform_2, window_bounds = array<i64: 1, 32, 32>}, {transform_indices = @transform_3, window_bounds = array<i64: 1, 1, 32>}, {transform_indices = @transform_4, window_bounds = array<i64: 1, 32, 64>}, {transform_indices = @transform_5, window_bounds = array<i64: 1, 1, 64>}, {transform_indices = @transform_6, window_bounds = array<i64: 1, 32, 32>}, {transform_indices = @transform_7, window_bounds = array<i64: 1, 1, 32>}, {transform_indices = @transform_8, window_bounds = array<i64: 1, 1, 32>}, {transform_indices = @transform_9, window_bounds = array<i64: 1, 1, 32>}, {pipeline_mode = #tpu.pipeline_mode<synchronous>, transform_indices = @transform_10, window_bounds = array<i64: 1, 32>}, {pipeline_mode = #tpu.pipeline_mode<synchronous>, transform_indices = @transform_11, window_bounds = array<i64: 1, 32>}, {transform_indices = @transform_12, window_bounds = array<i64: 1, 2, 8, 32>}]} {
    %c0 = arith.constant 0 : index
    %c0_0 = arith.constant 0 : index
    %c0_1 = arith.constant 0 : index
    %0 = vector.load %arg3[%c0, %c0_0, %c0_1] : memref<1x32x32xf32, #tpu.memory_space<vmem>>, vector<1x32x32xf32>
    %1 = vector.shape_cast %0 : vector<1x32x32xf32> to vector<32x32xf32>
    %c0_2 = arith.constant 0 : index
    %c0_3 = arith.constant 0 : index
    %c0_4 = arith.constant 0 : index
    %2 = vector.load %arg4[%c0_2, %c0_3, %c0_4] : memref<1x1x32xf32, #tpu.memory_space<vmem>>, vector<1x1x32xf32>
    %3 = vector.shape_cast %2 : vector<1x1x32xf32> to vector<1x32xf32>
    %c0_5 = arith.constant 0 : index
    %c0_6 = arith.constant 0 : index
    %c0_7 = arith.constant 0 : index
    %4 = vector.load %arg5[%c0_5, %c0_6, %c0_7] : memref<1x32x64xf32, #tpu.memory_space<vmem>>, vector<1x32x64xf32>
    %5 = vector.shape_cast %4 : vector<1x32x64xf32> to vector<32x64xf32>
    %c0_8 = arith.constant 0 : index
    %c0_9 = arith.constant 0 : index
    %c0_10 = arith.constant 0 : index
    %6 = vector.load %arg6[%c0_8, %c0_9, %c0_10] : memref<1x1x64xf32, #tpu.memory_space<vmem>>, vector<1x1x64xf32>
    %7 = vector.shape_cast %6 : vector<1x1x64xf32> to vector<1x64xf32>
    %c0_11 = arith.constant 0 : index
    %c0_12 = arith.constant 0 : index
    %c0_13 = arith.constant 0 : index
    %8 = vector.load %arg7[%c0_11, %c0_12, %c0_13] : memref<1x32x32xf32, #tpu.memory_space<vmem>>, vector<1x32x32xf32>
    %9 = vector.shape_cast %8 : vector<1x32x32xf32> to vector<32x32xf32>
    %c0_14 = arith.constant 0 : index
    %c0_15 = arith.constant 0 : index
    %c0_16 = arith.constant 0 : index
    %10 = vector.load %arg8[%c0_14, %c0_15, %c0_16] : memref<1x1x32xf32, #tpu.memory_space<vmem>>, vector<1x1x32xf32>
    %11 = vector.shape_cast %10 : vector<1x1x32xf32> to vector<1x32xf32>
    %c0_17 = arith.constant 0 : index
    %c0_18 = arith.constant 0 : index
    %c0_19 = arith.constant 0 : index
    %12 = vector.load %arg9[%c0_17, %c0_18, %c0_19] : memref<1x1x32xf32, #tpu.memory_space<vmem>>, vector<1x1x32xf32>
    %13 = vector.shape_cast %12 : vector<1x1x32xf32> to vector<1x32xf32>
    %c0_20 = arith.constant 0 : index
    %c0_21 = arith.constant 0 : index
    %c0_22 = arith.constant 0 : index
    %14 = vector.load %arg10[%c0_20, %c0_21, %c0_22] : memref<1x1x32xf32, #tpu.memory_space<vmem>>, vector<1x1x32xf32>
    %15 = vector.shape_cast %14 : vector<1x1x32xf32> to vector<1x32xf32>
    %c0_23 = arith.constant 0 : index
    %c0_24 = arith.constant 0 : index
    %16 = vector.load %arg11[%c0_23, %c0_24] : memref<1x32xf32, #tpu.memory_space<vmem>>, vector<1x32xf32>
    %c0_25 = arith.constant 0 : index
    %c0_26 = arith.constant 0 : index
    %17 = vector.load %arg12[%c0_25, %c0_26] : memref<1x32xf32, #tpu.memory_space<vmem>>, vector<1x32xf32>
    %c0_27 = arith.constant 0 : index
    %c0_28 = arith.constant 0 : index
    %c0_29 = arith.constant 0 : index
    %c0_30 = arith.constant 0 : index
    %18 = vector.load %arg1[%c0_27, %c0_28, %c0_29, %c0_30] : memref<1x2x8x32xf32, #tpu.memory_space<vmem>>, vector<1x2x8x32xf32>
    %19 = vector.shape_cast %18 : vector<1x2x8x32xf32> to vector<2x8x32xf32>
    %20 = vector.shape_cast %19 : vector<2x8x32xf32> to vector<16x32xf32>
    %c0_31 = arith.constant 0 : index
    %c0_32 = arith.constant 0 : index
    %c0_33 = arith.constant 0 : index
    %c0_34 = arith.constant 0 : index
    %21 = vector.load %arg2[%c0_31, %c0_32, %c0_33, %c0_34] : memref<1x2x8x32xf32, #tpu.memory_space<vmem>>, vector<1x2x8x32xf32>
    %22 = vector.shape_cast %21 : vector<1x2x8x32xf32> to vector<2x8x32xf32>
    %23 = vector.shape_cast %22 : vector<2x8x32xf32> to vector<16x32xf32>
    %cst = arith.constant dense<0.000000e+00> : vector<16xf32>
    %24 = vector.multi_reduction <add>, %20, %cst [1] : vector<16x32xf32> to vector<16xf32>
    %25 = vector.shape_cast %24 : vector<16xf32> to vector<16x1xf32>
    %cst_35 = arith.constant 3.200000e+01 : f32
    %26 = vector.broadcast %cst_35 : f32 to vector<16x1xf32>
    %27 = arith.divf %25, %26 : vector<16x1xf32>
    %28 = vector.broadcast %27 : vector<16x1xf32> to vector<16x32xf32>
    %29 = arith.subf %20, %28 : vector<16x32xf32>
    %30 = arith.mulf %29, %29 : vector<16x32xf32>
    %cst_36 = arith.constant dense<0.000000e+00> : vector<16xf32>
    %31 = vector.multi_reduction <add>, %30, %cst_36 [1] : vector<16x32xf32> to vector<16xf32>
    %32 = vector.shape_cast %31 : vector<16xf32> to vector<16x1xf32>
    %cst_37 = arith.constant 3.200000e+01 : f32
    %33 = vector.broadcast %cst_37 : f32 to vector<16x1xf32>
    %34 = arith.divf %32, %33 : vector<16x1xf32>
    %35 = vector.broadcast %27 : vector<16x1xf32> to vector<16x32xf32>
    %36 = arith.subf %20, %35 : vector<16x32xf32>
    %cst_38 = arith.constant 9.99999974E-6 : f32
    %37 = vector.broadcast %cst_38 : f32 to vector<16x1xf32>
    %38 = arith.addf %34, %37 : vector<16x1xf32>
    %39 = math.rsqrt %38 : vector<16x1xf32>
    %40 = vector.broadcast %39 : vector<16x1xf32> to vector<16x32xf32>
    %41 = arith.mulf %36, %40 : vector<16x32xf32>
    %42 = vector.broadcast %13 : vector<1x32xf32> to vector<16x32xf32>
    %43 = arith.mulf %41, %42 : vector<16x32xf32>
    %44 = vector.broadcast %15 : vector<1x32xf32> to vector<16x32xf32>
    %45 = arith.addf %43, %44 : vector<16x32xf32>
    %cst_39 = arith.constant dense<0.000000e+00> : vector<16xf32>
    %46 = vector.multi_reduction <add>, %23, %cst_39 [1] : vector<16x32xf32> to vector<16xf32>
    %47 = vector.shape_cast %46 : vector<16xf32> to vector<16x1xf32>
    %cst_40 = arith.constant 3.200000e+01 : f32
    %48 = vector.broadcast %cst_40 : f32 to vector<16x1xf32>
    %49 = arith.divf %47, %48 : vector<16x1xf32>
    %50 = vector.broadcast %49 : vector<16x1xf32> to vector<16x32xf32>
    %51 = arith.subf %23, %50 : vector<16x32xf32>
    %52 = arith.mulf %51, %51 : vector<16x32xf32>
    %cst_41 = arith.constant dense<0.000000e+00> : vector<16xf32>
    %53 = vector.multi_reduction <add>, %52, %cst_41 [1] : vector<16x32xf32> to vector<16xf32>
    %54 = vector.shape_cast %53 : vector<16xf32> to vector<16x1xf32>
    %cst_42 = arith.constant 3.200000e+01 : f32
    %55 = vector.broadcast %cst_42 : f32 to vector<16x1xf32>
    %56 = arith.divf %54, %55 : vector<16x1xf32>
    %57 = vector.broadcast %49 : vector<16x1xf32> to vector<16x32xf32>
    %58 = arith.subf %23, %57 : vector<16x32xf32>
    %cst_43 = arith.constant 9.99999974E-6 : f32
    %59 = vector.broadcast %cst_43 : f32 to vector<16x1xf32>
    %60 = arith.addf %56, %59 : vector<16x1xf32>
    %61 = math.rsqrt %60 : vector<16x1xf32>
    %62 = vector.broadcast %61 : vector<16x1xf32> to vector<16x32xf32>
    %63 = arith.mulf %58, %62 : vector<16x32xf32>
    %64 = vector.broadcast %13 : vector<1x32xf32> to vector<16x32xf32>
    %65 = arith.mulf %63, %64 : vector<16x32xf32>
    %66 = vector.broadcast %15 : vector<1x32xf32> to vector<16x32xf32>
    %67 = arith.addf %65, %66 : vector<16x32xf32>
    %cst_44 = arith.constant dense<0.000000e+00> : vector<16x32xf32>
    %68 = tpu.matmul %45, %1, %cst_44 {dimension_numbers = #tpu.dot_dimension_numbers<[1], [0], [0], [1], [0, 0, 1, 1], [], []>} : vector<16x32xf32>, vector<32x32xf32>, vector<16x32xf32> -> vector<16x32xf32>
    %69 = vector.broadcast %3 : vector<1x32xf32> to vector<16x32xf32>
    %70 = arith.addf %68, %69 : vector<16x32xf32>
    %cst_45 = arith.constant dense<0.000000e+00> : vector<16x64xf32>
    %71 = tpu.matmul %67, %5, %cst_45 {dimension_numbers = #tpu.dot_dimension_numbers<[1], [0], [0], [1], [0, 0, 1, 1], [], []>} : vector<16x32xf32>, vector<32x64xf32>, vector<16x64xf32> -> vector<16x64xf32>
    %72 = vector.broadcast %7 : vector<1x64xf32> to vector<16x64xf32>
    %73 = arith.addf %71, %72 : vector<16x64xf32>
    %74 = vector.extract_strided_slice %73 {offsets = [0, 0], sizes = [16, 32], strides = [1, 1]} : vector<16x64xf32> to vector<16x32xf32>
    %75 = vector.extract_strided_slice %73 {offsets = [0, 32], sizes = [16, 32], strides = [1, 1]} : vector<16x64xf32> to vector<16x32xf32>
    %76 = vector.extract_strided_slice %70 {offsets = [0, 0], sizes = [8, 8], strides = [1, 1]} : vector<16x32xf32> to vector<8x8xf32>
    %77 = vector.extract_strided_slice %74 {offsets = [0, 0], sizes = [8, 8], strides = [1, 1]} : vector<16x32xf32> to vector<8x8xf32>
    %78 = vector.extract_strided_slice %75 {offsets = [0, 0], sizes = [8, 8], strides = [1, 1]} : vector<16x32xf32> to vector<8x8xf32>
    %cst_46 = arith.constant dense<0.000000e+00> : vector<8x8xf32>
    %79 = tpu.matmul %76, %77, %cst_46 {dimension_numbers = #tpu.dot_dimension_numbers<[1], [1], [0], [0], [0, 0, 1, 0], [], []>} : vector<8x8xf32>, vector<8x8xf32>, vector<8x8xf32> -> vector<8x8xf32>
    %cst_47 = arith.constant 0.353553385 : f32
    %80 = vector.broadcast %cst_47 : f32 to vector<8x8xf32>
    %81 = arith.mulf %79, %80 : vector<8x8xf32>
    %cst_48 = arith.constant dense<0xFF800000> : vector<8xf32>
    %82 = vector.multi_reduction <maximumf>, %81, %cst_48 [1] : vector<8x8xf32> to vector<8xf32>
    %83 = vector.shape_cast %82 : vector<8xf32> to vector<8x1xf32>
    %84 = vector.broadcast %83 : vector<8x1xf32> to vector<8x8xf32>
    %85 = arith.subf %81, %84 : vector<8x8xf32>
    %86 = math.exp %85 : vector<8x8xf32>
    %cst_49 = arith.constant dense<0.000000e+00> : vector<8xf32>
    %87 = vector.multi_reduction <add>, %86, %cst_49 [1] : vector<8x8xf32> to vector<8xf32>
    %88 = vector.shape_cast %87 : vector<8xf32> to vector<8x1xf32>
    %89 = vector.broadcast %88 : vector<8x1xf32> to vector<8x8xf32>
    %90 = arith.divf %86, %89 : vector<8x8xf32>
    %cst_50 = arith.constant dense<0.000000e+00> : vector<8x8xf32>
    %91 = tpu.matmul %90, %78, %cst_50 {dimension_numbers = #tpu.dot_dimension_numbers<[1], [0], [0], [1], [0, 0, 1, 1], [], []>} : vector<8x8xf32>, vector<8x8xf32>, vector<8x8xf32> -> vector<8x8xf32>
    %92 = vector.extract_strided_slice %70 {offsets = [0, 8], sizes = [8, 8], strides = [1, 1]} : vector<16x32xf32> to vector<8x8xf32>
    %93 = vector.extract_strided_slice %74 {offsets = [0, 8], sizes = [8, 8], strides = [1, 1]} : vector<16x32xf32> to vector<8x8xf32>
    %94 = vector.extract_strided_slice %75 {offsets = [0, 8], sizes = [8, 8], strides = [1, 1]} : vector<16x32xf32> to vector<8x8xf32>
    %cst_51 = arith.constant dense<0.000000e+00> : vector<8x8xf32>
    %95 = tpu.matmul %92, %93, %cst_51 {dimension_numbers = #tpu.dot_dimension_numbers<[1], [1], [0], [0], [0, 0, 1, 0], [], []>} : vector<8x8xf32>, vector<8x8xf32>, vector<8x8xf32> -> vector<8x8xf32>
    %cst_52 = arith.constant 0.353553385 : f32
    %96 = vector.broadcast %cst_52 : f32 to vector<8x8xf32>
    %97 = arith.mulf %95, %96 : vector<8x8xf32>
    %cst_53 = arith.constant dense<0xFF800000> : vector<8xf32>
    %98 = vector.multi_reduction <maximumf>, %97, %cst_53 [1] : vector<8x8xf32> to vector<8xf32>
    %99 = vector.shape_cast %98 : vector<8xf32> to vector<8x1xf32>
    %100 = vector.broadcast %99 : vector<8x1xf32> to vector<8x8xf32>
    %101 = arith.subf %97, %100 : vector<8x8xf32>
    %102 = math.exp %101 : vector<8x8xf32>
    %cst_54 = arith.constant dense<0.000000e+00> : vector<8xf32>
    %103 = vector.multi_reduction <add>, %102, %cst_54 [1] : vector<8x8xf32> to vector<8xf32>
    %104 = vector.shape_cast %103 : vector<8xf32> to vector<8x1xf32>
    %105 = vector.broadcast %104 : vector<8x1xf32> to vector<8x8xf32>
    %106 = arith.divf %102, %105 : vector<8x8xf32>
    %cst_55 = arith.constant dense<0.000000e+00> : vector<8x8xf32>
    %107 = tpu.matmul %106, %94, %cst_55 {dimension_numbers = #tpu.dot_dimension_numbers<[1], [0], [0], [1], [0, 0, 1, 1], [], []>} : vector<8x8xf32>, vector<8x8xf32>, vector<8x8xf32> -> vector<8x8xf32>
    %108 = vector.extract_strided_slice %70 {offsets = [0, 16], sizes = [8, 8], strides = [1, 1]} : vector<16x32xf32> to vector<8x8xf32>
    %109 = vector.extract_strided_slice %74 {offsets = [0, 16], sizes = [8, 8], strides = [1, 1]} : vector<16x32xf32> to vector<8x8xf32>
    %110 = vector.extract_strided_slice %75 {offsets = [0, 16], sizes = [8, 8], strides = [1, 1]} : vector<16x32xf32> to vector<8x8xf32>
    %cst_56 = arith.constant dense<0.000000e+00> : vector<8x8xf32>
    %111 = tpu.matmul %108, %109, %cst_56 {dimension_numbers = #tpu.dot_dimension_numbers<[1], [1], [0], [0], [0, 0, 1, 0], [], []>} : vector<8x8xf32>, vector<8x8xf32>, vector<8x8xf32> -> vector<8x8xf32>
    %cst_57 = arith.constant 0.353553385 : f32
    %112 = vector.broadcast %cst_57 : f32 to vector<8x8xf32>
    %113 = arith.mulf %111, %112 : vector<8x8xf32>
    %cst_58 = arith.constant dense<0xFF800000> : vector<8xf32>
    %114 = vector.multi_reduction <maximumf>, %113, %cst_58 [1] : vector<8x8xf32> to vector<8xf32>
    %115 = vector.shape_cast %114 : vector<8xf32> to vector<8x1xf32>
    %116 = vector.broadcast %115 : vector<8x1xf32> to vector<8x8xf32>
    %117 = arith.subf %113, %116 : vector<8x8xf32>
    %118 = math.exp %117 : vector<8x8xf32>
    %cst_59 = arith.constant dense<0.000000e+00> : vector<8xf32>
    %119 = vector.multi_reduction <add>, %118, %cst_59 [1] : vector<8x8xf32> to vector<8xf32>
    %120 = vector.shape_cast %119 : vector<8xf32> to vector<8x1xf32>
    %121 = vector.broadcast %120 : vector<8x1xf32> to vector<8x8xf32>
    %122 = arith.divf %118, %121 : vector<8x8xf32>
    %cst_60 = arith.constant dense<0.000000e+00> : vector<8x8xf32>
    %123 = tpu.matmul %122, %110, %cst_60 {dimension_numbers = #tpu.dot_dimension_numbers<[1], [0], [0], [1], [0, 0, 1, 1], [], []>} : vector<8x8xf32>, vector<8x8xf32>, vector<8x8xf32> -> vector<8x8xf32>
    %124 = vector.extract_strided_slice %70 {offsets = [0, 24], sizes = [8, 8], strides = [1, 1]} : vector<16x32xf32> to vector<8x8xf32>
    %125 = vector.extract_strided_slice %74 {offsets = [0, 24], sizes = [8, 8], strides = [1, 1]} : vector<16x32xf32> to vector<8x8xf32>
    %126 = vector.extract_strided_slice %75 {offsets = [0, 24], sizes = [8, 8], strides = [1, 1]} : vector<16x32xf32> to vector<8x8xf32>
    %cst_61 = arith.constant dense<0.000000e+00> : vector<8x8xf32>
    %127 = tpu.matmul %124, %125, %cst_61 {dimension_numbers = #tpu.dot_dimension_numbers<[1], [1], [0], [0], [0, 0, 1, 0], [], []>} : vector<8x8xf32>, vector<8x8xf32>, vector<8x8xf32> -> vector<8x8xf32>
    %cst_62 = arith.constant 0.353553385 : f32
    %128 = vector.broadcast %cst_62 : f32 to vector<8x8xf32>
    %129 = arith.mulf %127, %128 : vector<8x8xf32>
    %cst_63 = arith.constant dense<0xFF800000> : vector<8xf32>
    %130 = vector.multi_reduction <maximumf>, %129, %cst_63 [1] : vector<8x8xf32> to vector<8xf32>
    %131 = vector.shape_cast %130 : vector<8xf32> to vector<8x1xf32>
    %132 = vector.broadcast %131 : vector<8x1xf32> to vector<8x8xf32>
    %133 = arith.subf %129, %132 : vector<8x8xf32>
    %134 = math.exp %133 : vector<8x8xf32>
    %cst_64 = arith.constant dense<0.000000e+00> : vector<8xf32>
    %135 = vector.multi_reduction <add>, %134, %cst_64 [1] : vector<8x8xf32> to vector<8xf32>
    %136 = vector.shape_cast %135 : vector<8xf32> to vector<8x1xf32>
    %137 = vector.broadcast %136 : vector<8x1xf32> to vector<8x8xf32>
    %138 = arith.divf %134, %137 : vector<8x8xf32>
    %cst_65 = arith.constant dense<0.000000e+00> : vector<8x8xf32>
    %139 = tpu.matmul %138, %126, %cst_65 {dimension_numbers = #tpu.dot_dimension_numbers<[1], [0], [0], [1], [0, 0, 1, 1], [], []>} : vector<8x8xf32>, vector<8x8xf32>, vector<8x8xf32> -> vector<8x8xf32>
    %140 = tpu.concatenate %91, %107, %123, %139 in 1 : vector<8x8xf32>, vector<8x8xf32>, vector<8x8xf32>, vector<8x8xf32> -> vector<8x32xf32>
    %141 = vector.extract_strided_slice %70 {offsets = [8, 0], sizes = [8, 8], strides = [1, 1]} : vector<16x32xf32> to vector<8x8xf32>
    %142 = vector.extract_strided_slice %74 {offsets = [8, 0], sizes = [8, 8], strides = [1, 1]} : vector<16x32xf32> to vector<8x8xf32>
    %143 = vector.extract_strided_slice %75 {offsets = [8, 0], sizes = [8, 8], strides = [1, 1]} : vector<16x32xf32> to vector<8x8xf32>
    %cst_66 = arith.constant dense<0.000000e+00> : vector<8x8xf32>
    %144 = tpu.matmul %141, %142, %cst_66 {dimension_numbers = #tpu.dot_dimension_numbers<[1], [1], [0], [0], [0, 0, 1, 0], [], []>} : vector<8x8xf32>, vector<8x8xf32>, vector<8x8xf32> -> vector<8x8xf32>
    %cst_67 = arith.constant 0.353553385 : f32
    %145 = vector.broadcast %cst_67 : f32 to vector<8x8xf32>
    %146 = arith.mulf %144, %145 : vector<8x8xf32>
    %cst_68 = arith.constant dense<0xFF800000> : vector<8xf32>
    %147 = vector.multi_reduction <maximumf>, %146, %cst_68 [1] : vector<8x8xf32> to vector<8xf32>
    %148 = vector.shape_cast %147 : vector<8xf32> to vector<8x1xf32>
    %149 = vector.broadcast %148 : vector<8x1xf32> to vector<8x8xf32>
    %150 = arith.subf %146, %149 : vector<8x8xf32>
    %151 = math.exp %150 : vector<8x8xf32>
    %cst_69 = arith.constant dense<0.000000e+00> : vector<8xf32>
    %152 = vector.multi_reduction <add>, %151, %cst_69 [1] : vector<8x8xf32> to vector<8xf32>
    %153 = vector.shape_cast %152 : vector<8xf32> to vector<8x1xf32>
    %154 = vector.broadcast %153 : vector<8x1xf32> to vector<8x8xf32>
    %155 = arith.divf %151, %154 : vector<8x8xf32>
    %cst_70 = arith.constant dense<0.000000e+00> : vector<8x8xf32>
    %156 = tpu.matmul %155, %143, %cst_70 {dimension_numbers = #tpu.dot_dimension_numbers<[1], [0], [0], [1], [0, 0, 1, 1], [], []>} : vector<8x8xf32>, vector<8x8xf32>, vector<8x8xf32> -> vector<8x8xf32>
    %157 = vector.extract_strided_slice %70 {offsets = [8, 8], sizes = [8, 8], strides = [1, 1]} : vector<16x32xf32> to vector<8x8xf32>
    %158 = vector.extract_strided_slice %74 {offsets = [8, 8], sizes = [8, 8], strides = [1, 1]} : vector<16x32xf32> to vector<8x8xf32>
    %159 = vector.extract_strided_slice %75 {offsets = [8, 8], sizes = [8, 8], strides = [1, 1]} : vector<16x32xf32> to vector<8x8xf32>
    %cst_71 = arith.constant dense<0.000000e+00> : vector<8x8xf32>
    %160 = tpu.matmul %157, %158, %cst_71 {dimension_numbers = #tpu.dot_dimension_numbers<[1], [1], [0], [0], [0, 0, 1, 0], [], []>} : vector<8x8xf32>, vector<8x8xf32>, vector<8x8xf32> -> vector<8x8xf32>
    %cst_72 = arith.constant 0.353553385 : f32
    %161 = vector.broadcast %cst_72 : f32 to vector<8x8xf32>
    %162 = arith.mulf %160, %161 : vector<8x8xf32>
    %cst_73 = arith.constant dense<0xFF800000> : vector<8xf32>
    %163 = vector.multi_reduction <maximumf>, %162, %cst_73 [1] : vector<8x8xf32> to vector<8xf32>
    %164 = vector.shape_cast %163 : vector<8xf32> to vector<8x1xf32>
    %165 = vector.broadcast %164 : vector<8x1xf32> to vector<8x8xf32>
    %166 = arith.subf %162, %165 : vector<8x8xf32>
    %167 = math.exp %166 : vector<8x8xf32>
    %cst_74 = arith.constant dense<0.000000e+00> : vector<8xf32>
    %168 = vector.multi_reduction <add>, %167, %cst_74 [1] : vector<8x8xf32> to vector<8xf32>
    %169 = vector.shape_cast %168 : vector<8xf32> to vector<8x1xf32>
    %170 = vector.broadcast %169 : vector<8x1xf32> to vector<8x8xf32>
    %171 = arith.divf %167, %170 : vector<8x8xf32>
    %cst_75 = arith.constant dense<0.000000e+00> : vector<8x8xf32>
    %172 = tpu.matmul %171, %159, %cst_75 {dimension_numbers = #tpu.dot_dimension_numbers<[1], [0], [0], [1], [0, 0, 1, 1], [], []>} : vector<8x8xf32>, vector<8x8xf32>, vector<8x8xf32> -> vector<8x8xf32>
    %173 = vector.extract_strided_slice %70 {offsets = [8, 16], sizes = [8, 8], strides = [1, 1]} : vector<16x32xf32> to vector<8x8xf32>
    %174 = vector.extract_strided_slice %74 {offsets = [8, 16], sizes = [8, 8], strides = [1, 1]} : vector<16x32xf32> to vector<8x8xf32>
    %175 = vector.extract_strided_slice %75 {offsets = [8, 16], sizes = [8, 8], strides = [1, 1]} : vector<16x32xf32> to vector<8x8xf32>
    %cst_76 = arith.constant dense<0.000000e+00> : vector<8x8xf32>
    %176 = tpu.matmul %173, %174, %cst_76 {dimension_numbers = #tpu.dot_dimension_numbers<[1], [1], [0], [0], [0, 0, 1, 0], [], []>} : vector<8x8xf32>, vector<8x8xf32>, vector<8x8xf32> -> vector<8x8xf32>
    %cst_77 = arith.constant 0.353553385 : f32
    %177 = vector.broadcast %cst_77 : f32 to vector<8x8xf32>
    %178 = arith.mulf %176, %177 : vector<8x8xf32>
    %cst_78 = arith.constant dense<0xFF800000> : vector<8xf32>
    %179 = vector.multi_reduction <maximumf>, %178, %cst_78 [1] : vector<8x8xf32> to vector<8xf32>
    %180 = vector.shape_cast %179 : vector<8xf32> to vector<8x1xf32>
    %181 = vector.broadcast %180 : vector<8x1xf32> to vector<8x8xf32>
    %182 = arith.subf %178, %181 : vector<8x8xf32>
    %183 = math.exp %182 : vector<8x8xf32>
    %cst_79 = arith.constant dense<0.000000e+00> : vector<8xf32>
    %184 = vector.multi_reduction <add>, %183, %cst_79 [1] : vector<8x8xf32> to vector<8xf32>
    %185 = vector.shape_cast %184 : vector<8xf32> to vector<8x1xf32>
    %186 = vector.broadcast %185 : vector<8x1xf32> to vector<8x8xf32>
    %187 = arith.divf %183, %186 : vector<8x8xf32>
    %cst_80 = arith.constant dense<0.000000e+00> : vector<8x8xf32>
    %188 = tpu.matmul %187, %175, %cst_80 {dimension_numbers = #tpu.dot_dimension_numbers<[1], [0], [0], [1], [0, 0, 1, 1], [], []>} : vector<8x8xf32>, vector<8x8xf32>, vector<8x8xf32> -> vector<8x8xf32>
    %189 = vector.extract_strided_slice %70 {offsets = [8, 24], sizes = [8, 8], strides = [1, 1]} : vector<16x32xf32> to vector<8x8xf32>
    %190 = vector.extract_strided_slice %74 {offsets = [8, 24], sizes = [8, 8], strides = [1, 1]} : vector<16x32xf32> to vector<8x8xf32>
    %191 = vector.extract_strided_slice %75 {offsets = [8, 24], sizes = [8, 8], strides = [1, 1]} : vector<16x32xf32> to vector<8x8xf32>
    %cst_81 = arith.constant dense<0.000000e+00> : vector<8x8xf32>
    %192 = tpu.matmul %189, %190, %cst_81 {dimension_numbers = #tpu.dot_dimension_numbers<[1], [1], [0], [0], [0, 0, 1, 0], [], []>} : vector<8x8xf32>, vector<8x8xf32>, vector<8x8xf32> -> vector<8x8xf32>
    %cst_82 = arith.constant 0.353553385 : f32
    %193 = vector.broadcast %cst_82 : f32 to vector<8x8xf32>
    %194 = arith.mulf %192, %193 : vector<8x8xf32>
    %cst_83 = arith.constant dense<0xFF800000> : vector<8xf32>
    %195 = vector.multi_reduction <maximumf>, %194, %cst_83 [1] : vector<8x8xf32> to vector<8xf32>
    %196 = vector.shape_cast %195 : vector<8xf32> to vector<8x1xf32>
    %197 = vector.broadcast %196 : vector<8x1xf32> to vector<8x8xf32>
    %198 = arith.subf %194, %197 : vector<8x8xf32>
    %199 = math.exp %198 : vector<8x8xf32>
    %cst_84 = arith.constant dense<0.000000e+00> : vector<8xf32>
    %200 = vector.multi_reduction <add>, %199, %cst_84 [1] : vector<8x8xf32> to vector<8xf32>
    %201 = vector.shape_cast %200 : vector<8xf32> to vector<8x1xf32>
    %202 = vector.broadcast %201 : vector<8x1xf32> to vector<8x8xf32>
    %203 = arith.divf %199, %202 : vector<8x8xf32>
    %cst_85 = arith.constant dense<0.000000e+00> : vector<8x8xf32>
    %204 = tpu.matmul %203, %191, %cst_85 {dimension_numbers = #tpu.dot_dimension_numbers<[1], [0], [0], [1], [0, 0, 1, 1], [], []>} : vector<8x8xf32>, vector<8x8xf32>, vector<8x8xf32> -> vector<8x8xf32>
    %205 = tpu.concatenate %156, %172, %188, %204 in 1 : vector<8x8xf32>, vector<8x8xf32>, vector<8x8xf32>, vector<8x8xf32> -> vector<8x32xf32>
    %206 = tpu.concatenate %140, %205 in 0 : vector<8x32xf32>, vector<8x32xf32> -> vector<16x32xf32>
    %cst_86 = arith.constant dense<0.000000e+00> : vector<16x32xf32>
    %207 = tpu.matmul %206, %9, %cst_86 {dimension_numbers = #tpu.dot_dimension_numbers<[1], [0], [0], [1], [0, 0, 1, 1], [], []>} : vector<16x32xf32>, vector<32x32xf32>, vector<16x32xf32> -> vector<16x32xf32>
    %208 = vector.broadcast %11 : vector<1x32xf32> to vector<16x32xf32>
    %209 = arith.addf %207, %208 : vector<16x32xf32>
    %210 = arith.addf %20, %209 : vector<16x32xf32>
    %cst_87 = arith.constant dense<0.000000e+00> : vector<16xf32>
    %211 = vector.multi_reduction <add>, %210, %cst_87 [1] : vector<16x32xf32> to vector<16xf32>
    %212 = vector.shape_cast %211 : vector<16xf32> to vector<16x1xf32>
    %cst_88 = arith.constant 3.200000e+01 : f32
    %213 = vector.broadcast %cst_88 : f32 to vector<16x1xf32>
    %214 = arith.divf %212, %213 : vector<16x1xf32>
    %215 = vector.broadcast %214 : vector<16x1xf32> to vector<16x32xf32>
    %216 = arith.subf %210, %215 : vector<16x32xf32>
    %217 = arith.mulf %216, %216 : vector<16x32xf32>
    %cst_89 = arith.constant dense<0.000000e+00> : vector<16xf32>
    %218 = vector.multi_reduction <add>, %217, %cst_89 [1] : vector<16x32xf32> to vector<16xf32>
    %219 = vector.shape_cast %218 : vector<16xf32> to vector<16x1xf32>
    %cst_90 = arith.constant 3.200000e+01 : f32
    %220 = vector.broadcast %cst_90 : f32 to vector<16x1xf32>
    %221 = arith.divf %219, %220 : vector<16x1xf32>
    %222 = vector.broadcast %214 : vector<16x1xf32> to vector<16x32xf32>
    %223 = arith.subf %210, %222 : vector<16x32xf32>
    %cst_91 = arith.constant 9.99999974E-6 : f32
    %224 = vector.broadcast %cst_91 : f32 to vector<16x1xf32>
    %225 = arith.addf %221, %224 : vector<16x1xf32>
    %226 = math.rsqrt %225 : vector<16x1xf32>
    %227 = vector.broadcast %226 : vector<16x1xf32> to vector<16x32xf32>
    %228 = arith.mulf %223, %227 : vector<16x32xf32>
    %229 = vector.broadcast %16 : vector<1x32xf32> to vector<16x32xf32>
    %230 = arith.mulf %228, %229 : vector<16x32xf32>
    %231 = vector.broadcast %17 : vector<1x32xf32> to vector<16x32xf32>
    %232 = arith.addf %230, %231 : vector<16x32xf32>
    %233 = vector.shape_cast %232 : vector<16x32xf32> to vector<2x8x32xf32>
    %c0_92 = arith.constant 0 : index
    %c0_93 = arith.constant 0 : index
    %c0_94 = arith.constant 0 : index
    %c0_95 = arith.constant 0 : index
    %234 = vector.load %arg13[%c0_92, %c0_93, %c0_94, %c0_95] : memref<1x2x8x32xf32, #tpu.memory_space<vmem>>, vector<1x2x8x32xf32>
    %235 = vector.shape_cast %234 : vector<1x2x8x32xf32> to vector<2x8x32xf32>
    %236 = vector.shape_cast %233 : vector<2x8x32xf32> to vector<1x2x8x32xf32>
    tpu.vector_store %arg13[%c0_92, %c0_93, %c0_94, %c0_95], %236 {strides = array<i32>} : memref<1x2x8x32xf32, #tpu.memory_space<vmem>>, vector<1x2x8x32xf32>,
    return
  }
  func.func @transform_0(%arg0: i32) -> (i32, i32, i32, i32) {
    %c1_i32 = arith.constant 1 : i32
    %0 = arith.addi %arg0, %c1_i32 : i32
    %c0_i32 = arith.constant 0 : i32
    %c0_i32_0 = arith.constant 0 : i32
    %c0_i32_1 = arith.constant 0 : i32
    %c0_i32_2 = arith.constant 0 : i32
    return %0, %c0_i32, %c0_i32_0, %c0_i32_1 : i32, i32, i32, i32
  }
  func.func @transform_1(%arg0: i32) -> (i32, i32, i32, i32) {
    %c0_i32 = arith.constant 0 : i32
    %c0_i32_0 = arith.constant 0 : i32
    %c0_i32_1 = arith.constant 0 : i32
    %c0_i32_2 = arith.constant 0 : i32
    %c0_i32_3 = arith.constant 0 : i32
    return %c0_i32, %c0_i32_0, %c0_i32_1, %c0_i32_2 : i32, i32, i32, i32
  }
  func.func @transform_2(%arg0: i32) -> (i32, i32, i32) {
    %c0_i32 = arith.constant 0 : i32
    %c0_i32_0 = arith.constant 0 : i32
    %c0_i32_1 = arith.constant 0 : i32
    return %arg0, %c0_i32, %c0_i32_0 : i32, i32, i32
  }
  func.func @transform_3(%arg0: i32) -> (i32, i32, i32) {
    %c0_i32 = arith.constant 0 : i32
    %c0_i32_0 = arith.constant 0 : i32
    %c0_i32_1 = arith.constant 0 : i32
    return %arg0, %c0_i32, %c0_i32_0 : i32, i32, i32
  }
  func.func @transform_4(%arg0: i32) -> (i32, i32, i32) {
    %c0_i32 = arith.constant 0 : i32
    %c0_i32_0 = arith.constant 0 : i32
    %c0_i32_1 = arith.constant 0 : i32
    return %arg0, %c0_i32, %c0_i32_0 : i32, i32, i32
  }
  func.func @transform_5(%arg0: i32) -> (i32, i32, i32) {
    %c0_i32 = arith.constant 0 : i32
    %c0_i32_0 = arith.constant 0 : i32
    %c0_i32_1 = arith.constant 0 : i32
    return %arg0, %c0_i32, %c0_i32_0 : i32, i32, i32
  }
  func.func @transform_6(%arg0: i32) -> (i32, i32, i32) {
    %c0_i32 = arith.constant 0 : i32
    %c0_i32_0 = arith.constant 0 : i32
    %c0_i32_1 = arith.constant 0 : i32
    return %arg0, %c0_i32, %c0_i32_0 : i32, i32, i32
  }
  func.func @transform_7(%arg0: i32) -> (i32, i32, i32) {
    %c0_i32 = arith.constant 0 : i32
    %c0_i32_0 = arith.constant 0 : i32
    %c0_i32_1 = arith.constant 0 : i32
    return %arg0, %c0_i32, %c0_i32_0 : i32, i32, i32
  }
  func.func @transform_8(%arg0: i32) -> (i32, i32, i32) {
    %c0_i32 = arith.constant 0 : i32
    %c0_i32_0 = arith.constant 0 : i32
    %c0_i32_1 = arith.constant 0 : i32
    return %arg0, %c0_i32, %c0_i32_0 : i32, i32, i32
  }
  func.func @transform_9(%arg0: i32) -> (i32, i32, i32) {
    %c0_i32 = arith.constant 0 : i32
    %c0_i32_0 = arith.constant 0 : i32
    %c0_i32_1 = arith.constant 0 : i32
    return %arg0, %c0_i32, %c0_i32_0 : i32, i32, i32
  }
  func.func @transform_10(%arg0: i32) -> (i32, i32) {
    %c0_i32 = arith.constant 0 : i32
    %c0_i32_0 = arith.constant 0 : i32
    %c0_i32_1 = arith.constant 0 : i32
    return %c0_i32, %c0_i32_0 : i32, i32
  }
  func.func @transform_11(%arg0: i32) -> (i32, i32) {
    %c0_i32 = arith.constant 0 : i32
    %c0_i32_0 = arith.constant 0 : i32
    %c0_i32_1 = arith.constant 0 : i32
    return %c0_i32, %c0_i32_0 : i32, i32
  }
  func.func @transform_12(%arg0: i32) -> (i32, i32, i32, i32) {
    %c1_i32 = arith.constant 1 : i32
    %0 = arith.addi %arg0, %c1_i32 : i32
    %c0_i32 = arith.constant 0 : i32
    %c0_i32_0 = arith.constant 0 : i32
    %c0_i32_1 = arith.constant 0 : i32
    %c0_i32_2 = arith.constant 0 : i32
    return %0, %c0_i32, %c0_i32_0, %c0_i32_1 : i32, i32, i32, i32
  }
}

module attributes {stable_mosaic.version = 11 : i64} {
  func.func @_stage2_kernel(%arg0: i32, %arg1: memref<1x2x8x32xf32, #tpu.memory_space<vmem>>, %arg2: memref<1x32x128xf32, #tpu.memory_space<vmem>>, %arg3: memref<1x4x64xf32, #tpu.memory_space<vmem>>, %arg4: memref<1x1x64xf32, #tpu.memory_space<vmem>>, %arg5: memref<1x64x2xf32, #tpu.memory_space<vmem>>, %arg6: memref<1x16x64xf32, #tpu.memory_space<vmem>>, %arg7: memref<1x16x64xf32, #tpu.memory_space<vmem>>, %arg8: memref<1x2x64xf32, #tpu.memory_space<vmem>>, %arg9: memref<1x1x64xf32, #tpu.memory_space<vmem>>, %arg10: memref<1x16x64xf32, #tpu.memory_space<vmem>>, %arg11: memref<1x1x64xf32, #tpu.memory_space<vmem>>, %arg12: memref<1x64x32xf32, #tpu.memory_space<vmem>>, %arg13: memref<1x1x32xf32, #tpu.memory_space<vmem>>, %arg14: memref<1x1x32xf32, #tpu.memory_space<vmem>>, %arg15: memref<1x32x32xf32, #tpu.memory_space<vmem>>, %arg16: memref<1x1x32xf32, #tpu.memory_space<vmem>>, %arg17: memref<1x32x64xf32, #tpu.memory_space<vmem>>, %arg18: memref<1x1x64xf32, #tpu.memory_space<vmem>>, %arg19: memref<1x32x32xf32, #tpu.memory_space<vmem>>, %arg20: memref<1x1x32xf32, #tpu.memory_space<vmem>>, %arg21: memref<1x1x32xf32, #tpu.memory_space<vmem>>, %arg22: memref<1x1x32xf32, #tpu.memory_space<vmem>>, %arg23: memref<1x32xf32, #tpu.memory_space<vmem>>, %arg24: memref<1x32xf32, #tpu.memory_space<vmem>>, %arg25: memref<1x32x64xf32, #tpu.memory_space<vmem>>, %arg26: memref<1x1x64xf32, #tpu.memory_space<vmem>>, %arg27: memref<1x64x32xf32, #tpu.memory_space<vmem>>, %arg28: memref<1x1x32xf32, #tpu.memory_space<vmem>>, %arg29: memref<1x1x32xf32, #tpu.memory_space<vmem>>, %arg30: memref<1x1x32xf32, #tpu.memory_space<vmem>>, %arg31: memref<1x2x8x32xf32, #tpu.memory_space<vmem>>) attributes {dimension_semantics = [#tpu.dimension_semantics<parallel>], iteration_bounds = array<i64: 3>, scalar_prefetch = 0 : i64, scratch_operands = 0 : i64, tpu.core_type = #tpu.core_type<tc>, window_params = [{transform_indices = @transform_0, window_bounds = array<i64: 1, 2, 8, 32>}, {transform_indices = @transform_1, window_bounds = array<i64: 1, 32, 128>}, {transform_indices = @transform_2, window_bounds = array<i64: 1, 4, 64>}, {transform_indices = @transform_3, window_bounds = array<i64: 1, 1, 64>}, {transform_indices = @transform_4, window_bounds = array<i64: 1, 64, 2>}, {transform_indices = @transform_5, window_bounds = array<i64: 1, 16, 64>}, {transform_indices = @transform_6, window_bounds = array<i64: 1, 16, 64>}, {transform_indices = @transform_7, window_bounds = array<i64: 1, 2, 64>}, {transform_indices = @transform_8, window_bounds = array<i64: 1, 1, 64>}, {transform_indices = @transform_9, window_bounds = array<i64: 1, 16, 64>}, {transform_indices = @transform_10, window_bounds = array<i64: 1, 1, 64>}, {transform_indices = @transform_11, window_bounds = array<i64: 1, 64, 32>}, {transform_indices = @transform_12, window_bounds = array<i64: 1, 1, 32>}, {transform_indices = @transform_13, window_bounds = array<i64: 1, 1, 32>}, {transform_indices = @transform_14, window_bounds = array<i64: 1, 32, 32>}, {transform_indices = @transform_15, window_bounds = array<i64: 1, 1, 32>}, {transform_indices = @transform_16, window_bounds = array<i64: 1, 32, 64>}, {transform_indices = @transform_17, window_bounds = array<i64: 1, 1, 64>}, {transform_indices = @transform_18, window_bounds = array<i64: 1, 32, 32>}, {transform_indices = @transform_19, window_bounds = array<i64: 1, 1, 32>}, {transform_indices = @transform_20, window_bounds = array<i64: 1, 1, 32>}, {transform_indices = @transform_21, window_bounds = array<i64: 1, 1, 32>}, {pipeline_mode = #tpu.pipeline_mode<synchronous>, transform_indices = @transform_22, window_bounds = array<i64: 1, 32>}, {pipeline_mode = #tpu.pipeline_mode<synchronous>, transform_indices = @transform_23, window_bounds = array<i64: 1, 32>}, {transform_indices = @transform_24, window_bounds = array<i64: 1, 32, 64>}, {transform_indices = @transform_25, window_bounds = array<i64: 1, 1, 64>}, {transform_indices = @transform_26, window_bounds = array<i64: 1, 64, 32>}, {transform_indices = @transform_27, window_bounds = array<i64: 1, 1, 32>}, {transform_indices = @transform_28, window_bounds = array<i64: 1, 1, 32>}, {transform_indices = @transform_29, window_bounds = array<i64: 1, 1, 32>}, {transform_indices = @transform_30, window_bounds = array<i64: 1, 2, 8, 32>}]} {
    %c0 = arith.constant 0 : index
    %c0_0 = arith.constant 0 : index
    %c0_1 = arith.constant 0 : index
    %0 = vector.load %arg2[%c0, %c0_0, %c0_1] : memref<1x32x128xf32, #tpu.memory_space<vmem>>, vector<1x32x128xf32>
    %1 = vector.shape_cast %0 : vector<1x32x128xf32> to vector<32x128xf32>
    %c0_2 = arith.constant 0 : index
    %c0_3 = arith.constant 0 : index
    %c0_4 = arith.constant 0 : index
    %2 = vector.load %arg3[%c0_2, %c0_3, %c0_4] : memref<1x4x64xf32, #tpu.memory_space<vmem>>, vector<1x4x64xf32>
    %3 = vector.shape_cast %2 : vector<1x4x64xf32> to vector<4x64xf32>
    %c0_5 = arith.constant 0 : index
    %c0_6 = arith.constant 0 : index
    %c0_7 = arith.constant 0 : index
    %4 = vector.load %arg4[%c0_5, %c0_6, %c0_7] : memref<1x1x64xf32, #tpu.memory_space<vmem>>, vector<1x1x64xf32>
    %5 = vector.shape_cast %4 : vector<1x1x64xf32> to vector<1x64xf32>
    %c0_8 = arith.constant 0 : index
    %c0_9 = arith.constant 0 : index
    %c0_10 = arith.constant 0 : index
    %6 = vector.load %arg5[%c0_8, %c0_9, %c0_10] : memref<1x64x2xf32, #tpu.memory_space<vmem>>, vector<1x64x2xf32>
    %7 = vector.shape_cast %6 : vector<1x64x2xf32> to vector<64x2xf32>
    %c0_11 = arith.constant 0 : index
    %c0_12 = arith.constant 0 : index
    %c0_13 = arith.constant 0 : index
    %8 = vector.load %arg6[%c0_11, %c0_12, %c0_13] : memref<1x16x64xf32, #tpu.memory_space<vmem>>, vector<1x16x64xf32>
    %9 = vector.shape_cast %8 : vector<1x16x64xf32> to vector<16x64xf32>
    %c0_14 = arith.constant 0 : index
    %c0_15 = arith.constant 0 : index
    %c0_16 = arith.constant 0 : index
    %10 = vector.load %arg7[%c0_14, %c0_15, %c0_16] : memref<1x16x64xf32, #tpu.memory_space<vmem>>, vector<1x16x64xf32>
    %11 = vector.shape_cast %10 : vector<1x16x64xf32> to vector<16x64xf32>
    %c0_17 = arith.constant 0 : index
    %c0_18 = arith.constant 0 : index
    %c0_19 = arith.constant 0 : index
    %12 = vector.load %arg8[%c0_17, %c0_18, %c0_19] : memref<1x2x64xf32, #tpu.memory_space<vmem>>, vector<1x2x64xf32>
    %13 = vector.shape_cast %12 : vector<1x2x64xf32> to vector<2x64xf32>
    %c0_20 = arith.constant 0 : index
    %c0_21 = arith.constant 0 : index
    %c0_22 = arith.constant 0 : index
    %14 = vector.load %arg9[%c0_20, %c0_21, %c0_22] : memref<1x1x64xf32, #tpu.memory_space<vmem>>, vector<1x1x64xf32>
    %15 = vector.shape_cast %14 : vector<1x1x64xf32> to vector<1x64xf32>
    %c0_23 = arith.constant 0 : index
    %c0_24 = arith.constant 0 : index
    %c0_25 = arith.constant 0 : index
    %16 = vector.load %arg10[%c0_23, %c0_24, %c0_25] : memref<1x16x64xf32, #tpu.memory_space<vmem>>, vector<1x16x64xf32>
    %17 = vector.shape_cast %16 : vector<1x16x64xf32> to vector<16x64xf32>
    %c0_26 = arith.constant 0 : index
    %c0_27 = arith.constant 0 : index
    %c0_28 = arith.constant 0 : index
    %18 = vector.load %arg11[%c0_26, %c0_27, %c0_28] : memref<1x1x64xf32, #tpu.memory_space<vmem>>, vector<1x1x64xf32>
    %19 = vector.shape_cast %18 : vector<1x1x64xf32> to vector<1x64xf32>
    %c0_29 = arith.constant 0 : index
    %c0_30 = arith.constant 0 : index
    %c0_31 = arith.constant 0 : index
    %20 = vector.load %arg12[%c0_29, %c0_30, %c0_31] : memref<1x64x32xf32, #tpu.memory_space<vmem>>, vector<1x64x32xf32>
    %21 = vector.shape_cast %20 : vector<1x64x32xf32> to vector<64x32xf32>
    %c0_32 = arith.constant 0 : index
    %c0_33 = arith.constant 0 : index
    %c0_34 = arith.constant 0 : index
    %22 = vector.load %arg13[%c0_32, %c0_33, %c0_34] : memref<1x1x32xf32, #tpu.memory_space<vmem>>, vector<1x1x32xf32>
    %23 = vector.shape_cast %22 : vector<1x1x32xf32> to vector<1x32xf32>
    %c0_35 = arith.constant 0 : index
    %c0_36 = arith.constant 0 : index
    %c0_37 = arith.constant 0 : index
    %24 = vector.load %arg14[%c0_35, %c0_36, %c0_37] : memref<1x1x32xf32, #tpu.memory_space<vmem>>, vector<1x1x32xf32>
    %25 = vector.shape_cast %24 : vector<1x1x32xf32> to vector<1x32xf32>
    %c0_38 = arith.constant 0 : index
    %c0_39 = arith.constant 0 : index
    %c0_40 = arith.constant 0 : index
    %26 = vector.load %arg15[%c0_38, %c0_39, %c0_40] : memref<1x32x32xf32, #tpu.memory_space<vmem>>, vector<1x32x32xf32>
    %27 = vector.shape_cast %26 : vector<1x32x32xf32> to vector<32x32xf32>
    %c0_41 = arith.constant 0 : index
    %c0_42 = arith.constant 0 : index
    %c0_43 = arith.constant 0 : index
    %28 = vector.load %arg16[%c0_41, %c0_42, %c0_43] : memref<1x1x32xf32, #tpu.memory_space<vmem>>, vector<1x1x32xf32>
    %29 = vector.shape_cast %28 : vector<1x1x32xf32> to vector<1x32xf32>
    %c0_44 = arith.constant 0 : index
    %c0_45 = arith.constant 0 : index
    %c0_46 = arith.constant 0 : index
    %30 = vector.load %arg17[%c0_44, %c0_45, %c0_46] : memref<1x32x64xf32, #tpu.memory_space<vmem>>, vector<1x32x64xf32>
    %31 = vector.shape_cast %30 : vector<1x32x64xf32> to vector<32x64xf32>
    %c0_47 = arith.constant 0 : index
    %c0_48 = arith.constant 0 : index
    %c0_49 = arith.constant 0 : index
    %32 = vector.load %arg18[%c0_47, %c0_48, %c0_49] : memref<1x1x64xf32, #tpu.memory_space<vmem>>, vector<1x1x64xf32>
    %33 = vector.shape_cast %32 : vector<1x1x64xf32> to vector<1x64xf32>
    %c0_50 = arith.constant 0 : index
    %c0_51 = arith.constant 0 : index
    %c0_52 = arith.constant 0 : index
    %34 = vector.load %arg19[%c0_50, %c0_51, %c0_52] : memref<1x32x32xf32, #tpu.memory_space<vmem>>, vector<1x32x32xf32>
    %35 = vector.shape_cast %34 : vector<1x32x32xf32> to vector<32x32xf32>
    %c0_53 = arith.constant 0 : index
    %c0_54 = arith.constant 0 : index
    %c0_55 = arith.constant 0 : index
    %36 = vector.load %arg20[%c0_53, %c0_54, %c0_55] : memref<1x1x32xf32, #tpu.memory_space<vmem>>, vector<1x1x32xf32>
    %37 = vector.shape_cast %36 : vector<1x1x32xf32> to vector<1x32xf32>
    %c0_56 = arith.constant 0 : index
    %c0_57 = arith.constant 0 : index
    %c0_58 = arith.constant 0 : index
    %38 = vector.load %arg21[%c0_56, %c0_57, %c0_58] : memref<1x1x32xf32, #tpu.memory_space<vmem>>, vector<1x1x32xf32>
    %39 = vector.shape_cast %38 : vector<1x1x32xf32> to vector<1x32xf32>
    %c0_59 = arith.constant 0 : index
    %c0_60 = arith.constant 0 : index
    %c0_61 = arith.constant 0 : index
    %40 = vector.load %arg22[%c0_59, %c0_60, %c0_61] : memref<1x1x32xf32, #tpu.memory_space<vmem>>, vector<1x1x32xf32>
    %41 = vector.shape_cast %40 : vector<1x1x32xf32> to vector<1x32xf32>
    %c0_62 = arith.constant 0 : index
    %c0_63 = arith.constant 0 : index
    %42 = vector.load %arg23[%c0_62, %c0_63] : memref<1x32xf32, #tpu.memory_space<vmem>>, vector<1x32xf32>
    %c0_64 = arith.constant 0 : index
    %c0_65 = arith.constant 0 : index
    %43 = vector.load %arg24[%c0_64, %c0_65] : memref<1x32xf32, #tpu.memory_space<vmem>>, vector<1x32xf32>
    %c0_66 = arith.constant 0 : index
    %c0_67 = arith.constant 0 : index
    %c0_68 = arith.constant 0 : index
    %44 = vector.load %arg25[%c0_66, %c0_67, %c0_68] : memref<1x32x64xf32, #tpu.memory_space<vmem>>, vector<1x32x64xf32>
    %45 = vector.shape_cast %44 : vector<1x32x64xf32> to vector<32x64xf32>
    %c0_69 = arith.constant 0 : index
    %c0_70 = arith.constant 0 : index
    %c0_71 = arith.constant 0 : index
    %46 = vector.load %arg26[%c0_69, %c0_70, %c0_71] : memref<1x1x64xf32, #tpu.memory_space<vmem>>, vector<1x1x64xf32>
    %47 = vector.shape_cast %46 : vector<1x1x64xf32> to vector<1x64xf32>
    %c0_72 = arith.constant 0 : index
    %c0_73 = arith.constant 0 : index
    %c0_74 = arith.constant 0 : index
    %48 = vector.load %arg27[%c0_72, %c0_73, %c0_74] : memref<1x64x32xf32, #tpu.memory_space<vmem>>, vector<1x64x32xf32>
    %49 = vector.shape_cast %48 : vector<1x64x32xf32> to vector<64x32xf32>
    %c0_75 = arith.constant 0 : index
    %c0_76 = arith.constant 0 : index
    %c0_77 = arith.constant 0 : index
    %50 = vector.load %arg28[%c0_75, %c0_76, %c0_77] : memref<1x1x32xf32, #tpu.memory_space<vmem>>, vector<1x1x32xf32>
    %51 = vector.shape_cast %50 : vector<1x1x32xf32> to vector<1x32xf32>
    %c0_78 = arith.constant 0 : index
    %c0_79 = arith.constant 0 : index
    %c0_80 = arith.constant 0 : index
    %52 = vector.load %arg29[%c0_78, %c0_79, %c0_80] : memref<1x1x32xf32, #tpu.memory_space<vmem>>, vector<1x1x32xf32>
    %53 = vector.shape_cast %52 : vector<1x1x32xf32> to vector<1x32xf32>
    %c0_81 = arith.constant 0 : index
    %c0_82 = arith.constant 0 : index
    %c0_83 = arith.constant 0 : index
    %54 = vector.load %arg30[%c0_81, %c0_82, %c0_83] : memref<1x1x32xf32, #tpu.memory_space<vmem>>, vector<1x1x32xf32>
    %55 = vector.shape_cast %54 : vector<1x1x32xf32> to vector<1x32xf32>
    %c0_84 = arith.constant 0 : index
    %c0_85 = arith.constant 0 : index
    %c0_86 = arith.constant 0 : index
    %c0_87 = arith.constant 0 : index
    %56 = vector.load %arg1[%c0_84, %c0_85, %c0_86, %c0_87] : memref<1x2x8x32xf32, #tpu.memory_space<vmem>>, vector<1x2x8x32xf32>
    %57 = vector.shape_cast %56 : vector<1x2x8x32xf32> to vector<2x8x32xf32>
    %58 = vector.shape_cast %57 : vector<2x8x32xf32> to vector<16x32xf32>
    %cst = arith.constant dense<0.000000e+00> : vector<16x128xf32>
    %59 = tpu.matmul %58, %1, %cst {dimension_numbers = #tpu.dot_dimension_numbers<[1], [0], [0], [1], [0, 0, 1, 1], [], []>} : vector<16x32xf32>, vector<32x128xf32>, vector<16x128xf32> -> vector<16x128xf32>
    %60 = vector.extract_strided_slice %59 {offsets = [0, 0], sizes = [16, 64], strides = [1, 1]} : vector<16x128xf32> to vector<16x64xf32>
    %61 = vector.extract_strided_slice %59 {offsets = [0, 64], sizes = [16, 64], strides = [1, 1]} : vector<16x128xf32> to vector<16x64xf32>
    %62 = vector.extract_strided_slice %60 {offsets = [0, 0], sizes = [8, 64], strides = [1, 1]} : vector<16x64xf32> to vector<8x64xf32>
    %63 = vector.extract_strided_slice %3 {offsets = [3, 0], sizes = [1, 64], strides = [1, 1]} : vector<4x64xf32> to vector<1x64xf32>
    %64 = vector.broadcast %63 : vector<1x64xf32> to vector<8x64xf32>
    %65 = arith.mulf %62, %64 : vector<8x64xf32>
    %cst_88 = arith.constant 0.000000e+00 : f32
    %66 = vector.broadcast %cst_88 : f32 to vector<1x64xf32>
    %67 = vector.extract_strided_slice %62 {offsets = [0, 0], sizes = [7, 64], strides = [1, 1]} : vector<8x64xf32> to vector<7x64xf32>
    %68 = tpu.concatenate %66, %67 in 0 : vector<1x64xf32>, vector<7x64xf32> -> vector<8x64xf32>
    %69 = vector.extract_strided_slice %3 {offsets = [2, 0], sizes = [1, 64], strides = [1, 1]} : vector<4x64xf32> to vector<1x64xf32>
    %70 = vector.broadcast %69 : vector<1x64xf32> to vector<8x64xf32>
    %71 = arith.mulf %68, %70 : vector<8x64xf32>
    %72 = arith.addf %65, %71 : vector<8x64xf32>
    %cst_89 = arith.constant 0.000000e+00 : f32
    %73 = vector.broadcast %cst_89 : f32 to vector<2x64xf32>
    %74 = vector.extract_strided_slice %62 {offsets = [0, 0], sizes = [6, 64], strides = [1, 1]} : vector<8x64xf32> to vector<6x64xf32>
    %75 = tpu.concatenate %73, %74 in 0 : vector<2x64xf32>, vector<6x64xf32> -> vector<8x64xf32>
    %76 = vector.extract_strided_slice %3 {offsets = [1, 0], sizes = [1, 64], strides = [1, 1]} : vector<4x64xf32> to vector<1x64xf32>
    %77 = vector.broadcast %76 : vector<1x64xf32> to vector<8x64xf32>
    %78 = arith.mulf %75, %77 : vector<8x64xf32>
    %79 = arith.addf %72, %78 : vector<8x64xf32>
    %cst_90 = arith.constant 0.000000e+00 : f32
    %80 = vector.broadcast %cst_90 : f32 to vector<3x64xf32>
    %81 = vector.extract_strided_slice %62 {offsets = [0, 0], sizes = [5, 64], strides = [1, 1]} : vector<8x64xf32> to vector<5x64xf32>
    %82 = tpu.concatenate %80, %81 in 0 : vector<3x64xf32>, vector<5x64xf32> -> vector<8x64xf32>
    %83 = vector.extract_strided_slice %3 {offsets = [0, 0], sizes = [1, 64], strides = [1, 1]} : vector<4x64xf32> to vector<1x64xf32>
    %84 = vector.broadcast %83 : vector<1x64xf32> to vector<8x64xf32>
    %85 = arith.mulf %82, %84 : vector<8x64xf32>
    %86 = arith.addf %79, %85 : vector<8x64xf32>
    %87 = vector.extract_strided_slice %60 {offsets = [8, 0], sizes = [8, 64], strides = [1, 1]} : vector<16x64xf32> to vector<8x64xf32>
    %88 = vector.extract_strided_slice %3 {offsets = [3, 0], sizes = [1, 64], strides = [1, 1]} : vector<4x64xf32> to vector<1x64xf32>
    %89 = vector.broadcast %88 : vector<1x64xf32> to vector<8x64xf32>
    %90 = arith.mulf %87, %89 : vector<8x64xf32>
    %cst_91 = arith.constant 0.000000e+00 : f32
    %91 = vector.broadcast %cst_91 : f32 to vector<1x64xf32>
    %92 = vector.extract_strided_slice %87 {offsets = [0, 0], sizes = [7, 64], strides = [1, 1]} : vector<8x64xf32> to vector<7x64xf32>
    %93 = tpu.concatenate %91, %92 in 0 : vector<1x64xf32>, vector<7x64xf32> -> vector<8x64xf32>
    %94 = vector.extract_strided_slice %3 {offsets = [2, 0], sizes = [1, 64], strides = [1, 1]} : vector<4x64xf32> to vector<1x64xf32>
    %95 = vector.broadcast %94 : vector<1x64xf32> to vector<8x64xf32>
    %96 = arith.mulf %93, %95 : vector<8x64xf32>
    %97 = arith.addf %90, %96 : vector<8x64xf32>
    %cst_92 = arith.constant 0.000000e+00 : f32
    %98 = vector.broadcast %cst_92 : f32 to vector<2x64xf32>
    %99 = vector.extract_strided_slice %87 {offsets = [0, 0], sizes = [6, 64], strides = [1, 1]} : vector<8x64xf32> to vector<6x64xf32>
    %100 = tpu.concatenate %98, %99 in 0 : vector<2x64xf32>, vector<6x64xf32> -> vector<8x64xf32>
    %101 = vector.extract_strided_slice %3 {offsets = [1, 0], sizes = [1, 64], strides = [1, 1]} : vector<4x64xf32> to vector<1x64xf32>
    %102 = vector.broadcast %101 : vector<1x64xf32> to vector<8x64xf32>
    %103 = arith.mulf %100, %102 : vector<8x64xf32>
    %104 = arith.addf %97, %103 : vector<8x64xf32>
    %cst_93 = arith.constant 0.000000e+00 : f32
    %105 = vector.broadcast %cst_93 : f32 to vector<3x64xf32>
    %106 = vector.extract_strided_slice %87 {offsets = [0, 0], sizes = [5, 64], strides = [1, 1]} : vector<8x64xf32> to vector<5x64xf32>
    %107 = tpu.concatenate %105, %106 in 0 : vector<3x64xf32>, vector<5x64xf32> -> vector<8x64xf32>
    %108 = vector.extract_strided_slice %3 {offsets = [0, 0], sizes = [1, 64], strides = [1, 1]} : vector<4x64xf32> to vector<1x64xf32>
    %109 = vector.broadcast %108 : vector<1x64xf32> to vector<8x64xf32>
    %110 = arith.mulf %107, %109 : vector<8x64xf32>
    %111 = arith.addf %104, %110 : vector<8x64xf32>
    %112 = tpu.concatenate %86, %111 in 0 : vector<8x64xf32>, vector<8x64xf32> -> vector<16x64xf32>
    %113 = vector.broadcast %5 : vector<1x64xf32> to vector<16x64xf32>
    %114 = arith.addf %112, %113 : vector<16x64xf32>
    %cst_94 = arith.constant 0.000000e+00 : f32
    %115 = vector.broadcast %cst_94 : f32 to vector<16x64xf32>
    %116 = arith.subf %115, %114 : vector<16x64xf32>
    %117 = math.exp %116 : vector<16x64xf32>
    %cst_95 = arith.constant 1.000000e+00 : f32
    %118 = vector.broadcast %cst_95 : f32 to vector<16x64xf32>
    %119 = arith.addf %118, %117 : vector<16x64xf32>
    %cst_96 = arith.constant 1.000000e+00 : f32
    %120 = vector.broadcast %cst_96 : f32 to vector<16x64xf32>
    %121 = arith.divf %120, %119 : vector<16x64xf32>
    %122 = arith.mulf %114, %121 : vector<16x64xf32>
    %cst_97 = arith.constant dense<0.000000e+00> : vector<16x2xf32>
    %123 = tpu.matmul %122, %7, %cst_97 {dimension_numbers = #tpu.dot_dimension_numbers<[1], [0], [0], [1], [0, 0, 1, 1], [], []>} : vector<16x64xf32>, vector<64x2xf32>, vector<16x2xf32> -> vector<16x2xf32>
    %cst_98 = arith.constant dense<0.000000e+00> : vector<16x64xf32>
    %124 = tpu.matmul %123, %13, %cst_98 {dimension_numbers = #tpu.dot_dimension_numbers<[1], [0], [0], [1], [0, 0, 1, 1], [], []>} : vector<16x2xf32>, vector<2x64xf32>, vector<16x64xf32> -> vector<16x64xf32>
    %125 = vector.broadcast %15 : vector<1x64xf32> to vector<16x64xf32>
    %126 = arith.addf %124, %125 : vector<16x64xf32>
    %cst_99 = arith.constant 0.000000e+00 : f32
    %127 = vector.broadcast %cst_99 : f32 to vector<16x64xf32>
    %128 = arith.maximumf %126, %127 : vector<16x64xf32>
    %129 = math.absf %126 : vector<16x64xf32>
    %cst_100 = arith.constant 0.000000e+00 : f32
    %130 = vector.broadcast %cst_100 : f32 to vector<16x64xf32>
    %131 = arith.subf %130, %129 : vector<16x64xf32>
    %132 = math.exp %131 : vector<16x64xf32>
    %cst_101 = arith.constant 1.000000e+00 : f32
    %133 = vector.broadcast %cst_101 : f32 to vector<16x64xf32>
    %134 = arith.addf %133, %132 : vector<16x64xf32>
    %135 = math.log %134 : vector<16x64xf32>
    %136 = arith.addf %128, %135 : vector<16x64xf32>
    %cst_102 = arith.constant dense<0.000000e+00> : vector<16x16xf32>
    %137 = tpu.matmul %9, %122, %cst_102 {dimension_numbers = #tpu.dot_dimension_numbers<[1], [1], [0], [0], [0, 0, 1, 0], [], []>} : vector<16x64xf32>, vector<16x64xf32>, vector<16x16xf32> -> vector<16x16xf32>
    %cst_103 = arith.constant dense<0.000000e+00> : vector<16x16xf32>
    %138 = tpu.matmul %11, %122, %cst_103 {dimension_numbers = #tpu.dot_dimension_numbers<[1], [1], [0], [0], [0, 0, 1, 0], [], []>} : vector<16x64xf32>, vector<16x64xf32>, vector<16x16xf32> -> vector<16x16xf32>
    %139 = math.exp %17 : vector<16x64xf32>
    %cst_104 = arith.constant 0.000000e+00 : f32
    %140 = vector.broadcast %cst_104 : f32 to vector<16x64xf32>
    %141 = arith.subf %140, %139 : vector<16x64xf32>
    %142 = arith.mulf %136, %122 : vector<16x64xf32>
    %cst_105 = arith.constant 0.000000e+00 : f32
    %143 = vector.broadcast %cst_105 : f32 to vector<16x64xf32>
    %144 = arith.subf %143, %61 : vector<16x64xf32>
    %145 = math.exp %144 : vector<16x64xf32>
    %cst_106 = arith.constant 1.000000e+00 : f32
    %146 = vector.broadcast %cst_106 : f32 to vector<16x64xf32>
    %147 = arith.addf %146, %145 : vector<16x64xf32>
    %cst_107 = arith.constant 1.000000e+00 : f32
    %148 = vector.broadcast %cst_107 : f32 to vector<16x64xf32>
    %149 = arith.divf %148, %147 : vector<16x64xf32>
    %150 = arith.mulf %61, %149 : vector<16x64xf32>
    %151 = vector.broadcast %19 : vector<1x64xf32> to vector<16x64xf32>
    %152 = arith.mulf %122, %151 : vector<16x64xf32>
    %153 = vector.extract_strided_slice %136 {offsets = [0, 0], sizes = [1, 64], strides = [1, 1]} : vector<16x64xf32> to vector<1x64xf32>
    %154 = vector.broadcast %153 : vector<1x64xf32> to vector<16x64xf32>
    %155 = arith.mulf %154, %141 : vector<16x64xf32>
    %156 = math.exp %155 : vector<16x64xf32>
    %157 = vector.extract_strided_slice %136 {offsets = [1, 0], sizes = [1, 64], strides = [1, 1]} : vector<16x64xf32> to vector<1x64xf32>
    %158 = vector.broadcast %157 : vector<1x64xf32> to vector<16x64xf32>
    %159 = arith.mulf %158, %141 : vector<16x64xf32>
    %160 = math.exp %159 : vector<16x64xf32>
    %161 = vector.extract_strided_slice %136 {offsets = [2, 0], sizes = [1, 64], strides = [1, 1]} : vector<16x64xf32> to vector<1x64xf32>
    %162 = vector.broadcast %161 : vector<1x64xf32> to vector<16x64xf32>
    %163 = arith.mulf %162, %141 : vector<16x64xf32>
    %164 = math.exp %163 : vector<16x64xf32>
    %165 = vector.extract_strided_slice %136 {offsets = [3, 0], sizes = [1, 64], strides = [1, 1]} : vector<16x64xf32> to vector<1x64xf32>
    %166 = vector.broadcast %165 : vector<1x64xf32> to vector<16x64xf32>
    %167 = arith.mulf %166, %141 : vector<16x64xf32>
    %168 = math.exp %167 : vector<16x64xf32>
    %169 = vector.extract_strided_slice %136 {offsets = [4, 0], sizes = [1, 64], strides = [1, 1]} : vector<16x64xf32> to vector<1x64xf32>
    %170 = vector.broadcast %169 : vector<1x64xf32> to vector<16x64xf32>
    %171 = arith.mulf %170, %141 : vector<16x64xf32>
    %172 = math.exp %171 : vector<16x64xf32>
    %173 = vector.extract_strided_slice %136 {offsets = [5, 0], sizes = [1, 64], strides = [1, 1]} : vector<16x64xf32> to vector<1x64xf32>
    %174 = vector.broadcast %173 : vector<1x64xf32> to vector<16x64xf32>
    %175 = arith.mulf %174, %141 : vector<16x64xf32>
    %176 = math.exp %175 : vector<16x64xf32>
    %177 = vector.extract_strided_slice %136 {offsets = [6, 0], sizes = [1, 64], strides = [1, 1]} : vector<16x64xf32> to vector<1x64xf32>
    %178 = vector.broadcast %177 : vector<1x64xf32> to vector<16x64xf32>
    %179 = arith.mulf %178, %141 : vector<16x64xf32>
    %180 = math.exp %179 : vector<16x64xf32>
    %181 = vector.extract_strided_slice %136 {offsets = [7, 0], sizes = [1, 64], strides = [1, 1]} : vector<16x64xf32> to vector<1x64xf32>
    %182 = vector.broadcast %181 : vector<1x64xf32> to vector<16x64xf32>
    %183 = arith.mulf %182, %141 : vector<16x64xf32>
    %184 = math.exp %183 : vector<16x64xf32>
    %185 = vector.extract_strided_slice %136 {offsets = [8, 0], sizes = [1, 64], strides = [1, 1]} : vector<16x64xf32> to vector<1x64xf32>
    %186 = vector.broadcast %185 : vector<1x64xf32> to vector<16x64xf32>
    %187 = arith.mulf %186, %141 : vector<16x64xf32>
    %188 = math.exp %187 : vector<16x64xf32>
    %189 = vector.extract_strided_slice %136 {offsets = [9, 0], sizes = [1, 64], strides = [1, 1]} : vector<16x64xf32> to vector<1x64xf32>
    %190 = vector.broadcast %189 : vector<1x64xf32> to vector<16x64xf32>
    %191 = arith.mulf %190, %141 : vector<16x64xf32>
    %192 = math.exp %191 : vector<16x64xf32>
    %193 = vector.extract_strided_slice %136 {offsets = [10, 0], sizes = [1, 64], strides = [1, 1]} : vector<16x64xf32> to vector<1x64xf32>
    %194 = vector.broadcast %193 : vector<1x64xf32> to vector<16x64xf32>
    %195 = arith.mulf %194, %141 : vector<16x64xf32>
    %196 = math.exp %195 : vector<16x64xf32>
    %197 = vector.extract_strided_slice %136 {offsets = [11, 0], sizes = [1, 64], strides = [1, 1]} : vector<16x64xf32> to vector<1x64xf32>
    %198 = vector.broadcast %197 : vector<1x64xf32> to vector<16x64xf32>
    %199 = arith.mulf %198, %141 : vector<16x64xf32>
    %200 = math.exp %199 : vector<16x64xf32>
    %201 = vector.extract_strided_slice %136 {offsets = [12, 0], sizes = [1, 64], strides = [1, 1]} : vector<16x64xf32> to vector<1x64xf32>
    %202 = vector.broadcast %201 : vector<1x64xf32> to vector<16x64xf32>
    %203 = arith.mulf %202, %141 : vector<16x64xf32>
    %204 = math.exp %203 : vector<16x64xf32>
    %205 = vector.extract_strided_slice %136 {offsets = [13, 0], sizes = [1, 64], strides = [1, 1]} : vector<16x64xf32> to vector<1x64xf32>
    %206 = vector.broadcast %205 : vector<1x64xf32> to vector<16x64xf32>
    %207 = arith.mulf %206, %141 : vector<16x64xf32>
    %208 = math.exp %207 : vector<16x64xf32>
    %209 = vector.extract_strided_slice %136 {offsets = [14, 0], sizes = [1, 64], strides = [1, 1]} : vector<16x64xf32> to vector<1x64xf32>
    %210 = vector.broadcast %209 : vector<1x64xf32> to vector<16x64xf32>
    %211 = arith.mulf %210, %141 : vector<16x64xf32>
    %212 = math.exp %211 : vector<16x64xf32>
    %213 = vector.extract_strided_slice %136 {offsets = [15, 0], sizes = [1, 64], strides = [1, 1]} : vector<16x64xf32> to vector<1x64xf32>
    %214 = vector.broadcast %213 : vector<1x64xf32> to vector<16x64xf32>
    %215 = arith.mulf %214, %141 : vector<16x64xf32>
    %216 = math.exp %215 : vector<16x64xf32>
    %217 = vector.extract_strided_slice %137 {offsets = [0, 0], sizes = [16, 1], strides = [1, 1]} : vector<16x16xf32> to vector<16x1xf32>
    %218 = vector.extract_strided_slice %142 {offsets = [0, 0], sizes = [1, 64], strides = [1, 1]} : vector<16x64xf32> to vector<1x64xf32>
    %219 = vector.broadcast %217 : vector<16x1xf32> to vector<16x64xf32>
    %220 = vector.broadcast %218 : vector<1x64xf32> to vector<16x64xf32>
    %221 = arith.mulf %219, %220 : vector<16x64xf32>
    %222 = vector.extract_strided_slice %137 {offsets = [0, 1], sizes = [16, 1], strides = [1, 1]} : vector<16x16xf32> to vector<16x1xf32>
    %223 = vector.extract_strided_slice %142 {offsets = [1, 0], sizes = [1, 64], strides = [1, 1]} : vector<16x64xf32> to vector<1x64xf32>
    %224 = vector.broadcast %222 : vector<16x1xf32> to vector<16x64xf32>
    %225 = vector.broadcast %223 : vector<1x64xf32> to vector<16x64xf32>
    %226 = arith.mulf %224, %225 : vector<16x64xf32>
    %227 = vector.extract_strided_slice %137 {offsets = [0, 2], sizes = [16, 1], strides = [1, 1]} : vector<16x16xf32> to vector<16x1xf32>
    %228 = vector.extract_strided_slice %142 {offsets = [2, 0], sizes = [1, 64], strides = [1, 1]} : vector<16x64xf32> to vector<1x64xf32>
    %229 = vector.broadcast %227 : vector<16x1xf32> to vector<16x64xf32>
    %230 = vector.broadcast %228 : vector<1x64xf32> to vector<16x64xf32>
    %231 = arith.mulf %229, %230 : vector<16x64xf32>
    %232 = vector.extract_strided_slice %137 {offsets = [0, 3], sizes = [16, 1], strides = [1, 1]} : vector<16x16xf32> to vector<16x1xf32>
    %233 = vector.extract_strided_slice %142 {offsets = [3, 0], sizes = [1, 64], strides = [1, 1]} : vector<16x64xf32> to vector<1x64xf32>
    %234 = vector.broadcast %232 : vector<16x1xf32> to vector<16x64xf32>
    %235 = vector.broadcast %233 : vector<1x64xf32> to vector<16x64xf32>
    %236 = arith.mulf %234, %235 : vector<16x64xf32>
    %237 = vector.extract_strided_slice %137 {offsets = [0, 4], sizes = [16, 1], strides = [1, 1]} : vector<16x16xf32> to vector<16x1xf32>
    %238 = vector.extract_strided_slice %142 {offsets = [4, 0], sizes = [1, 64], strides = [1, 1]} : vector<16x64xf32> to vector<1x64xf32>
    %239 = vector.broadcast %237 : vector<16x1xf32> to vector<16x64xf32>
    %240 = vector.broadcast %238 : vector<1x64xf32> to vector<16x64xf32>
    %241 = arith.mulf %239, %240 : vector<16x64xf32>
    %242 = vector.extract_strided_slice %137 {offsets = [0, 5], sizes = [16, 1], strides = [1, 1]} : vector<16x16xf32> to vector<16x1xf32>
    %243 = vector.extract_strided_slice %142 {offsets = [5, 0], sizes = [1, 64], strides = [1, 1]} : vector<16x64xf32> to vector<1x64xf32>
    %244 = vector.broadcast %242 : vector<16x1xf32> to vector<16x64xf32>
    %245 = vector.broadcast %243 : vector<1x64xf32> to vector<16x64xf32>
    %246 = arith.mulf %244, %245 : vector<16x64xf32>
    %247 = vector.extract_strided_slice %137 {offsets = [0, 6], sizes = [16, 1], strides = [1, 1]} : vector<16x16xf32> to vector<16x1xf32>
    %248 = vector.extract_strided_slice %142 {offsets = [6, 0], sizes = [1, 64], strides = [1, 1]} : vector<16x64xf32> to vector<1x64xf32>
    %249 = vector.broadcast %247 : vector<16x1xf32> to vector<16x64xf32>
    %250 = vector.broadcast %248 : vector<1x64xf32> to vector<16x64xf32>
    %251 = arith.mulf %249, %250 : vector<16x64xf32>
    %252 = vector.extract_strided_slice %137 {offsets = [0, 7], sizes = [16, 1], strides = [1, 1]} : vector<16x16xf32> to vector<16x1xf32>
    %253 = vector.extract_strided_slice %142 {offsets = [7, 0], sizes = [1, 64], strides = [1, 1]} : vector<16x64xf32> to vector<1x64xf32>
    %254 = vector.broadcast %252 : vector<16x1xf32> to vector<16x64xf32>
    %255 = vector.broadcast %253 : vector<1x64xf32> to vector<16x64xf32>
    %256 = arith.mulf %254, %255 : vector<16x64xf32>
    %257 = vector.extract_strided_slice %137 {offsets = [0, 8], sizes = [16, 1], strides = [1, 1]} : vector<16x16xf32> to vector<16x1xf32>
    %258 = vector.extract_strided_slice %142 {offsets = [8, 0], sizes = [1, 64], strides = [1, 1]} : vector<16x64xf32> to vector<1x64xf32>
    %259 = vector.broadcast %257 : vector<16x1xf32> to vector<16x64xf32>
    %260 = vector.broadcast %258 : vector<1x64xf32> to vector<16x64xf32>
    %261 = arith.mulf %259, %260 : vector<16x64xf32>
    %262 = vector.extract_strided_slice %137 {offsets = [0, 9], sizes = [16, 1], strides = [1, 1]} : vector<16x16xf32> to vector<16x1xf32>
    %263 = vector.extract_strided_slice %142 {offsets = [9, 0], sizes = [1, 64], strides = [1, 1]} : vector<16x64xf32> to vector<1x64xf32>
    %264 = vector.broadcast %262 : vector<16x1xf32> to vector<16x64xf32>
    %265 = vector.broadcast %263 : vector<1x64xf32> to vector<16x64xf32>
    %266 = arith.mulf %264, %265 : vector<16x64xf32>
    %267 = vector.extract_strided_slice %137 {offsets = [0, 10], sizes = [16, 1], strides = [1, 1]} : vector<16x16xf32> to vector<16x1xf32>
    %268 = vector.extract_strided_slice %142 {offsets = [10, 0], sizes = [1, 64], strides = [1, 1]} : vector<16x64xf32> to vector<1x64xf32>
    %269 = vector.broadcast %267 : vector<16x1xf32> to vector<16x64xf32>
    %270 = vector.broadcast %268 : vector<1x64xf32> to vector<16x64xf32>
    %271 = arith.mulf %269, %270 : vector<16x64xf32>
    %272 = vector.extract_strided_slice %137 {offsets = [0, 11], sizes = [16, 1], strides = [1, 1]} : vector<16x16xf32> to vector<16x1xf32>
    %273 = vector.extract_strided_slice %142 {offsets = [11, 0], sizes = [1, 64], strides = [1, 1]} : vector<16x64xf32> to vector<1x64xf32>
    %274 = vector.broadcast %272 : vector<16x1xf32> to vector<16x64xf32>
    %275 = vector.broadcast %273 : vector<1x64xf32> to vector<16x64xf32>
    %276 = arith.mulf %274, %275 : vector<16x64xf32>
    %277 = vector.extract_strided_slice %137 {offsets = [0, 12], sizes = [16, 1], strides = [1, 1]} : vector<16x16xf32> to vector<16x1xf32>
    %278 = vector.extract_strided_slice %142 {offsets = [12, 0], sizes = [1, 64], strides = [1, 1]} : vector<16x64xf32> to vector<1x64xf32>
    %279 = vector.broadcast %277 : vector<16x1xf32> to vector<16x64xf32>
    %280 = vector.broadcast %278 : vector<1x64xf32> to vector<16x64xf32>
    %281 = arith.mulf %279, %280 : vector<16x64xf32>
    %282 = vector.extract_strided_slice %137 {offsets = [0, 13], sizes = [16, 1], strides = [1, 1]} : vector<16x16xf32> to vector<16x1xf32>
    %283 = vector.extract_strided_slice %142 {offsets = [13, 0], sizes = [1, 64], strides = [1, 1]} : vector<16x64xf32> to vector<1x64xf32>
    %284 = vector.broadcast %282 : vector<16x1xf32> to vector<16x64xf32>
    %285 = vector.broadcast %283 : vector<1x64xf32> to vector<16x64xf32>
    %286 = arith.mulf %284, %285 : vector<16x64xf32>
    %287 = vector.extract_strided_slice %137 {offsets = [0, 14], sizes = [16, 1], strides = [1, 1]} : vector<16x16xf32> to vector<16x1xf32>
    %288 = vector.extract_strided_slice %142 {offsets = [14, 0], sizes = [1, 64], strides = [1, 1]} : vector<16x64xf32> to vector<1x64xf32>
    %289 = vector.broadcast %287 : vector<16x1xf32> to vector<16x64xf32>
    %290 = vector.broadcast %288 : vector<1x64xf32> to vector<16x64xf32>
    %291 = arith.mulf %289, %290 : vector<16x64xf32>
    %292 = vector.extract_strided_slice %137 {offsets = [0, 15], sizes = [16, 1], strides = [1, 1]} : vector<16x16xf32> to vector<16x1xf32>
    %293 = vector.extract_strided_slice %142 {offsets = [15, 0], sizes = [1, 64], strides = [1, 1]} : vector<16x64xf32> to vector<1x64xf32>
    %294 = vector.broadcast %292 : vector<16x1xf32> to vector<16x64xf32>
    %295 = vector.broadcast %293 : vector<1x64xf32> to vector<16x64xf32>
    %296 = arith.mulf %294, %295 : vector<16x64xf32>
    %cst_108 = arith.constant 0.000000e+00 : f32
    %297 = vector.broadcast %cst_108 : f32 to vector<16x64xf32>
    %298 = arith.mulf %156, %297 : vector<16x64xf32>
    %299 = arith.addf %298, %221 : vector<16x64xf32>
    %300 = vector.extract_strided_slice %138 {offsets = [0, 0], sizes = [16, 1], strides = [1, 1]} : vector<16x16xf32> to vector<16x1xf32>
    %301 = vector.broadcast %300 : vector<16x1xf32> to vector<16x64xf32>
    %302 = arith.mulf %299, %301 : vector<16x64xf32>
    %cst_109 = arith.constant dense<0.000000e+00> : vector<64xf32>
    %303 = vector.multi_reduction <add>, %302, %cst_109 [0] : vector<16x64xf32> to vector<64xf32>
    %304 = vector.shape_cast %303 : vector<64xf32> to vector<1x64xf32>
    %305 = vector.extract_strided_slice %152 {offsets = [0, 0], sizes = [1, 64], strides = [1, 1]} : vector<16x64xf32> to vector<1x64xf32>
    %306 = arith.addf %304, %305 : vector<1x64xf32>
    %307 = vector.extract_strided_slice %150 {offsets = [0, 0], sizes = [1, 64], strides = [1, 1]} : vector<16x64xf32> to vector<1x64xf32>
    %308 = arith.mulf %306, %307 : vector<1x64xf32>
    %309 = arith.mulf %160, %299 : vector<16x64xf32>
    %310 = arith.addf %309, %226 : vector<16x64xf32>
    %311 = vector.extract_strided_slice %138 {offsets = [0, 1], sizes = [16, 1], strides = [1, 1]} : vector<16x16xf32> to vector<16x1xf32>
    %312 = vector.broadcast %311 : vector<16x1xf32> to vector<16x64xf32>
    %313 = arith.mulf %310, %312 : vector<16x64xf32>
    %cst_110 = arith.constant dense<0.000000e+00> : vector<64xf32>
    %314 = vector.multi_reduction <add>, %313, %cst_110 [0] : vector<16x64xf32> to vector<64xf32>
    %315 = vector.shape_cast %314 : vector<64xf32> to vector<1x64xf32>
    %316 = vector.extract_strided_slice %152 {offsets = [1, 0], sizes = [1, 64], strides = [1, 1]} : vector<16x64xf32> to vector<1x64xf32>
    %317 = arith.addf %315, %316 : vector<1x64xf32>
    %318 = vector.extract_strided_slice %150 {offsets = [1, 0], sizes = [1, 64], strides = [1, 1]} : vector<16x64xf32> to vector<1x64xf32>
    %319 = arith.mulf %317, %318 : vector<1x64xf32>
    %320 = arith.mulf %164, %310 : vector<16x64xf32>
    %321 = arith.addf %320, %231 : vector<16x64xf32>
    %322 = vector.extract_strided_slice %138 {offsets = [0, 2], sizes = [16, 1], strides = [1, 1]} : vector<16x16xf32> to vector<16x1xf32>
    %323 = vector.broadcast %322 : vector<16x1xf32> to vector<16x64xf32>
    %324 = arith.mulf %321, %323 : vector<16x64xf32>
    %cst_111 = arith.constant dense<0.000000e+00> : vector<64xf32>
    %325 = vector.multi_reduction <add>, %324, %cst_111 [0] : vector<16x64xf32> to vector<64xf32>
    %326 = vector.shape_cast %325 : vector<64xf32> to vector<1x64xf32>
    %327 = vector.extract_strided_slice %152 {offsets = [2, 0], sizes = [1, 64], strides = [1, 1]} : vector<16x64xf32> to vector<1x64xf32>
    %328 = arith.addf %326, %327 : vector<1x64xf32>
    %329 = vector.extract_strided_slice %150 {offsets = [2, 0], sizes = [1, 64], strides = [1, 1]} : vector<16x64xf32> to vector<1x64xf32>
    %330 = arith.mulf %328, %329 : vector<1x64xf32>
    %331 = arith.mulf %168, %321 : vector<16x64xf32>
    %332 = arith.addf %331, %236 : vector<16x64xf32>
    %333 = vector.extract_strided_slice %138 {offsets = [0, 3], sizes = [16, 1], strides = [1, 1]} : vector<16x16xf32> to vector<16x1xf32>
    %334 = vector.broadcast %333 : vector<16x1xf32> to vector<16x64xf32>
    %335 = arith.mulf %332, %334 : vector<16x64xf32>
    %cst_112 = arith.constant dense<0.000000e+00> : vector<64xf32>
    %336 = vector.multi_reduction <add>, %335, %cst_112 [0] : vector<16x64xf32> to vector<64xf32>
    %337 = vector.shape_cast %336 : vector<64xf32> to vector<1x64xf32>
    %338 = vector.extract_strided_slice %152 {offsets = [3, 0], sizes = [1, 64], strides = [1, 1]} : vector<16x64xf32> to vector<1x64xf32>
    %339 = arith.addf %337, %338 : vector<1x64xf32>
    %340 = vector.extract_strided_slice %150 {offsets = [3, 0], sizes = [1, 64], strides = [1, 1]} : vector<16x64xf32> to vector<1x64xf32>
    %341 = arith.mulf %339, %340 : vector<1x64xf32>
    %342 = arith.mulf %172, %332 : vector<16x64xf32>
    %343 = arith.addf %342, %241 : vector<16x64xf32>
    %344 = vector.extract_strided_slice %138 {offsets = [0, 4], sizes = [16, 1], strides = [1, 1]} : vector<16x16xf32> to vector<16x1xf32>
    %345 = vector.broadcast %344 : vector<16x1xf32> to vector<16x64xf32>
    %346 = arith.mulf %343, %345 : vector<16x64xf32>
    %cst_113 = arith.constant dense<0.000000e+00> : vector<64xf32>
    %347 = vector.multi_reduction <add>, %346, %cst_113 [0] : vector<16x64xf32> to vector<64xf32>
    %348 = vector.shape_cast %347 : vector<64xf32> to vector<1x64xf32>
    %349 = vector.extract_strided_slice %152 {offsets = [4, 0], sizes = [1, 64], strides = [1, 1]} : vector<16x64xf32> to vector<1x64xf32>
    %350 = arith.addf %348, %349 : vector<1x64xf32>
    %351 = vector.extract_strided_slice %150 {offsets = [4, 0], sizes = [1, 64], strides = [1, 1]} : vector<16x64xf32> to vector<1x64xf32>
    %352 = arith.mulf %350, %351 : vector<1x64xf32>
    %353 = arith.mulf %176, %343 : vector<16x64xf32>
    %354 = arith.addf %353, %246 : vector<16x64xf32>
    %355 = vector.extract_strided_slice %138 {offsets = [0, 5], sizes = [16, 1], strides = [1, 1]} : vector<16x16xf32> to vector<16x1xf32>
    %356 = vector.broadcast %355 : vector<16x1xf32> to vector<16x64xf32>
    %357 = arith.mulf %354, %356 : vector<16x64xf32>
    %cst_114 = arith.constant dense<0.000000e+00> : vector<64xf32>
    %358 = vector.multi_reduction <add>, %357, %cst_114 [0] : vector<16x64xf32> to vector<64xf32>
    %359 = vector.shape_cast %358 : vector<64xf32> to vector<1x64xf32>
    %360 = vector.extract_strided_slice %152 {offsets = [5, 0], sizes = [1, 64], strides = [1, 1]} : vector<16x64xf32> to vector<1x64xf32>
    %361 = arith.addf %359, %360 : vector<1x64xf32>
    %362 = vector.extract_strided_slice %150 {offsets = [5, 0], sizes = [1, 64], strides = [1, 1]} : vector<16x64xf32> to vector<1x64xf32>
    %363 = arith.mulf %361, %362 : vector<1x64xf32>
    %364 = arith.mulf %180, %354 : vector<16x64xf32>
    %365 = arith.addf %364, %251 : vector<16x64xf32>
    %366 = vector.extract_strided_slice %138 {offsets = [0, 6], sizes = [16, 1], strides = [1, 1]} : vector<16x16xf32> to vector<16x1xf32>
    %367 = vector.broadcast %366 : vector<16x1xf32> to vector<16x64xf32>
    %368 = arith.mulf %365, %367 : vector<16x64xf32>
    %cst_115 = arith.constant dense<0.000000e+00> : vector<64xf32>
    %369 = vector.multi_reduction <add>, %368, %cst_115 [0] : vector<16x64xf32> to vector<64xf32>
    %370 = vector.shape_cast %369 : vector<64xf32> to vector<1x64xf32>
    %371 = vector.extract_strided_slice %152 {offsets = [6, 0], sizes = [1, 64], strides = [1, 1]} : vector<16x64xf32> to vector<1x64xf32>
    %372 = arith.addf %370, %371 : vector<1x64xf32>
    %373 = vector.extract_strided_slice %150 {offsets = [6, 0], sizes = [1, 64], strides = [1, 1]} : vector<16x64xf32> to vector<1x64xf32>
    %374 = arith.mulf %372, %373 : vector<1x64xf32>
    %375 = arith.mulf %184, %365 : vector<16x64xf32>
    %376 = arith.addf %375, %256 : vector<16x64xf32>
    %377 = vector.extract_strided_slice %138 {offsets = [0, 7], sizes = [16, 1], strides = [1, 1]} : vector<16x16xf32> to vector<16x1xf32>
    %378 = vector.broadcast %377 : vector<16x1xf32> to vector<16x64xf32>
    %379 = arith.mulf %376, %378 : vector<16x64xf32>
    %cst_116 = arith.constant dense<0.000000e+00> : vector<64xf32>
    %380 = vector.multi_reduction <add>, %379, %cst_116 [0] : vector<16x64xf32> to vector<64xf32>
    %381 = vector.shape_cast %380 : vector<64xf32> to vector<1x64xf32>
    %382 = vector.extract_strided_slice %152 {offsets = [7, 0], sizes = [1, 64], strides = [1, 1]} : vector<16x64xf32> to vector<1x64xf32>
    %383 = arith.addf %381, %382 : vector<1x64xf32>
    %384 = vector.extract_strided_slice %150 {offsets = [7, 0], sizes = [1, 64], strides = [1, 1]} : vector<16x64xf32> to vector<1x64xf32>
    %385 = arith.mulf %383, %384 : vector<1x64xf32>
    %cst_117 = arith.constant 0.000000e+00 : f32
    %386 = vector.broadcast %cst_117 : f32 to vector<16x64xf32>
    %387 = arith.mulf %188, %386 : vector<16x64xf32>
    %388 = arith.addf %387, %261 : vector<16x64xf32>
    %389 = vector.extract_strided_slice %138 {offsets = [0, 8], sizes = [16, 1], strides = [1, 1]} : vector<16x16xf32> to vector<16x1xf32>
    %390 = vector.broadcast %389 : vector<16x1xf32> to vector<16x64xf32>
    %391 = arith.mulf %388, %390 : vector<16x64xf32>
    %cst_118 = arith.constant dense<0.000000e+00> : vector<64xf32>
    %392 = vector.multi_reduction <add>, %391, %cst_118 [0] : vector<16x64xf32> to vector<64xf32>
    %393 = vector.shape_cast %392 : vector<64xf32> to vector<1x64xf32>
    %394 = vector.extract_strided_slice %152 {offsets = [8, 0], sizes = [1, 64], strides = [1, 1]} : vector<16x64xf32> to vector<1x64xf32>
    %395 = arith.addf %393, %394 : vector<1x64xf32>
    %396 = vector.extract_strided_slice %150 {offsets = [8, 0], sizes = [1, 64], strides = [1, 1]} : vector<16x64xf32> to vector<1x64xf32>
    %397 = arith.mulf %395, %396 : vector<1x64xf32>
    %398 = arith.mulf %192, %388 : vector<16x64xf32>
    %399 = arith.addf %398, %266 : vector<16x64xf32>
    %400 = vector.extract_strided_slice %138 {offsets = [0, 9], sizes = [16, 1], strides = [1, 1]} : vector<16x16xf32> to vector<16x1xf32>
    %401 = vector.broadcast %400 : vector<16x1xf32> to vector<16x64xf32>
    %402 = arith.mulf %399, %401 : vector<16x64xf32>
    %cst_119 = arith.constant dense<0.000000e+00> : vector<64xf32>
    %403 = vector.multi_reduction <add>, %402, %cst_119 [0] : vector<16x64xf32> to vector<64xf32>
    %404 = vector.shape_cast %403 : vector<64xf32> to vector<1x64xf32>
    %405 = vector.extract_strided_slice %152 {offsets = [9, 0], sizes = [1, 64], strides = [1, 1]} : vector<16x64xf32> to vector<1x64xf32>
    %406 = arith.addf %404, %405 : vector<1x64xf32>
    %407 = vector.extract_strided_slice %150 {offsets = [9, 0], sizes = [1, 64], strides = [1, 1]} : vector<16x64xf32> to vector<1x64xf32>
    %408 = arith.mulf %406, %407 : vector<1x64xf32>
    %409 = arith.mulf %196, %399 : vector<16x64xf32>
    %410 = arith.addf %409, %271 : vector<16x64xf32>
    %411 = vector.extract_strided_slice %138 {offsets = [0, 10], sizes = [16, 1], strides = [1, 1]} : vector<16x16xf32> to vector<16x1xf32>
    %412 = vector.broadcast %411 : vector<16x1xf32> to vector<16x64xf32>
    %413 = arith.mulf %410, %412 : vector<16x64xf32>
    %cst_120 = arith.constant dense<0.000000e+00> : vector<64xf32>
    %414 = vector.multi_reduction <add>, %413, %cst_120 [0] : vector<16x64xf32> to vector<64xf32>
    %415 = vector.shape_cast %414 : vector<64xf32> to vector<1x64xf32>
    %416 = vector.extract_strided_slice %152 {offsets = [10, 0], sizes = [1, 64], strides = [1, 1]} : vector<16x64xf32> to vector<1x64xf32>
    %417 = arith.addf %415, %416 : vector<1x64xf32>
    %418 = vector.extract_strided_slice %150 {offsets = [10, 0], sizes = [1, 64], strides = [1, 1]} : vector<16x64xf32> to vector<1x64xf32>
    %419 = arith.mulf %417, %418 : vector<1x64xf32>
    %420 = arith.mulf %200, %410 : vector<16x64xf32>
    %421 = arith.addf %420, %276 : vector<16x64xf32>
    %422 = vector.extract_strided_slice %138 {offsets = [0, 11], sizes = [16, 1], strides = [1, 1]} : vector<16x16xf32> to vector<16x1xf32>
    %423 = vector.broadcast %422 : vector<16x1xf32> to vector<16x64xf32>
    %424 = arith.mulf %421, %423 : vector<16x64xf32>
    %cst_121 = arith.constant dense<0.000000e+00> : vector<64xf32>
    %425 = vector.multi_reduction <add>, %424, %cst_121 [0] : vector<16x64xf32> to vector<64xf32>
    %426 = vector.shape_cast %425 : vector<64xf32> to vector<1x64xf32>
    %427 = vector.extract_strided_slice %152 {offsets = [11, 0], sizes = [1, 64], strides = [1, 1]} : vector<16x64xf32> to vector<1x64xf32>
    %428 = arith.addf %426, %427 : vector<1x64xf32>
    %429 = vector.extract_strided_slice %150 {offsets = [11, 0], sizes = [1, 64], strides = [1, 1]} : vector<16x64xf32> to vector<1x64xf32>
    %430 = arith.mulf %428, %429 : vector<1x64xf32>
    %431 = arith.mulf %204, %421 : vector<16x64xf32>
    %432 = arith.addf %431, %281 : vector<16x64xf32>
    %433 = vector.extract_strided_slice %138 {offsets = [0, 12], sizes = [16, 1], strides = [1, 1]} : vector<16x16xf32> to vector<16x1xf32>
    %434 = vector.broadcast %433 : vector<16x1xf32> to vector<16x64xf32>
    %435 = arith.mulf %432, %434 : vector<16x64xf32>
    %cst_122 = arith.constant dense<0.000000e+00> : vector<64xf32>
    %436 = vector.multi_reduction <add>, %435, %cst_122 [0] : vector<16x64xf32> to vector<64xf32>
    %437 = vector.shape_cast %436 : vector<64xf32> to vector<1x64xf32>
    %438 = vector.extract_strided_slice %152 {offsets = [12, 0], sizes = [1, 64], strides = [1, 1]} : vector<16x64xf32> to vector<1x64xf32>
    %439 = arith.addf %437, %438 : vector<1x64xf32>
    %440 = vector.extract_strided_slice %150 {offsets = [12, 0], sizes = [1, 64], strides = [1, 1]} : vector<16x64xf32> to vector<1x64xf32>
    %441 = arith.mulf %439, %440 : vector<1x64xf32>
    %442 = arith.mulf %208, %432 : vector<16x64xf32>
    %443 = arith.addf %442, %286 : vector<16x64xf32>
    %444 = vector.extract_strided_slice %138 {offsets = [0, 13], sizes = [16, 1], strides = [1, 1]} : vector<16x16xf32> to vector<16x1xf32>
    %445 = vector.broadcast %444 : vector<16x1xf32> to vector<16x64xf32>
    %446 = arith.mulf %443, %445 : vector<16x64xf32>
    %cst_123 = arith.constant dense<0.000000e+00> : vector<64xf32>
    %447 = vector.multi_reduction <add>, %446, %cst_123 [0] : vector<16x64xf32> to vector<64xf32>
    %448 = vector.shape_cast %447 : vector<64xf32> to vector<1x64xf32>
    %449 = vector.extract_strided_slice %152 {offsets = [13, 0], sizes = [1, 64], strides = [1, 1]} : vector<16x64xf32> to vector<1x64xf32>
    %450 = arith.addf %448, %449 : vector<1x64xf32>
    %451 = vector.extract_strided_slice %150 {offsets = [13, 0], sizes = [1, 64], strides = [1, 1]} : vector<16x64xf32> to vector<1x64xf32>
    %452 = arith.mulf %450, %451 : vector<1x64xf32>
    %453 = arith.mulf %212, %443 : vector<16x64xf32>
    %454 = arith.addf %453, %291 : vector<16x64xf32>
    %455 = vector.extract_strided_slice %138 {offsets = [0, 14], sizes = [16, 1], strides = [1, 1]} : vector<16x16xf32> to vector<16x1xf32>
    %456 = vector.broadcast %455 : vector<16x1xf32> to vector<16x64xf32>
    %457 = arith.mulf %454, %456 : vector<16x64xf32>
    %cst_124 = arith.constant dense<0.000000e+00> : vector<64xf32>
    %458 = vector.multi_reduction <add>, %457, %cst_124 [0] : vector<16x64xf32> to vector<64xf32>
    %459 = vector.shape_cast %458 : vector<64xf32> to vector<1x64xf32>
    %460 = vector.extract_strided_slice %152 {offsets = [14, 0], sizes = [1, 64], strides = [1, 1]} : vector<16x64xf32> to vector<1x64xf32>
    %461 = arith.addf %459, %460 : vector<1x64xf32>
    %462 = vector.extract_strided_slice %150 {offsets = [14, 0], sizes = [1, 64], strides = [1, 1]} : vector<16x64xf32> to vector<1x64xf32>
    %463 = arith.mulf %461, %462 : vector<1x64xf32>
    %464 = arith.mulf %216, %454 : vector<16x64xf32>
    %465 = arith.addf %464, %296 : vector<16x64xf32>
    %466 = vector.extract_strided_slice %138 {offsets = [0, 15], sizes = [16, 1], strides = [1, 1]} : vector<16x16xf32> to vector<16x1xf32>
    %467 = vector.broadcast %466 : vector<16x1xf32> to vector<16x64xf32>
    %468 = arith.mulf %465, %467 : vector<16x64xf32>
    %cst_125 = arith.constant dense<0.000000e+00> : vector<64xf32>
    %469 = vector.multi_reduction <add>, %468, %cst_125 [0] : vector<16x64xf32> to vector<64xf32>
    %470 = vector.shape_cast %469 : vector<64xf32> to vector<1x64xf32>
    %471 = vector.extract_strided_slice %152 {offsets = [15, 0], sizes = [1, 64], strides = [1, 1]} : vector<16x64xf32> to vector<1x64xf32>
    %472 = arith.addf %470, %471 : vector<1x64xf32>
    %473 = vector.extract_strided_slice %150 {offsets = [15, 0], sizes = [1, 64], strides = [1, 1]} : vector<16x64xf32> to vector<1x64xf32>
    %474 = arith.mulf %472, %473 : vector<1x64xf32>
    %475 = tpu.concatenate %308, %319, %330, %341, %352, %363, %374, %385, %397, %408, %419, %430, %441, %452, %463, %474 in 0 : vector<1x64xf32>, vector<1x64xf32>, vector<1x64xf32>, vector<1x64xf32>, vector<1x64xf32>, vector<1x64xf32>, vector<1x64xf32>, vector<1x64xf32>, vector<1x64xf32>, vector<1x64xf32>, vector<1x64xf32>, vector<1x64xf32>, vector<1x64xf32>, vector<1x64xf32>, vector<1x64xf32>, vector<1x64xf32> -> vector<16x64xf32>
    %cst_126 = arith.constant dense<0.000000e+00> : vector<16x32xf32>
    %476 = tpu.matmul %475, %21, %cst_126 {dimension_numbers = #tpu.dot_dimension_numbers<[1], [0], [0], [1], [0, 0, 1, 1], [], []>} : vector<16x64xf32>, vector<64x32xf32>, vector<16x32xf32> -> vector<16x32xf32>
    %477 = arith.addf %58, %476 : vector<16x32xf32>
    %cst_127 = arith.constant dense<0.000000e+00> : vector<16xf32>
    %478 = vector.multi_reduction <add>, %477, %cst_127 [1] : vector<16x32xf32> to vector<16xf32>
    %479 = vector.shape_cast %478 : vector<16xf32> to vector<16x1xf32>
    %cst_128 = arith.constant 3.200000e+01 : f32
    %480 = vector.broadcast %cst_128 : f32 to vector<16x1xf32>
    %481 = arith.divf %479, %480 : vector<16x1xf32>
    %482 = vector.broadcast %481 : vector<16x1xf32> to vector<16x32xf32>
    %483 = arith.subf %477, %482 : vector<16x32xf32>
    %484 = arith.mulf %483, %483 : vector<16x32xf32>
    %cst_129 = arith.constant dense<0.000000e+00> : vector<16xf32>
    %485 = vector.multi_reduction <add>, %484, %cst_129 [1] : vector<16x32xf32> to vector<16xf32>
    %486 = vector.shape_cast %485 : vector<16xf32> to vector<16x1xf32>
    %cst_130 = arith.constant 3.200000e+01 : f32
    %487 = vector.broadcast %cst_130 : f32 to vector<16x1xf32>
    %488 = arith.divf %486, %487 : vector<16x1xf32>
    %489 = vector.broadcast %481 : vector<16x1xf32> to vector<16x32xf32>
    %490 = arith.subf %477, %489 : vector<16x32xf32>
    %cst_131 = arith.constant 9.99999974E-6 : f32
    %491 = vector.broadcast %cst_131 : f32 to vector<16x1xf32>
    %492 = arith.addf %488, %491 : vector<16x1xf32>
    %493 = math.rsqrt %492 : vector<16x1xf32>
    %494 = vector.broadcast %493 : vector<16x1xf32> to vector<16x32xf32>
    %495 = arith.mulf %490, %494 : vector<16x32xf32>
    %496 = vector.broadcast %23 : vector<1x32xf32> to vector<16x32xf32>
    %497 = arith.mulf %495, %496 : vector<16x32xf32>
    %498 = vector.broadcast %25 : vector<1x32xf32> to vector<16x32xf32>
    %499 = arith.addf %497, %498 : vector<16x32xf32>
    %cst_132 = arith.constant dense<0.000000e+00> : vector<16xf32>
    %500 = vector.multi_reduction <add>, %499, %cst_132 [1] : vector<16x32xf32> to vector<16xf32>
    %501 = vector.shape_cast %500 : vector<16xf32> to vector<16x1xf32>
    %cst_133 = arith.constant 3.200000e+01 : f32
    %502 = vector.broadcast %cst_133 : f32 to vector<16x1xf32>
    %503 = arith.divf %501, %502 : vector<16x1xf32>
    %504 = vector.broadcast %503 : vector<16x1xf32> to vector<16x32xf32>
    %505 = arith.subf %499, %504 : vector<16x32xf32>
    %506 = arith.mulf %505, %505 : vector<16x32xf32>
    %cst_134 = arith.constant dense<0.000000e+00> : vector<16xf32>
    %507 = vector.multi_reduction <add>, %506, %cst_134 [1] : vector<16x32xf32> to vector<16xf32>
    %508 = vector.shape_cast %507 : vector<16xf32> to vector<16x1xf32>
    %cst_135 = arith.constant 3.200000e+01 : f32
    %509 = vector.broadcast %cst_135 : f32 to vector<16x1xf32>
    %510 = arith.divf %508, %509 : vector<16x1xf32>
    %511 = vector.broadcast %503 : vector<16x1xf32> to vector<16x32xf32>
    %512 = arith.subf %499, %511 : vector<16x32xf32>
    %cst_136 = arith.constant 9.99999974E-6 : f32
    %513 = vector.broadcast %cst_136 : f32 to vector<16x1xf32>
    %514 = arith.addf %510, %513 : vector<16x1xf32>
    %515 = math.rsqrt %514 : vector<16x1xf32>
    %516 = vector.broadcast %515 : vector<16x1xf32> to vector<16x32xf32>
    %517 = arith.mulf %512, %516 : vector<16x32xf32>
    %518 = vector.broadcast %39 : vector<1x32xf32> to vector<16x32xf32>
    %519 = arith.mulf %517, %518 : vector<16x32xf32>
    %520 = vector.broadcast %41 : vector<1x32xf32> to vector<16x32xf32>
    %521 = arith.addf %519, %520 : vector<16x32xf32>
    %cst_137 = arith.constant dense<0.000000e+00> : vector<16xf32>
    %522 = vector.multi_reduction <add>, %499, %cst_137 [1] : vector<16x32xf32> to vector<16xf32>
    %523 = vector.shape_cast %522 : vector<16xf32> to vector<16x1xf32>
    %cst_138 = arith.constant 3.200000e+01 : f32
    %524 = vector.broadcast %cst_138 : f32 to vector<16x1xf32>
    %525 = arith.divf %523, %524 : vector<16x1xf32>
    %526 = vector.broadcast %525 : vector<16x1xf32> to vector<16x32xf32>
    %527 = arith.subf %499, %526 : vector<16x32xf32>
    %528 = arith.mulf %527, %527 : vector<16x32xf32>
    %cst_139 = arith.constant dense<0.000000e+00> : vector<16xf32>
    %529 = vector.multi_reduction <add>, %528, %cst_139 [1] : vector<16x32xf32> to vector<16xf32>
    %530 = vector.shape_cast %529 : vector<16xf32> to vector<16x1xf32>
    %cst_140 = arith.constant 3.200000e+01 : f32
    %531 = vector.broadcast %cst_140 : f32 to vector<16x1xf32>
    %532 = arith.divf %530, %531 : vector<16x1xf32>
    %533 = vector.broadcast %525 : vector<16x1xf32> to vector<16x32xf32>
    %534 = arith.subf %499, %533 : vector<16x32xf32>
    %cst_141 = arith.constant 9.99999974E-6 : f32
    %535 = vector.broadcast %cst_141 : f32 to vector<16x1xf32>
    %536 = arith.addf %532, %535 : vector<16x1xf32>
    %537 = math.rsqrt %536 : vector<16x1xf32>
    %538 = vector.broadcast %537 : vector<16x1xf32> to vector<16x32xf32>
    %539 = arith.mulf %534, %538 : vector<16x32xf32>
    %540 = vector.broadcast %39 : vector<1x32xf32> to vector<16x32xf32>
    %541 = arith.mulf %539, %540 : vector<16x32xf32>
    %542 = vector.broadcast %41 : vector<1x32xf32> to vector<16x32xf32>
    %543 = arith.addf %541, %542 : vector<16x32xf32>
    %cst_142 = arith.constant dense<0.000000e+00> : vector<16x32xf32>
    %544 = tpu.matmul %521, %27, %cst_142 {dimension_numbers = #tpu.dot_dimension_numbers<[1], [0], [0], [1], [0, 0, 1, 1], [], []>} : vector<16x32xf32>, vector<32x32xf32>, vector<16x32xf32> -> vector<16x32xf32>
    %545 = vector.broadcast %29 : vector<1x32xf32> to vector<16x32xf32>
    %546 = arith.addf %544, %545 : vector<16x32xf32>
    %cst_143 = arith.constant dense<0.000000e+00> : vector<16x64xf32>
    %547 = tpu.matmul %543, %31, %cst_143 {dimension_numbers = #tpu.dot_dimension_numbers<[1], [0], [0], [1], [0, 0, 1, 1], [], []>} : vector<16x32xf32>, vector<32x64xf32>, vector<16x64xf32> -> vector<16x64xf32>
    %548 = vector.broadcast %33 : vector<1x64xf32> to vector<16x64xf32>
    %549 = arith.addf %547, %548 : vector<16x64xf32>
    %550 = vector.extract_strided_slice %549 {offsets = [0, 0], sizes = [16, 32], strides = [1, 1]} : vector<16x64xf32> to vector<16x32xf32>
    %551 = vector.extract_strided_slice %549 {offsets = [0, 32], sizes = [16, 32], strides = [1, 1]} : vector<16x64xf32> to vector<16x32xf32>
    %552 = vector.extract_strided_slice %546 {offsets = [0, 0], sizes = [8, 8], strides = [1, 1]} : vector<16x32xf32> to vector<8x8xf32>
    %553 = vector.extract_strided_slice %550 {offsets = [0, 0], sizes = [8, 8], strides = [1, 1]} : vector<16x32xf32> to vector<8x8xf32>
    %554 = vector.extract_strided_slice %551 {offsets = [0, 0], sizes = [8, 8], strides = [1, 1]} : vector<16x32xf32> to vector<8x8xf32>
    %cst_144 = arith.constant dense<0.000000e+00> : vector<8x8xf32>
    %555 = tpu.matmul %552, %553, %cst_144 {dimension_numbers = #tpu.dot_dimension_numbers<[1], [1], [0], [0], [0, 0, 1, 0], [], []>} : vector<8x8xf32>, vector<8x8xf32>, vector<8x8xf32> -> vector<8x8xf32>
    %cst_145 = arith.constant 0.353553385 : f32
    %556 = vector.broadcast %cst_145 : f32 to vector<8x8xf32>
    %557 = arith.mulf %555, %556 : vector<8x8xf32>
    %cst_146 = arith.constant dense<0xFF800000> : vector<8xf32>
    %558 = vector.multi_reduction <maximumf>, %557, %cst_146 [1] : vector<8x8xf32> to vector<8xf32>
    %559 = vector.shape_cast %558 : vector<8xf32> to vector<8x1xf32>
    %560 = vector.broadcast %559 : vector<8x1xf32> to vector<8x8xf32>
    %561 = arith.subf %557, %560 : vector<8x8xf32>
    %562 = math.exp %561 : vector<8x8xf32>
    %cst_147 = arith.constant dense<0.000000e+00> : vector<8xf32>
    %563 = vector.multi_reduction <add>, %562, %cst_147 [1] : vector<8x8xf32> to vector<8xf32>
    %564 = vector.shape_cast %563 : vector<8xf32> to vector<8x1xf32>
    %565 = vector.broadcast %564 : vector<8x1xf32> to vector<8x8xf32>
    %566 = arith.divf %562, %565 : vector<8x8xf32>
    %cst_148 = arith.constant dense<0.000000e+00> : vector<8x8xf32>
    %567 = tpu.matmul %566, %554, %cst_148 {dimension_numbers = #tpu.dot_dimension_numbers<[1], [0], [0], [1], [0, 0, 1, 1], [], []>} : vector<8x8xf32>, vector<8x8xf32>, vector<8x8xf32> -> vector<8x8xf32>
    %568 = vector.extract_strided_slice %546 {offsets = [0, 8], sizes = [8, 8], strides = [1, 1]} : vector<16x32xf32> to vector<8x8xf32>
    %569 = vector.extract_strided_slice %550 {offsets = [0, 8], sizes = [8, 8], strides = [1, 1]} : vector<16x32xf32> to vector<8x8xf32>
    %570 = vector.extract_strided_slice %551 {offsets = [0, 8], sizes = [8, 8], strides = [1, 1]} : vector<16x32xf32> to vector<8x8xf32>
    %cst_149 = arith.constant dense<0.000000e+00> : vector<8x8xf32>
    %571 = tpu.matmul %568, %569, %cst_149 {dimension_numbers = #tpu.dot_dimension_numbers<[1], [1], [0], [0], [0, 0, 1, 0], [], []>} : vector<8x8xf32>, vector<8x8xf32>, vector<8x8xf32> -> vector<8x8xf32>
    %cst_150 = arith.constant 0.353553385 : f32
    %572 = vector.broadcast %cst_150 : f32 to vector<8x8xf32>
    %573 = arith.mulf %571, %572 : vector<8x8xf32>
    %cst_151 = arith.constant dense<0xFF800000> : vector<8xf32>
    %574 = vector.multi_reduction <maximumf>, %573, %cst_151 [1] : vector<8x8xf32> to vector<8xf32>
    %575 = vector.shape_cast %574 : vector<8xf32> to vector<8x1xf32>
    %576 = vector.broadcast %575 : vector<8x1xf32> to vector<8x8xf32>
    %577 = arith.subf %573, %576 : vector<8x8xf32>
    %578 = math.exp %577 : vector<8x8xf32>
    %cst_152 = arith.constant dense<0.000000e+00> : vector<8xf32>
    %579 = vector.multi_reduction <add>, %578, %cst_152 [1] : vector<8x8xf32> to vector<8xf32>
    %580 = vector.shape_cast %579 : vector<8xf32> to vector<8x1xf32>
    %581 = vector.broadcast %580 : vector<8x1xf32> to vector<8x8xf32>
    %582 = arith.divf %578, %581 : vector<8x8xf32>
    %cst_153 = arith.constant dense<0.000000e+00> : vector<8x8xf32>
    %583 = tpu.matmul %582, %570, %cst_153 {dimension_numbers = #tpu.dot_dimension_numbers<[1], [0], [0], [1], [0, 0, 1, 1], [], []>} : vector<8x8xf32>, vector<8x8xf32>, vector<8x8xf32> -> vector<8x8xf32>
    %584 = vector.extract_strided_slice %546 {offsets = [0, 16], sizes = [8, 8], strides = [1, 1]} : vector<16x32xf32> to vector<8x8xf32>
    %585 = vector.extract_strided_slice %550 {offsets = [0, 16], sizes = [8, 8], strides = [1, 1]} : vector<16x32xf32> to vector<8x8xf32>
    %586 = vector.extract_strided_slice %551 {offsets = [0, 16], sizes = [8, 8], strides = [1, 1]} : vector<16x32xf32> to vector<8x8xf32>
    %cst_154 = arith.constant dense<0.000000e+00> : vector<8x8xf32>
    %587 = tpu.matmul %584, %585, %cst_154 {dimension_numbers = #tpu.dot_dimension_numbers<[1], [1], [0], [0], [0, 0, 1, 0], [], []>} : vector<8x8xf32>, vector<8x8xf32>, vector<8x8xf32> -> vector<8x8xf32>
    %cst_155 = arith.constant 0.353553385 : f32
    %588 = vector.broadcast %cst_155 : f32 to vector<8x8xf32>
    %589 = arith.mulf %587, %588 : vector<8x8xf32>
    %cst_156 = arith.constant dense<0xFF800000> : vector<8xf32>
    %590 = vector.multi_reduction <maximumf>, %589, %cst_156 [1] : vector<8x8xf32> to vector<8xf32>
    %591 = vector.shape_cast %590 : vector<8xf32> to vector<8x1xf32>
    %592 = vector.broadcast %591 : vector<8x1xf32> to vector<8x8xf32>
    %593 = arith.subf %589, %592 : vector<8x8xf32>
    %594 = math.exp %593 : vector<8x8xf32>
    %cst_157 = arith.constant dense<0.000000e+00> : vector<8xf32>
    %595 = vector.multi_reduction <add>, %594, %cst_157 [1] : vector<8x8xf32> to vector<8xf32>
    %596 = vector.shape_cast %595 : vector<8xf32> to vector<8x1xf32>
    %597 = vector.broadcast %596 : vector<8x1xf32> to vector<8x8xf32>
    %598 = arith.divf %594, %597 : vector<8x8xf32>
    %cst_158 = arith.constant dense<0.000000e+00> : vector<8x8xf32>
    %599 = tpu.matmul %598, %586, %cst_158 {dimension_numbers = #tpu.dot_dimension_numbers<[1], [0], [0], [1], [0, 0, 1, 1], [], []>} : vector<8x8xf32>, vector<8x8xf32>, vector<8x8xf32> -> vector<8x8xf32>
    %600 = vector.extract_strided_slice %546 {offsets = [0, 24], sizes = [8, 8], strides = [1, 1]} : vector<16x32xf32> to vector<8x8xf32>
    %601 = vector.extract_strided_slice %550 {offsets = [0, 24], sizes = [8, 8], strides = [1, 1]} : vector<16x32xf32> to vector<8x8xf32>
    %602 = vector.extract_strided_slice %551 {offsets = [0, 24], sizes = [8, 8], strides = [1, 1]} : vector<16x32xf32> to vector<8x8xf32>
    %cst_159 = arith.constant dense<0.000000e+00> : vector<8x8xf32>
    %603 = tpu.matmul %600, %601, %cst_159 {dimension_numbers = #tpu.dot_dimension_numbers<[1], [1], [0], [0], [0, 0, 1, 0], [], []>} : vector<8x8xf32>, vector<8x8xf32>, vector<8x8xf32> -> vector<8x8xf32>
    %cst_160 = arith.constant 0.353553385 : f32
    %604 = vector.broadcast %cst_160 : f32 to vector<8x8xf32>
    %605 = arith.mulf %603, %604 : vector<8x8xf32>
    %cst_161 = arith.constant dense<0xFF800000> : vector<8xf32>
    %606 = vector.multi_reduction <maximumf>, %605, %cst_161 [1] : vector<8x8xf32> to vector<8xf32>
    %607 = vector.shape_cast %606 : vector<8xf32> to vector<8x1xf32>
    %608 = vector.broadcast %607 : vector<8x1xf32> to vector<8x8xf32>
    %609 = arith.subf %605, %608 : vector<8x8xf32>
    %610 = math.exp %609 : vector<8x8xf32>
    %cst_162 = arith.constant dense<0.000000e+00> : vector<8xf32>
    %611 = vector.multi_reduction <add>, %610, %cst_162 [1] : vector<8x8xf32> to vector<8xf32>
    %612 = vector.shape_cast %611 : vector<8xf32> to vector<8x1xf32>
    %613 = vector.broadcast %612 : vector<8x1xf32> to vector<8x8xf32>
    %614 = arith.divf %610, %613 : vector<8x8xf32>
    %cst_163 = arith.constant dense<0.000000e+00> : vector<8x8xf32>
    %615 = tpu.matmul %614, %602, %cst_163 {dimension_numbers = #tpu.dot_dimension_numbers<[1], [0], [0], [1], [0, 0, 1, 1], [], []>} : vector<8x8xf32>, vector<8x8xf32>, vector<8x8xf32> -> vector<8x8xf32>
    %616 = tpu.concatenate %567, %583, %599, %615 in 1 : vector<8x8xf32>, vector<8x8xf32>, vector<8x8xf32>, vector<8x8xf32> -> vector<8x32xf32>
    %617 = vector.extract_strided_slice %546 {offsets = [8, 0], sizes = [8, 8], strides = [1, 1]} : vector<16x32xf32> to vector<8x8xf32>
    %618 = vector.extract_strided_slice %550 {offsets = [8, 0], sizes = [8, 8], strides = [1, 1]} : vector<16x32xf32> to vector<8x8xf32>
    %619 = vector.extract_strided_slice %551 {offsets = [8, 0], sizes = [8, 8], strides = [1, 1]} : vector<16x32xf32> to vector<8x8xf32>
    %cst_164 = arith.constant dense<0.000000e+00> : vector<8x8xf32>
    %620 = tpu.matmul %617, %618, %cst_164 {dimension_numbers = #tpu.dot_dimension_numbers<[1], [1], [0], [0], [0, 0, 1, 0], [], []>} : vector<8x8xf32>, vector<8x8xf32>, vector<8x8xf32> -> vector<8x8xf32>
    %cst_165 = arith.constant 0.353553385 : f32
    %621 = vector.broadcast %cst_165 : f32 to vector<8x8xf32>
    %622 = arith.mulf %620, %621 : vector<8x8xf32>
    %cst_166 = arith.constant dense<0xFF800000> : vector<8xf32>
    %623 = vector.multi_reduction <maximumf>, %622, %cst_166 [1] : vector<8x8xf32> to vector<8xf32>
    %624 = vector.shape_cast %623 : vector<8xf32> to vector<8x1xf32>
    %625 = vector.broadcast %624 : vector<8x1xf32> to vector<8x8xf32>
    %626 = arith.subf %622, %625 : vector<8x8xf32>
    %627 = math.exp %626 : vector<8x8xf32>
    %cst_167 = arith.constant dense<0.000000e+00> : vector<8xf32>
    %628 = vector.multi_reduction <add>, %627, %cst_167 [1] : vector<8x8xf32> to vector<8xf32>
    %629 = vector.shape_cast %628 : vector<8xf32> to vector<8x1xf32>
    %630 = vector.broadcast %629 : vector<8x1xf32> to vector<8x8xf32>
    %631 = arith.divf %627, %630 : vector<8x8xf32>
    %cst_168 = arith.constant dense<0.000000e+00> : vector<8x8xf32>
    %632 = tpu.matmul %631, %619, %cst_168 {dimension_numbers = #tpu.dot_dimension_numbers<[1], [0], [0], [1], [0, 0, 1, 1], [], []>} : vector<8x8xf32>, vector<8x8xf32>, vector<8x8xf32> -> vector<8x8xf32>
    %633 = vector.extract_strided_slice %546 {offsets = [8, 8], sizes = [8, 8], strides = [1, 1]} : vector<16x32xf32> to vector<8x8xf32>
    %634 = vector.extract_strided_slice %550 {offsets = [8, 8], sizes = [8, 8], strides = [1, 1]} : vector<16x32xf32> to vector<8x8xf32>
    %635 = vector.extract_strided_slice %551 {offsets = [8, 8], sizes = [8, 8], strides = [1, 1]} : vector<16x32xf32> to vector<8x8xf32>
    %cst_169 = arith.constant dense<0.000000e+00> : vector<8x8xf32>
    %636 = tpu.matmul %633, %634, %cst_169 {dimension_numbers = #tpu.dot_dimension_numbers<[1], [1], [0], [0], [0, 0, 1, 0], [], []>} : vector<8x8xf32>, vector<8x8xf32>, vector<8x8xf32> -> vector<8x8xf32>
    %cst_170 = arith.constant 0.353553385 : f32
    %637 = vector.broadcast %cst_170 : f32 to vector<8x8xf32>
    %638 = arith.mulf %636, %637 : vector<8x8xf32>
    %cst_171 = arith.constant dense<0xFF800000> : vector<8xf32>
    %639 = vector.multi_reduction <maximumf>, %638, %cst_171 [1] : vector<8x8xf32> to vector<8xf32>
    %640 = vector.shape_cast %639 : vector<8xf32> to vector<8x1xf32>
    %641 = vector.broadcast %640 : vector<8x1xf32> to vector<8x8xf32>
    %642 = arith.subf %638, %641 : vector<8x8xf32>
    %643 = math.exp %642 : vector<8x8xf32>
    %cst_172 = arith.constant dense<0.000000e+00> : vector<8xf32>
    %644 = vector.multi_reduction <add>, %643, %cst_172 [1] : vector<8x8xf32> to vector<8xf32>
    %645 = vector.shape_cast %644 : vector<8xf32> to vector<8x1xf32>
    %646 = vector.broadcast %645 : vector<8x1xf32> to vector<8x8xf32>
    %647 = arith.divf %643, %646 : vector<8x8xf32>
    %cst_173 = arith.constant dense<0.000000e+00> : vector<8x8xf32>
    %648 = tpu.matmul %647, %635, %cst_173 {dimension_numbers = #tpu.dot_dimension_numbers<[1], [0], [0], [1], [0, 0, 1, 1], [], []>} : vector<8x8xf32>, vector<8x8xf32>, vector<8x8xf32> -> vector<8x8xf32>
    %649 = vector.extract_strided_slice %546 {offsets = [8, 16], sizes = [8, 8], strides = [1, 1]} : vector<16x32xf32> to vector<8x8xf32>
    %650 = vector.extract_strided_slice %550 {offsets = [8, 16], sizes = [8, 8], strides = [1, 1]} : vector<16x32xf32> to vector<8x8xf32>
    %651 = vector.extract_strided_slice %551 {offsets = [8, 16], sizes = [8, 8], strides = [1, 1]} : vector<16x32xf32> to vector<8x8xf32>
    %cst_174 = arith.constant dense<0.000000e+00> : vector<8x8xf32>
    %652 = tpu.matmul %649, %650, %cst_174 {dimension_numbers = #tpu.dot_dimension_numbers<[1], [1], [0], [0], [0, 0, 1, 0], [], []>} : vector<8x8xf32>, vector<8x8xf32>, vector<8x8xf32> -> vector<8x8xf32>
    %cst_175 = arith.constant 0.353553385 : f32
    %653 = vector.broadcast %cst_175 : f32 to vector<8x8xf32>
    %654 = arith.mulf %652, %653 : vector<8x8xf32>
    %cst_176 = arith.constant dense<0xFF800000> : vector<8xf32>
    %655 = vector.multi_reduction <maximumf>, %654, %cst_176 [1] : vector<8x8xf32> to vector<8xf32>
    %656 = vector.shape_cast %655 : vector<8xf32> to vector<8x1xf32>
    %657 = vector.broadcast %656 : vector<8x1xf32> to vector<8x8xf32>
    %658 = arith.subf %654, %657 : vector<8x8xf32>
    %659 = math.exp %658 : vector<8x8xf32>
    %cst_177 = arith.constant dense<0.000000e+00> : vector<8xf32>
    %660 = vector.multi_reduction <add>, %659, %cst_177 [1] : vector<8x8xf32> to vector<8xf32>
    %661 = vector.shape_cast %660 : vector<8xf32> to vector<8x1xf32>
    %662 = vector.broadcast %661 : vector<8x1xf32> to vector<8x8xf32>
    %663 = arith.divf %659, %662 : vector<8x8xf32>
    %cst_178 = arith.constant dense<0.000000e+00> : vector<8x8xf32>
    %664 = tpu.matmul %663, %651, %cst_178 {dimension_numbers = #tpu.dot_dimension_numbers<[1], [0], [0], [1], [0, 0, 1, 1], [], []>} : vector<8x8xf32>, vector<8x8xf32>, vector<8x8xf32> -> vector<8x8xf32>
    %665 = vector.extract_strided_slice %546 {offsets = [8, 24], sizes = [8, 8], strides = [1, 1]} : vector<16x32xf32> to vector<8x8xf32>
    %666 = vector.extract_strided_slice %550 {offsets = [8, 24], sizes = [8, 8], strides = [1, 1]} : vector<16x32xf32> to vector<8x8xf32>
    %667 = vector.extract_strided_slice %551 {offsets = [8, 24], sizes = [8, 8], strides = [1, 1]} : vector<16x32xf32> to vector<8x8xf32>
    %cst_179 = arith.constant dense<0.000000e+00> : vector<8x8xf32>
    %668 = tpu.matmul %665, %666, %cst_179 {dimension_numbers = #tpu.dot_dimension_numbers<[1], [1], [0], [0], [0, 0, 1, 0], [], []>} : vector<8x8xf32>, vector<8x8xf32>, vector<8x8xf32> -> vector<8x8xf32>
    %cst_180 = arith.constant 0.353553385 : f32
    %669 = vector.broadcast %cst_180 : f32 to vector<8x8xf32>
    %670 = arith.mulf %668, %669 : vector<8x8xf32>
    %cst_181 = arith.constant dense<0xFF800000> : vector<8xf32>
    %671 = vector.multi_reduction <maximumf>, %670, %cst_181 [1] : vector<8x8xf32> to vector<8xf32>
    %672 = vector.shape_cast %671 : vector<8xf32> to vector<8x1xf32>
    %673 = vector.broadcast %672 : vector<8x1xf32> to vector<8x8xf32>
    %674 = arith.subf %670, %673 : vector<8x8xf32>
    %675 = math.exp %674 : vector<8x8xf32>
    %cst_182 = arith.constant dense<0.000000e+00> : vector<8xf32>
    %676 = vector.multi_reduction <add>, %675, %cst_182 [1] : vector<8x8xf32> to vector<8xf32>
    %677 = vector.shape_cast %676 : vector<8xf32> to vector<8x1xf32>
    %678 = vector.broadcast %677 : vector<8x1xf32> to vector<8x8xf32>
    %679 = arith.divf %675, %678 : vector<8x8xf32>
    %cst_183 = arith.constant dense<0.000000e+00> : vector<8x8xf32>
    %680 = tpu.matmul %679, %667, %cst_183 {dimension_numbers = #tpu.dot_dimension_numbers<[1], [0], [0], [1], [0, 0, 1, 1], [], []>} : vector<8x8xf32>, vector<8x8xf32>, vector<8x8xf32> -> vector<8x8xf32>
    %681 = tpu.concatenate %632, %648, %664, %680 in 1 : vector<8x8xf32>, vector<8x8xf32>, vector<8x8xf32>, vector<8x8xf32> -> vector<8x32xf32>
    %682 = tpu.concatenate %616, %681 in 0 : vector<8x32xf32>, vector<8x32xf32> -> vector<16x32xf32>
    %cst_184 = arith.constant dense<0.000000e+00> : vector<16x32xf32>
    %683 = tpu.matmul %682, %35, %cst_184 {dimension_numbers = #tpu.dot_dimension_numbers<[1], [0], [0], [1], [0, 0, 1, 1], [], []>} : vector<16x32xf32>, vector<32x32xf32>, vector<16x32xf32> -> vector<16x32xf32>
    %684 = vector.broadcast %37 : vector<1x32xf32> to vector<16x32xf32>
    %685 = arith.addf %683, %684 : vector<16x32xf32>
    %686 = arith.addf %499, %685 : vector<16x32xf32>
    %cst_185 = arith.constant dense<0.000000e+00> : vector<16xf32>
    %687 = vector.multi_reduction <add>, %686, %cst_185 [1] : vector<16x32xf32> to vector<16xf32>
    %688 = vector.shape_cast %687 : vector<16xf32> to vector<16x1xf32>
    %cst_186 = arith.constant 3.200000e+01 : f32
    %689 = vector.broadcast %cst_186 : f32 to vector<16x1xf32>
    %690 = arith.divf %688, %689 : vector<16x1xf32>
    %691 = vector.broadcast %690 : vector<16x1xf32> to vector<16x32xf32>
    %692 = arith.subf %686, %691 : vector<16x32xf32>
    %693 = arith.mulf %692, %692 : vector<16x32xf32>
    %cst_187 = arith.constant dense<0.000000e+00> : vector<16xf32>
    %694 = vector.multi_reduction <add>, %693, %cst_187 [1] : vector<16x32xf32> to vector<16xf32>
    %695 = vector.shape_cast %694 : vector<16xf32> to vector<16x1xf32>
    %cst_188 = arith.constant 3.200000e+01 : f32
    %696 = vector.broadcast %cst_188 : f32 to vector<16x1xf32>
    %697 = arith.divf %695, %696 : vector<16x1xf32>
    %698 = vector.broadcast %690 : vector<16x1xf32> to vector<16x32xf32>
    %699 = arith.subf %686, %698 : vector<16x32xf32>
    %cst_189 = arith.constant 9.99999974E-6 : f32
    %700 = vector.broadcast %cst_189 : f32 to vector<16x1xf32>
    %701 = arith.addf %697, %700 : vector<16x1xf32>
    %702 = math.rsqrt %701 : vector<16x1xf32>
    %703 = vector.broadcast %702 : vector<16x1xf32> to vector<16x32xf32>
    %704 = arith.mulf %699, %703 : vector<16x32xf32>
    %705 = vector.broadcast %42 : vector<1x32xf32> to vector<16x32xf32>
    %706 = arith.mulf %704, %705 : vector<16x32xf32>
    %707 = vector.broadcast %43 : vector<1x32xf32> to vector<16x32xf32>
    %708 = arith.addf %706, %707 : vector<16x32xf32>
    %cst_190 = arith.constant dense<0.000000e+00> : vector<16x64xf32>
    %709 = tpu.matmul %708, %45, %cst_190 {dimension_numbers = #tpu.dot_dimension_numbers<[1], [0], [0], [1], [0, 0, 1, 1], [], []>} : vector<16x32xf32>, vector<32x64xf32>, vector<16x64xf32> -> vector<16x64xf32>
    %710 = vector.broadcast %47 : vector<1x64xf32> to vector<16x64xf32>
    %711 = arith.addf %709, %710 : vector<16x64xf32>
    %cst_191 = arith.constant 0.000000e+00 : f32
    %712 = vector.broadcast %cst_191 : f32 to vector<16x64xf32>
    %713 = arith.maximumf %711, %712 : vector<16x64xf32>
    %cst_192 = arith.constant dense<0.000000e+00> : vector<16x32xf32>
    %714 = tpu.matmul %713, %49, %cst_192 {dimension_numbers = #tpu.dot_dimension_numbers<[1], [0], [0], [1], [0, 0, 1, 1], [], []>} : vector<16x64xf32>, vector<64x32xf32>, vector<16x32xf32> -> vector<16x32xf32>
    %715 = arith.addf %708, %714 : vector<16x32xf32>
    %716 = vector.broadcast %51 : vector<1x32xf32> to vector<16x32xf32>
    %717 = arith.addf %715, %716 : vector<16x32xf32>
    %cst_193 = arith.constant dense<0.000000e+00> : vector<16xf32>
    %718 = vector.multi_reduction <add>, %717, %cst_193 [1] : vector<16x32xf32> to vector<16xf32>
    %719 = vector.shape_cast %718 : vector<16xf32> to vector<16x1xf32>
    %cst_194 = arith.constant 3.200000e+01 : f32
    %720 = vector.broadcast %cst_194 : f32 to vector<16x1xf32>
    %721 = arith.divf %719, %720 : vector<16x1xf32>
    %722 = vector.broadcast %721 : vector<16x1xf32> to vector<16x32xf32>
    %723 = arith.subf %717, %722 : vector<16x32xf32>
    %724 = arith.mulf %723, %723 : vector<16x32xf32>
    %cst_195 = arith.constant dense<0.000000e+00> : vector<16xf32>
    %725 = vector.multi_reduction <add>, %724, %cst_195 [1] : vector<16x32xf32> to vector<16xf32>
    %726 = vector.shape_cast %725 : vector<16xf32> to vector<16x1xf32>
    %cst_196 = arith.constant 3.100000e+01 : f32
    %727 = vector.broadcast %cst_196 : f32 to vector<16x1xf32>
    %728 = arith.divf %726, %727 : vector<16x1xf32>
    %729 = vector.broadcast %721 : vector<16x1xf32> to vector<16x32xf32>
    %730 = arith.subf %717, %729 : vector<16x32xf32>
    %731 = vector.broadcast %53 : vector<1x32xf32> to vector<16x32xf32>
    %732 = arith.mulf %731, %730 : vector<16x32xf32>
    %733 = math.sqrt %728 : vector<16x1xf32>
    %cst_197 = arith.constant 9.99999997E-7 : f32
    %734 = vector.broadcast %cst_197 : f32 to vector<16x1xf32>
    %735 = arith.addf %733, %734 : vector<16x1xf32>
    %736 = vector.broadcast %735 : vector<16x1xf32> to vector<16x32xf32>
    %737 = arith.divf %732, %736 : vector<16x32xf32>
    %738 = vector.broadcast %55 : vector<1x32xf32> to vector<16x32xf32>
    %739 = arith.addf %737, %738 : vector<16x32xf32>
    %740 = vector.shape_cast %739 : vector<16x32xf32> to vector<2x8x32xf32>
    %c0_198 = arith.constant 0 : index
    %c0_199 = arith.constant 0 : index
    %c0_200 = arith.constant 0 : index
    %c0_201 = arith.constant 0 : index
    %741 = vector.load %arg31[%c0_198, %c0_199, %c0_200, %c0_201] : memref<1x2x8x32xf32, #tpu.memory_space<vmem>>, vector<1x2x8x32xf32>
    %742 = vector.shape_cast %741 : vector<1x2x8x32xf32> to vector<2x8x32xf32>
    %743 = vector.shape_cast %740 : vector<2x8x32xf32> to vector<1x2x8x32xf32>
    tpu.vector_store %arg31[%c0_198, %c0_199, %c0_200, %c0_201], %743 {strides = array<i32>} : memref<1x2x8x32xf32, #tpu.memory_space<vmem>>, vector<1x2x8x32xf32>,
    return
  }
  func.func @transform_0(%arg0: i32) -> (i32, i32, i32, i32) {
    %c0_i32 = arith.constant 0 : i32
    %c0_i32_0 = arith.constant 0 : i32
    %c0_i32_1 = arith.constant 0 : i32
    %c0_i32_2 = arith.constant 0 : i32
    return %arg0, %c0_i32, %c0_i32_0, %c0_i32_1 : i32, i32, i32, i32
  }
  func.func @transform_1(%arg0: i32) -> (i32, i32, i32) {
    %c0_i32 = arith.constant 0 : i32
    %c0_i32_0 = arith.constant 0 : i32
    %c0_i32_1 = arith.constant 0 : i32
    return %arg0, %c0_i32, %c0_i32_0 : i32, i32, i32
  }
  func.func @transform_2(%arg0: i32) -> (i32, i32, i32) {
    %c0_i32 = arith.constant 0 : i32
    %c0_i32_0 = arith.constant 0 : i32
    %c0_i32_1 = arith.constant 0 : i32
    return %arg0, %c0_i32, %c0_i32_0 : i32, i32, i32
  }
  func.func @transform_3(%arg0: i32) -> (i32, i32, i32) {
    %c0_i32 = arith.constant 0 : i32
    %c0_i32_0 = arith.constant 0 : i32
    %c0_i32_1 = arith.constant 0 : i32
    return %arg0, %c0_i32, %c0_i32_0 : i32, i32, i32
  }
  func.func @transform_4(%arg0: i32) -> (i32, i32, i32) {
    %c0_i32 = arith.constant 0 : i32
    %c0_i32_0 = arith.constant 0 : i32
    %c0_i32_1 = arith.constant 0 : i32
    return %arg0, %c0_i32, %c0_i32_0 : i32, i32, i32
  }
  func.func @transform_5(%arg0: i32) -> (i32, i32, i32) {
    %c0_i32 = arith.constant 0 : i32
    %c0_i32_0 = arith.constant 0 : i32
    %c0_i32_1 = arith.constant 0 : i32
    return %arg0, %c0_i32, %c0_i32_0 : i32, i32, i32
  }
  func.func @transform_6(%arg0: i32) -> (i32, i32, i32) {
    %c0_i32 = arith.constant 0 : i32
    %c0_i32_0 = arith.constant 0 : i32
    %c0_i32_1 = arith.constant 0 : i32
    return %arg0, %c0_i32, %c0_i32_0 : i32, i32, i32
  }
  func.func @transform_7(%arg0: i32) -> (i32, i32, i32) {
    %c0_i32 = arith.constant 0 : i32
    %c0_i32_0 = arith.constant 0 : i32
    %c0_i32_1 = arith.constant 0 : i32
    return %arg0, %c0_i32, %c0_i32_0 : i32, i32, i32
  }
  func.func @transform_8(%arg0: i32) -> (i32, i32, i32) {
    %c0_i32 = arith.constant 0 : i32
    %c0_i32_0 = arith.constant 0 : i32
    %c0_i32_1 = arith.constant 0 : i32
    return %arg0, %c0_i32, %c0_i32_0 : i32, i32, i32
  }
  func.func @transform_9(%arg0: i32) -> (i32, i32, i32) {
    %c0_i32 = arith.constant 0 : i32
    %c0_i32_0 = arith.constant 0 : i32
    %c0_i32_1 = arith.constant 0 : i32
    return %arg0, %c0_i32, %c0_i32_0 : i32, i32, i32
  }
  func.func @transform_10(%arg0: i32) -> (i32, i32, i32) {
    %c0_i32 = arith.constant 0 : i32
    %c0_i32_0 = arith.constant 0 : i32
    %c0_i32_1 = arith.constant 0 : i32
    return %arg0, %c0_i32, %c0_i32_0 : i32, i32, i32
  }
  func.func @transform_11(%arg0: i32) -> (i32, i32, i32) {
    %c0_i32 = arith.constant 0 : i32
    %c0_i32_0 = arith.constant 0 : i32
    %c0_i32_1 = arith.constant 0 : i32
    return %arg0, %c0_i32, %c0_i32_0 : i32, i32, i32
  }
  func.func @transform_12(%arg0: i32) -> (i32, i32, i32) {
    %c0_i32 = arith.constant 0 : i32
    %c0_i32_0 = arith.constant 0 : i32
    %c0_i32_1 = arith.constant 0 : i32
    return %arg0, %c0_i32, %c0_i32_0 : i32, i32, i32
  }
  func.func @transform_13(%arg0: i32) -> (i32, i32, i32) {
    %c0_i32 = arith.constant 0 : i32
    %c0_i32_0 = arith.constant 0 : i32
    %c0_i32_1 = arith.constant 0 : i32
    return %arg0, %c0_i32, %c0_i32_0 : i32, i32, i32
  }
  func.func @transform_14(%arg0: i32) -> (i32, i32, i32) {
    %c0_i32 = arith.constant 0 : i32
    %c0_i32_0 = arith.constant 0 : i32
    %c0_i32_1 = arith.constant 0 : i32
    return %arg0, %c0_i32, %c0_i32_0 : i32, i32, i32
  }
  func.func @transform_15(%arg0: i32) -> (i32, i32, i32) {
    %c0_i32 = arith.constant 0 : i32
    %c0_i32_0 = arith.constant 0 : i32
    %c0_i32_1 = arith.constant 0 : i32
    return %arg0, %c0_i32, %c0_i32_0 : i32, i32, i32
  }
  func.func @transform_16(%arg0: i32) -> (i32, i32, i32) {
    %c0_i32 = arith.constant 0 : i32
    %c0_i32_0 = arith.constant 0 : i32
    %c0_i32_1 = arith.constant 0 : i32
    return %arg0, %c0_i32, %c0_i32_0 : i32, i32, i32
  }
  func.func @transform_17(%arg0: i32) -> (i32, i32, i32) {
    %c0_i32 = arith.constant 0 : i32
    %c0_i32_0 = arith.constant 0 : i32
    %c0_i32_1 = arith.constant 0 : i32
    return %arg0, %c0_i32, %c0_i32_0 : i32, i32, i32
  }
  func.func @transform_18(%arg0: i32) -> (i32, i32, i32) {
    %c0_i32 = arith.constant 0 : i32
    %c0_i32_0 = arith.constant 0 : i32
    %c0_i32_1 = arith.constant 0 : i32
    return %arg0, %c0_i32, %c0_i32_0 : i32, i32, i32
  }
  func.func @transform_19(%arg0: i32) -> (i32, i32, i32) {
    %c0_i32 = arith.constant 0 : i32
    %c0_i32_0 = arith.constant 0 : i32
    %c0_i32_1 = arith.constant 0 : i32
    return %arg0, %c0_i32, %c0_i32_0 : i32, i32, i32
  }
  func.func @transform_20(%arg0: i32) -> (i32, i32, i32) {
    %c0_i32 = arith.constant 0 : i32
    %c0_i32_0 = arith.constant 0 : i32
    %c0_i32_1 = arith.constant 0 : i32
    return %arg0, %c0_i32, %c0_i32_0 : i32, i32, i32
  }
  func.func @transform_21(%arg0: i32) -> (i32, i32, i32) {
    %c0_i32 = arith.constant 0 : i32
    %c0_i32_0 = arith.constant 0 : i32
    %c0_i32_1 = arith.constant 0 : i32
    return %arg0, %c0_i32, %c0_i32_0 : i32, i32, i32
  }
  func.func @transform_22(%arg0: i32) -> (i32, i32) {
    %c0_i32 = arith.constant 0 : i32
    %c0_i32_0 = arith.constant 0 : i32
    %c0_i32_1 = arith.constant 0 : i32
    return %c0_i32, %c0_i32_0 : i32, i32
  }
  func.func @transform_23(%arg0: i32) -> (i32, i32) {
    %c0_i32 = arith.constant 0 : i32
    %c0_i32_0 = arith.constant 0 : i32
    %c0_i32_1 = arith.constant 0 : i32
    return %c0_i32, %c0_i32_0 : i32, i32
  }
  func.func @transform_24(%arg0: i32) -> (i32, i32, i32) {
    %c0_i32 = arith.constant 0 : i32
    %c0_i32_0 = arith.constant 0 : i32
    %c0_i32_1 = arith.constant 0 : i32
    return %arg0, %c0_i32, %c0_i32_0 : i32, i32, i32
  }
  func.func @transform_25(%arg0: i32) -> (i32, i32, i32) {
    %c0_i32 = arith.constant 0 : i32
    %c0_i32_0 = arith.constant 0 : i32
    %c0_i32_1 = arith.constant 0 : i32
    return %arg0, %c0_i32, %c0_i32_0 : i32, i32, i32
  }
  func.func @transform_26(%arg0: i32) -> (i32, i32, i32) {
    %c0_i32 = arith.constant 0 : i32
    %c0_i32_0 = arith.constant 0 : i32
    %c0_i32_1 = arith.constant 0 : i32
    return %arg0, %c0_i32, %c0_i32_0 : i32, i32, i32
  }
  func.func @transform_27(%arg0: i32) -> (i32, i32, i32) {
    %c0_i32 = arith.constant 0 : i32
    %c0_i32_0 = arith.constant 0 : i32
    %c0_i32_1 = arith.constant 0 : i32
    return %arg0, %c0_i32, %c0_i32_0 : i32, i32, i32
  }
  func.func @transform_28(%arg0: i32) -> (i32, i32, i32) {
    %c0_i32 = arith.constant 0 : i32
    %c0_i32_0 = arith.constant 0 : i32
    %c0_i32_1 = arith.constant 0 : i32
    return %arg0, %c0_i32, %c0_i32_0 : i32, i32, i32
  }
  func.func @transform_29(%arg0: i32) -> (i32, i32, i32) {
    %c0_i32 = arith.constant 0 : i32
    %c0_i32_0 = arith.constant 0 : i32
    %c0_i32_1 = arith.constant 0 : i32
    return %arg0, %c0_i32, %c0_i32_0 : i32, i32, i32
  }
  func.func @transform_30(%arg0: i32) -> (i32, i32, i32, i32) {
    %c0_i32 = arith.constant 0 : i32
    %c0_i32_0 = arith.constant 0 : i32
    %c0_i32_1 = arith.constant 0 : i32
    %c0_i32_2 = arith.constant 0 : i32
    return %arg0, %c0_i32, %c0_i32_0, %c0_i32_1 : i32, i32, i32, i32
  }
}

</mosaic_0001>

<bundles_post_ra>
// kernel: cross_mambaformer_forward.5
= control target key start
LH: loop header
LB: loop body
LE: loop exit
PB: predicated region body
PF: predicated region fallthrough
CT: control target
= control target key end

     0   :  { %s1792_s21 = smov 0   ;;  %s1956_s0 = inlined_call_operand.vmem [shape: f32[3,2,8,32], index: 0, kind: input, shape index: {}, may-alias: {0,12}]   ;;  %s1957_s1 = inlined_call_operand.vmem [shape: f32[3,2,8,32], index: 1, kind: input, shape index: {}]   ;;  %s1958_s2 = inlined_call_operand.vmem [shape: f32[1,32,32], index: 2, kind: input, shape index: {}]   ;;  %s1959_s3 = inlined_call_operand.vmem [shape: f32[1,1,32], index: 3, kind: input, shape index: {}]   ;;  %s1960_s4 = inlined_call_operand.vmem [shape: f32[1,32,64], index: 4, kind: input, shape index: {}]   ;;  %s1961_s5 = inlined_call_operand.vmem [shape: f32[1,1,64], index: 5, kind: input, shape index: {}]   ;;  %s1962_s6 = inlined_call_operand.vmem [shape: f32[1,32,32], index: 6, kind: input, shape index: {}]   ;;  %s1963_s7 = inlined_call_operand.vmem [shape: f32[1,1,32], index: 7, kind: input, shape index: {}]   ;;  %s1964_s8 = inlined_call_operand.vmem [shape: f32[1,1,32], index: 8, kind: input, shape index: {}]   ;;  %s1965_s9 = inlined_call_operand.vmem [shape: f32[1,1,32], index: 9, kind: input, shape index: {}]   ;;  %s1966_s10 = inlined_call_operand.vmem [shape: f32[1,32], index: 10, kind: input, shape index: {}]   ;;  %s1967_s11 = inlined_call_operand.vmem [shape: f32[1,32], index: 11, kind: input, shape index: {}]   ;;  %s1968_s12 = inlined_call_operand.vmem [shape: f32[3,2,8,32], index: 12, kind: output, shape index: {}, may-alias: {0,12}]  }
   0x1 LB: > { %s1508_s22 = sadd.s32 4294967295, %s1712_s21   ;;  %p1512_p0 = scmp.ge.s32.totalorder %s1712_s21, 1  ;;  %s1712_s21 = sphi %s1792_s21, %s22_s21  }
   0x2   : > { %p371_p1 = scmp.lt.s32.totalorder %s1712_s21, 3 }
   0x4   : > { %p372_p2 = pnand %p1512_p0, %p371_p1 }
   0x5   : > { %p416_p3 = scmp.lt.s32.totalorder (!%p372_p2), %s1508_s22, 1  ;;  %vm450_vm0 = vcmask (!%p372_p2), 261120   ;;  %v434_v14 = vld [vmem:[%s1960_s4] sm:$0xff] (!%p372_p2)  ;;  %v435_v15 = vld [vmem:[%s1960_s4 + $0x8] sm:$0xff] (!%p372_p2)  ;;  %v1714_v17 = vmov (!%p372_p2), 0.0|0.0   ;;  %v436_v20 = vld [vmem:[%s1960_s4 + $0x10] sm:$0xff] (!%p372_p2) }
   0x6   : > { %375 = sbr.rel (%p372_p2) target bundleno = 2106 (0x83a), region = 68  ;;  %v429_v16 = vld [vmem:[%s1958_s2] sm:$0xff] (!%p372_p2)  ;;  %1651 = vmatprep.subr.bf16.mxu1 (!%p372_p2), %v1714_v17  ;;  %v1652_v18 = vpack.c.bf16 (!%p372_p2), %v435_v15, %v434_v14  ;;  %1645 = vmatprep.subr.bf16.mxu0 (!%p372_p2), %v1714_v17  ;;  %v430_v19 = vld [vmem:[%s1958_s2 + $0x8] sm:$0xff] (!%p372_p2)  ;;  %v437_v21 = vld [vmem:[%s1960_s4 + $0x18] sm:$0xff] (!%p372_p2)  ;;  %vm1715_vm1 = vmmov (!%p372_p2), 0   ;;  %v1716_v23 = vmov (!%p372_p2), 0.0  }
   0x7   : > { %v1646_v22 = vpack.c.bf16 (!%p372_p2), %v430_v19, %v429_v16  ;;  %1591 = vmatprep.mubr.msk.f32.mxu1 (!%p372_p2), %vm1715_vm1, %v1716_v23  ;;  %1580 = vmatprep.mubr.msk.f32.mxu0 (!%p372_p2), %vm1715_vm1, %v1716_v23  ;;  %v1655_v24 = vpack.c.bf16 (!%p372_p2), %v437_v21, %v436_v20  ;;  %v431_v25 = vld [vmem:[%s1958_s2 + $0x10] sm:$0xff] (!%p372_p2)  ;;  %v432_v26 = vld [vmem:[%s1958_s2 + $0x18] sm:$0xff] (!%p372_p2)  ;;  %v1517_v35 = vld [vmem:[%s1964_s8] ss:$0 sm:$0xff] (!%p372_p2)  ;;  %vm652_vm2 = vcmask (!%p372_p2), 64512   ;;  %s1717_s20 = smov (!%p372_p2), 120  }
   0x8   : > { %1653 = vmatpush3.bf16.msra.mxu1 (!%p372_p2), %v1652_v18  ;;  %v1649_v27 = vpack.c.bf16 (!%p372_p2), %v432_v26, %v431_v25  ;;  %v1518_v37 = vld [vmem:[%s1965_s9] ss:$0 sm:$0xff] (!%p372_p2)  ;;  %s1719_s24 = smov (!%p372_p2), 112   ;;  %s1720_s25 = smov (!%p372_p2), 88   ;;  %vm1328_vm3 = vcmask (!%p372_p2), 130048   ;;  %vm1330_vm4 = vcmask (!%p372_p2), 195584  }
   0x9   : > { %1654 = vmatprep.subr.bf16.mxu1 (!%p372_p2), %v1714_v17  ;;  %1647 = vmatpush3.bf16.msra.mxu0 (!%p372_p2), %v1646_v22  ;;  %v1521_v44 = vld [vmem:[%s1961_s5] ss:$0 sm:$0xff] (!%p372_p2)  ;;  %s1722_s27 = smov (!%p372_p2), 96   ;;  %s1723_s28 = smov (!%p372_p2), 72  }
   0xa   : > { %1648 = vmatprep.subr.bf16.mxu0 (!%p372_p2), %v1714_v17  ;;  %v1519_v48 = vld [vmem:[%s1959_s3] ss:$0 sm:$0xff] (!%p372_p2)  ;;  %s1724_s19 = smov (!%p372_p2), 8  }
   0xc   : > { %1656 = vmatpush3.bf16.msra.mxu1 (!%p372_p2), %v1655_v24 }
   0xd   : > { %s1970_s22 = smov (!%p416_p3, %s1508_s22), 1  ;;  %1594 = vmatprep.subr.mxu1 %v1716_v23  ;;  %1650 = vmatpush3.bf16.msra.mxu0 %v1649_v27 }
   0xe   : > { %s1800_s23 = sshll.u32 %s1970_s22, 3  ;;  %1604 = vmatprep.subr.mxu0 %v1716_v23  ;;  %s1718_s22 = smov 104  }
   0xf   : > { %s1474_s26 = scalar_lea.vmem %s1957_s1, %s1800_s23  ;;  %s419_s29 = scalar_lea.vmem %s1956_s0, %s1800_s23 }
  0x10   : > { %v1516_v0 = vld [vmem:[%s1474_s26 + $0x10] sm:$0xff]  ;;  %v1811_v2 = vld [vmem:[%s419_s29] sm:$0xff]  ;;  %s1721_s26 = smov 80   ;;  %s428_s14 = scalar_lea.vmem %s1968_s12, %s1800_s23 }
  0x11   : > { %v479_v1 = vsel %vm450_vm0, %v1516_v0, 0.0  ;;  %v451_v3 = vsel %vm450_vm0, %v1811_v2, 0.0 }
  0x12   : > { %480 = vadd.xlane.f32.xlu0 %v479_v1 }
  0x16   : > { %452 = vadd.xlane.f32.xlu0 %v451_v3 }
  0x9f   : > { %v481_v4 = vpop.xlane.xlu0 %480 }
  0xa0   : > { %v482_v5 = vmul.f32 0.03125, %v481_v4 }
  0xa2   : > { %v483_v6 = vsub.f32 %v1516_v0, %v482_v5 }
  0xa3   : > { %v453_v7 = vpop.xlane.xlu0 %452 }
  0xa4   : > { %v455_v8 = vmul.f32 0.03125, %v453_v7  ;;  %v484_v9 = vmul.f32 %v483_v6, %v483_v6 }
  0xa6   : > { %v456_v10 = vsub.f32 %v1811_v2, %v455_v8  ;;  %v485_v11 = vsel %vm450_vm0, %v484_v9, 0.0 }
  0xa7   : > { %486 = vadd.xlane.f32.xlu1 %v485_v11 }
  0xa8   : > { %v457_v12 = vmul.f32 %v456_v10, %v456_v10 }
  0xaa   : > { %v458_v13 = vsel %vm450_vm0, %v457_v12, 0.0 }
  0xab   : > { %459 = vadd.xlane.f32.xlu1 %v458_v13 }
 0x134   : > { %v487_v28 = vpop.xlane.xlu1 %486 }
 0x135   : > { %v488_v29 = vmul.f32 0.03125, %v487_v28 }
 0x137   : > { %v489_v30 = vadd.f32 1e-05, %v488_v29 }
 0x138   : > { %v460_v31 = vpop.xlane.xlu1 %459 }
 0x139   : > { %1684 = vrsqrt.f32 %v489_v30  ;;  %v461_v32 = vmul.f32 0.03125, %v460_v31 }
 0x13b   : > { %v462_v33 = vadd.f32 1e-05, %v461_v32 }
 0x13d   : > { %1686 = vrsqrt.f32 %v462_v33 }
 0x143   : > { %v1685_v34 = vpop.eup %1684 }
 0x144   : > { %v491_v36 = vmul.f32 %v1685_v34, %v483_v6 }
 0x146   : > { %v492_v38 = vmul.f32 %v1517_v35, %v491_v36 }
 0x147   : > { %v1687_v39 = vpop.eup %1686 }
 0x148   : > { %v493_v40 = vadd.f32 %v1518_v37, %v492_v38  ;;  %v464_v41 = vmul.f32 %v1687_v39, %v456_v10 }
 0x14a   : > { %1592 = vmatmul.mubr.msk.f32.vlgmr.msra.gmra.mrb[0].mxu1 %vm450_vm0, %v493_v40  ;;  %v471_v42 = vmul.f32 %v1517_v35, %v464_v41 }
 0x14b   : > { %1596 = vmatprep.mubr.msk.f32.mxu1 %vm1715_vm1, %v1716_v23 }
 0x14c   : > { %v478_v43 = vadd.f32 %v1518_v37, %v471_v42 }
 0x14e   : > { %1581 = vmatmul.mubr.msk.f32.vlgmr.msra.gmra.mrb[0].mxu0 %vm450_vm0, %v478_v43 }
 0x14f   : > { %1606 = vmatprep.mubr.msk.f32.mxu0 %vm1715_vm1, %v1716_v23 }
 0x21d   : > { %v648_v45 = vpop.f32.mrb[0].mxu1 }
 0x21e   : > { %v1867_v46 = vadd.f32 %v1521_v44, %v648_v45  ;;  %v1593_v47 = vpop.f32.mrb[1].mxu1 }
 0x220   : > { %1595 = vmatpush3.xpose.msk.msra.mxu1 %vm652_vm2, %v1867_v46  ;;  %819 = vrot.lane.b32.xlu0 %v1867_v46, %s1717_s20 }
 0x221   : > { %v569_v49 = vpop.f32.mrb[0].mxu0  ;;  %1599 = vmatprep.subr.mxu1 %v1716_v23 }
 0x222   : > { %v570_v50 = vadd.f32 %v1519_v48, %v569_v49  ;;  %v1582_v51 = vpop.f32.mrb[1].mxu0  ;;  %v439_v49 = vld [vmem:[%s1962_s6] sm:$0xff] }
 0x224   : > { %1151 = vrot.lane.b32.xlu0 %v1867_v46, %s1718_s22  ;;  %817 = vrot.lane.b32.xlu1 %v570_v50, %s1717_s20  ;;  %s1725_s20 = smov 16  }
 0x225   : > { %1597 = vmatmul.mubr.msk.f32.vlgmr.msra.gmra.mrb[2].mxu1 %vm652_vm2, %v570_v50 }
 0x226   : > { %1601 = vmatprep.mubr.msk.f32.mxu1 %vm1715_vm1, %v1716_v23 }
 0x228   : > { %985 = vrot.lane.b32.xlu1 %v1867_v46, %s1719_s24 }
 0x22c   : > { %983 = vrot.lane.b32.xlu1 %v570_v50, %s1719_s24 }
 0x230   : > { %1149 = vrot.lane.b32.xlu1 %v570_v50, %s1718_s22  ;;  %v440_v50 = vld [vmem:[%s1962_s6 + $0x8] sm:$0xff]  ;;  %s1726_s22 = smov 24  }
 0x231   : > { %v1658_v51 = vpack.c.bf16 %v440_v50, %v439_v49 }
 0x292   : > { %v820_v52 = vpop.permute.xlu0 %819 }
 0x293   : > { %1605 = vmatpush3.xpose.msk.msra.mxu0 %vm652_vm2, %v820_v52  ;;  %v442_v52 = vld [vmem:[%s1962_s6 + $0x18] sm:$0xff] }
 0x294   : > { %1614 = vmatprep.subr.mxu0 %v1716_v23 }
 0x296   : > { %v818_v53 = vpop.permute.xlu1 %817  ;;  %v1152_v56 = vpop.permute.xlu0 %1151 }
 0x297   : > { %1607 = vmatmul.mubr.msk.f32.vlgmr.msra.gmra.mrb[2].mxu0 %vm652_vm2, %v818_v53 }
 0x298   : > { %1616 = vmatprep.mubr.msk.f32.mxu0 %vm1715_vm1, %v1716_v23 }
 0x29a   : > { %v986_v54 = vpop.permute.xlu1 %985 }
 0x29b   : > { %1615 = vmatpush3.xpose.msk.msra.mxu0 %vm652_vm2, %v986_v54 }
 0x29c   : > { %1624 = vmatprep.subr.mxu0 %v1716_v23 }
 0x29e   : > { %v984_v55 = vpop.permute.xlu1 %983 }
 0x29f   : > { %1617 = vmatmul.mubr.msk.f32.vlgmr.msra.gmra.mrb[4].mxu0 %vm652_vm2, %v984_v55 }
 0x2a0   : > { %1625 = vmatpush3.xpose.msk.msra.mxu0 %vm652_vm2, %v1152_v56  ;;  %1626 = vmatprep.mubr.msk.f32.mxu0 %vm1715_vm1, %v1716_v23 }
 0x2a1   : > { %1657 = vmatprep.subr.bf16.mxu0 %v1714_v17 }
 0x2a2   : > { %v1150_v57 = vpop.permute.xlu1 %1149 }
 0x2a3   : > { %1627 = vmatmul.mubr.msk.f32.vlgmr.msra.gmra.mrb[6].mxu0 %vm652_vm2, %v1150_v57 }
 0x2a4   : > { %1642 = vmatprep.mubr.msk.f32.mxu0 %vm1715_vm1, %v1716_v23  ;;  %1659 = vmatpush3.bf16.msra.mxu0 %v1658_v51 }
 0x2a5   : > { %1660 = vmatprep.subr.bf16.mxu0 %v1714_v17 }
 0x2f8   : > { %v725_v58 = vpop.f32.mrb[2].mxu1 }
 0x2f9   : > { %v729_v59 = vmul.f32 0.35355338, %v725_v58  ;;  %v1598_v60 = vpop.f32.mrb[3].mxu1 }
 0x2fb   : > { %v730_v61 = vsel %vm652_vm2, %v729_v59, -inf }
 0x2fc   : > { %731 = vmax.xlane.f32.xlu0 %v730_v61 }
 0x36a   : > { %v891_v62 = vpop.f32.mrb[2].mxu0 }
 0x36b   : > { %v895_v63 = vmul.f32 0.35355338, %v891_v62  ;;  %v1608_v0 = vpop.f32.mrb[3].mxu0 }
 0x36d   : > { %v896_v1 = vsel %vm652_vm2, %v895_v63, -inf }
 0x36e   : > { %897 = vmax.xlane.f32.xlu1 %v896_v1 }
 0x372   : > { %v1057_v3 = vpop.f32.mrb[4].mxu0 }
 0x373   : > { %v1061_v4 = vmul.f32 0.35355338, %v1057_v3  ;;  %v1618_v5 = vpop.f32.mrb[5].mxu0 }
 0x375   : > { %v1062_v6 = vsel %vm652_vm2, %v1061_v4, -inf }
 0x376   : > { %1063 = vmax.xlane.f32.xlu0 %v1062_v6  ;;  %v1223_v7 = vpop.f32.mrb[6].mxu0 }
 0x377   : > { %v1227_v8 = vmul.f32 0.35355338, %v1223_v7  ;;  %v1628_v9 = vpop.f32.mrb[7].mxu0 }
 0x379   : > { %v1228_v10 = vsel %vm652_vm2, %v1227_v8, -inf }
 0x37a   : > { %1229 = vmax.xlane.f32.xlu0 %v1228_v10 }
 0x389   : > { %v732_v11 = vpop.xlane.xlu0 %731 }
 0x38a   : > { %v733_v12 = vsub.f32 %v729_v59, %v732_v11 }
 0x38c   : > { %v734_v13 = vmul.f32 1.442695, %v733_v12 }
 0x38e   : > { %1688 = vpow2.f32 %v734_v13 }
 0x398   : > { %v1689_v14 = vpop.eup %1688 }
 0x399   : > { %v736_v15 = vsel %vm652_vm2, %v1689_v14, 0.0 }
 0x39a   : > { %737 = vadd.xlane.f32.xlu0 %v736_v15 }
 0x3fb   : > { %v898_v16 = vpop.xlane.xlu1 %897 }
 0x3fc   : > { %v899_v18 = vsub.f32 %v895_v63, %v898_v16 }
 0x3fe   : > { %v900_v19 = vmul.f32 1.442695, %v899_v18 }
 0x400   : > { %1690 = vpow2.f32 %v900_v19 }
 0x403   : > { %v1064_v20 = vpop.xlane.xlu0 %1063 }
 0x404   : > { %v1065_v21 = vsub.f32 %v1061_v4, %v1064_v20  ;;  %v1535_v4 = vld [vmem:[%s1963_s7] ss:$0 sm:$0xff] }
 0x406   : > { %v1066_v22 = vmul.f32 1.442695, %v1065_v21  ;;  %v1538_v21 = vld [vmem:[%s1967_s11] ss:$0 sm:$0xff] }
 0x407   : > { %v1230_v28 = vpop.xlane.xlu0 %1229 }
 0x408   : > { %1692 = vpow2.f32 %v1066_v22  ;;  %v1231_v29 = vsub.f32 %v1227_v8, %v1230_v28 }
 0x40a   : > { %v1691_v24 = vpop.eup %1690  ;;  %v1232_v30 = vmul.f32 1.442695, %v1231_v29 }
 0x40b   : > { %v902_v25 = vsel %vm652_vm2, %v1691_v24, 0.0 }
 0x40c   : > { %903 = vadd.xlane.f32.xlu1 %v902_v25  ;;  %1694 = vpow2.f32 %v1232_v30 }
 0x412   : > { %v1693_v26 = vpop.eup %1692 }
 0x413   : > { %v1068_v27 = vsel %vm652_vm2, %v1693_v26, 0.0 }
 0x414   : > { %1069 = vadd.xlane.f32.xlu0 %v1068_v27 }
 0x416   : > { %v1695_v31 = vpop.eup %1694 }
 0x417   : > { %v1234_v32 = vsel %vm652_vm2, %v1695_v31, 0.0 }
 0x41d   : > { %907 = vrot.lane.b32.xlu1 %v1867_v46, %s1720_s25 }
 0x421   : > { %1073 = vrot.lane.b32.xlu1 %v1867_v46, %s1721_s26 }
 0x427   : > { %v738_v33 = vpop.xlane.xlu0 %737 }
 0x428   : > { %1696 = vrcp.f32 %v738_v33 }
 0x42a   : > { %741 = vrot.lane.b32.xlu0 %v1867_v46, %s1722_s27 }
 0x432   : > { %v1697_v36 = vpop.eup %1696 }
 0x433   : > { %v740_v37 = vmul.f32 %v1697_v36, %v1689_v14 }
 0x445   : > { %1235 = vadd.xlane.f32.xlu1 %v1234_v32 }
 0x456   : > { %1239 = vrot.lane.b32.xlu1 %v1867_v46, %s1723_s28 }
 0x499   : > { %v904_v34 = vpop.xlane.xlu1 %903 }
 0x49a   : > { %1698 = vrcp.f32 %v904_v34 }
 0x49d   : > { %v908_v38 = vpop.permute.xlu1 %907 }
 0x4a1   : > { %v1070_v35 = vpop.xlane.xlu0 %1069  ;;  %v1074_v42 = vpop.permute.xlu1 %1073 }
 0x4a2   : > { %1700 = vrcp.f32 %v1070_v35 }
 0x4a4   : > { %v1699_v40 = vpop.eup %1698 }
 0x4a5   : > { %v742_v39 = vpop.permute.xlu0 %741  ;;  %v906_v41 = vmul.f32 %v1699_v40, %v1691_v24 }
 0x4a6   : > { %1600 = vmatpush3.msra.mxu1 %v742_v39 }
 0x4a7   : > { %1602 = vmatmul.mubr.msk.f32.vlgmr.msra.gmra.mrb[4].mxu1 %vm652_vm2, %v740_v37  ;;  %1609 = vmatprep.subr.mxu1 %v1716_v23 }
 0x4a8   : > { %1610 = vmatpush3.msra.mxu1 %v908_v38  ;;  %1611 = vmatprep.mubr.msk.f32.mxu1 %vm1715_vm1, %v1716_v23 }
 0x4a9   : > { %1619 = vmatprep.subr.mxu1 %v1716_v23 }
 0x4ab   : > { %1612 = vmatmul.mubr.msk.f32.vlgmr.msra.gmra.mrb[6].mxu1 %vm652_vm2, %v906_v41 }
 0x4ac   : > { %v1701_v43 = vpop.eup %1700  ;;  %1620 = vmatpush3.msra.mxu1 %v1074_v42  ;;  %1621 = vmatprep.mubr.msk.f32.mxu1 %vm1715_vm1, %v1716_v23 }
 0x4ad   : > { %v1072_v44 = vmul.f32 %v1701_v43, %v1693_v26  ;;  %1629 = vmatprep.subr.mxu1 %v1716_v23 }
 0x4af   : > { %1622 = vmatmul.mubr.msk.f32.vlgmr.msra.gmra.mrb[8].mxu1 %vm652_vm2, %v1072_v44 }
 0x4b0   : > { %1631 = vmatprep.mubr.msk.f32.mxu1 %vm1715_vm1, %v1716_v23  ;;  %v441_v23 = vld [vmem:[%s1962_s6 + $0x10] sm:$0xff] }
 0x4b1   : > { %v1661_v53 = vpack.c.bf16 %v442_v52, %v441_v23 }
 0x4b3   : > { %1662 = vmatpush3.bf16.msra.mxu0 %v1661_v53 }
 0x4d2   : > { %v1236_v45 = vpop.xlane.xlu1 %1235 }
 0x4d3   : > { %1702 = vrcp.f32 %v1236_v45 }
 0x4d6   : > { %v1240_v46 = vpop.permute.xlu1 %1239 }
 0x4d7   : > { %1630 = vmatpush3.msra.mxu1 %v1240_v46 }
 0x4dd   : > { %v1703_v47 = vpop.eup %1702 }
 0x4de   : > { %v1238_v48 = vmul.f32 %v1703_v47, %v1695_v31 }
 0x4e0   : > { %1632 = vmatmul.mubr.msk.f32.vlgmr.msra.gmra.mrb[10].mxu1 %vm652_vm2, %v1238_v48 }
 0x57a   : > { %v813_v54 = vpop.f32.mrb[4].mxu1 }
 0x57b   : > { %v1603_v55 = vpop.f32.mrb[5].mxu1 }
 0x57e   : > { %v979_v56 = vpop.f32.mrb[6].mxu1 }
 0x57f   : > { %1316 = vrot.lane.b32.xlu0 %v979_v56, %s1724_s19  ;;  %v1613_v57 = vpop.f32.mrb[7].mxu1 }
 0x582   : > { %v1145_v58 = vpop.f32.mrb[8].mxu1 }
 0x583   : > { %1320 = vrot.lane.b32.xlu1 %v1145_v58, %s1725_s20  ;;  %v1623_v59 = vpop.f32.mrb[9].mxu1 }
 0x5b3   : > { %v1311_v60 = vpop.f32.mrb[10].mxu1 }
 0x5b4   : > { %1324 = vrot.lane.b32.xlu0 %v1311_v60, %s1726_s22  ;;  %v1633_v61 = vpop.f32.mrb[11].mxu1 }
 0x5f1   : > { %v1317_v62 = vpop.permute.xlu0 %1316 }
 0x5f2   : > { %v1327_v17 = vsel %vm652_vm2, %v813_v54, %v1317_v62 }
 0x5f5   : > { %v1321_v63 = vpop.permute.xlu1 %1320 }
 0x5f6   : > { %v1329_v0 = vsel %vm1328_vm3, %v1327_v17, %v1321_v63 }
 0x626   : > { %v1325_v1 = vpop.permute.xlu0 %1324 }
 0x627   : > { %v1331_v3 = vsel %vm1330_vm4, %v1329_v0, %v1325_v1 }
 0x628   : > { %1643 = vmatmul.mubr.msk.f32.vlgmr.msra.gmra.mrb[8].mxu0 %vm450_vm0, %v1331_v3 }
 0x6fb   : > { %v1407_v5 = vpop.f32.mrb[8].mxu0 }
 0x6fc   : > { %v1408_v6 = vadd.f32 %v1535_v4, %v1407_v5  ;;  %v1644_v7 = vpop.f32.mrb[9].mxu0 }
 0x6fe   : > { %v1411_v8 = vadd.f32 %v1408_v6, %v1811_v2  ;;  %v1537_v2 = vld [vmem:[%s1966_s10] ss:$0 sm:$0xff] }
 0x700   : > { %v1412_v9 = vsel %vm450_vm0, %v1411_v8, 0.0 }
 0x701   : > { %1413 = vadd.xlane.f32.xlu1 %v1412_v9 }
 0x78e   : > { %v1414_v10 = vpop.xlane.xlu1 %1413 }
 0x78f   : > { %v1415_v11 = vmul.f32 0.03125, %v1414_v10 }
 0x791   : > { %v1416_v12 = vsub.f32 %v1411_v8, %v1415_v11 }
 0x793   : > { %v1417_v13 = vmul.f32 %v1416_v12, %v1416_v12 }
 0x795   : > { %v1418_v14 = vsel %vm450_vm0, %v1417_v13, 0.0 }
 0x796   : > { %1419 = vadd.xlane.f32.xlu0 %v1418_v14 }
 0x823   : > { %v1420_v15 = vpop.xlane.xlu0 %1419 }
 0x824   : > { %v1421_v16 = vmul.f32 0.03125, %v1420_v15 }
 0x826   : > { %v1422_v18 = vadd.f32 1e-05, %v1421_v16 }
 0x828   : > { %1704 = vrsqrt.f32 %v1422_v18 }
 0x832   : > { %v1705_v19 = vpop.eup %1704 }
 0x833   : > { %v1424_v20 = vmul.f32 %v1705_v19, %v1416_v12 }
 0x835   : > { %v1431_v22 = vmul.f32 %v1537_v2, %v1424_v20 }
 0x837   : > { %v1438_v24 = vadd.f32 %v1538_v21, %v1431_v22 }
 0x839   : > { %1439 = vst.msk [vmem:[%s428_s14] sm:$0xff] %vm450_vm0, %v1438_v24 }
 0x83a PF: > { %s22_s21 = sadd.s32 1, %s1712_s21  }
 0x83b   : > { %p19_p4 = scmp.ge.s32.totalorder %s22_s21, 4  }
 0x83d   :  { %21 = sbr.rel (!%p19_p4) target bundleno = 1 (0x1), region = 101 }

// kernel: cross_mambaformer_forward.6
= control target key start
LH: loop header
LB: loop body
LE: loop exit
PB: predicated region body
PF: predicated region fallthrough
CT: control target
= control target key end

     0   :  { %s2851_s21 = smov 0   ;;  %s3107_s0 = inlined_call_operand.vmem [shape: f32[3,2,8,32], index: 0, kind: input, shape index: {}, may-alias: {0,12}]   ;;  %s3108_s1 = inlined_call_operand.vmem [shape: f32[3,2,8,32], index: 1, kind: input, shape index: {}]   ;;  %s3109_s2 = inlined_call_operand.vmem [shape: f32[2,32,32], index: 2, kind: input, shape index: {}]   ;;  %s3110_s3 = inlined_call_operand.vmem [shape: f32[2,1,32], index: 3, kind: input, shape index: {}]   ;;  %s3111_s4 = inlined_call_operand.vmem [shape: f32[2,32,64], index: 4, kind: input, shape index: {}]   ;;  %s3112_s5 = inlined_call_operand.vmem [shape: f32[2,1,64], index: 5, kind: input, shape index: {}]   ;;  %s3113_s6 = inlined_call_operand.vmem [shape: f32[2,32,32], index: 6, kind: input, shape index: {}]   ;;  %s3114_s7 = inlined_call_operand.vmem [shape: f32[2,1,32], index: 7, kind: input, shape index: {}]   ;;  %s3115_s8 = inlined_call_operand.vmem [shape: f32[2,1,32], index: 8, kind: input, shape index: {}]   ;;  %s3116_s9 = inlined_call_operand.vmem [shape: f32[2,1,32], index: 9, kind: input, shape index: {}]   ;;  %s3117_s10 = inlined_call_operand.vmem [shape: f32[1,32], index: 10, kind: input, shape index: {}]   ;;  %s3118_s11 = inlined_call_operand.vmem [shape: f32[1,32], index: 11, kind: input, shape index: {}]   ;;  %s3119_s12 = inlined_call_operand.vmem [shape: f32[3,2,8,32], index: 12, kind: output, shape index: {}, may-alias: {0,12}]  }
   0x1 LB: > { %s2857_s22 = sadd.s32 4294967295, %s2772_s21   ;;  %p2460_p0 = scmp.ge.s32.totalorder %s2772_s21, 1  ;;  %s2772_s21 = sphi %s2851_s21, %s22_s21  }
   0x2   : > { %p438_p1 = scmp.lt.s32.totalorder %s2772_s21, 3 }
   0x4   : > { %p439_p2 = pnand %p2460_p0, %p438_p1 }
   0x5   : > { %v577_v0 = vld [vmem:[%s3108_s1] sm:$0xff] (!%p439_p2)  ;;  %vm579_vm0 = vcmask (!%p439_p2), 261120   ;;  %v578_v1 = vld [vmem:[%s3108_s1 + $0x8] sm:$0xff] (!%p439_p2)  ;;  %s512_s27 = sadd.s32 (!%p439_p2), 1, %s2857_s22  ;;  %p519_p4 = scmp.lt.s32.totalorder (!%p439_p2), %s2857_s22, 1  ;;  %vm2775_vm1 = vmmov (!%p439_p2), 0  }
   0x6   : > { %442 = sbr.rel (%p439_p2) target bundleno = 2124 (0x84c), region = 68  ;;  %v623_v2 = vsel (!%p439_p2), %vm579_vm0, %v577_v0, 0.0  ;;  %p513_p3 = scmp.lt.s32.totalorder (!%p439_p2), %s512_s27, 2  ;;  %v626_v3 = vsel (!%p439_p2), %vm579_vm0, %v578_v1, 0.0  ;;  %vm827_vm2 = vcmask (!%p439_p2), 64512   ;;  %vm1503_vm3 = vcmask (!%p439_p2), 130048  }
   0x7   : > { %624 = vadd.xlane.f32.xlu0 (!%p439_p2), %v623_v2  ;;  %s2777_s23 = smov (!%p439_p2), 120   ;;  %s2778_s24 = smov (!%p439_p2), 104   ;;  %vm1505_vm4 = vcmask (!%p439_p2), 195584  }
   0x8   : > { %s2780_s26 = smov (!%p439_p2), 88   ;;  %s2781_s29 = smov (!%p439_p2), 80  }
   0x9   : > { %s2784_s15 = smov (!%p439_p2), 16  }
   0xb   : > { %627 = vadd.xlane.f32.xlu0 (!%p439_p2), %v626_v3 }
   0xd   : > { %s3121_s27 = smov (!%p513_p3, %s512_s27), 2  ;;  %s3123_s22 = smov (!%p519_p4, %s2857_s22), 1 }
   0xe   : > { %s2510_s28 = sshll.u32 %s3121_s27, 4  ;;  %s2913_s14 = sshll.u32 %s3123_s22, 5 }
   0xf   : > { %s517_s13 = scalar_lea.vmem %s3107_s0, %s2510_s28  ;;  %s531_s17 = scalar_lea.vmem %s3111_s4, %s2913_s14 }
  0x10   : > { %v2878_v4 = vld [vmem:[%s517_s13] sm:$0xff]  ;;  %v2880_v5 = vld [vmem:[%s517_s13 + $0x8] sm:$0xff]  ;;  %v563_v31 = vld [vmem:[%s531_s17 + $0x10] sm:$0xff]  ;;  %s523_s20 = scalar_lea.vmem %s3109_s2, %s2913_s14  ;;  %s545_s25 = scalar_lea.vmem %s3115_s8, %s3123_s22 }
  0x11   : > { %v580_v6 = vsel %vm579_vm0, %v2878_v4, 0.0  ;;  %v583_v7 = vsel %vm579_vm0, %v2880_v5, 0.0  ;;  %v561_v28 = vld [vmem:[%s531_s17] sm:$0xff]  ;;  %v562_v29 = vld [vmem:[%s531_s17 + $0x8] sm:$0xff]  ;;  %v564_v32 = vld [vmem:[%s531_s17 + $0x18] sm:$0xff]  ;;  %s548_s30 = scalar_lea.vmem %s3116_s9, %s3123_s22  ;;  %s534_s16 = scalar_lea.vmem %s3112_s5, %s3123_s22 }
  0x12   : > { %581 = vadd.xlane.f32.xlu1 %v580_v6  ;;  %v2686_v30 = vpack.c.bf16 %v562_v29, %v561_v28  ;;  %v2690_v33 = vpack.c.bf16 %v564_v32, %v563_v31  ;;  %v556_v34 = vld [vmem:[%s523_s20] sm:$0xff]  ;;  %v557_v35 = vld [vmem:[%s523_s20 + $0x8] sm:$0xff]  ;;  %v558_v37 = vld [vmem:[%s523_s20 + $0x10] sm:$0xff]  ;;  %s526_s19 = scalar_lea.vmem %s3110_s3, %s3123_s22  ;;  %s2783_s13 = smov 8  }
  0x13   : > { %v2678_v36 = vpack.c.bf16 %v557_v35, %v556_v34  ;;  %v559_v38 = vld [vmem:[%s523_s20 + $0x18] sm:$0xff]  ;;  %v2471_v53 = vld [vmem:[%s545_s25] ss:$0 sm:$0xff]  ;;  %s2776_s20 = smov 112   ;;  %s2779_s25 = smov 96  }
  0x14   : > { %2687 = vmatprep.subr.bf16.mxu1 %v2686_v30  ;;  %v2682_v39 = vpack.c.bf16 %v559_v38, %v558_v37  ;;  %v2472_v55 = vld [vmem:[%s548_s30] ss:$0 sm:$0xff]  ;;  %s2782_s30 = smov 72  }
  0x15   : > { %2689 = vmatpush3.bf16.msra.mxu1 %v2686_v30  ;;  %2679 = vmatprep.subr.bf16.mxu0 %v2678_v36 }
  0x16   : > { %584 = vadd.xlane.f32.xlu1 %v583_v7  ;;  %2691 = vmatprep.subr.bf16.mxu1 %v2690_v33 }
  0x17   : > { %2681 = vmatpush3.bf16.msra.mxu0 %v2678_v36 }
  0x18   : > { %2683 = vmatprep.subr.bf16.mxu0 %v2682_v39 }
  0x19   : > { %2693 = vmatpush3.bf16.msra.mxu1 %v2690_v33 }
  0x1b   : > { %2685 = vmatpush3.bf16.msra.mxu0 %v2682_v39 }
  0x94   : > { %v625_v8 = vpop.xlane.xlu0 %624 }
  0x95   : > { %v629_v9 = vmul.f32 0.03125, %v625_v8  ;;  %v2774_v8 = vmov 0.0  }
  0x96   : > { %2587 = vmatprep.subr.mxu1 %v2774_v8  ;;  %2597 = vmatprep.subr.mxu0 %v2774_v8 }
  0x97   : > { %v2886_v10 = vsub.f32 %v577_v0, %v629_v9  ;;  %v2476_v9 = vld [vmem:[%s534_s16] ss:$0 sm:$0xff]  ;;  %s2785_s16 = smov 24  }
  0x98   : > { %v628_v11 = vpop.xlane.xlu0 %627 }
  0x99   : > { %v630_v12 = vmul.f32 0.03125, %v628_v11  ;;  %v633_v13 = vmul.f32 %v2886_v10, %v2886_v10 }
  0x9b   : > { %v2890_v14 = vsub.f32 %v578_v1, %v630_v12  ;;  %v635_v16 = vsel %vm579_vm0, %v633_v13, 0.0  ;;  %v2473_v13 = vld [vmem:[%s526_s19] ss:$0 sm:$0xff]  ;;  %s539_s19 = scalar_lea.vmem %s3113_s6, %s2913_s14 }
  0x9c   : > { %636 = vadd.xlane.f32.xlu0 %v635_v16 }
  0x9d   : > { %v634_v18 = vmul.f32 %v2890_v14, %v2890_v14 }
  0x9f   : > { %v582_v15 = vpop.xlane.xlu1 %581  ;;  %v638_v21 = vsel %vm579_vm0, %v634_v18, 0.0 }
  0xa0   : > { %v587_v17 = vmul.f32 0.03125, %v582_v15  ;;  %639 = vadd.xlane.f32.xlu1 %v638_v21 }
  0xa2   : > { %v2896_v19 = vsub.f32 %v2878_v4, %v587_v17 }
  0xa3   : > { %v585_v20 = vpop.xlane.xlu1 %584 }
  0xa4   : > { %v588_v22 = vmul.f32 0.03125, %v585_v20  ;;  %v591_v23 = vmul.f32 %v2896_v19, %v2896_v19 }
  0xa6   : > { %v2902_v24 = vsub.f32 %v2880_v5, %v588_v22  ;;  %v593_v25 = vsel %vm579_vm0, %v591_v23, 0.0 }
  0xa7   : > { %594 = vadd.xlane.f32.xlu0 %v593_v25 }
  0xa8   : > { %v592_v26 = vmul.f32 %v2902_v24, %v2902_v24 }
  0xaa   : > { %v596_v27 = vsel %vm579_vm0, %v592_v26, 0.0 }
  0xab   : > { %597 = vadd.xlane.f32.xlu1 %v596_v27 }
 0x129   : > { %v637_v40 = vpop.xlane.xlu0 %636 }
 0x12a   : > { %v641_v41 = vmul.f32 0.03125, %v637_v40 }
 0x12c   : > { %v643_v42 = vadd.f32 1e-05, %v641_v41 }
 0x12d   : > { %v640_v43 = vpop.xlane.xlu1 %639 }
 0x12e   : > { %2722 = vrsqrt.f32 %v643_v42  ;;  %v642_v44 = vmul.f32 0.03125, %v640_v43 }
 0x130   : > { %v644_v45 = vadd.f32 1e-05, %v642_v44 }
 0x132   : > { %2724 = vrsqrt.f32 %v644_v45 }
 0x134   : > { %v595_v46 = vpop.xlane.xlu0 %594 }
 0x135   : > { %v599_v47 = vmul.f32 0.03125, %v595_v46 }
 0x137   : > { %v601_v48 = vadd.f32 1e-05, %v599_v47 }
 0x138   : > { %v598_v49 = vpop.xlane.xlu1 %597  ;;  %v2723_v52 = vpop.eup %2722 }
 0x139   : > { %2726 = vrsqrt.f32 %v601_v48  ;;  %v600_v50 = vmul.f32 0.03125, %v598_v49  ;;  %v647_v54 = vmul.f32 %v2723_v52, %v2886_v10 }
 0x13b   : > { %v602_v51 = vadd.f32 1e-05, %v600_v50  ;;  %v649_v56 = vmul.f32 %v2471_v53, %v647_v54 }
 0x13c   : > { %v2725_v57 = vpop.eup %2724 }
 0x13d   : > { %2728 = vrsqrt.f32 %v602_v51  ;;  %v651_v58 = vadd.f32 %v2472_v55, %v649_v56  ;;  %v648_v59 = vmul.f32 %v2725_v57, %v2890_v14 }
 0x13f   : > { %2584 = vmatprep.mubr.msk.f32.mxu1 %vm579_vm0, %v651_v58  ;;  %v650_v61 = vmul.f32 %v2471_v53, %v648_v59 }
 0x141   : > { %v652_v63 = vadd.f32 %v2472_v55, %v650_v61 }
 0x143   : > { %v2727_v60 = vpop.eup %2726  ;;  %2585 = vmatmul.mubr.msk.f32.vlgmr.msra.gmra.mrb[0].mxu1 %vm579_vm0, %v652_v63 }
 0x144   : > { %v605_v62 = vmul.f32 %v2727_v60, %v2896_v19  ;;  %2589 = vmatprep.mubr.msk.f32.mxu1 %vm2775_vm1, %v2774_v8 }
 0x146   : > { %v613_v0 = vmul.f32 %v2471_v53, %v605_v62 }
 0x147   : > { %v2729_v1 = vpop.eup %2728 }
 0x148   : > { %v621_v2 = vadd.f32 %v2472_v55, %v613_v0  ;;  %v606_v3 = vmul.f32 %v2729_v1, %v2902_v24 }
 0x14a   : > { %2573 = vmatprep.mubr.msk.f32.mxu0 %vm579_vm0, %v621_v2  ;;  %v614_v6 = vmul.f32 %v2471_v53, %v606_v3 }
 0x14c   : > { %v622_v7 = vadd.f32 %v2472_v55, %v614_v6 }
 0x14e   : > { %2574 = vmatmul.mubr.msk.f32.vlgmr.msra.gmra.mrb[0].mxu0 %vm579_vm0, %v622_v7 }
 0x14f   : > { %2599 = vmatprep.mubr.msk.f32.mxu0 %vm2775_vm1, %v2774_v8 }
 0x216   : > { %v2586_v10 = vpop.f32.mrb[0].mxu1 }
 0x217   : > { %v818_v11 = vpop.f32.mrb[1].mxu1  ;;  %v2961_v17 = vadd.f32 %v2586_v10, %v2476_v9 }
 0x218   : > { %v2949_v12 = vadd.f32 %v2476_v9, %v818_v11 }
 0x21a   : > { %1160 = vrot.lane.b32.xlu1 %v2949_v12, %s2776_s20  ;;  %994 = vrot.lane.b32.xlu0 %v2949_v12, %s2777_s23 }
 0x21b   : > { %2588 = vmatpush3.xpose.msk.msra.mxu1 %vm827_vm2, %v2949_v12 }
 0x21c   : > { %2592 = vmatprep.subr.mxu1 %v2774_v8 }
 0x21e   : > { %1326 = vrot.lane.b32.xlu0 %v2949_v12, %s2778_s24 }
 0x221   : > { %v2575_v14 = vpop.f32.mrb[0].mxu0 }
 0x222   : > { %v731_v15 = vpop.f32.mrb[1].mxu0  ;;  %1673 = vrot.lane.b32.xlu0 %v2961_v17, %s2777_s23  ;;  %v737_v18 = vadd.f32 %v2575_v14, %v2473_v13 }
 0x223   : > { %v732_v16 = vadd.f32 %v2473_v13, %v731_v15 }
 0x225   : > { %992 = vrot.lane.b32.xlu1 %v732_v16, %s2777_s23  ;;  %2590 = vmatmul.mubr.msk.f32.vlgmr.msra.gmra.mrb[2].mxu1 %vm827_vm2, %v732_v16 }
 0x226   : > { %2594 = vmatprep.mubr.msk.f32.mxu1 %vm2775_vm1, %v2774_v8  ;;  %1839 = vrot.lane.b32.xlu0 %v2961_v17, %s2776_s20 }
 0x229   : > { %1158 = vrot.lane.b32.xlu1 %v732_v16, %s2776_s20 }
 0x22a   : > { %2005 = vrot.lane.b32.xlu0 %v2961_v17, %s2778_s24 }
 0x22d   : > { %1324 = vrot.lane.b32.xlu1 %v732_v16, %s2778_s24 }
 0x231   : > { %1671 = vrot.lane.b32.xlu1 %v737_v18, %s2777_s23  ;;  %s542_s23 = scalar_lea.vmem %s3114_s7, %s3123_s22 }
 0x235   : > { %1837 = vrot.lane.b32.xlu1 %v737_v18, %s2776_s20 }
 0x239   : > { %2003 = vrot.lane.b32.xlu1 %v737_v18, %s2778_s24 }
 0x28c   : > { %v995_v19 = vpop.permute.xlu0 %994  ;;  %v1161_v20 = vpop.permute.xlu1 %1160 }
 0x28d   : > { %2598 = vmatpush3.xpose.msk.msra.mxu0 %vm827_vm2, %v995_v19 }
 0x28e   : > { %2607 = vmatprep.subr.mxu0 %v2774_v8 }
 0x290   : > { %v1327_v22 = vpop.permute.xlu0 %1326 }
 0x294   : > { %v1674_v25 = vpop.permute.xlu0 %1673 }
 0x297   : > { %v993_v21 = vpop.permute.xlu1 %992 }
 0x298   : > { %2600 = vmatmul.mubr.msk.f32.vlgmr.msra.gmra.mrb[2].mxu0 %vm827_vm2, %v993_v21  ;;  %v1840_v27 = vpop.permute.xlu0 %1839 }
 0x299   : > { %2608 = vmatpush3.xpose.msk.msra.mxu0 %vm827_vm2, %v1161_v20  ;;  %2609 = vmatprep.mubr.msk.f32.mxu0 %vm2775_vm1, %v2774_v8 }
 0x29a   : > { %2617 = vmatprep.subr.mxu0 %v2774_v8 }
 0x29b   : > { %v1159_v23 = vpop.permute.xlu1 %1158 }
 0x29c   : > { %2610 = vmatmul.mubr.msk.f32.vlgmr.msra.gmra.mrb[4].mxu0 %vm827_vm2, %v1159_v23  ;;  %v2006_v29 = vpop.permute.xlu0 %2005 }
 0x29d   : > { %2618 = vmatpush3.xpose.msk.msra.mxu0 %vm827_vm2, %v1327_v22  ;;  %2619 = vmatprep.mubr.msk.f32.mxu0 %vm2775_vm1, %v2774_v8 }
 0x29e   : > { %2627 = vmatprep.subr.mxu0 %v2774_v8 }
 0x29f   : > { %v1325_v24 = vpop.permute.xlu1 %1324 }
 0x2a0   : > { %2620 = vmatmul.mubr.msk.f32.vlgmr.msra.gmra.mrb[6].mxu0 %vm827_vm2, %v1325_v24 }
 0x2a1   : > { %2628 = vmatpush3.xpose.msk.msra.mxu0 %vm827_vm2, %v2961_v17  ;;  %2629 = vmatprep.mubr.msk.f32.mxu0 %vm2775_vm1, %v2774_v8 }
 0x2a2   : > { %2637 = vmatprep.subr.mxu0 %v2774_v8 }
 0x2a3   : > { %v1672_v26 = vpop.permute.xlu1 %1671 }
 0x2a4   : > { %2630 = vmatmul.mubr.msk.f32.vlgmr.msra.gmra.mrb[8].mxu0 %vm827_vm2, %v737_v18 }
 0x2a5   : > { %2638 = vmatpush3.xpose.msk.msra.mxu0 %vm827_vm2, %v1674_v25  ;;  %2639 = vmatprep.mubr.msk.f32.mxu0 %vm2775_vm1, %v2774_v8 }
 0x2a6   : > { %2647 = vmatprep.subr.mxu0 %v2774_v8 }
 0x2a7   : > { %v1838_v28 = vpop.permute.xlu1 %1837 }
 0x2a8   : > { %2640 = vmatmul.mubr.msk.f32.vlgmr.msra.gmra.mrb[10].mxu0 %vm827_vm2, %v1672_v26 }
 0x2a9   : > { %2648 = vmatpush3.xpose.msk.msra.mxu0 %vm827_vm2, %v1840_v27  ;;  %2649 = vmatprep.mubr.msk.f32.mxu0 %vm2775_vm1, %v2774_v8 }
 0x2aa   : > { %2657 = vmatprep.subr.mxu0 %v2774_v8 }
 0x2ab   : > { %v2004_v30 = vpop.permute.xlu1 %2003 }
 0x2ac   : > { %2650 = vmatmul.mubr.msk.f32.vlgmr.msra.gmra.mrb[12].mxu0 %vm827_vm2, %v1838_v28 }
 0x2ad   : > { %2658 = vmatpush3.xpose.msk.msra.mxu0 %vm827_vm2, %v2006_v29  ;;  %2659 = vmatprep.mubr.msk.f32.mxu0 %vm2775_vm1, %v2774_v8 }
 0x2b0   : > { %2660 = vmatmul.mubr.msk.f32.vlgmr.msra.gmra.mrb[14].mxu0 %vm827_vm2, %v2004_v30 }
 0x2f8   : > { %v900_v31 = vpop.f32.mrb[2].mxu1 }
 0x2f9   : > { %v904_v32 = vmul.f32 0.35355338, %v900_v31  ;;  %v2591_v33 = vpop.f32.mrb[3].mxu1 }
 0x2fb   : > { %v905_v34 = vsel %vm827_vm2, %v904_v32, -inf }
 0x2fc   : > { %906 = vmax.xlane.f32.xlu0 %v905_v34 }
 0x36b   : > { %v1066_v35 = vpop.f32.mrb[2].mxu0 }
 0x36c   : > { %v1070_v36 = vmul.f32 0.35355338, %v1066_v35  ;;  %v2601_v37 = vpop.f32.mrb[3].mxu0 }
 0x36e   : > { %v1071_v38 = vsel %vm827_vm2, %v1070_v36, -inf }
 0x36f   : > { %1072 = vmax.xlane.f32.xlu1 %v1071_v38  ;;  %v1232_v39 = vpop.f32.mrb[4].mxu0 }
 0x370   : > { %v1236_v40 = vmul.f32 0.35355338, %v1232_v39  ;;  %v2611_v41 = vpop.f32.mrb[5].mxu0 }
 0x372   : > { %v1237_v42 = vsel %vm827_vm2, %v1236_v40, -inf }
 0x373   : > { %1238 = vmax.xlane.f32.xlu0 %v1237_v42  ;;  %v1398_v43 = vpop.f32.mrb[6].mxu0 }
 0x374   : > { %v1402_v44 = vmul.f32 0.35355338, %v1398_v43  ;;  %v2621_v45 = vpop.f32.mrb[7].mxu0 }
 0x376   : > { %v1403_v46 = vsel %vm827_vm2, %v1402_v44, -inf }
 0x377   : > { %1404 = vmax.xlane.f32.xlu0 %v1403_v46  ;;  %v1579_v47 = vpop.f32.mrb[8].mxu0 }
 0x378   : > { %v1583_v48 = vmul.f32 0.35355338, %v1579_v47  ;;  %v2631_v49 = vpop.f32.mrb[9].mxu0 }
 0x37a   : > { %v1584_v50 = vsel %vm827_vm2, %v1583_v48, -inf }
 0x37b   : > { %1585 = vmax.xlane.f32.xlu0 %v1584_v50  ;;  %v1745_v51 = vpop.f32.mrb[10].mxu0 }
 0x37c   : > { %v3007_v52 = vmul.f32 0.35355338, %v1745_v51  ;;  %v2641_v53 = vpop.f32.mrb[11].mxu0 }
 0x37e   : > { %v1750_v54 = vsel %vm827_vm2, %v3007_v52, -inf }
 0x37f   : > { %1751 = vmax.xlane.f32.xlu1 %v1750_v54  ;;  %v1911_v55 = vpop.f32.mrb[12].mxu0 }
 0x380   : > { %v1915_v56 = vmul.f32 0.35355338, %v1911_v55  ;;  %v2651_v57 = vpop.f32.mrb[13].mxu0 }
 0x382   : > { %v1916_v58 = vsel %vm827_vm2, %v1915_v56, -inf }
 0x383   : > { %1917 = vmax.xlane.f32.xlu0 %v1916_v58  ;;  %v2077_v59 = vpop.f32.mrb[14].mxu0 }
 0x384   : > { %v2661_v60 = vpop.f32.mrb[15].mxu0  ;;  %v3014_v2 = vmul.f32 0.35355338, %v2077_v59 }
 0x386   : > { %v2082_v3 = vsel %vm827_vm2, %v3014_v2, -inf }
 0x389   : > { %v907_v61 = vpop.xlane.xlu0 %906 }
 0x38a   : > { %v908_v62 = vsub.f32 %v904_v32, %v907_v61 }
 0x38c   : > { %v909_v63 = vmul.f32 1.442695, %v908_v62 }
 0x38e   : > { %2730 = vpow2.f32 %v909_v63 }
 0x390   : > { %916 = vrot.lane.b32.xlu1 %v2949_v12, %s2779_s25 }
 0x398   : > { %v2731_v0 = vpop.eup %2730 }
 0x399   : > { %v911_v1 = vsel %vm827_vm2, %v2731_v0, 0.0 }
 0x39a   : > { %912 = vadd.xlane.f32.xlu0 %v911_v1 }
 0x3b0   : > { %1082 = vrot.lane.b32.xlu0 %v2949_v12, %s2780_s26 }
 0x3b4   : > { %2083 = vmax.xlane.f32.xlu1 %v2082_v3 }
 0x3c5   : > { %1248 = vrot.lane.b32.xlu1 %v2949_v12, %s2781_s29 }
 0x3c9   : > { %1414 = vrot.lane.b32.xlu1 %v2949_v12, %s2782_s30 }
 0x3cd   : > { %1595 = vrot.lane.b32.xlu1 %v2961_v17, %s2779_s25 }
 0x3fc   : > { %v1073_v6 = vpop.xlane.xlu1 %1072 }
 0x3fd   : > { %v1074_v7 = vsub.f32 %v1070_v36, %v1073_v6 }
 0x3ff   : > { %v1075_v9 = vmul.f32 1.442695, %v1074_v7 }
 0x400   : > { %v1239_v10 = vpop.xlane.xlu0 %1238 }
 0x401   : > { %2732 = vpow2.f32 %v1075_v9  ;;  %v1240_v11 = vsub.f32 %v1236_v40, %v1239_v10 }
 0x403   : > { %v1241_v13 = vmul.f32 1.442695, %v1240_v11 }
 0x404   : > { %v1405_v14 = vpop.xlane.xlu0 %1404 }
 0x405   : > { %2734 = vpow2.f32 %v1241_v13  ;;  %v1406_v15 = vsub.f32 %v1402_v44, %v1405_v14 }
 0x407   : > { %v1407_v16 = vmul.f32 1.442695, %v1406_v15 }
 0x408   : > { %v1586_v18 = vpop.xlane.xlu0 %1585 }
 0x409   : > { %2736 = vpow2.f32 %v1407_v16  ;;  %v1587_v19 = vsub.f32 %v1583_v48, %v1586_v18 }
 0x40b   : > { %v2733_v20 = vpop.eup %2732  ;;  %v1588_v21 = vmul.f32 1.442695, %v1587_v19 }
 0x40c   : > { %v1752_v22 = vpop.xlane.xlu1 %1751  ;;  %v1077_v12 = vsel %vm827_vm2, %v2733_v20, 0.0 }
 0x40d   : > { %2738 = vpow2.f32 %v1588_v21  ;;  %1078 = vadd.xlane.f32.xlu1 %v1077_v12  ;;  %v1753_v38 = vsub.f32 %v3007_v52, %v1752_v22 }
 0x40f   : > { %v2735_v23 = vpop.eup %2734  ;;  %v1754_v40 = vmul.f32 1.442695, %v1753_v38 }
 0x410   : > { %v1918_v24 = vpop.xlane.xlu0 %1917  ;;  %v917_v25 = vpop.permute.xlu1 %916  ;;  %v1243_v26 = vsel %vm827_vm2, %v2735_v23, 0.0 }
 0x411   : > { %v1919_v27 = vsub.f32 %v1915_v56, %v1918_v24  ;;  %1244 = vadd.xlane.f32.xlu0 %v1243_v26  ;;  %2593 = vmatpush3.msra.mxu1 %v917_v25  ;;  %v567_v24 = vld [vmem:[%s539_s19 + $0x8] sm:$0xff]  ;;  %v568_v26 = vld [vmem:[%s539_s19 + $0x10] sm:$0xff] }
 0x412   : > { %2602 = vmatprep.subr.mxu1 %v2774_v8 }
 0x413   : > { %v2737_v28 = vpop.eup %2736  ;;  %v1920_v29 = vmul.f32 1.442695, %v1919_v27  ;;  %v569_v27 = vld [vmem:[%s539_s19 + $0x18] sm:$0xff] }
 0x414   : > { %v1409_v30 = vsel %vm827_vm2, %v2737_v28, 0.0 }
 0x415   : > { %2740 = vpow2.f32 %v1920_v29  ;;  %1410 = vadd.xlane.f32.xlu1 %v1409_v30 }
 0x417   : > { %v2739_v31 = vpop.eup %2738 }
 0x418   : > { %v1590_v32 = vsel %vm827_vm2, %v2739_v31, 0.0 }
 0x419   : > { %1591 = vadd.xlane.f32.xlu0 %v1590_v32 }
 0x41f   : > { %v3030_v33 = vpop.eup %2740 }
 0x420   : > { %v1922_v34 = vsel %vm827_vm2, %v3030_v33, 0.0 }
 0x421   : > { %1923 = vadd.xlane.f32.xlu0 %v1922_v34 }
 0x426   : > { %1761 = vrot.lane.b32.xlu1 %v2961_v17, %s2780_s26 }
 0x427   : > { %v913_v35 = vpop.xlane.xlu0 %912 }
 0x428   : > { %2742 = vrcp.f32 %v913_v35 }
 0x429   : > { %2744 = vpow2.f32 %v1754_v40 }
 0x42b   : > { %v1083_v39 = vpop.permute.xlu0 %1082 }
 0x432   : > { %v2743_v36 = vpop.eup %2742 }
 0x433   : > { %v915_v37 = vmul.f32 %v2743_v36, %v2731_v0  ;;  %v2745_v44 = vpop.eup %2744 }
 0x434   : > { %v1756_v45 = vsel %vm827_vm2, %v2745_v44, 0.0 }
 0x435   : > { %2595 = vmatmul.mubr.msk.f32.vlgmr.msra.gmra.mrb[4].mxu1 %vm827_vm2, %v915_v37 }
 0x436   : > { %2603 = vmatpush3.msra.mxu1 %v1083_v39  ;;  %2604 = vmatprep.mubr.msk.f32.mxu1 %vm2775_vm1, %v2774_v8 }
 0x437   : > { %2612 = vmatprep.subr.mxu1 %v2774_v8 }
 0x441   : > { %v2084_v41 = vpop.xlane.xlu1 %2083 }
 0x442   : > { %v2085_v42 = vsub.f32 %v3014_v2, %v2084_v41 }
 0x444   : > { %v2086_v43 = vmul.f32 1.442695, %v2085_v42 }
 0x445   : > { %v1249_v48 = vpop.permute.xlu1 %1248 }
 0x446   : > { %2746 = vpow2.f32 %v2086_v43 }
 0x449   : > { %v1415_v49 = vpop.permute.xlu1 %1414 }
 0x44a   : > { %1757 = vadd.xlane.f32.xlu1 %v1756_v45 }
 0x44d   : > { %v1596_v50 = vpop.permute.xlu1 %1595 }
 0x450   : > { %v2747_v46 = vpop.eup %2746 }
 0x451   : > { %v2088_v47 = vsel %vm827_vm2, %v2747_v46, 0.0 }
 0x452   : > { %2089 = vadd.xlane.f32.xlu0 %v2088_v47  ;;  %v2503_v47 = vld [vmem:[%s542_s23] ss:$0 sm:$0xff] }
 0x45b   : > { %2093 = vrot.lane.b32.xlu1 %v2961_v17, %s2782_s30 }
 0x468   : > { %1927 = vrot.lane.b32.xlu0 %v2961_v17, %s2781_s29 }
 0x49a   : > { %v1079_v51 = vpop.xlane.xlu1 %1078 }
 0x49b   : > { %2748 = vrcp.f32 %v1079_v51 }
 0x49e   : > { %v1245_v52 = vpop.xlane.xlu0 %1244 }
 0x49f   : > { %2750 = vrcp.f32 %v1245_v52 }
 0x4a2   : > { %v1411_v53 = vpop.xlane.xlu1 %1410 }
 0x4a3   : > { %2752 = vrcp.f32 %v1411_v53 }
 0x4a5   : > { %v2749_v54 = vpop.eup %2748 }
 0x4a6   : > { %v1081_v55 = vmul.f32 %v2749_v54, %v2733_v20  ;;  %v1592_v56 = vpop.xlane.xlu0 %1591  ;;  %v1762_v62 = vpop.permute.xlu1 %1761 }
 0x4a7   : > { %2754 = vrcp.f32 %v1592_v56 }
 0x4a8   : > { %2605 = vmatmul.mubr.msk.f32.vlgmr.msra.gmra.mrb[6].mxu1 %vm827_vm2, %v1081_v55 }
 0x4a9   : > { %v2751_v57 = vpop.eup %2750  ;;  %2613 = vmatpush3.msra.mxu1 %v1249_v48  ;;  %2614 = vmatprep.mubr.msk.f32.mxu1 %vm2775_vm1, %v2774_v8 }
 0x4aa   : > { %v1247_v17 = vmul.f32 %v2751_v57, %v2735_v23  ;;  %2622 = vmatprep.subr.mxu1 %v2774_v8  ;;  %v566_v23 = vld [vmem:[%s539_s19] sm:$0xff] }
 0x4ab   : > { %v2694_v25 = vpack.c.bf16 %v567_v24, %v566_v23 }
 0x4ac   : > { %2615 = vmatmul.mubr.msk.f32.vlgmr.msra.gmra.mrb[8].mxu1 %vm827_vm2, %v1247_v17 }
 0x4ad   : > { %v2753_v58 = vpop.eup %2752  ;;  %2623 = vmatpush3.msra.mxu1 %v1415_v49  ;;  %2624 = vmatprep.mubr.msk.f32.mxu1 %vm2775_vm1, %v2774_v8 }
 0x4ae   : > { %v1413_v59 = vmul.f32 %v2753_v58, %v2737_v28  ;;  %2632 = vmatprep.subr.mxu1 %v2774_v8  ;;  %v1924_v63 = vpop.xlane.xlu0 %1923  ;;  %2695 = vmatprep.subr.bf16.mxu0 %v2694_v25  ;;  %v2698_v28 = vpack.c.bf16 %v569_v27, %v568_v26 }
 0x4af   : > { %2697 = vmatpush3.bf16.msra.mxu0 %v2694_v25 }
 0x4b0   : > { %2625 = vmatmul.mubr.msk.f32.vlgmr.msra.gmra.mrb[10].mxu1 %vm827_vm2, %v1413_v59  ;;  %2699 = vmatprep.subr.bf16.mxu0 %v2698_v28 }
 0x4b1   : > { %v2755_v60 = vpop.eup %2754  ;;  %2633 = vmatpush3.msra.mxu1 %v1596_v50  ;;  %2634 = vmatprep.mubr.msk.f32.mxu1 %vm2775_vm1, %v2774_v8 }
 0x4b2   : > { %v1594_v61 = vmul.f32 %v2755_v60, %v2739_v31  ;;  %2642 = vmatprep.subr.mxu1 %v2774_v8 }
 0x4b3   : > { %2701 = vmatpush3.bf16.msra.mxu0 %v2698_v28 }
 0x4b4   : > { %2635 = vmatmul.mubr.msk.f32.vlgmr.msra.gmra.mrb[12].mxu1 %vm827_vm2, %v1594_v61 }
 0x4b5   : > { %2643 = vmatpush3.msra.mxu1 %v1762_v62  ;;  %2644 = vmatprep.mubr.msk.f32.mxu1 %vm2775_vm1, %v2774_v8 }
 0x4b6   : > { %2652 = vmatprep.subr.mxu1 %v2774_v8 }
 0x4d7   : > { %v1758_v0 = vpop.xlane.xlu1 %1757 }
 0x4d8   : > { %2756 = vrcp.f32 %v1758_v0 }
 0x4d9   : > { %2758 = vrcp.f32 %v1924_v63 }
 0x4db   : > { %v2094_v10 = vpop.permute.xlu1 %2093 }
 0x4df   : > { %v2090_v1 = vpop.xlane.xlu0 %2089 }
 0x4e0   : > { %2760 = vrcp.f32 %v2090_v1 }
 0x4e2   : > { %v2757_v2 = vpop.eup %2756 }
 0x4e3   : > { %v1760_v3 = vmul.f32 %v2757_v2, %v2745_v44  ;;  %v1928_v6 = vpop.permute.xlu0 %1927  ;;  %v2759_v7 = vpop.eup %2758 }
 0x4e4   : > { %v1926_v9 = vmul.f32 %v2759_v7, %v3030_v33 }
 0x4e5   : > { %2645 = vmatmul.mubr.msk.f32.vlgmr.msra.gmra.mrb[14].mxu1 %vm827_vm2, %v1760_v3 }
 0x4e6   : > { %2653 = vmatpush3.msra.mxu1 %v1928_v6  ;;  %2654 = vmatprep.mubr.msk.f32.mxu1 %vm2775_vm1, %v2774_v8 }
 0x4e7   : > { %2662 = vmatprep.subr.mxu1 %v2774_v8 }
 0x4e9   : > { %2655 = vmatmul.mubr.msk.f32.vlgmr.msra.gmra.mrb[16].mxu1 %vm827_vm2, %v1926_v9  ;;  %v2506_v9 = vld [vmem:[%s3117_s10] ss:$0 sm:$0xff] }
 0x4ea   : > { %v2761_v11 = vpop.eup %2760  ;;  %2663 = vmatpush3.msra.mxu1 %v2094_v10  ;;  %2664 = vmatprep.mubr.msk.f32.mxu1 %vm2775_vm1, %v2774_v8 }
 0x4eb   : > { %v2092_v13 = vmul.f32 %v2761_v11, %v2747_v46  ;;  %v2507_v11 = vld [vmem:[%s3118_s11] ss:$0 sm:$0xff] }
 0x4ed   : > { %2665 = vmatmul.mubr.msk.f32.vlgmr.msra.gmra.mrb[18].mxu1 %vm827_vm2, %v2092_v13 }
 0x508   : > { %v988_v14 = vpop.f32.mrb[4].mxu1 }
 0x509   : > { %v2596_v15 = vpop.f32.mrb[5].mxu1 }
 0x57b   : > { %v1154_v16 = vpop.f32.mrb[6].mxu1 }
 0x57c   : > { %1491 = vrot.lane.b32.xlu0 %v1154_v16, %s2783_s13  ;;  %v2606_v18 = vpop.f32.mrb[7].mxu1 }
 0x57f   : > { %v1320_v19 = vpop.f32.mrb[8].mxu1 }
 0x580   : > { %1495 = vrot.lane.b32.xlu1 %v1320_v19, %s2784_s15  ;;  %v2616_v20 = vpop.f32.mrb[9].mxu1 }
 0x583   : > { %v1486_v21 = vpop.f32.mrb[10].mxu1 }
 0x584   : > { %1499 = vrot.lane.b32.xlu1 %v1486_v21, %s2785_s16  ;;  %v2626_v22 = vpop.f32.mrb[11].mxu1 }
 0x587   : > { %v1667_v12 = vpop.f32.mrb[12].mxu1 }
 0x588   : > { %v2636_v8 = vpop.f32.mrb[13].mxu1 }
 0x5b8   : > { %v1833_v29 = vpop.f32.mrb[14].mxu1 }
 0x5b9   : > { %2170 = vrot.lane.b32.xlu0 %v1833_v29, %s2783_s13  ;;  %v2646_v30 = vpop.f32.mrb[15].mxu1  ;;  %s554_s13 = scalar_lea.vmem %s3119_s12, %s2510_s28 }
 0x5bc   : > { %v1999_v31 = vpop.f32.mrb[16].mxu1 }
 0x5bd   : > { %2174 = vrot.lane.b32.xlu0 %v1999_v31, %s2784_s15  ;;  %v2656_v32 = vpop.f32.mrb[17].mxu1 }
 0x5c0   : > { %v2165_v33 = vpop.f32.mrb[18].mxu1 }
 0x5c1   : > { %2178 = vrot.lane.b32.xlu1 %v2165_v33, %s2785_s16  ;;  %v2666_v34 = vpop.f32.mrb[19].mxu1 }
 0x5ee   : > { %v1492_v35 = vpop.permute.xlu0 %1491 }
 0x5ef   : > { %v1502_v37 = vsel %vm827_vm2, %v988_v14, %v1492_v35 }
 0x5f2   : > { %v1496_v36 = vpop.permute.xlu1 %1495 }
 0x5f3   : > { %v1504_v38 = vsel %vm1503_vm3, %v1502_v37, %v1496_v36 }
 0x5f6   : > { %v1500_v39 = vpop.permute.xlu1 %1499 }
 0x5f7   : > { %v1506_v40 = vsel %vm1505_vm4, %v1504_v38, %v1500_v39 }
 0x5f8   : > { %2675 = vmatprep.mubr.msk.f32.mxu0 %vm579_vm0, %v1506_v40 }
 0x62b   : > { %v2171_v41 = vpop.permute.xlu0 %2170 }
 0x62c   : > { %v2181_v43 = vsel %vm827_vm2, %v1667_v12, %v2171_v41 }
 0x62f   : > { %v2175_v42 = vpop.permute.xlu0 %2174 }
 0x630   : > { %v2182_v44 = vsel %vm1503_vm3, %v2181_v43, %v2175_v42 }
 0x633   : > { %v2179_v45 = vpop.permute.xlu1 %2178 }
 0x634   : > { %v2183_v46 = vsel %vm1505_vm4, %v2182_v44, %v2179_v45 }
 0x635   : > { %2676 = vmatmul.mubr.msk.f32.vlgmr.msra.gmra.mrb[16].mxu0 %vm579_vm0, %v2183_v46 }
 0x708   : > { %v2677_v48 = vpop.f32.mrb[16].mxu0 }
 0x709   : > { %v2268_v49 = vadd.f32 %v2677_v48, %v2503_v47  ;;  %v2262_v50 = vpop.f32.mrb[17].mxu0 }
 0x70a   : > { %v2263_v51 = vadd.f32 %v2503_v47, %v2262_v50 }
 0x70b   : > { %v2272_v52 = vadd.f32 %v2268_v49, %v2880_v5 }
 0x70c   : > { %v2271_v53 = vadd.f32 %v2263_v51, %v2878_v4 }
 0x70d   : > { %v2276_v54 = vsel %vm579_vm0, %v2272_v52, 0.0 }
 0x70e   : > { %2277 = vadd.xlane.f32.xlu1 %v2276_v54  ;;  %v2273_v55 = vsel %vm579_vm0, %v2271_v53, 0.0 }
 0x70f   : > { %2274 = vadd.xlane.f32.xlu0 %v2273_v55 }
 0x79b   : > { %v2278_v56 = vpop.xlane.xlu1 %2277 }
 0x79c   : > { %v2280_v57 = vmul.f32 0.03125, %v2278_v56  ;;  %v2275_v17 = vpop.xlane.xlu0 %2274 }
 0x79d   : > { %v2279_v58 = vmul.f32 0.03125, %v2275_v17 }
 0x79e   : > { %v2282_v59 = vsub.f32 %v2272_v52, %v2280_v57 }
 0x79f   : > { %v2281_v60 = vsub.f32 %v2271_v53, %v2279_v58 }
 0x7a0   : > { %v2284_v63 = vmul.f32 %v2282_v59, %v2282_v59 }
 0x7a1   : > { %v2283_v61 = vmul.f32 %v2281_v60, %v2281_v60 }
 0x7a2   : > { %v2288_v5 = vsel %vm579_vm0, %v2284_v63, 0.0 }
 0x7a3   : > { %v2285_v62 = vsel %vm579_vm0, %v2283_v61, 0.0 }
 0x7a4   : > { %2286 = vadd.xlane.f32.xlu0 %v2285_v62 }
 0x7a8   : > { %2289 = vadd.xlane.f32.xlu0 %v2288_v5 }
 0x831   : > { %v2287_v4 = vpop.xlane.xlu0 %2286 }
 0x832   : > { %v2291_v0 = vmul.f32 0.03125, %v2287_v4 }
 0x834   : > { %v2293_v1 = vadd.f32 1e-05, %v2291_v0 }
 0x835   : > { %v2290_v2 = vpop.xlane.xlu0 %2289 }
 0x836   : > { %2762 = vrsqrt.f32 %v2293_v1  ;;  %v2292_v3 = vmul.f32 0.03125, %v2290_v2 }
 0x838   : > { %v2294_v6 = vadd.f32 1e-05, %v2292_v3 }
 0x83a   : > { %2764 = vrsqrt.f32 %v2294_v6 }
 0x840   : > { %v2763_v7 = vpop.eup %2762 }
 0x841   : > { %v2297_v10 = vmul.f32 %v2763_v7, %v2281_v60 }
 0x843   : > { %v2305_v13 = vmul.f32 %v2506_v9, %v2297_v10 }
 0x844   : > { %v2765_v14 = vpop.eup %2764 }
 0x845   : > { %v2313_v15 = vadd.f32 %v2507_v11, %v2305_v13  ;;  %v2298_v16 = vmul.f32 %v2765_v14, %v2282_v59 }
 0x847   : > { %2315 = vst.msk [vmem:[%s554_s13] sm:$0xff] %vm579_vm0, %v2313_v15  ;;  %v2306_v18 = vmul.f32 %v2506_v9, %v2298_v16 }
 0x849   : > { %v2314_v19 = vadd.f32 %v2507_v11, %v2306_v18 }
 0x84b   : > { %2316 = vst.msk [vmem:[%s554_s13 + $0x8] sm:$0xff] %vm579_vm0, %v2314_v19 }
 0x84c PF: > { %s22_s21 = sadd.s32 1, %s2772_s21  }
 0x84d   : > { %p19_p5 = scmp.ge.s32.totalorder %s22_s21, 4  }
 0x84f   :  { %21 = sbr.rel (!%p19_p5) target bundleno = 1 (0x1), region = 122 }

// kernel: cross_mambaformer_forward.4
= control target key start
LH: loop header
LB: loop body
LE: loop exit
PB: predicated region body
PF: predicated region fallthrough
CT: control target
= control target key end

     0   :  { %s6448_s0 = inlined_call_operand.vmem [shape: f32[3,2,8,32], index: 0, kind: input, shape index: {}]   ;;  %s6449_s1 = inlined_call_operand.vmem [shape: f32[3,32,128], index: 1, kind: input, shape index: {}]   ;;  %s6450_s2 = inlined_call_operand.vmem [shape: f32[3,4,64], index: 2, kind: input, shape index: {}]   ;;  %s6451_s3 = inlined_call_operand.vmem [shape: f32[3,1,64], index: 3, kind: input, shape index: {}]   ;;  %s6452_s4 = inlined_call_operand.vmem [shape: f32[3,64,2], index: 4, kind: input, shape index: {}]   ;;  %s6453_s5 = inlined_call_operand.vmem [shape: f32[3,16,64], index: 5, kind: input, shape index: {}]   ;;  %s6454_s6 = inlined_call_operand.vmem [shape: f32[3,16,64], index: 6, kind: input, shape index: {}]   ;;  %s6455_s7 = inlined_call_operand.vmem [shape: f32[3,2,64], index: 7, kind: input, shape index: {}]   ;;  %s6456_s8 = inlined_call_operand.vmem [shape: f32[3,1,64], index: 8, kind: input, shape index: {}]   ;;  %s6457_s9 = inlined_call_operand.vmem [shape: f32[3,16,64], index: 9, kind: input, shape index: {}]   ;;  %s6458_s10 = inlined_call_operand.vmem [shape: f32[3,1,64], index: 10, kind: input, shape index: {}]   ;;  %s6459_s11 = inlined_call_operand.vmem [shape: f32[3,64,32], index: 11, kind: input, shape index: {}]   ;;  %s6460_s12 = inlined_call_operand.vmem [shape: f32[3,1,32], index: 12, kind: input, shape index: {}]   ;;  %s6461_s13 = inlined_call_operand.vmem [shape: f32[3,1,32], index: 13, kind: input, shape index: {}]   ;;  %s6462_s14 = inlined_call_operand.vmem [shape: f32[3,32,32], index: 14, kind: input, shape index: {}]   ;;  %s6463_s15 = inlined_call_operand.vmem [shape: f32[3,1,32], index: 15, kind: input, shape index: {}]   ;;  %s6464_s16 = inlined_call_operand.vmem [shape: f32[3,32,64], index: 16, kind: input, shape index: {}]   ;;  %s6465_s17 = inlined_call_operand.vmem [shape: f32[3,1,64], index: 17, kind: input, shape index: {}]   ;;  %s6466_s18 = inlined_call_operand.vmem [shape: f32[3,32,32], index: 18, kind: input, shape index: {}]   ;;  %s6467_s19 = inlined_call_operand.vmem [shape: f32[3,1,32], index: 19, kind: input, shape index: {}]   ;;  %s6468_s20 = inlined_call_operand.vmem [shape: f32[3,1,32], index: 20, kind: input, shape index: {}]   ;;  %s6469_s21 = inlined_call_operand.vmem [shape: f32[3,1,32], index: 21, kind: input, shape index: {}]   ;;  %s6470_s22 = inlined_call_operand.vmem [shape: f32[1,32], index: 22, kind: input, shape index: {}]   ;;  %s6471_s23 = inlined_call_operand.vmem [shape: f32[1,32], index: 23, kind: input, shape index: {}]   ;;  %s6472_s24 = inlined_call_operand.vmem [shape: f32[3,2,8,32], index: 24, kind: output, shape index: {}]  }
   0x1   :  { %6484 = sst [smem:[#allocation30_spill]] %s6448_s0 }
   0x2   :  { %6485 = sst [smem:[#allocation31_spill]] %s6449_s1 }
   0x3   :  { %6486 = sst [smem:[#allocation32_spill]] %s6450_s2 }
   0x4   :  { %6487 = sst [smem:[#allocation33_spill]] %s6451_s3 }
   0x5   :  { %6488 = sst [smem:[#allocation34_spill]] %s6452_s4 }
   0x6   :  { %6489 = sst [smem:[#allocation35_spill]] %s6453_s5  ;;  %s5449_s5 = smov 0  }
   0x7   :  { %6490 = sst [smem:[#allocation36_spill]] %s6454_s6 }
   0x8   :  { %6491 = sst [smem:[#allocation37_spill]] %s6455_s7 }
   0x9   :  { %6492 = sst [smem:[#allocation38_spill]] %s6456_s8 }
   0xa LB: > { %s4603_s26 = sadd.s32 4294967295, %s5293_s5   ;;  %p4607_p0 = scmp.ge.s32.totalorder %s5293_s5, 1  ;;  %s5293_s5 = sphi %s5449_s5, %s34_s5  }
   0xb   : > { %p850_p1 = scmp.lt.s32.totalorder %s5293_s5, 4 }
   0xd   : > { %p851_p2 = pnand %p4607_p0, %p850_p1 }
   0xf   : > { %854 = sbr.rel (%p851_p2) target bundleno = 3652 (0xe44), region = 116 }
  0x16   : > { %p999_p3 = scmp.lt.s32.totalorder %s4603_s26, 2  ;;  %s6493_s29 = sld [smem:[#allocation31_spill]]  ;;  %vm1146_vm0 = vcmask 261120   ;;  %vm1246_vm1 = vcmask 1041408   ;;  %v1228_v21 = vlaneseq  ;;  %vm1236_vm2 = vcmask 1040384  }
  0x17   : > { %s6494_s3 = sld [smem:[#allocation30_spill]]  ;;  %s6495_s6 = sld [smem:[#allocation34_spill]]  ;;  %vm1256_vm3 = vcmask 1042432   ;;  %vm1303_vm4 = vcmask 523264   ;;  %vm1391_vm6 = vcmask 15360   ;;  %vm2485_vm7 = vcmask 1043456  }
  0x18   : > { %s6562_s26 = smov (!%p999_p3, %s4603_s26), 2  ;;  %s6496_s30 = sld [smem:[#allocation37_spill]]  ;;  %v5492_v22 = vshrl.u32 %v1228_v21, 7  ;;  %vm5545_vm5 = vmpackc.low %vm1303_vm4, %vm1303_vm4  ;;  %vm2487_vm8 = vcmask 1044480   ;;  %vm2489_vm9 = vcmask 1045504   ;;  %vm2491_vm10 = vcmask 1046528  }
  0x19   : > { %s5460_s27 = sshll.u32 %s6562_s26, 5  ;;  %s5463_s28 = sshll.u32 %s6562_s26, 4  ;;  %vm5313_vm11 = vmmov 0   ;;  %vm2836_vm12 = vcmask 64512   ;;  %vm3512_vm13 = vcmask 130048   ;;  %vm3514_vm14 = vcmask 195584  }
  0x1a   : > { %s6473_s8 = sshll.u32 %s6562_s26, 6  ;;  %s4612_s4 = sshll.u32 %s6562_s26, 2  ;;  %v5498_v23 = vsub.s32 3, %v5492_v22  ;;  %v5501_v24 = vsub.s32 2, %v5492_v22  ;;  %v5504_v26 = vsub.s32 1, %v5492_v22  ;;  %v5511_v30 = vsub.s32 0, %v5492_v22 }
  0x1c   : > { %s1008_s0 = scalar_lea.vmem %s6493_s29, %s5460_s27  ;;  %s4619_s29 = sshll.u32 %s6562_s26, 1 }
  0x1d   : > { %s5473_s25 = scalar_lea.vmem %s6494_s3, %s5463_s28  ;;  %v1092_v0 = vld [vmem:[%s1008_s0] sm:$0xff]  ;;  %v1093_v1 = vld [vmem:[%s1008_s0 + $0x8] sm:$0xff]  ;;  %v1094_v2 = vld [vmem:[%s1008_s0 + $0x10] sm:$0xff]  ;;  %s1020_s2 = scalar_lea.vmem %s6495_s6, %s6473_s8 }
  0x1e   : > { %v4972_v3 = vpack.c.bf16 %v1093_v1, %v1092_v0  ;;  %v1095_v4 = vld [vmem:[%s1008_s0 + $0x18] sm:$0xff]  ;;  %v1144_v6 = vld [vmem:[%s5473_s25] sm:$0xff]  ;;  %v1145_v7 = vld [vmem:[%s5473_s25 + $0x8] sm:$0xff]  ;;  %s1034_s3 = scalar_lea.vmem %s6496_s30, %s4619_s29  ;;  %s6498_s0 = sld [smem:[#allocation33_spill]] }
  0x1f   : > { %v4976_v5 = vpack.c.bf16 %v1095_v4, %v1094_v2  ;;  %4799 = vmatprep.mubr.msk.f32.mxu0 %vm1146_vm0, %v1144_v6  ;;  %v1098_v8 = vld [vmem:[%s1020_s2] sm:$0xff]  ;;  %v1099_v9 = vld [vmem:[%s1020_s2 + $0x8] sm:$0xff]  ;;  %v1100_v10 = vld [vmem:[%s1020_s2 + $0x10] sm:$0xff]  ;;  %s6504_s30 = sld [smem:[#allocation38_spill]]  ;;  %s1053_s6 = scalar_lea.vmem %s6460_s12, %s6562_s26 }
  0x20   : > { %4973 = vmatprep.subr.bf16.mxu0 %v4972_v3  ;;  %v4980_v11 = vpack.c.bf16 %v1099_v9, %v1098_v8  ;;  %v1101_v12 = vld [vmem:[%s1020_s2 + $0x18] sm:$0xff]  ;;  %v1102_v14 = vld [vmem:[%s1020_s2 + $0x20] sm:$0xff]  ;;  %v1103_v15 = vld [vmem:[%s1020_s2 + $0x28] sm:$0xff] }
  0x21   : > { %4975 = vmatpush3.bf16.msra.mxu0 %v4972_v3  ;;  %v4984_v13 = vpack.c.bf16 %v1101_v12, %v1100_v10  ;;  %v4988_v16 = vpack.c.bf16 %v1103_v15, %v1102_v14  ;;  %v1104_v17 = vld [vmem:[%s1020_s2 + $0x30] sm:$0xff]  ;;  %v1105_v18 = vld [vmem:[%s1020_s2 + $0x38] sm:$0xff]  ;;  %v1110_v20 = vld [vmem:[%s1034_s3] sm:$0x3]  ;;  %s6497_s2 = sld [smem:[#allocation32_spill]]  ;;  %v5295_v15 = vmov 0  }
  0x22   : > { %4977 = vmatprep.subr.bf16.mxu0 %v4976_v5  ;;  %4981 = vmatprep.subr.bf16.mxu1 %v4980_v11  ;;  %v4992_v19 = vpack.c.bf16 %v1105_v18, %v1104_v17 }
  0x23   : > { %4983 = vmatpush3.bf16.msra.mxu1 %v4980_v11  ;;  %5085 = vset.pattern.permute.xlu1 %v5295_v15 }
  0x24   : > { %4985 = vmatprep.subr.bf16.mxu1 %v4984_v13  ;;  %s1015_s7 = scalar_lea.vmem %s6498_s0, %s6562_s26  ;;  %s1086_s0 = scalar_lea.vmem %s6469_s21, %s6562_s26 }
  0x25   : > { %4979 = vmatpush3.bf16.msra.mxu0 %v4976_v5  ;;  %v4634_v56 = vld [vmem:[%s1015_s7] ss:$0 sm:$0xff]  ;;  %s1037_s3 = scalar_lea.vmem %s6504_s30, %s6562_s26  ;;  %s1061_s30 = scalar_lea.vmem %s6462_s14, %s5460_s27 }
  0x26   : > { %4821 = vmatprep.subr.msk.mxu0 %vm1246_vm1, %v1110_v20 }
  0x27   : > { %4987 = vmatpush3.bf16.msra.mxu1 %v4984_v13  ;;  %s1012_s8 = scalar_lea.vmem %s6497_s2, %s4612_s4  ;;  %s6500_s4 = sld [smem:[#allocation36_spill]] }
  0x28   : > { %4800 = vmatmul.mubr.msk.f32.vlgmr.msra.gmra.mrb[0].mxu0 %vm1146_vm0, %v1145_v7  ;;  %4989 = vmatprep.subr.bf16.mxu1 %v4988_v16  ;;  %v1096_v25 = vld [vmem:[%s1012_s8] sm:$0xf]  ;;  %s6503_s8 = sld [smem:[#allocation35_spill]]  ;;  %s5712_s2 = scalar_lea.vmem %s6457_s9, %s5463_s28 }
  0x29   : > { %4822 = vmatpush3.msk.msra.mxu0 %vm1246_vm1, %v1110_v20  ;;  %v1231_v28 = vrot.slane %v1096_v25, %v5498_v23  ;;  %v1241_v29 = vrot.slane %v1096_v25, %v5501_v24  ;;  %v1251_v35 = vrot.slane %v1096_v25, %v5504_v26  ;;  %v1261_v44 = vrot.slane %v1096_v25, %v5511_v30 }
  0x2b   : > { %4991 = vmatpush3.bf16.msra.mxu1 %v4988_v16  ;;  %v5296_v16 = vmov 1  }
  0x2c   : > { %4993 = vmatprep.subr.bf16.mxu1 %v4992_v19  ;;  %5086 = vset.pattern.permute.xlu0 %v5296_v16 }
  0x2d   : > { %s1030_s1 = scalar_lea.vmem %s6500_s4, %s5463_s28  ;;  %s5311_s4 = smov 64  }
  0x2e   : > { %v1108_v13 = vld [vmem:[%s1030_s1] sm:$0xff]  ;;  %v1109_v14 = vld [vmem:[%s1030_s1 + $0x8] sm:$0xff]  ;;  %s1025_s29 = scalar_lea.vmem %s6503_s8, %s5463_s28  ;;  %s6519_s8 = sshll.u32 %s6562_s26, 6 }
  0x2f   : > { %4995 = vmatpush3.bf16.msra.mxu1 %v4992_v19  ;;  %v1106_v19 = vld [vmem:[%s1025_s29] sm:$0xff]  ;;  %v1107_v20 = vld [vmem:[%s1025_s29 + $0x8] sm:$0xff]  ;;  %s5855_s7 = scalar_lea.vmem %s6459_s11, %s6519_s8  ;;  %s1056_s29 = scalar_lea.vmem %s6461_s13, %s6562_s26 }
  0x30   : > { %s5316_s8 = smov 112  }
  0xfb   : > { %v5506_v27 = vpop.f32.mrb[0].mxu0 }
  0xfc   : > { %v1266_v31 = vrot.slane %v5506_v27, 7  ;;  %v1271_v32 = vrot.slane %v5506_v27, 6  ;;  %v1276_v33 = vrot.slane %v5506_v27, 5  ;;  %v5516_v34 = vpop.f32.mrb[1].mxu0  ;;  %v1264_v41 = vmul.f32 %v5506_v27, %v1231_v28 }
  0xfd   : > { %v1234_v36 = vrot.slane %v5516_v34, 7  ;;  %v1244_v37 = vrot.slane %v5516_v34, 6  ;;  %v1254_v40 = vrot.slane %v5516_v34, 5  ;;  %v1232_v46 = vmul.f32 %v1231_v28, %v5516_v34 }
  0xfe   : > { %v1268_v38 = vsel %vm1236_vm2, 0.0, %v1266_v31  ;;  %v1273_v39 = vsel %vm1246_vm1, 0.0, %v1271_v32  ;;  %v1278_v45 = vsel %vm1256_vm3, 0.0, %v1276_v33  ;;  %v5297_v28 = vmov 2  }
  0xff   : > { %v1269_v42 = vmul.f32 %v1268_v38, %v1241_v29  ;;  %v1237_v43 = vsel %vm1236_vm2, 0.0, %v1234_v36  ;;  %v1247_v48 = vsel %vm1246_vm1, 0.0, %v1244_v37  ;;  %v1274_v50 = vmul.f32 %v1273_v39, %v1251_v35 }
 0x100   : > { %v1242_v47 = vmul.f32 %v1241_v29, %v1237_v43  ;;  %v1257_v51 = vsel %vm1256_vm3, 0.0, %v1254_v40  ;;  %v1252_v53 = vmul.f32 %v1251_v35, %v1247_v48  ;;  %v1279_v55 = vmul.f32 %v1278_v45, %v1261_v44 }
 0x101   : > { %v1270_v49 = vadd.f32 %v1269_v42, %v1264_v41  ;;  %v1262_v58 = vmul.f32 %v1261_v44, %v1257_v51  ;;  %v5298_v29 = vmov 9   ;;  %v5299_v31 = vmov 8  }
 0x102   : > { %v1243_v52 = vadd.f32 %v1242_v47, %v1232_v46  ;;  %v5300_v32 = vmov 10   ;;  %v5301_v33 = vmov 3   ;;  %v5302_v35 = vmov 11  }
 0x103   : > { %v1275_v54 = vadd.f32 %v1274_v50, %v1270_v49  ;;  %v5303_v36 = vmov 4   ;;  %v5304_v37 = vmov 6   ;;  %v5305_v38 = vmov 5  }
 0x104   : > { %v1253_v57 = vadd.f32 %v1252_v53, %v1243_v52  ;;  %v5306_v39 = vmov 12   ;;  %v5307_v40 = vmov 13   ;;  %v1664_v45 = vsub.f32 0.0, %v5516_v34 }
 0x105   : > { %v1280_v59 = vadd.f32 %v1279_v55, %v1275_v54  ;;  %v5308_v50 = vmov 14   ;;  %v5309_v52 = vmov 7   ;;  %v4637_v54 = vld [vmem:[%s1037_s3] ss:$0 sm:$0xff]  ;;  %v5310_v55 = vmov 15   ;;  %s1064_s3 = scalar_lea.vmem %s6463_s15, %s6562_s26 }
 0x106   : > { %v1263_v60 = vadd.f32 %v1262_v58, %v1253_v57  ;;  %v1666_v46 = vmul.f32 1.442695, %v1664_v45 }
 0x107   : > { %v1288_v61 = vadd.f32 %v4634_v56, %v1280_v59 }
 0x108   : > { %v1287_v62 = vadd.f32 %v4634_v56, %v1263_v60 }
 0x109   : > { %v1290_v63 = vsub.f32 0.0, %v1288_v61 }
 0x10a   : > { %v1289_v0 = vsub.f32 0.0, %v1287_v62 }
 0x10b   : > { %v1293_v1 = vmul.f32 1.442695, %v1290_v63 }
 0x10c   : > { %v1291_v2 = vmul.f32 1.442695, %v1289_v0 }
 0x10d   : > { %5149 = vpow2.f32 %v1293_v1 }
 0x10e   : > { %5151 = vpow2.f32 %v1291_v2 }
 0x117   : > { %v5150_v3 = vpop.eup %5149 }
 0x118   : > { %v5152_v4 = vpop.eup %5151  ;;  %v1296_v5 = vadd.f32 1.0, %v5150_v3 }
 0x119   : > { %v1295_v6 = vadd.f32 1.0, %v5152_v4 }
 0x11a   : > { %5153 = vrcp.f32 %v1296_v5 }
 0x11b   : > { %5155 = vrcp.f32 %v1295_v6 }
 0x11c   : > { %5157 = vpow2.f32 %v1666_v46 }
 0x124   : > { %v5154_v7 = vpop.eup %5153 }
 0x125   : > { %v5156_v8 = vpop.eup %5155  ;;  %v5535_v9 = vmul.f32 %v5154_v7, %v1288_v61 }
 0x126   : > { %v5541_v10 = vmul.f32 %v5156_v8, %v1287_v62  ;;  %v5158_v48 = vpop.eup %5157 }
 0x127   : > { %6499 = vst [vmem:[#allocation2_spill] sm:$0xff] %v5535_v9  ;;  %v1670_v51 = vadd.f32 1.0, %v5158_v48  ;;  %v1112_v48 = vld [vmem:[%s5712_s2] sm:$0xff] }
 0x128   : > { %4818 = vmatprep.mubr.msk.f32.mxu1 %vm1303_vm4, %v5541_v10  ;;  %v4996_v12 = vpack.c.bf16 %v5535_v9, %v5541_v10 }
 0x129   : > { %4819 = vmatmul.mubr.msk.f32.vlgmr.msra.gmra.mrb[0].mxu1 %vm1303_vm4, %v5535_v9  ;;  %5159 = vrcp.f32 %v1670_v51 }
 0x12a   : > { %4998 = vmatprep.subr.msk.bf16.mxu0 %vm5545_vm5, %v4996_v12  ;;  %5004 = vmatprep.subr.msk.bf16.mxu1 %vm5545_vm5, %v4996_v12 }
 0x12b   : > { %5007 = vmatpush3.bf16.xpose.msk.msra.mxu1 %vm5545_vm5, %v4996_v12  ;;  %4837 = vmatprep.mubr.msk.f32.mxu1 %vm1303_vm4, %v1108_v13 }
 0x132   : > { %4838 = vmatmul.mubr.msk.f32.vlgmr.msra.gmra.mrb[2].mxu1 %vm1303_vm4, %v1109_v14  ;;  %v1113_v14 = vld [vmem:[%s5712_s2 + $0x8] sm:$0xff]  ;;  %s1083_s2 = scalar_lea.vmem %s6468_s20, %s6562_s26 }
 0x133   : > { %v5160_v58 = vpop.eup %5159 }
 0x134   : > { %v1676_v61 = vmul.f32 %v5160_v58, %v5516_v34 }
 0x1fc   : > { %v4820_v17 = vpop.f32.mrb[0].mxu1 }
 0x1fd   : > { %v1376_v18 = vpop.f32.mrb[1].mxu1 }
 0x1fe   : > { %4823 = vmatprep.mubr.msk.f32.mxu0 %vm1391_vm6, %v1376_v18  ;;  %v1665_v18 = vsub.f32 0.0, %v5506_v27 }
 0x1ff   : > { %4824 = vmatmul.mubr.msk.f32.vlgmr.msra.gmra.mrb[2].mxu0 %vm1391_vm6, %v4820_v17 }
 0x200   : > { %5001 = vmatpush3.bf16.xpose.msk.msra.mxu0 %vm5545_vm5, %v4996_v12  ;;  %4830 = vmatprep.mubr.msk.f32.mxu0 %vm1303_vm4, %v1106_v19 }
 0x205   : > { %v5572_v21 = vpop.f32.mrb[2].mxu1 }
 0x206   : > { %2083 = vperm.xlu1 %5085, %v5572_v21   ;;  %2112 = vperm.xlu0 %5086, %v5572_v21   ;;  %v5576_v25 = vpop.f32.mrb[3].mxu1 }
 0x207   : > { %4831 = vmatmul.mubr.msk.f32.vlgmr.msra.gmra.mrb[4].mxu0 %vm1303_vm4, %v1107_v20  ;;  %v1668_v20 = vmul.f32 1.442695, %v1665_v18 }
 0x20a   : > { %5087 = vset.pattern.permute.xlu1 %v5297_v28  ;;  %5089 = vset.pattern.permute.xlu0 %v5298_v29 }
 0x20b   : > { %2137 = vperm.xlu1 %5087, %v5572_v21   ;;  %2316 = vperm.xlu0 %5089, %v5572_v21  }
 0x20f   : > { %5088 = vset.pattern.permute.xlu1 %v5299_v31  ;;  %5091 = vset.pattern.permute.xlu0 %v5300_v32 }
 0x210   : > { %2287 = vperm.xlu1 %5088, %v5572_v21   ;;  %2341 = vperm.xlu0 %5091, %v5572_v21  }
 0x214   : > { %5090 = vset.pattern.permute.xlu1 %v5301_v33  ;;  %5093 = vset.pattern.permute.xlu0 %v5302_v35 }
 0x215   : > { %2162 = vperm.xlu1 %5090, %v5572_v21   ;;  %2366 = vperm.xlu0 %5093, %v5572_v21  }
 0x219   : > { %5092 = vset.pattern.permute.xlu1 %v5303_v36  ;;  %5096 = vset.pattern.permute.xlu0 %v5304_v37 }
 0x21a   : > { %2187 = vperm.xlu1 %5092, %v5572_v21   ;;  %2237 = vperm.xlu0 %5096, %v5572_v21  }
 0x21e   : > { %5094 = vset.pattern.permute.xlu1 %v5305_v38  ;;  %5098 = vset.pattern.permute.xlu0 %v5295_v15 }
 0x21f   : > { %2212 = vperm.xlu1 %5094, %v5572_v21   ;;  %2078 = vperm.xlu0 %5098, %v5576_v25  }
 0x223   : > { %5095 = vset.pattern.permute.xlu1 %v5306_v39  ;;  %5101 = vset.pattern.permute.xlu0 %v5299_v31 }
 0x224   : > { %2391 = vperm.xlu1 %5095, %v5572_v21   ;;  %2283 = vperm.xlu0 %5101, %v5576_v25  }
 0x228   : > { %5097 = vset.pattern.permute.xlu1 %v5307_v40  ;;  %5103 = vset.pattern.permute.xlu0 %v5301_v33 }
 0x229   : > { %2416 = vperm.xlu1 %5097, %v5572_v21   ;;  %2158 = vperm.xlu0 %5103, %v5576_v25  }
 0x22d   : > { %5099 = vset.pattern.permute.xlu1 %v5296_v16  ;;  %5105 = vset.pattern.permute.xlu0 %v5303_v36 }
 0x22e   : > { %2108 = vperm.xlu1 %5099, %v5576_v25   ;;  %2183 = vperm.xlu0 %5105, %v5576_v25  }
 0x232   : > { %5100 = vset.pattern.permute.xlu1 %v5297_v28  ;;  %5108 = vset.pattern.permute.xlu0 %v5306_v39 }
 0x233   : > { %2133 = vperm.xlu1 %5100, %v5576_v25   ;;  %2387 = vperm.xlu0 %5108, %v5576_v25  }
 0x237   : > { %5102 = vset.pattern.permute.xlu1 %v5298_v29  ;;  %5111 = vset.pattern.permute.xlu0 %v5295_v15 }
 0x238   : > { %2312 = vperm.xlu1 %5102, %v5576_v25  }
 0x23c   : > { %5104 = vset.pattern.permute.xlu1 %v5300_v32 }
 0x23d   : > { %2337 = vperm.xlu1 %5104, %v5576_v25  }
 0x241   : > { %5106 = vset.pattern.permute.xlu1 %v5302_v35 }
 0x242   : > { %2362 = vperm.xlu1 %5106, %v5576_v25  }
 0x246   : > { %5107 = vset.pattern.permute.xlu1 %v5305_v38 }
 0x247   : > { %2208 = vperm.xlu1 %5107, %v5576_v25  }
 0x24b   : > { %5109 = vset.pattern.permute.xlu1 %v5304_v37 }
 0x24c   : > { %2233 = vperm.xlu1 %5109, %v5576_v25  }
 0x250   : > { %5110 = vset.pattern.permute.xlu1 %v5307_v40 }
 0x251   : > { %2412 = vperm.xlu1 %5110, %v5576_v25  }
 0x255   : > { %5112 = vset.pattern.permute.xlu1 %v5299_v31 }
 0x285   : > { %v5648_v47 = vpop.permute.xlu1 %2083  ;;  %v5693_v1 = vpop.permute.xlu0 %2112 }
 0x28a   : > { %v5653_v49 = vpop.permute.xlu1 %2137  ;;  %v5701_v5 = vpop.permute.xlu0 %2316 }
 0x28b   : > { %6507 = vst [vmem:[#allocation5_spill] sm:$0xff] %v5701_v5 }
 0x28f   : > { %v5664_v53 = vpop.permute.xlu1 %2287  ;;  %v5714_v12 = vpop.permute.xlu0 %2341 }
 0x290   : > { %6509 = vst [vmem:[#allocation7_spill] sm:$0xff] %v5714_v12  ;;  %v1116_v12 = vld [vmem:[%s5855_s7 + $0x8] sm:$0xff] }
 0x294   : > { %v5672_v57 = vpop.permute.xlu1 %2162 }
 0x299   : > { %v5679_v60 = vpop.permute.xlu1 %2187 }
 0x29e   : > { %v5686_v0 = vpop.permute.xlu1 %2212 }
 0x29f   : > { %6505 = vst [vmem:[#allocation3_spill] sm:$0xff] %v5686_v0  ;;  %v1120_v0 = vld [vmem:[%s5855_s7 + $0x28] sm:$0xff] }
 0x2a3   : > { %v5695_v2 = vpop.permute.xlu1 %2391 }
 0x2a4   : > { %6506 = vst [vmem:[#allocation4_spill] sm:$0xff] %v5695_v2 }
 0x2a8   : > { %v5703_v6 = vpop.permute.xlu1 %2416 }
 0x2a9   : > { %6508 = vst [vmem:[#allocation6_spill] sm:$0xff] %v5703_v6  ;;  %v1119_v6 = vld [vmem:[%s5855_s7 + $0x20] sm:$0xff] }
 0x2ad   : > { %v5716_v13 = vpop.permute.xlu1 %2108 }
 0x2b2   : > { %v5723_v17 = vpop.permute.xlu1 %2133 }
 0x2d2   : > { %v4825_v41 = vpop.f32.mrb[2].mxu0 }
 0x2d3   : > { %v5629_v42 = vpop.f32.mrb[3].mxu0  ;;  %v5669_v56 = vadd.f32 %v4825_v41, %v4637_v54 }
 0x2d4   : > { %v5691_v34 = vadd.f32 %v4637_v54, %v5629_v42 }
 0x2d5   : > { %v1479_v59 = vand.u32 2147483647, %v5669_v56 }
 0x2d6   : > { %v1478_v3 = vand.u32 2147483647, %v5691_v34 }
 0x2d7   : > { %v1481_v62 = vsub.f32 0.0, %v1479_v59 }
 0x2d8   : > { %v1480_v4 = vsub.f32 0.0, %v1478_v3 }
 0x2d9   : > { %v1484_v63 = vmul.f32 1.442695, %v1481_v62 }
 0x2da   : > { %v4832_v43 = vpop.f32.mrb[4].mxu0  ;;  %v1482_v8 = vmul.f32 1.442695, %v1480_v4 }
 0x2db   : > { %1965 = vperm.xlu1 %5112, %v4832_v43   ;;  %1853 = vperm.xlu0 %5111, %v4832_v43   ;;  %v5631_v44 = vpop.f32.mrb[5].mxu0  ;;  %5161 = vpow2.f32 %v1484_v63 }
 0x2dc   : > { %5163 = vpow2.f32 %v1482_v8 }
 0x2df   : > { %5113 = vset.pattern.permute.xlu1 %v5296_v16  ;;  %5114 = vset.pattern.permute.xlu0 %v5298_v29 }
 0x2e0   : > { %1867 = vperm.xlu1 %5113, %v4832_v43   ;;  %1979 = vperm.xlu0 %5114, %v4832_v43  }
 0x2e4   : > { %5115 = vset.pattern.permute.xlu1 %v5297_v28  ;;  %5117 = vset.pattern.permute.xlu0 %v5301_v33 }
 0x2e5   : > { %1881 = vperm.xlu1 %5115, %v4832_v43   ;;  %1895 = vperm.xlu0 %5117, %v4832_v43   ;;  %v5162_v7 = vpop.eup %5161 }
 0x2e6   : > { %v1487_v11 = vadd.f32 1.0, %v5162_v7  ;;  %v5164_v19 = vpop.eup %5163 }
 0x2e8   : > { %5165 = vlog2.f32 %v1487_v11 }
 0x2e9   : > { %5116 = vset.pattern.permute.xlu1 %v5300_v32  ;;  %5120 = vset.pattern.permute.xlu0 %v5306_v39 }
 0x2ea   : > { %1993 = vperm.xlu1 %5116, %v4832_v43   ;;  %2021 = vperm.xlu0 %5120, %v4832_v43  }
 0x2ee   : > { %5118 = vset.pattern.permute.xlu1 %v5302_v35  ;;  %5123 = vset.pattern.permute.xlu0 %v5304_v37 }
 0x2ef   : > { %2007 = vperm.xlu1 %5118, %v4832_v43   ;;  %1937 = vperm.xlu0 %5123, %v4832_v43  }
 0x2f3   : > { %5119 = vset.pattern.permute.xlu1 %v5303_v36  ;;  %5127 = vset.pattern.permute.xlu0 %v5295_v15  ;;  %v1658_v15 = vmul.f32 1.442695, %v1113_v14 }
 0x2f4   : > { %1909 = vperm.xlu1 %5119, %v4832_v43   ;;  %1848 = vperm.xlu0 %5127, %v5631_v44  }
 0x2f5   : > { %5167 = vpow2.f32 %v1658_v15 }
 0x2f6   : > { %5169 = vpow2.f32 %v1668_v20 }
 0x2f8   : > { %5121 = vset.pattern.permute.xlu1 %v5305_v38  ;;  %5129 = vset.pattern.permute.xlu0 %v5296_v16  ;;  %v5721_v16 = vpop.permute.xlu0 %2366 }
 0x2f9   : > { %1923 = vperm.xlu1 %5121, %v4832_v43   ;;  %1863 = vperm.xlu0 %5129, %v5631_v44  }
 0x2fd   : > { %5122 = vset.pattern.permute.xlu1 %v5307_v40  ;;  %5132 = vset.pattern.permute.xlu0 %v5300_v32 }
 0x2fe   : > { %2035 = vperm.xlu1 %5122, %v4832_v43   ;;  %1989 = vperm.xlu0 %5132, %v5631_v44  }
 0x302   : > { %5124 = vset.pattern.permute.xlu1 %v5308_v50  ;;  %5135 = vset.pattern.permute.xlu0 %v5303_v36 }
 0x303   : > { %2049 = vperm.xlu1 %5124, %v4832_v43   ;;  %1905 = vperm.xlu0 %5135, %v5631_v44  }
 0x307   : > { %5125 = vset.pattern.permute.xlu1 %v5309_v52  ;;  %5138 = vset.pattern.permute.xlu0 %v5307_v40 }
 0x308   : > { %1951 = vperm.xlu1 %5125, %v4832_v43   ;;  %2031 = vperm.xlu0 %5138, %v5631_v44  }
 0x30c   : > { %5126 = vset.pattern.permute.xlu1 %v5310_v55  ;;  %5139 = vset.pattern.permute.xlu0 %v5309_v52 }
 0x30d   : > { %2063 = vperm.xlu1 %5126, %v4832_v43   ;;  %2258 = vperm.xlu0 %5139, %v5576_v25  }
 0x311   : > { %5128 = vset.pattern.permute.xlu1 %v5299_v31  ;;  %5142 = vset.pattern.permute.xlu0 %v5308_v50  ;;  %v5730_v31 = vpop.permute.xlu1 %2312 }
 0x312   : > { %1961 = vperm.xlu1 %5128, %v5631_v44   ;;  %2441 = vperm.xlu0 %5142, %v5572_v21   ;;  %6511 = vst [vmem:[#allocation9_spill] sm:$0xff] %v5730_v31 }
 0x315   : > { %v5735_v36 = vpop.permute.xlu1 %2337 }
 0x316   : > { %5130 = vset.pattern.permute.xlu1 %v5298_v29  ;;  %2099 = vrot.lane.b32.xlu0 %v1676_v61, %s5311_s4  ;;  %v5728_v29 = vpop.permute.xlu0 %2237  ;;  %6512 = vst [vmem:[#allocation10_spill] sm:$0xff] %v5735_v36 }
 0x317   : > { %1975 = vperm.xlu1 %5130, %v5631_v44   ;;  %5148 = vset.pattern.permute.xlu0 %v5310_v55  ;;  %6510 = vst [vmem:[#allocation8_spill] sm:$0xff] %v5728_v29  ;;  %v1115_v29 = vld [vmem:[%s5855_s7] sm:$0xff] }
 0x318   : > { %v5008_v36 = vpack.c.bf16 %v1116_v12, %v1115_v29  ;;  %v5888_v12 = vsub.s32 7, %v5492_v22 }
 0x319   : > { %v5750_v43 = vpop.permute.xlu1 %2362 }
 0x31a   : > { %6513 = vst [vmem:[#allocation11_spill] sm:$0xff] %v5750_v43  ;;  %5009 = vmatprep.subr.bf16.mxu0 %v5008_v36 }
 0x31b   : > { %5131 = vset.pattern.permute.xlu1 %v5297_v28  ;;  %v5166_v28 = vpop.eup %5165  ;;  %5011 = vmatpush3.bf16.msra.mxu0 %v5008_v36 }
 0x31c   : > { %1877 = vperm.xlu1 %5131, %v5631_v44   ;;  %v1491_v32 = vmul.f32 0.6931472, %v5166_v28  ;;  %v5168_v40 = vpop.eup %5167  ;;  %v5804_v28 = vsub.s32 4, %v5492_v22 }
 0x31d   : > { %v5743_v41 = vsub.f32 0.0, %v5168_v40  ;;  %v5170_v46 = vpop.eup %5169 }
 0x31e   : > { %v1671_v51 = vadd.f32 1.0, %v5170_v46 }
 0x320   : > { %5133 = vset.pattern.permute.xlu1 %v5301_v33  ;;  %v1486_v33 = vadd.f32 1.0, %v5164_v19 }
 0x321   : > { %1891 = vperm.xlu1 %5133, %v5631_v44  }
 0x322   : > { %5171 = vlog2.f32 %v1486_v33 }
 0x323   : > { %5173 = vrcp.f32 %v1671_v51 }
 0x325   : > { %5134 = vset.pattern.permute.xlu1 %v5302_v35  ;;  %v1477_v35 = vmax.f32 %v5669_v56, 0.0  ;;  %v5760_v56 = vpop.permute.xlu1 %2208 }
 0x326   : > { %2003 = vperm.xlu1 %5134, %v5631_v44   ;;  %6514 = vst [vmem:[#allocation12_spill] sm:$0xff] %v5760_v56  ;;  %v1117_v56 = vld [vmem:[%s5855_s7 + $0x10] sm:$0xff] }
 0x329   : > { %v5775_v4 = vpop.permute.xlu1 %2233 }
 0x32a   : > { %5136 = vset.pattern.permute.xlu1 %v5306_v39  ;;  %v5740_v39 = vadd.f32 %v1491_v32, %v1477_v35  ;;  %6515 = vst [vmem:[#allocation13_spill] sm:$0xff] %v5775_v4 }
 0x32b   : > { %2017 = vperm.xlu1 %5136, %v5631_v44  }
 0x32c   : > { %v5748_v42 = vrot.slane %v5740_v39, %v5511_v30  ;;  %v5172_v54 = vpop.eup %5171  ;;  %v5766_v61 = vrot.slane %v5740_v39, %v5504_v26  ;;  %v5789_v11 = vmul.f32 %v5740_v39, %v5535_v9 }
 0x32d   : > { %v1489_v62 = vmul.f32 0.6931472, %v5172_v54  ;;  %v5174_v14 = vpop.eup %5173  ;;  %v5791_v15 = vpop.permute.xlu1 %2412 }
 0x32e   : > { %v1781_v63 = vmul.f32 %v5766_v61, %v5743_v41  ;;  %6517 = vst [vmem:[#allocation15_spill] sm:$0xff] %v5791_v15  ;;  %v5808_v33 = vrot.slane %v5789_v11, %v5511_v30 }
 0x32f   : > { %5137 = vset.pattern.permute.xlu1 %v5305_v38  ;;  %v5737_v38 = vpop.permute.xlu0 %2078 }
 0x330   : > { %1919 = vperm.xlu1 %5137, %v5631_v44  }
 0x333   : > { %v5752_v45 = vpop.permute.xlu0 %2283 }
 0x334   : > { %5140 = vset.pattern.permute.xlu1 %v5309_v52 }
 0x335   : > { %2262 = vperm.xlu1 %5140, %v5572_v21  }
 0x337   : > { %v5762_v58 = vpop.permute.xlu0 %2158 }
 0x339   : > { %5141 = vset.pattern.permute.xlu1 %v5308_v50 }
 0x33a   : > { %2437 = vperm.xlu1 %5141, %v5576_v25  }
 0x33b   : > { %v5777_v7 = vpop.permute.xlu0 %2183 }
 0x33c   : > { %6516 = vst [vmem:[#allocation14_spill] sm:$0xff] %v5777_v7 }
 0x33e   : > { %5143 = vset.pattern.permute.xlu1 %v5310_v55 }
 0x33f   : > { %2462 = vperm.xlu1 %5143, %v5576_v25   ;;  %v1771_v25 = vmul.f32 %v5748_v42, %v5743_v41  ;;  %v5793_v18 = vpop.permute.xlu0 %2387 }
 0x340   : > { %6518 = vst [vmem:[#allocation16_spill] sm:$0xff] %v5793_v18 }
 0x341   : > { %v1774_v59 = vmul.f32 1.442695, %v1771_v25 }
 0x343   : > { %5144 = vset.pattern.permute.xlu1 %v5304_v37  ;;  %v1656_v37 = vmul.f32 1.442695, %v1112_v48 }
 0x344   : > { %1933 = vperm.xlu1 %5144, %v5631_v44  }
 0x345   : > { %5175 = vpow2.f32 %v1656_v37 }
 0x346   : > { %5177 = vpow2.f32 %v1774_v59 }
 0x348   : > { %5145 = vset.pattern.permute.xlu1 %v5308_v50  ;;  %v1476_v50 = vmax.f32 %v5691_v34, 0.0  ;;  %v5783_v34 = vrot.slane %v5740_v39, %v5501_v24 }
 0x349   : > { %2045 = vperm.xlu1 %5145, %v5631_v44  }
 0x34a   : > { %v5773_v3 = vadd.f32 %v1489_v62, %v1476_v50  ;;  %v5824_v62 = vsub.s32 5, %v5492_v22 }
 0x34c   : > { %v1689_v8 = vrot.slane %v5773_v3, %v5511_v30  ;;  %v1699_v46 = vrot.slane %v5773_v3, %v5504_v26 }
 0x34d   : > { %5146 = vset.pattern.permute.xlu1 %v5309_v52  ;;  %v1784_v52 = vmul.f32 1.442695, %v1781_v63 }
 0x34e   : > { %1947 = vperm.xlu1 %5146, %v5631_v44   ;;  %v1691_v20 = vmul.f32 %v1689_v8, %v5743_v41  ;;  %v1701_v63 = vmul.f32 %v1699_v46, %v5743_v41 }
 0x34f   : > { %5179 = vpow2.f32 %v1784_v52  ;;  %v5176_v19 = vpop.eup %5175 }
 0x350   : > { %v5178_v32 = vpop.eup %5177  ;;  %v5813_v48 = vsub.f32 0.0, %v5176_v19  ;;  %v1694_v59 = vmul.f32 1.442695, %v1691_v20  ;;  %v5834_v20 = vrot.slane %v5789_v11, %v5504_v26 }
 0x351   : > { %v2279_v37 = vmul.f32 0.0, %v5178_v32 }
 0x352   : > { %5147 = vset.pattern.permute.xlu1 %v5310_v55  ;;  %v5800_v55 = vrot.slane %v5740_v39, %v5498_v23  ;;  %v1690_v19 = vmul.f32 %v1689_v8, %v5813_v48 }
 0x353   : > { %2059 = vperm.xlu1 %5147, %v5631_v44   ;;  %v1791_v44 = vmul.f32 %v5783_v34, %v5743_v41 }
 0x354   : > { %v1801_v54 = vmul.f32 %v5800_v55, %v5743_v41  ;;  %v1692_v8 = vmul.f32 1.442695, %v1690_v19  ;;  %v5865_v19 = vsub.s32 6, %v5492_v22  ;;  %v1121_v22 = vld [vmem:[%s5855_s7 + $0x30] sm:$0xff] }
 0x355   : > { %v1794_v51 = vmul.f32 1.442695, %v1791_v44 }
 0x356   : > { %v1804_v44 = vmul.f32 1.442695, %v1801_v54 }
 0x357   : > { %2466 = vperm.xlu1 %5147, %v5572_v21   ;;  %v1677_v21 = vmul.f32 %v5174_v14, %v5506_v27  ;;  %v5821_v27 = vrot.slane %v5740_v39, %v5804_v28  ;;  %5181 = vpow2.f32 %v1794_v51 }
 0x358   : > { %5183 = vpow2.f32 %v1694_v59 }
 0x359   : > { %v1811_v32 = vmul.f32 %v5821_v27, %v5743_v41  ;;  %5185 = vpow2.f32 %v1804_v44 }
 0x35a   : > { %v1966_v35 = vpop.permute.xlu1 %1965  ;;  %v1854_v40 = vpop.permute.xlu0 %1853 }
 0x35b   : > { %v1973_v25 = vmul.f32 %v5808_v33, %v1966_v35  ;;  %2303 = vrot.lane.b32.xlu1 %v1677_v21, %s5311_s4  ;;  %v5840_v21 = vrot.slane %v5740_v39, %v5824_v62  ;;  %v5180_v35 = vpop.eup %5179  ;;  %v1814_v9 = vmul.f32 1.442695, %v1811_v32  ;;  %v5869_v32 = vrot.slane %v5789_v11, %v5501_v24  ;;  %s1045_s4 = scalar_lea.vmem %s6458_s10, %s6562_s26 }
 0x35d   : > { %v5826_v50 = vadd.f32 %v2279_v37, %v1973_v25  ;;  %v1704_v25 = vmul.f32 1.442695, %v1701_v63  ;;  %v1821_v4 = vmul.f32 %v5840_v21, %v5743_v41  ;;  %v5859_v63 = vmul.f32 %v5773_v3, %v5541_v10 }
 0x35f   : > { %v5829_v52 = vpop.permute.xlu1 %1867  ;;  %v1980_v14 = vpop.permute.xlu0 %1979  ;;  %v2308_v51 = vmul.f32 %v5180_v35, %v5826_v50  ;;  %5187 = vpow2.f32 %v1704_v25  ;;  %v1824_v35 = vmul.f32 1.442695, %v1821_v4  ;;  %v1859_v25 = vrot.slane %v5859_v63, %v5511_v30 }
 0x360   : > { %v1987_v54 = vmul.f32 %v5834_v20, %v1980_v14  ;;  %v1700_v14 = vmul.f32 %v1699_v46, %v5813_v48  ;;  %5189 = vpow2.f32 %v1692_v8  ;;  %v1118_v8 = vld [vmem:[%s5855_s7 + $0x18] sm:$0xff]  ;;  %v5881_v4 = vrot.slane %v5740_v39, %v5865_v19 }
 0x361   : > { %5191 = vpow2.f32 %v1814_v9  ;;  %v5182_v46 = vpop.eup %5181  ;;  %v5012_v18 = vpack.c.bf16 %v1118_v8, %v1117_v56  ;;  %v1861_v43 = vmul.f32 %v1859_v25, %v1854_v40  ;;  %v5016_v56 = vpack.c.bf16 %v1120_v0, %v1119_v6 }
 0x362   : > { %v5862_v44 = vadd.f32 %v2308_v51, %v1987_v54  ;;  %v1702_v15 = vmul.f32 1.442695, %v1700_v14  ;;  %v5184_v5 = vpop.eup %5183  ;;  %6521 = vst [vmem:[#allocation18_spill] sm:$0xff] %v5881_v4  ;;  %5193 = vpow2.f32 %v1824_v35  ;;  %v1122_v35 = vld [vmem:[%s5855_s7 + $0x38] sm:$0xff]  ;;  %v1873_v6 = vrot.slane %v5859_v63, %v5504_v26  ;;  %s5319_s7 = smov 72  }
 0x363   : > { %v5186_v29 = vpop.eup %5185  ;;  %v2073_v14 = vmul.f32 0.0, %v5184_v5  ;;  %5013 = vmatprep.subr.bf16.mxu0 %v5012_v18 }
 0x364   : > { %v5844_v37 = vpop.permute.xlu1 %1881  ;;  %v5846_v59 = vpop.permute.xlu0 %1895  ;;  %6520 = vst [vmem:[#allocation17_spill] sm:$0xff] %v5862_v44  ;;  %v2333_v31 = vmul.f32 %v5182_v46, %v5862_v44  ;;  %v5892_v46 = vrot.slane %v5789_v11, %v5498_v23  ;;  %5195 = vpow2.f32 %v1702_v15  ;;  %v5904_v44 = vrot.slane %v5740_v39, %v5888_v12  ;;  %5015 = vmatpush3.bf16.msra.mxu0 %v5012_v18 }
 0x365   : > { %v2075_v36 = vadd.f32 %v2073_v14, %v1861_v43  ;;  %v5910_v15 = vrot.slane %v5789_v11, %v5804_v28  ;;  %5017 = vmatprep.subr.bf16.mxu0 %v5016_v56  ;;  %v5020_v43 = vpack.c.bf16 %v1122_v35, %v1121_v22 }
 0x366   : > { %6524 = vst [vmem:[#allocation21_spill] sm:$0xff] %v5904_v44 }
 0x367   : > { %v2087_v22 = vmul.f32 %v5648_v47, %v2075_v36 }
 0x368   : > { %5019 = vmatpush3.bf16.msra.mxu0 %v5016_v56 }
 0x369   : > { %v1994_v51 = vpop.permute.xlu1 %1993  ;;  %v2022_v54 = vpop.permute.xlu0 %2021  ;;  %5021 = vmatprep.subr.bf16.mxu0 %v5020_v43  ;;  %v2089_v47 = vsel %vm1303_vm4, %v2087_v22, 0.0 }
 0x36a   : > { %v2001_v9 = vmul.f32 %v5869_v32, %v1994_v51  ;;  %v2029_v39 = vmul.f32 %v5910_v15, %v2022_v54 }
 0x36c   : > { %v5885_v30 = vadd.f32 %v2333_v31, %v2001_v9  ;;  %v1831_v31 = vmul.f32 %v5881_v4, %v5743_v41  ;;  %v5188_v9 = vpop.eup %5187  ;;  %5023 = vmatpush3.bf16.msra.mxu0 %v5020_v43 }
 0x36d   : > { %v5190_v0 = vpop.eup %5189 }
 0x36e   : > { %6522 = vst [vmem:[#allocation19_spill] sm:$0xff] %v5885_v30  ;;  %v2008_v40 = vpop.permute.xlu1 %2007  ;;  %v2358_v51 = vmul.f32 %v5186_v29, %v5885_v30  ;;  %v5895_v8 = vpop.permute.xlu0 %1937  ;;  %v1875_v30 = vmul.f32 %v1873_v6, %v5829_v52  ;;  %v2072_v7 = vmul.f32 0.0, %v5190_v0 }
 0x36f   : > { %6523 = vst [vmem:[#allocation20_spill] sm:$0xff] %v5895_v8  ;;  %v2015_v5 = vmul.f32 %v5892_v46, %v2008_v40  ;;  %v5192_v14 = vpop.eup %5191  ;;  %v1834_v40 = vmul.f32 1.442695, %v1831_v31  ;;  %v2104_v8 = vmul.f32 %v5188_v9, %v2075_v36 }
 0x370   : > { %v5194_v31 = vpop.eup %5193 }
 0x371   : > { %v5912_v29 = vadd.f32 %v2358_v51, %v2015_v5  ;;  %v1841_v51 = vmul.f32 %v5904_v44, %v5743_v41  ;;  %v5196_v35 = vpop.eup %5195  ;;  %v5924_v54 = vadd.f32 %v2104_v8, %v1875_v30  ;;  %5197 = vpow2.f32 %v1834_v40 }
 0x373   : > { %v2383_v18 = vmul.f32 %v5192_v14, %v5912_v29  ;;  %v5917_v4 = vpop.permute.xlu1 %1909  ;;  %v1849_v26 = vpop.permute.xlu0 %1848 }
 0x374   : > { %v1860_v2 = vmul.f32 %v1859_v25, %v1849_v26  ;;  %v1709_v25 = vrot.slane %v5773_v3, %v5501_v24 }
 0x375   : > { %v5921_v5 = vadd.f32 %v2383_v18, %v2029_v39  ;;  %v1844_v18 = vmul.f32 1.442695, %v1841_v51 }
 0x376   : > { %v2074_v52 = vadd.f32 %v2072_v7, %v1860_v2  ;;  %v2116_v7 = vmul.f32 %v5693_v1, %v5924_v54  ;;  %v1711_v36 = vmul.f32 %v1709_v25, %v5743_v41  ;;  %v1770_v1 = vmul.f32 %v5748_v42, %v5813_v48 }
 0x377   : > { %v2408_v9 = vmul.f32 %v5194_v31, %v5921_v5  ;;  %5199 = vpow2.f32 %v1844_v18 }
 0x378   : > { %v2086_v0 = vmul.f32 %v5737_v38, %v2074_v52  ;;  %v5930_v14 = vpop.permute.xlu1 %1923  ;;  %v1864_v56 = vpop.permute.xlu0 %1863  ;;  %v2103_v39 = vmul.f32 %v5196_v35, %v2074_v52  ;;  %v5941_v38 = vrot.slane %v5789_v11, %v5824_v62  ;;  %v2118_v22 = vsel %vm1303_vm4, %v2116_v7, 0.0 }
 0x379   : > { %v1874_v26 = vmul.f32 %v1873_v6, %v1864_v56  ;;  %v1719_v52 = vrot.slane %v5773_v3, %v5498_v23  ;;  %v1772_v42 = vmul.f32 1.442695, %v1770_v1 }
 0x37a   : > { %v2088_v2 = vsel %vm1303_vm4, %v2086_v0, 0.0  ;;  %6525 = vst [vmem:[#allocation22_spill] sm:$0xff] %v5941_v38  ;;  %v1714_v0 = vmul.f32 1.442695, %v1711_v36 }
 0x37b   : > { %v2090_v30 = vadd.f32 %v2089_v47, %v2088_v2  ;;  %v5936_v8 = vadd.f32 %v2103_v39, %v1874_v26  ;;  %v5958_v26 = vrot.slane %v5789_v11, %v5865_v19 }
 0x37c   : > { %5201 = vpow2.f32 %v1714_v0 }
 0x37d   : > { %v2091_v40 = vrot.slane %v2090_v30, 4  ;;  %v2115_v6 = vmul.f32 %v5716_v13, %v5936_v8  ;;  %v2036_v43 = vpop.permute.xlu1 %2035  ;;  %v5945_v51 = vpop.permute.xlu0 %1989  ;;  %6527 = vst [vmem:[#allocation24_spill] sm:$0xff] %v5958_v26  ;;  %5203 = vpow2.f32 %v1772_v42  ;;  %v5980_v42 = vrot.slane %v5789_v11, %v5888_v12 }
 0x37e   : > { %v2043_v31 = vmul.f32 %v5941_v38, %v2036_v43  ;;  %v5198_v13 = vpop.eup %5197 }
 0x37f   : > { %v2117_v35 = vsel %vm1303_vm4, %v2115_v6, 0.0  ;;  %v2092_v56 = vadd.f32 %v2091_v40, %v2090_v30  ;;  %v1780_v30 = vmul.f32 %v5766_v61, %v5813_v48  ;;  %6531 = vst [vmem:[#allocation28_spill] sm:$0xff] %v5980_v42 }
 0x380   : > { %v2119_v39 = vadd.f32 %v2118_v22, %v2117_v35  ;;  %v5954_v18 = vadd.f32 %v2408_v9, %v2043_v31  ;;  %v1721_v9 = vmul.f32 %v1719_v52, %v5743_v41  ;;  %v1729_v31 = vrot.slane %v5773_v3, %v5804_v28 }
 0x381   : > { %v2093_v36 = vrot.slane %v2092_v56, 2  ;;  %v5200_v1 = vpop.eup %5199 }
 0x382   : > { %6526 = vst [vmem:[#allocation23_spill] sm:$0xff] %v5954_v18  ;;  %v2120_v47 = vrot.slane %v2119_v39, 4  ;;  %v2050_v2 = vpop.permute.xlu1 %2049  ;;  %v5960_v43 = vpop.permute.xlu0 %1905  ;;  %v2433_v7 = vmul.f32 %v5198_v13, %v5954_v18  ;;  %v1724_v0 = vmul.f32 1.442695, %v1721_v9 }
 0x383   : > { %v2057_v44 = vmul.f32 %v5958_v26, %v2050_v2  ;;  %v1782_v2 = vmul.f32 1.442695, %v1780_v30  ;;  %v2094_v26 = vadd.f32 %v2093_v36, %v2092_v56 }
 0x384   : > { %v2121_v40 = vadd.f32 %v2120_v47, %v2119_v39  ;;  %v1710_v39 = vmul.f32 %v1709_v25, %v5813_v48  ;;  %v1790_v47 = vmul.f32 %v5783_v34, %v5813_v48  ;;  %v5992_v25 = vrot.slane %v5773_v3, %v5824_v62 }
 0x385   : > { %v5967_v6 = vadd.f32 %v2433_v7, %v2057_v44  ;;  %v1731_v44 = vmul.f32 %v1729_v31, %v5743_v41  ;;  %5205 = vpow2.f32 %v1782_v2  ;;  %v2095_v7 = vrot.slane %v2094_v26, 1 }
 0x386   : > { %v2122_v22 = vrot.slane %v2121_v40, 2  ;;  %5207 = vpow2.f32 %v1724_v0  ;;  %v1712_v36 = vmul.f32 1.442695, %v1710_v39  ;;  %v5202_v34 = vpop.eup %5201  ;;  %v5998_v0 = vld [vmem:[%s1045_s4] ss:$0 sm:$0xff]  ;;  %s5314_s4 = smov 120  }
 0x387   : > { %6528 = vst [vmem:[#allocation25_spill] sm:$0xff] %v5967_v6  ;;  %v5971_v35 = vpop.permute.xlu1 %1951  ;;  %v5973_v13 = vpop.permute.xlu0 %2031  ;;  %v2458_v61 = vmul.f32 %v5200_v1, %v5967_v6  ;;  %v1887_v1 = vrot.slane %v5859_v63, %v5501_v24  ;;  %v1792_v6 = vmul.f32 1.442695, %v1790_v47  ;;  %v2096_v18 = vadd.f32 %v2095_v7, %v2094_v26 }
 0x388   : > { %6529 = vst [vmem:[#allocation26_spill] sm:$0xff] %v5971_v35  ;;  %6530 = vst [vmem:[#allocation27_spill] sm:$0xff] %v5973_v13  ;;  %v2123_v38 = vadd.f32 %v2122_v22, %v2121_v40  ;;  %v1720_v40 = vmul.f32 %v1719_v52, %v5813_v48  ;;  %v1734_v22 = vmul.f32 1.442695, %v1731_v44  ;;  %v5204_v2 = vpop.eup %5203  ;;  %v2129_v13 = vmul.f32 %v5202_v34, %v5924_v54 }
 0x389   : > { %v1741_v52 = vmul.f32 %v5992_v25, %v5743_v41  ;;  %5209 = vpow2.f32 %v1712_v36  ;;  %v1730_v44 = vmul.f32 %v1729_v31, %v5813_v48  ;;  %v1800_v26 = vmul.f32 %v5800_v55, %v5813_v48 }
 0x38a   : > { %v2124_v56 = vrot.slane %v2123_v38, 1  ;;  %v1722_v24 = vmul.f32 1.442695, %v1720_v40  ;;  %5211 = vpow2.f32 %v1734_v22  ;;  %v6022_v36 = vrot.slane %v5773_v3, %v5865_v19 }
 0x38b   : > { %5213 = vpow2.f32 %v1792_v6  ;;  %v1901_v40 = vrot.slane %v5859_v63, %v5498_v23  ;;  %v1802_v22 = vmul.f32 1.442695, %v1800_v26  ;;  %v1740_v26 = vmul.f32 %v5992_v25, %v5813_v48 }
 0x38c   : > { %v2064_v30 = vpop.permute.xlu1 %2063  ;;  %v5988_v9 = vpop.permute.xlu0 %2258  ;;  %5215 = vpow2.f32 %v1722_v24  ;;  %v1751_v24 = vmul.f32 %v6022_v36, %v5743_v41 }
 0x38d   : > { %6532 = vst [vmem:[#allocation29_spill] sm:$0xff] %v5988_v9  ;;  %v2071_v11 = vmul.f32 %v5980_v42, %v2064_v30  ;;  %v1889_v9 = vmul.f32 %v1887_v1, %v5844_v37  ;;  %v2125_v30 = vadd.f32 %v2124_v56, %v2123_v38  ;;  %v2278_v37 = vmul.f32 0.0, %v5204_v2 }
 0x38e   : > { %v2291_v38 = vmul.f32 %v5664_v53, %v5826_v50  ;;  %v1732_v53 = vmul.f32 1.442695, %v1730_v44  ;;  %v1810_v2 = vmul.f32 %v5821_v27, %v5813_v48  ;;  %v1903_v23 = vmul.f32 %v1901_v40, %v5846_v59 }
 0x38f   : > { %v6000_v35 = vadd.f32 %v2458_v61, %v2071_v11  ;;  %v6011_v61 = vmul.f32 %v5998_v0, %v5541_v10  ;;  %v2131_v47 = vadd.f32 %v2129_v13, %v1889_v9  ;;  %v5206_v11 = vpop.eup %5205  ;;  %v1744_v10 = vmul.f32 1.442695, %v1741_v52 }
 0x390   : > { %v5208_v50 = vpop.eup %5207 }
 0x391   : > { %v1962_v39 = vpop.permute.xlu1 %1961  ;;  %v6006_v42 = vpop.permute.xlu0 %2441  ;;  %v2097_v7 = vadd.f32 %v2096_v18, %v6011_v61  ;;  %v2126_v31 = vadd.f32 %v2125_v30, %v6011_v61  ;;  %v2293_v30 = vsel %vm1303_vm4, %v2291_v38, 0.0  ;;  %v2154_v52 = vmul.f32 %v5208_v50, %v2131_v47 }
 0x392   : > { %v1972_v54 = vmul.f32 %v5808_v33, %v1962_v39  ;;  %5217 = vpow2.f32 %v1744_v10  ;;  %v1820_v38 = vmul.f32 %v5840_v21, %v5813_v48  ;;  %v2141_v50 = vmul.f32 %v5653_v49, %v2131_v47 }
 0x393   : > { %5219 = vpow2.f32 %v1732_v53  ;;  %v5210_v27 = vpop.eup %5209  ;;  %v1754_v53 = vmul.f32 1.442695, %v1751_v24 }
 0x394   : > { %v2280_v56 = vadd.f32 %v2278_v37, %v1972_v54  ;;  %5221 = vpow2.f32 %v1802_v22  ;;  %v1812_v54 = vmul.f32 1.442695, %v1810_v2  ;;  %v2128_v59 = vmul.f32 %v5210_v27, %v5936_v8 }
 0x395   : > { %v6024_v33 = vpop.permute.xlu0 %2099  ;;  %v1822_v25 = vmul.f32 1.442695, %v1820_v38  ;;  %v2143_v49 = vsel %vm1303_vm4, %v2141_v50, 0.0  ;;  %v6533_v50 = vld [vmem:[#allocation14_spill] sm:$0xff] }
 0x396   : > { %v2290_v6 = vmul.f32 %v5752_v45, %v2280_v56  ;;  %v2102_v55 = vmul.f32 %v6024_v33, %v2097_v7  ;;  %v2127_v18 = vmul.f32 %v2126_v31, %v6024_v33  ;;  %v2307_v13 = vmul.f32 %v5206_v11, %v2280_v56  ;;  %v1976_v9 = vpop.permute.xlu1 %1975  ;;  %v5212_v7 = vpop.eup %5211 }
 0x397   : > { %v1986_v34 = vmul.f32 %v5834_v20, %v1976_v9  ;;  %v2156_v31 = vadd.f32 %v2154_v52, %v1903_v23  ;;  %v1915_v56 = vrot.slane %v5859_v63, %v5804_v28  ;;  %v5214_v10 = vpop.eup %5213  ;;  %5223 = vpow2.f32 %v1812_v54 }
 0x398   : > { %v2292_v45 = vsel %vm1303_vm4, %v2290_v6, 0.0  ;;  %v6037_v39 = vsel %vm1236_vm2, %v2102_v55, %v2127_v18  ;;  %v5216_v18 = vpop.eup %5215  ;;  %v2000_v28 = vmul.f32 %v5869_v32, %v5945_v51  ;;  %5225 = vpow2.f32 %v1754_v53 }
 0x399   : > { %v6041_v44 = vadd.f32 %v2293_v30, %v2292_v45  ;;  %v6044_v20 = vadd.f32 %v2307_v13, %v1986_v34  ;;  %v1917_v6 = vmul.f32 %v1915_v56, %v5917_v4  ;;  %v1742_v13 = vmul.f32 1.442695, %v1740_v26 }
 0x39a   : > { %v2179_v9 = vmul.f32 %v5212_v7, %v2156_v31  ;;  %v2166_v52 = vmul.f32 %v5672_v57, %v2156_v31  ;;  %5227 = vpow2.f32 %v1822_v25  ;;  %v6068_v51 = vrot.slane %v5773_v3, %v5888_v12 }
 0x39b   : > { %v1878_v37 = vpop.permute.xlu1 %1877  ;;  %v2332_v55 = vmul.f32 %v5214_v10, %v6044_v20  ;;  %5229 = vpow2.f32 %v1742_v13  ;;  %v1916_v27 = vmul.f32 %v1915_v56, %v5960_v43  ;;  %v2370_v43 = vmul.f32 %v5721_v16, %v5912_v29  ;;  %v6535_v16 = vld [vmem:[#allocation11_spill] sm:$0xff] }
 0x39c   : > { %v1888_v11 = vmul.f32 %v1887_v1, %v1878_v37  ;;  %v2181_v4 = vadd.f32 %v2179_v9, %v1917_v6  ;;  %v5218_v30 = vpop.eup %5217  ;;  %v2168_v3 = vsel %vm1303_vm4, %v2166_v52, 0.0 }
 0x39d   : > { %v6061_v2 = vadd.f32 %v2332_v55, %v2000_v28  ;;  %v5220_v32 = vpop.eup %5219 }
 0x39e   : > { %v2130_v21 = vadd.f32 %v2128_v59, %v1888_v11  ;;  %v5222_v23 = vpop.eup %5221  ;;  %v2204_v7 = vmul.f32 %v5218_v30, %v2181_v4 }
 0x39f   : > { %v2357_v31 = vmul.f32 %v5222_v23, %v6061_v2  ;;  %v6538_v23 = vld [vmem:[#allocation6_spill] sm:$0xff] }
 0x3a0   : > { %v2140_v1 = vmul.f32 %v5723_v17, %v2130_v21  ;;  %v1892_v8 = vpop.permute.xlu1 %1891  ;;  %v2153_v34 = vmul.f32 %v5216_v18, %v2130_v21  ;;  %v1929_v17 = vrot.slane %v5859_v63, %v5824_v62  ;;  %v6534_v18 = vld [vmem:[#allocation4_spill] sm:$0xff] }
 0x3a1   : > { %v1902_v22 = vmul.f32 %v1901_v40, %v1892_v8  ;;  %v1750_v40 = vmul.f32 %v6022_v36, %v5813_v48  ;;  %v5224_v53 = vpop.eup %5223  ;;  %v2395_v25 = vmul.f32 %v6534_v18, %v5921_v5 }
 0x3a2   : > { %v2142_v47 = vsel %vm1303_vm4, %v2140_v1, 0.0  ;;  %v1931_v26 = vmul.f32 %v1929_v17, %v5930_v14  ;;  %v6092_v9 = vpop.eup %5225 }
 0x3a3   : > { %v2144_v45 = vadd.f32 %v2143_v49, %v2142_v47  ;;  %v2155_v24 = vadd.f32 %v2153_v34, %v1902_v22  ;;  %v6085_v55 = vmul.f32 1.442695, %v1750_v40  ;;  %v6537_v40 = vld [vmem:[#allocation23_spill] sm:$0xff] }
 0x3a4   : > { %v6087_v21 = vadd.f32 %v2204_v7, %v1931_v26  ;;  %v5228_v5 = vpop.eup %5227 }
 0x3a5   : > { %v2145_v37 = vrot.slane %v2144_v45, 4  ;;  %v2165_v57 = vmul.f32 %v5762_v58, %v2155_v24  ;;  %v2178_v54 = vmul.f32 %v5220_v32, %v2155_v24  ;;  %v2004_v38 = vpop.permute.xlu1 %2003  ;;  %v2191_v58 = vmul.f32 %v5679_v60, %v2181_v4  ;;  %v5230_v24 = vpop.eup %5229  ;;  %v6536_v32 = vld [vmem:[#allocation3_spill] sm:$0xff] }
 0x3a6   : > { %v2014_v62 = vmul.f32 %v5892_v46, %v2004_v38  ;;  %v1761_v46 = vmul.f32 %v6068_v51, %v5743_v41  ;;  %v2372_v41 = vsel %vm1303_vm4, %v2370_v43, 0.0  ;;  %v6540_v38 = vld [vmem:[#allocation22_spill] sm:$0xff]  ;;  %5231 = vpow2.f32 %v6085_v55 }
 0x3a7   : > { %v2146_v11 = vadd.f32 %v2145_v37, %v2144_v45  ;;  %v2167_v36 = vsel %vm1303_vm4, %v2165_v57, 0.0  ;;  %v2180_v59 = vadd.f32 %v2178_v54, %v1916_v27  ;;  %v2193_v22 = vsel %vm1303_vm4, %v2191_v58, 0.0  ;;  %v6539_v54 = vld [vmem:[#allocation27_spill] sm:$0xff] }
 0x3a8   : > { %v2169_v56 = vadd.f32 %v2168_v3, %v2167_v36  ;;  %v2359_v10 = vadd.f32 %v2357_v31, %v2014_v62  ;;  %v2420_v27 = vmul.f32 %v6538_v23, %v6537_v40  ;;  %v2397_v57 = vsel %vm1303_vm4, %v2395_v25, 0.0  ;;  %v6541_v62 = vld [vmem:[#allocation16_spill] sm:$0xff] }
 0x3a9   : > { %v2147_v14 = vrot.slane %v2146_v11, 2  ;;  %v2190_v6 = vmul.f32 %v6533_v50, %v2180_v59  ;;  %v2042_v26 = vmul.f32 %v6540_v38, %v6539_v54  ;;  %v1943_v55 = vrot.slane %v5859_v63, %v5865_v19 }
 0x3aa   : > { %v2170_v13 = vrot.slane %v2169_v56, 4  ;;  %v2369_v29 = vmul.f32 %v6535_v16, %v2359_v10  ;;  %v2018_v60 = vpop.permute.xlu1 %2017  ;;  %v2382_v8 = vmul.f32 %v5224_v53, %v2359_v10  ;;  %v6542_v10 = vld [vmem:[#allocation9_spill] sm:$0xff] }
 0x3ab   : > { %v2148_v28 = vadd.f32 %v2147_v14, %v2146_v11  ;;  %v2028_v1 = vmul.f32 %v5910_v15, %v2018_v60  ;;  %v2192_v34 = vsel %vm1303_vm4, %v2190_v6, 0.0  ;;  %v2216_v15 = vmul.f32 %v6536_v32, %v6087_v21  ;;  %v6544_v60 = vld [vmem:[#allocation5_spill] sm:$0xff] }
 0x3ac   : > { %v2171_v49 = vadd.f32 %v2170_v13, %v2169_v56  ;;  %v2371_v4 = vsel %vm1303_vm4, %v2369_v29, 0.0  ;;  %v2194_v45 = vadd.f32 %v2193_v22, %v2192_v34  ;;  %v2203_v56 = vmul.f32 %v5230_v24, %v2180_v59  ;;  %v6543_v29 = vld [vmem:[#allocation17_spill] sm:$0xff]  ;;  %v6545_v59 = vld [vmem:[#allocation10_spill] sm:$0xff] }
 0x3ad   : > { %v2149_v47 = vrot.slane %v2148_v28, 1  ;;  %v6099_v30 = vadd.f32 %v2372_v41, %v2371_v4  ;;  %v2384_v52 = vadd.f32 %v2382_v8, %v2028_v1  ;;  %v2319_v53 = vmul.f32 %v6542_v10, %v6044_v20  ;;  %v6546_v20 = vld [vmem:[#allocation18_spill] sm:$0xff]  ;;  %v6547_v8 = vld [vmem:[#allocation15_spill] sm:$0xff]  ;;  %v6548_v4 = vld [vmem:[#allocation12_spill] sm:$0xff] }
 0x3ae   : > { %v2172_v37 = vrot.slane %v2171_v49, 2  ;;  %v2195_v58 = vrot.slane %v2194_v45, 4  ;;  %v1830_v1 = vmul.f32 %v6546_v20, %v5813_v48  ;;  %v2422_v32 = vsel %vm1303_vm4, %v2420_v27, 0.0 }
 0x3af   : > { %v2150_v7 = vadd.f32 %v2149_v47, %v2148_v28  ;;  %v2394_v31 = vmul.f32 %v6541_v62, %v2384_v52  ;;  %v2407_v3 = vmul.f32 %v5228_v5, %v2384_v52  ;;  %v1920_v11 = vpop.permute.xlu1 %1919  ;;  %v2344_v28 = vmul.f32 %v6545_v59, %v6061_v2  ;;  %v6549_v52 = vld [vmem:[#allocation19_spill] sm:$0xff] }
 0x3b0   : > { %v2173_v36 = vadd.f32 %v2172_v37, %v2171_v49  ;;  %v1930_v43 = vmul.f32 %v1929_v17, %v1920_v11  ;;  %v2196_v13 = vadd.f32 %v2195_v58, %v2194_v45  ;;  %v2320_v17 = vmul.f32 %v6544_v60, %v6543_v29  ;;  %v6550_v45 = vld [vmem:[#allocation7_spill] sm:$0xff] }
 0x3b1   : > { %v2151_v14 = vadd.f32 %v2150_v7, %v6011_v61  ;;  %v2396_v50 = vsel %vm1303_vm4, %v2394_v31, 0.0  ;;  %v6113_v6 = vadd.f32 %v2407_v3, %v2042_v26  ;;  %v2345_v24 = vmul.f32 %v6550_v45, %v6549_v52  ;;  %v5232_v52 = vpop.eup %5231 }
 0x3b2   : > { %v2174_v18 = vrot.slane %v2173_v36, 1  ;;  %v6115_v25 = vadd.f32 %v2397_v57, %v2396_v50  ;;  %v6117_v16 = vadd.f32 %v2203_v56, %v1930_v43  ;;  %v2197_v49 = vrot.slane %v2196_v13, 2 }
 0x3b3   : > { %v2419_v34 = vmul.f32 %v6547_v8, %v6113_v6  ;;  %v2152_v41 = vmul.f32 %v2151_v14, %v6024_v33  ;;  %v2218_v2 = vsel %vm1303_vm4, %v2216_v15, 0.0  ;;  %v2321_v23 = vsel %vm1303_vm4, %v2319_v53, 0.0 }
 0x3b4   : > { %v2175_v22 = vadd.f32 %v2174_v18, %v2173_v36  ;;  %v2215_v5 = vmul.f32 %v6548_v4, %v6117_v16  ;;  %v6130_v47 = vpop.permute.xlu1 %2262  ;;  %v2198_v57 = vadd.f32 %v2197_v49, %v2196_v13  ;;  %v2322_v38 = vsel %vm1303_vm4, %v2320_v17, 0.0 }
 0x3b5   : > { %v2421_v40 = vsel %vm1303_vm4, %v2419_v34, 0.0  ;;  %v1764_v7 = vmul.f32 1.442695, %v1761_v46  ;;  %v2346_v31 = vsel %vm1303_vm4, %v2344_v28, 0.0  ;;  %v2483_v3 = vsel %vm1246_vm1, %v6037_v39, %v2152_v41  ;;  %v6552_v34 = vld [vmem:[#allocation20_spill] sm:$0xff] }
 0x3b6   : > { %v2176_v37 = vadd.f32 %v2175_v22, %v6011_v61  ;;  %v2217_v54 = vsel %vm1303_vm4, %v2215_v5, 0.0  ;;  %v6141_v62 = vadd.f32 %v2422_v32, %v2421_v40  ;;  %v2199_v15 = vrot.slane %v2198_v57, 1 }
 0x3b7   : > { %v2219_v26 = vadd.f32 %v2218_v2, %v2217_v54  ;;  %v2323_v11 = vadd.f32 %v2322_v38, %v2321_v23  ;;  %v2347_v58 = vsel %vm1303_vm4, %v2345_v24, 0.0  ;;  %v1832_v46 = vmul.f32 1.442695, %v1830_v1  ;;  %v6551_v1 = vld [vmem:[#allocation21_spill] sm:$0xff] }
 0x3b8   : > { %v2177_v27 = vmul.f32 %v2176_v37, %v6024_v33  ;;  %v2200_v56 = vadd.f32 %v2199_v15, %v2198_v57  ;;  %v2348_v53 = vadd.f32 %v2347_v58, %v2346_v31  ;;  %v1760_v50 = vmul.f32 %v6068_v51, %v5813_v48  ;;  %v6553_v31 = vld [vmem:[#allocation8_spill] sm:$0xff]  ;;  %v6554_v58 = vld [vmem:[#allocation26_spill] sm:$0xff] }
 0x3b9   : > { %v2220_v36 = vrot.slane %v2219_v26, 4  ;;  %v6147_v43 = vpop.permute.xlu1 %2437  ;;  %v2295_v18 = vrot.slane %v6041_v44, 4  ;;  %5233 = vpow2.f32 %v1764_v7  ;;  %v2324_v13 = vrot.slane %v2323_v11, 4 }
 0x3ba   : > { %v2484_v10 = vsel %vm1256_vm3, %v2483_v3, %v2177_v27  ;;  %v2201_v39 = vadd.f32 %v2200_v56, %v6011_v61  ;;  %v2229_v60 = vmul.f32 %v6092_v9, %v6087_v21  ;;  %5235 = vpow2.f32 %v1832_v46  ;;  %v6555_v56 = vld [vmem:[#allocation13_spill] sm:$0xff] }
 0x3bb   : > { %v2221_v14 = vadd.f32 %v2220_v36, %v2219_v26  ;;  %v2349_v51 = vrot.slane %v2348_v53, 4  ;;  %v1762_v20 = vmul.f32 1.442695, %v1760_v50  ;;  %v1840_v8 = vmul.f32 %v6551_v1, %v5813_v48 }
 0x3bc   : > { %v2202_v59 = vmul.f32 %v2201_v39, %v6024_v33  ;;  %v1945_v41 = vmul.f32 %v1943_v55, %v6552_v34  ;;  %v2296_v22 = vadd.f32 %v2295_v18, %v6041_v44  ;;  %v2325_v49 = vadd.f32 %v2324_v13, %v2323_v11 }
 0x3bd   : > { %v2222_v29 = vrot.slane %v2221_v14, 2  ;;  %v2374_v21 = vrot.slane %v6099_v30, 4  ;;  %v2399_v9 = vrot.slane %v6115_v25, 4  ;;  %v2350_v45 = vadd.f32 %v2349_v51, %v2348_v53 }
 0x3be   : > { %v6160_v17 = vpop.permute.xlu1 %2462  ;;  %v2486_v19 = vsel %vm2485_vm7, %v2484_v10, %v2202_v59  ;;  %v2231_v5 = vadd.f32 %v2229_v60, %v1945_v41  ;;  %5237 = vpow2.f32 %v1762_v20  ;;  %v1842_v32 = vmul.f32 1.442695, %v1840_v8  ;;  %v6557_v60 = vld [vmem:[#allocation25_spill] sm:$0xff] }
 0x3bf   : > { %v2223_v28 = vadd.f32 %v2222_v29, %v2221_v14  ;;  %v2297_v48 = vrot.slane %v2296_v22, 2  ;;  %v2228_v23 = vmul.f32 %v5232_v52, %v6117_v16  ;;  %v2424_v44 = vrot.slane %v6141_v62, 4  ;;  %v6556_v14 = vld [vmem:[#allocation24_spill] sm:$0xff] }
 0x3c0   : > { %v1957_v37 = vrot.slane %v5859_v63, %v5888_v12  ;;  %v2326_v57 = vrot.slane %v2325_v49, 2  ;;  %v2375_v26 = vadd.f32 %v2374_v21, %v6099_v30  ;;  %v2400_v7 = vadd.f32 %v2399_v9, %v6115_v25 }
 0x3c1   : > { %v2224_v4 = vrot.slane %v2223_v28, 1  ;;  %v2241_v15 = vmul.f32 %v6553_v31, %v2231_v5  ;;  %v2351_v3 = vrot.slane %v2350_v45, 2  ;;  %5239 = vpow2.f32 %v1842_v32 }
 0x3c2   : > { %v1959_v63 = vmul.f32 %v1957_v37, %v6554_v58  ;;  %v2298_v12 = vadd.f32 %v2297_v48, %v2296_v22  ;;  %v2425_v53 = vadd.f32 %v2424_v44, %v6141_v62  ;;  %v2327_v30 = vadd.f32 %v2326_v57, %v2325_v49 }
 0x3c3   : > { %v2225_v24 = vadd.f32 %v2224_v4, %v2223_v28  ;;  %v1934_v2 = vpop.permute.xlu1 %1933  ;;  %v5234_v38 = vpop.eup %5233  ;;  %v2376_v39 = vrot.slane %v2375_v26, 2  ;;  %v2401_v13 = vrot.slane %v2400_v7, 2  ;;  %v2445_v59 = vmul.f32 %v6006_v42, %v6557_v60 }
 0x3c4   : > { %v1944_v40 = vmul.f32 %v1943_v55, %v1934_v2  ;;  %v2254_v11 = vmul.f32 %v5234_v38, %v2231_v5  ;;  %v5236_v36 = vpop.eup %5235  ;;  %v2243_v55 = vsel %vm1303_vm4, %v2241_v15, 0.0  ;;  %v2352_v51 = vadd.f32 %v2351_v3, %v2350_v45 }
 0x3c5   : > { %v2226_v54 = vadd.f32 %v2225_v24, %v6011_v61  ;;  %v2432_v50 = vmul.f32 %v5236_v36, %v6113_v6  ;;  %v2426_v1 = vrot.slane %v2425_v53, 2  ;;  %v2299_v34 = vrot.slane %v2298_v12, 1 }
 0x3c6   : > { %v2230_v27 = vadd.f32 %v2228_v23, %v1944_v40  ;;  %v2256_v20 = vadd.f32 %v2254_v11, %v1959_v63  ;;  %v2328_v6 = vrot.slane %v2327_v30, 1  ;;  %v2377_v49 = vadd.f32 %v2376_v39, %v2375_v26  ;;  %v6558_v23 = vld [vmem:[#allocation2_spill] sm:$0xff] }
 0x3c7   : > { %v2227_v16 = vmul.f32 %v2226_v54, %v6024_v33  ;;  %v2402_v4 = vadd.f32 %v2401_v13, %v2400_v7  ;;  %v2447_v5 = vsel %vm1303_vm4, %v2445_v59, 0.0  ;;  %v2353_v52 = vrot.slane %v2352_v51, 1  ;;  %v6559_v7 = vld [vmem:[#allocation29_spill] sm:$0xff] }
 0x3c8   : > { %v2240_v46 = vmul.f32 %v6555_v56, %v2230_v27  ;;  %v2046_v10 = vpop.permute.xlu1 %2045  ;;  %v5238_v8 = vpop.eup %5237  ;;  %v2266_v24 = vmul.f32 %v6130_v47, %v2256_v20  ;;  %v2427_v2 = vadd.f32 %v2426_v1, %v2425_v53  ;;  %v2300_v44 = vadd.f32 %v2299_v34, %v2298_v12  ;;  %v6560_v47 = vld [vmem:[#allocation28_spill] sm:$0xff] }
 0x3c9   : > { %v2056_v25 = vmul.f32 %v6556_v14, %v2046_v10  ;;  %v6185_v18 = vsel %vm2487_vm8, %v2486_v19, %v2227_v16  ;;  %v2253_v9 = vmul.f32 %v5238_v8, %v2230_v27  ;;  %v2329_v57 = vadd.f32 %v2328_v6, %v2327_v30 }
 0x3ca   : > { %v2242_v29 = vsel %vm1303_vm4, %v2240_v46, 0.0  ;;  %v2378_v54 = vrot.slane %v2377_v49, 1  ;;  %v2403_v38 = vrot.slane %v2402_v4, 1  ;;  %v2354_v27 = vadd.f32 %v2353_v52, %v2352_v51 }
 0x3cb   : > { %v2244_v28 = vadd.f32 %v2243_v55, %v2242_v29  ;;  %v2434_v62 = vadd.f32 %v2432_v50, %v2056_v25  ;;  %v5240_v40 = vpop.eup %5239  ;;  %v2268_v36 = vsel %vm1303_vm4, %v2266_v24, 0.0  ;;  %v2428_v58 = vrot.slane %v2427_v2, 1 }
 0x3cc   : > { %v2379_v53 = vadd.f32 %v2378_v54, %v2377_v49  ;;  %v2404_v30 = vadd.f32 %v2403_v38, %v2402_v4 }
 0x3cd   : > { %v2245_v41 = vrot.slane %v2244_v28, 4  ;;  %v2444_v22 = vmul.f32 %v6147_v43, %v2434_v62  ;;  %v1948_v19 = vpop.permute.xlu1 %1947  ;;  %v6197_v43 = vmul.f32 %v5998_v0, %v6558_v23  ;;  %v2457_v16 = vmul.f32 %v5240_v40, %v2434_v62 }
 0x3ce   : > { %v1958_v21 = vmul.f32 %v1957_v37, %v1948_v19  ;;  %v2429_v59 = vadd.f32 %v2428_v58, %v2427_v2 }
 0x3cf   : > { %v2246_v42 = vadd.f32 %v2245_v41, %v2244_v28  ;;  %v2446_v45 = vsel %vm1303_vm4, %v2444_v22, 0.0  ;;  %v2301_v10 = vadd.f32 %v2300_v44, %v6197_v43  ;;  %v2330_v55 = vadd.f32 %v2329_v57, %v6197_v43 }
 0x3d0   : > { %v2448_v32 = vadd.f32 %v2447_v5, %v2446_v45  ;;  %v2255_v48 = vadd.f32 %v2253_v9, %v1958_v21  ;;  %v2355_v60 = vadd.f32 %v2354_v27, %v6197_v43  ;;  %v2380_v8 = vadd.f32 %v2379_v53, %v6197_v43 }
 0x3d1   : > { %v2247_v37 = vrot.slane %v2246_v42, 2  ;;  %v2405_v34 = vadd.f32 %v2404_v30, %v6197_v43  ;;  %v2430_v5 = vadd.f32 %v2429_v59, %v6197_v43 }
 0x3d2   : > { %v2449_v26 = vrot.slane %v2448_v32, 4  ;;  %v2265_v31 = vmul.f32 %v6559_v7, %v2255_v48  ;;  %v2060_v15 = vpop.permute.xlu1 %2059 }
 0x3d3   : > { %v2248_v3 = vadd.f32 %v2247_v37, %v2246_v42  ;;  %v2070_v11 = vmul.f32 %v6560_v47, %v2060_v15 }
 0x3d4   : > { %v2450_v63 = vadd.f32 %v2449_v26, %v2448_v32  ;;  %v2267_v0 = vsel %vm1303_vm4, %v2265_v31, 0.0 }
 0x3d5   : > { %v2249_v12 = vrot.slane %v2248_v3, 1  ;;  %v2269_v56 = vadd.f32 %v2268_v36, %v2267_v0  ;;  %v2459_v46 = vadd.f32 %v2457_v16, %v2070_v11  ;;  %v5285_v0 = vld [vmem:[%s5473_s25 + $0x8] sm:$0xff] }
 0x3d6   : > { %v2451_v14 = vrot.slane %v2450_v63, 2  ;;  %v2467_v25 = vpop.permute.xlu1 %2466 }
 0x3d7   : > { %v2250_v50 = vadd.f32 %v2249_v12, %v2248_v3  ;;  %v2270_v39 = vrot.slane %v2269_v56, 4  ;;  %v2469_v13 = vmul.f32 %v6160_v17, %v2459_v46  ;;  %v2470_v29 = vmul.f32 %v2467_v25, %v6000_v35  ;;  %v5286_v46 = vld [vmem:[%s5473_s25] sm:$0xff]  ;;  %s1069_s25 = scalar_lea.vmem %s6464_s16, %s5460_s27 }
 0x3d8   : > { %v2452_v51 = vadd.f32 %v2451_v14, %v2450_v63 }
 0x3d9   : > { %v2271_v28 = vadd.f32 %v2270_v39, %v2269_v56  ;;  %v2471_v62 = vsel %vm1303_vm4, %v2469_v13, 0.0  ;;  %v2472_v20 = vsel %vm1303_vm4, %v2470_v29, 0.0  ;;  %v2251_v1 = vadd.f32 %v2250_v50, %v6011_v61 }
 0x3da   : > { %v2453_v17 = vrot.slane %v2452_v51, 1  ;;  %v2473_v6 = vadd.f32 %v2472_v20, %v2471_v62  ;;  %v2304_v35 = vpop.permute.xlu1 %2303 }
 0x3db   : > { %v2272_v41 = vrot.slane %v2271_v28, 2  ;;  %v2306_v22 = vmul.f32 %v2304_v35, %v2301_v10  ;;  %v2331_v19 = vmul.f32 %v2330_v55, %v2304_v35  ;;  %v2356_v49 = vmul.f32 %v2355_v60, %v2304_v35 }
 0x3dc   : > { %v2454_v4 = vadd.f32 %v2453_v17, %v2452_v51  ;;  %v2474_v21 = vrot.slane %v2473_v6, 4  ;;  %v2252_v9 = vmul.f32 %v2251_v1, %v6024_v33  ;;  %v2381_v42 = vmul.f32 %v2380_v8, %v2304_v35  ;;  %v4652_v8 = vld [vmem:[%s1053_s6] ss:$0 sm:$0xff]  ;;  %s1072_s6 = scalar_lea.vmem %s6465_s17, %s6562_s26 }
 0x3dd   : > { %v2273_v52 = vadd.f32 %v2272_v41, %v2271_v28  ;;  %v2406_v45 = vmul.f32 %v2405_v34, %v2304_v35  ;;  %v2493_v24 = vsel %vm1236_vm2, %v2306_v22, %v2331_v19  ;;  %v2431_v44 = vmul.f32 %v2430_v5, %v2304_v35  ;;  %v4653_v17 = vld [vmem:[%s1056_s29] ss:$0 sm:$0xff]  ;;  %s5317_s29 = smov 96  }
 0x3de   : > { %v2475_v2 = vadd.f32 %v2474_v21, %v2473_v6  ;;  %v2490_v32 = vsel %vm2489_vm9, %v6185_v18, %v2252_v9  ;;  %v2455_v48 = vadd.f32 %v2454_v4, %v6197_v43  ;;  %v2494_v40 = vsel %vm1246_vm1, %v2493_v24, %v2356_v49 }
 0x3df   : > { %v2274_v23 = vrot.slane %v2273_v52, 1  ;;  %v2495_v57 = vsel %vm1256_vm3, %v2494_v40, %v2381_v42 }
 0x3e0   : > { %v2476_v37 = vrot.slane %v2475_v2, 2  ;;  %v2456_v54 = vmul.f32 %v2455_v48, %v2304_v35  ;;  %v2496_v38 = vsel %vm2485_vm7, %v2495_v57, %v2406_v45  ;;  %v1127_v57 = vld [vmem:[%s1061_s30 + $0x10] sm:$0xff] }
 0x3e1   : > { %v2275_v26 = vadd.f32 %v2274_v23, %v2273_v52  ;;  %v2497_v7 = vsel %vm2487_vm8, %v2496_v38, %v2431_v44  ;;  %v1125_v23 = vld [vmem:[%s1061_s30] sm:$0xff]  ;;  %v1126_v44 = vld [vmem:[%s1061_s30 + $0x8] sm:$0xff] }
 0x3e2   : > { %v2477_v31 = vadd.f32 %v2476_v37, %v2475_v2  ;;  %v2498_v15 = vsel %vm2489_vm9, %v2497_v7, %v2456_v54  ;;  %v5024_v37 = vpack.c.bf16 %v1126_v44, %v1125_v23  ;;  %v1128_v54 = vld [vmem:[%s1061_s30 + $0x18] sm:$0xff]  ;;  %v1131_v7 = vld [vmem:[%s1069_s25 + $0x8] sm:$0xff]  ;;  %s5320_s30 = smov 80  }
 0x3e3   : > { %v2276_v18 = vadd.f32 %v2275_v26, %v6011_v61  ;;  %v5028_v38 = vpack.c.bf16 %v1128_v54, %v1127_v57  ;;  %v1130_v26 = vld [vmem:[%s1069_s25] sm:$0xff] }
 0x3e4   : > { %v2478_v27 = vrot.slane %v2477_v31, 1  ;;  %5025 = vmatprep.subr.bf16.mxu1 %v5024_v37 }
 0x3e5   : > { %v2277_v3 = vmul.f32 %v2276_v18, %v6024_v33  ;;  %5027 = vmatpush3.bf16.msra.mxu1 %v5024_v37 }
 0x3e6   : > { %v2479_v47 = vadd.f32 %v2478_v27, %v2477_v31  ;;  %5029 = vmatprep.subr.bf16.mxu1 %v5028_v38  ;;  %v5032_v31 = vpack.c.bf16 %v1131_v7, %v1130_v26 }
 0x3e7   : > { %v2492_v11 = vsel %vm2491_vm10, %v2490_v32, %v2277_v3 }
 0x3e8   : > { %v2480_v16 = vadd.f32 %v2479_v47, %v6197_v43  ;;  %4856 = vmatprep.mubr.msk.f32.mxu0 %vm1303_vm4, %v2492_v11 }
 0x3e9   : > { %5031 = vmatpush3.bf16.msra.mxu1 %v5028_v38 }
 0x3ea   : > { %v2481_v36 = vmul.f32 %v2480_v16, %v2304_v35  ;;  %5033 = vmatprep.subr.bf16.mxu1 %v5032_v31 }
 0x3ec   : > { %v2499_v58 = vsel %vm2491_vm10, %v2498_v15, %v2481_v36  ;;  %v4654_v36 = vld [vmem:[%s1083_s2] ss:$0 sm:$0xff]  ;;  %s5315_s2 = smov 104  }
 0x3ed   : > { %4857 = vmatmul.mubr.msk.f32.vlgmr.msra.gmra.mrb[6].mxu0 %vm1303_vm4, %v2499_v58 }
 0x4c0   : > { %v4858_v63 = vpop.f32.mrb[6].mxu0 }
 0x4c1   : > { %v2582_v12 = vadd.f32 %v5285_v0, %v4858_v63  ;;  %v2572_v56 = vpop.f32.mrb[7].mxu0  ;;  %v4655_v63 = vld [vmem:[%s1086_s0] ss:$0 sm:$0xff]  ;;  %s5318_s0 = smov 88  }
 0x4c2   : > { %v2581_v61 = vadd.f32 %v5286_v46, %v2572_v56 }
 0x4c3   : > { %v2586_v10 = vsel %vm1146_vm0, %v2582_v12, 0.0 }
 0x4c4   : > { %2587 = vadd.xlane.f32.xlu1 %v2586_v10  ;;  %v2583_v33 = vsel %vm1146_vm0, %v2581_v61, 0.0  ;;  %v1133_v10 = vld [vmem:[%s1069_s25 + $0x18] sm:$0xff] }
 0x4c5   : > { %2584 = vadd.xlane.f32.xlu0 %v2583_v33 }
 0x551   : > { %v2588_v53 = vpop.xlane.xlu1 %2587 }
 0x552   : > { %v2591_v43 = vmul.f32 0.03125, %v2588_v53  ;;  %v2585_v30 = vpop.xlane.xlu0 %2584 }
 0x553   : > { %v2590_v14 = vmul.f32 0.03125, %v2585_v30  ;;  %v5312_v30 = vmov 0.0  }
 0x554   : > { %v2593_v25 = vsub.f32 %v2582_v12, %v2591_v43  ;;  %4881 = vmatprep.subr.mxu0 %v5312_v30  ;;  %4883 = vmatprep.mubr.msk.f32.mxu0 %vm5313_vm11, %v5312_v30 }
 0x555   : > { %v2592_v50 = vsub.f32 %v2581_v61, %v2590_v14  ;;  %v1132_v61 = vld [vmem:[%s1069_s25 + $0x10] sm:$0xff]  ;;  %v4656_v14 = vld [vmem:[%s1064_s3] ss:$0 sm:$0xff]  ;;  %s5321_s3 = smov 8   ;;  %s5323_s25 = smov 24  }
 0x556   : > { %v2595_v29 = vmul.f32 %v2593_v25, %v2593_v25  ;;  %v5036_v43 = vpack.c.bf16 %v1133_v10, %v1132_v61 }
 0x557   : > { %v2594_v39 = vmul.f32 %v2592_v50, %v2592_v50 }
 0x558   : > { %v2599_v55 = vsel %vm1146_vm0, %v2595_v29, 0.0 }
 0x559   : > { %v2596_v13 = vsel %vm1146_vm0, %v2594_v39, 0.0 }
 0x55a   : > { %2597 = vadd.xlane.f32.xlu0 %v2596_v13  ;;  %v4659_v13 = vld [vmem:[%s1072_s6] ss:$0 sm:$0xff] }
 0x55e   : > { %2600 = vadd.xlane.f32.xlu0 %v2599_v55 }
 0x5e7   : > { %v2598_v60 = vpop.xlane.xlu0 %2597 }
 0x5e8   : > { %v2602_v59 = vmul.f32 0.03125, %v2598_v60 }
 0x5ea   : > { %v2604_v51 = vadd.f32 1e-05, %v2602_v59 }
 0x5eb   : > { %v2601_v28 = vpop.xlane.xlu0 %2600 }
 0x5ec   : > { %5241 = vrsqrt.f32 %v2604_v51  ;;  %v2603_v62 = vmul.f32 0.03125, %v2601_v28 }
 0x5ee   : > { %v2605_v20 = vadd.f32 1e-05, %v2603_v62 }
 0x5f0   : > { %5243 = vrsqrt.f32 %v2605_v20 }
 0x5f6   : > { %v5242_v1 = vpop.eup %5241 }
 0x5f7   : > { %v2608_v34 = vmul.f32 %v5242_v1, %v2592_v50 }
 0x5f9   : > { %v2616_v6 = vmul.f32 %v4652_v8, %v2608_v34 }
 0x5fa   : > { %v5244_v35 = vpop.eup %5243 }
 0x5fb   : > { %v6243_v41 = vadd.f32 %v4653_v17, %v2616_v6  ;;  %v2609_v22 = vmul.f32 %v5244_v35, %v2593_v25 }
 0x5fd   : > { %v2626_v19 = vsel %vm1146_vm0, %v6243_v41, 0.0  ;;  %v2617_v49 = vmul.f32 %v4652_v8, %v2609_v22 }
 0x5fe   : > { %2627 = vadd.xlane.f32.xlu1 %v2626_v19 }
 0x5ff   : > { %v6247_v4 = vadd.f32 %v4653_v17, %v2617_v49 }
 0x601   : > { %v2629_v21 = vsel %vm1146_vm0, %v6247_v4, 0.0 }
 0x602   : > { %2630 = vadd.xlane.f32.xlu0 %v2629_v21 }
 0x68b   : > { %v2628_v9 = vpop.xlane.xlu1 %2627 }
 0x68c   : > { %v2632_v5 = vmul.f32 0.03125, %v2628_v9 }
 0x68e   : > { %v2634_v52 = vsub.f32 %v6243_v41, %v2632_v5 }
 0x68f   : > { %v2631_v42 = vpop.xlane.xlu0 %2630 }
 0x690   : > { %v2633_v45 = vmul.f32 0.03125, %v2631_v42  ;;  %v2636_v24 = vmul.f32 %v2634_v52, %v2634_v52 }
 0x692   : > { %v2635_v2 = vsub.f32 %v6247_v4, %v2633_v45  ;;  %v2638_v32 = vsel %vm1146_vm0, %v2636_v24, 0.0 }
 0x693   : > { %2639 = vadd.xlane.f32.xlu1 %v2638_v32 }
 0x694   : > { %v2637_v48 = vmul.f32 %v2635_v2, %v2635_v2 }
 0x696   : > { %v2641_v40 = vsel %vm1146_vm0, %v2637_v48, 0.0 }
 0x697   : > { %2642 = vadd.xlane.f32.xlu0 %v2641_v40 }
 0x720   : > { %v2640_v15 = vpop.xlane.xlu1 %2639 }
 0x721   : > { %v2644_v18 = vmul.f32 0.03125, %v2640_v15 }
 0x723   : > { %v2646_v27 = vadd.f32 1e-05, %v2644_v18 }
 0x724   : > { %v2643_v3 = vpop.xlane.xlu0 %2642 }
 0x725   : > { %5245 = vrsqrt.f32 %v2646_v27  ;;  %v2645_v47 = vmul.f32 0.03125, %v2643_v3 }
 0x727   : > { %v2647_v11 = vadd.f32 1e-05, %v2645_v47 }
 0x729   : > { %5247 = vrsqrt.f32 %v2647_v11 }
 0x72f   : > { %v5246_v16 = vpop.eup %5245 }
 0x730   : > { %v2650_v58 = vmul.f32 %v5246_v16, %v2634_v52 }
 0x732   : > { %v2658_v0 = vmul.f32 %v4654_v36, %v2650_v58 }
 0x733   : > { %v5248_v12 = vpop.eup %5247 }
 0x734   : > { %v2651_v56 = vmul.f32 %v5248_v12, %v2635_v2  ;;  %v2666_v46 = vadd.f32 %v4655_v63, %v2658_v0 }
 0x736   : > { %v2659_v33 = vmul.f32 %v4654_v36, %v2651_v56  ;;  %4867 = vmatprep.mubr.msk.f32.mxu1 %vm1146_vm0, %v2666_v46 }
 0x738   : > { %v2667_v53 = vadd.f32 %v4655_v63, %v2659_v33 }
 0x73a   : > { %4868 = vmatmul.mubr.msk.f32.vlgmr.msra.gmra.mrb[4].mxu1 %vm1146_vm0, %v2667_v53 }
 0x73b   : > { %5035 = vmatpush3.bf16.msra.mxu1 %v5032_v31  ;;  %4878 = vmatprep.mubr.msk.f32.mxu1 %vm1146_vm0, %v2666_v46 }
 0x73c   : > { %5037 = vmatprep.subr.bf16.mxu1 %v5036_v43 }
 0x73f   : > { %5039 = vmatpush3.bf16.msra.mxu1 %v5036_v43 }
 0x740   : > { %4891 = vmatprep.subr.mxu1 %v5312_v30 }
 0x742   : > { %4879 = vmatmul.mubr.msk.f32.vlgmr.msra.gmra.mrb[6].mxu1 %vm1146_vm0, %v2667_v53 }
 0x743   : > { %4893 = vmatprep.mubr.msk.f32.mxu1 %vm5313_vm11, %v5312_v30 }
 0x80d   : > { %v4869_v25 = vpop.f32.mrb[4].mxu1 }
 0x80e   : > { %v2746_v50 = vpop.f32.mrb[5].mxu1  ;;  %v2752_v51 = vadd.f32 %v4869_v25, %v4656_v14 }
 0x80f   : > { %v2747_v39 = vadd.f32 %v4656_v14, %v2746_v50 }
 0x811   : > { %3001 = vrot.lane.b32.xlu0 %v2747_v39, %s5314_s4 }
 0x815   : > { %v4880_v29 = vpop.f32.mrb[6].mxu1 }
 0x816   : > { %v2827_v55 = vpop.f32.mrb[7].mxu1  ;;  %v6296_v59 = vadd.f32 %v4880_v29, %v4659_v13 }
 0x817   : > { %v6289_v60 = vadd.f32 %v4659_v13, %v2827_v55 }
 0x819   : > { %3003 = vrot.lane.b32.xlu1 %v6289_v60, %s5314_s4  ;;  %4882 = vmatpush3.xpose.msk.msra.mxu0 %vm2836_vm12, %v6289_v60 }
 0x81a   : > { %3335 = vrot.lane.b32.xlu0 %v6289_v60, %s5315_s2  ;;  %4886 = vmatprep.subr.mxu0 %v5312_v30 }
 0x81c   : > { %4884 = vmatmul.mubr.msk.f32.vlgmr.msra.gmra.mrb[8].mxu0 %vm2836_vm12, %v2747_v39 }
 0x81d   : > { %3169 = vrot.lane.b32.xlu1 %v6289_v60, %s5316_s8  ;;  %4888 = vmatprep.mubr.msk.f32.mxu0 %vm5313_vm11, %v5312_v30 }
 0x81e   : > { %3682 = vrot.lane.b32.xlu0 %v6296_v59, %s5314_s4 }
 0x821   : > { %3167 = vrot.lane.b32.xlu1 %v2747_v39, %s5316_s8 }
 0x822   : > { %3848 = vrot.lane.b32.xlu0 %v6296_v59, %s5316_s8 }
 0x825   : > { %3333 = vrot.lane.b32.xlu1 %v2747_v39, %s5315_s2 }
 0x826   : > { %4014 = vrot.lane.b32.xlu0 %v6296_v59, %s5315_s2 }
 0x829   : > { %3680 = vrot.lane.b32.xlu1 %v2752_v51, %s5314_s4  ;;  %s5322_s4 = smov 16  }
 0x82a   : > { %2925 = vrot.lane.b32.xlu0 %v6289_v60, %s5317_s29 }
 0x82d   : > { %3846 = vrot.lane.b32.xlu1 %v2752_v51, %s5316_s8 }
 0x831   : > { %4012 = vrot.lane.b32.xlu1 %v2752_v51, %s5315_s2  ;;  %s1077_s2 = scalar_lea.vmem %s6466_s18, %s5460_s27 }
 0x835   : > { %3091 = vrot.lane.b32.xlu1 %v6289_v60, %s5318_s0 }
 0x883   : > { %v3002_v28 = vpop.permute.xlu0 %3001 }
 0x88b   : > { %v3004_v62 = vpop.permute.xlu1 %3003 }
 0x88c   : > { %v3336_v20 = vpop.permute.xlu0 %3335  ;;  %4892 = vmatpush3.xpose.msk.msra.mxu1 %vm2836_vm12, %v3004_v62 }
 0x88d   : > { %4901 = vmatprep.subr.mxu1 %v5312_v30 }
 0x88f   : > { %v3170_v1 = vpop.permute.xlu1 %3169  ;;  %4894 = vmatmul.mubr.msk.f32.vlgmr.msra.gmra.mrb[8].mxu1 %vm2836_vm12, %v3002_v28 }
 0x890   : > { %v3683_v8 = vpop.permute.xlu0 %3682  ;;  %4902 = vmatpush3.xpose.msk.msra.mxu1 %vm2836_vm12, %v3170_v1  ;;  %4903 = vmatprep.mubr.msk.f32.mxu1 %vm5313_vm11, %v5312_v30 }
 0x891   : > { %4911 = vmatprep.subr.mxu1 %v5312_v30 }
 0x893   : > { %v3168_v34 = vpop.permute.xlu1 %3167 }
 0x894   : > { %v3849_v17 = vpop.permute.xlu0 %3848  ;;  %4904 = vmatmul.mubr.msk.f32.vlgmr.msra.gmra.mrb[10].mxu1 %vm2836_vm12, %v3168_v34 }
 0x895   : > { %4912 = vmatpush3.xpose.msk.msra.mxu1 %vm2836_vm12, %v3336_v20  ;;  %4913 = vmatprep.mubr.msk.f32.mxu1 %vm5313_vm11, %v5312_v30 }
 0x896   : > { %4921 = vmatprep.subr.mxu1 %v5312_v30 }
 0x897   : > { %v3334_v6 = vpop.permute.xlu1 %3333 }
 0x898   : > { %v4015_v35 = vpop.permute.xlu0 %4014  ;;  %4914 = vmatmul.mubr.msk.f32.vlgmr.msra.gmra.mrb[12].mxu1 %vm2836_vm12, %v3334_v6 }
 0x899   : > { %4922 = vmatpush3.xpose.msk.msra.mxu1 %vm2836_vm12, %v6296_v59  ;;  %4923 = vmatprep.mubr.msk.f32.mxu1 %vm5313_vm11, %v5312_v30 }
 0x89a   : > { %4931 = vmatprep.subr.mxu1 %v5312_v30 }
 0x89b   : > { %v3681_v22 = vpop.permute.xlu1 %3680 }
 0x89c   : > { %v2926_v19 = vpop.permute.xlu0 %2925  ;;  %4924 = vmatmul.mubr.msk.f32.vlgmr.msra.gmra.mrb[14].mxu1 %vm2836_vm12, %v2752_v51 }
 0x89d   : > { %4887 = vmatpush3.msra.mxu0 %v2926_v19  ;;  %4932 = vmatpush3.xpose.msk.msra.mxu1 %vm2836_vm12, %v3683_v8 }
 0x89e   : > { %4933 = vmatprep.mubr.msk.f32.mxu1 %vm5313_vm11, %v5312_v30  ;;  %4941 = vmatprep.subr.mxu1 %v5312_v30 }
 0x89f   : > { %4896 = vmatprep.subr.mxu0 %v5312_v30  ;;  %v3847_v49 = vpop.permute.xlu1 %3846 }
 0x8a0   : > { %4934 = vmatmul.mubr.msk.f32.vlgmr.msra.gmra.mrb[16].mxu1 %vm2836_vm12, %v3681_v22 }
 0x8a1   : > { %4942 = vmatpush3.xpose.msk.msra.mxu1 %vm2836_vm12, %v3849_v17  ;;  %4943 = vmatprep.mubr.msk.f32.mxu1 %vm5313_vm11, %v5312_v30 }
 0x8a2   : > { %4951 = vmatprep.subr.mxu1 %v5312_v30 }
 0x8a3   : > { %v4013_v21 = vpop.permute.xlu1 %4012 }
 0x8a4   : > { %4944 = vmatmul.mubr.msk.f32.vlgmr.msra.gmra.mrb[18].mxu1 %vm2836_vm12, %v3847_v49 }
 0x8a5   : > { %4952 = vmatpush3.xpose.msk.msra.mxu1 %vm2836_vm12, %v4015_v35  ;;  %4953 = vmatprep.mubr.msk.f32.mxu1 %vm5313_vm11, %v5312_v30 }
 0x8a7   : > { %v3092_v43 = vpop.permute.xlu1 %3091 }
 0x8a8   : > { %4954 = vmatmul.mubr.msk.f32.vlgmr.msra.gmra.mrb[20].mxu1 %vm2836_vm12, %v4013_v21 }
 0x8ef   : > { %v2909_v9 = vpop.f32.mrb[8].mxu0 }
 0x8f0   : > { %v2913_v5 = vmul.f32 0.35355338, %v2909_v9  ;;  %v4885_v52 = vpop.f32.mrb[9].mxu0 }
 0x8f2   : > { %v2914_v42 = vsel %vm2836_vm12, %v2913_v5, -inf }
 0x8f3   : > { %2915 = vmax.xlane.f32.xlu0 %v2914_v42 }
 0x962   : > { %v3075_v45 = vpop.f32.mrb[8].mxu1 }
 0x963   : > { %v3079_v24 = vmul.f32 0.35355338, %v3075_v45  ;;  %v4895_v2 = vpop.f32.mrb[9].mxu1 }
 0x965   : > { %v3080_v32 = vsel %vm2836_vm12, %v3079_v24, -inf }
 0x966   : > { %3081 = vmax.xlane.f32.xlu1 %v3080_v32 }
 0x967   : > { %v3241_v48 = vpop.f32.mrb[10].mxu1 }
 0x968   : > { %v3245_v40 = vmul.f32 0.35355338, %v3241_v48  ;;  %v4905_v23 = vpop.f32.mrb[11].mxu1 }
 0x96a   : > { %v3246_v44 = vsel %vm2836_vm12, %v3245_v40, -inf }
 0x96b   : > { %v3407_v57 = vpop.f32.mrb[12].mxu1  ;;  %3247 = vmax.xlane.f32.xlu0 %v3246_v44 }
 0x96c   : > { %v3411_v37 = vmul.f32 0.35355338, %v3407_v57  ;;  %v4915_v54 = vpop.f32.mrb[13].mxu1 }
 0x96e   : > { %v3412_v38 = vsel %vm2836_vm12, %v3411_v37, -inf }
 0x96f   : > { %v3588_v26 = vpop.f32.mrb[14].mxu1  ;;  %3413 = vmax.xlane.f32.xlu0 %v3412_v38 }
 0x970   : > { %v3592_v7 = vmul.f32 0.35355338, %v3588_v26  ;;  %v4925_v31 = vpop.f32.mrb[15].mxu1 }
 0x972   : > { %v3593_v15 = vsel %vm2836_vm12, %v3592_v7, -inf }
 0x973   : > { %3594 = vmax.xlane.f32.xlu1 %v3593_v15  ;;  %v3754_v18 = vpop.f32.mrb[16].mxu1 }
 0x974   : > { %v3758_v27 = vmul.f32 0.35355338, %v3754_v18  ;;  %v4935_v3 = vpop.f32.mrb[17].mxu1 }
 0x976   : > { %v3759_v47 = vsel %vm2836_vm12, %v3758_v27, -inf }
 0x977   : > { %v3920_v11 = vpop.f32.mrb[18].mxu1  ;;  %3760 = vmax.xlane.f32.xlu0 %v3759_v47 }
 0x978   : > { %v3924_v16 = vmul.f32 0.35355338, %v3920_v11  ;;  %v4945_v36 = vpop.f32.mrb[19].mxu1 }
 0x97a   : > { %v3925_v58 = vsel %vm2836_vm12, %v3924_v16, -inf }
 0x97b   : > { %3926 = vmax.xlane.f32.xlu1 %v3925_v58  ;;  %v4086_v63 = vpop.f32.mrb[20].mxu1 }
 0x97c   : > { %v4090_v0 = vmul.f32 0.35355338, %v4086_v63  ;;  %v4955_v12 = vpop.f32.mrb[21].mxu1 }
 0x97e   : > { %v4091_v56 = vsel %vm2836_vm12, %v4090_v0, -inf }
 0x97f   : > { %4092 = vmax.xlane.f32.xlu0 %v4091_v56 }
 0x980   : > { %v2916_v46 = vpop.xlane.xlu0 %2915 }
 0x981   : > { %v2917_v61 = vsub.f32 %v2913_v5, %v2916_v46 }
 0x983   : > { %v2918_v10 = vmul.f32 1.442695, %v2917_v61 }
 0x985   : > { %5249 = vpow2.f32 %v2918_v10 }
 0x98c   : > { %3423 = vrot.lane.b32.xlu1 %v6289_v60, %s5319_s7 }
 0x98f   : > { %v5250_v33 = vpop.eup %5249 }
 0x990   : > { %v2920_v53 = vsel %vm2836_vm12, %v5250_v33, 0.0 }
 0x995   : > { %3257 = vrot.lane.b32.xlu0 %v6289_v60, %s5320_s30 }
 0x9b0   : > { %2921 = vadd.xlane.f32.xlu1 %v2920_v53 }
 0x9f3   : > { %v3082_v14 = vpop.xlane.xlu1 %3081 }
 0x9f4   : > { %v3083_v25 = vsub.f32 %v3079_v24, %v3082_v14 }
 0x9f6   : > { %v3084_v50 = vmul.f32 1.442695, %v3083_v25 }
 0x9f8   : > { %5251 = vpow2.f32 %v3084_v50  ;;  %v3248_v39 = vpop.xlane.xlu0 %3247 }
 0x9f9   : > { %v3249_v13 = vsub.f32 %v3245_v40, %v3248_v39 }
 0x9fb   : > { %v3250_v29 = vmul.f32 1.442695, %v3249_v13 }
 0x9fc   : > { %v3414_v55 = vpop.xlane.xlu0 %3413 }
 0x9fd   : > { %5253 = vpow2.f32 %v3250_v29  ;;  %v3415_v51 = vsub.f32 %v3411_v37, %v3414_v55 }
 0x9ff   : > { %v3416_v60 = vmul.f32 1.442695, %v3415_v51 }
 0xa00   : > { %v3595_v17 = vpop.xlane.xlu1 %3594 }
 0xa01   : > { %5255 = vpow2.f32 %v3416_v60  ;;  %v3596_v6 = vsub.f32 %v3592_v7, %v3595_v17  ;;  %v1138_v17 = vld [vmem:[%s1077_s2 + $0x18] sm:$0xff] }
 0xa02   : > { %v5252_v28 = vpop.eup %5251 }
 0xa03   : > { %v3086_v62 = vsel %vm2836_vm12, %v5252_v28, 0.0  ;;  %v3597_v49 = vmul.f32 1.442695, %v3596_v6 }
 0xa04   : > { %3087 = vadd.xlane.f32.xlu0 %v3086_v62  ;;  %v3761_v35 = vpop.xlane.xlu0 %3760 }
 0xa05   : > { %v3762_v19 = vsub.f32 %v3758_v27, %v3761_v35  ;;  %5257 = vpow2.f32 %v3597_v49 }
 0xa07   : > { %v5254_v20 = vpop.eup %5253  ;;  %v3763_v5 = vmul.f32 1.442695, %v3762_v19 }
 0xa08   : > { %v3252_v1 = vsel %vm2836_vm12, %v5254_v20, 0.0  ;;  %v3927_v22 = vpop.xlane.xlu1 %3926 }
 0xa09   : > { %3253 = vadd.xlane.f32.xlu1 %v3252_v1  ;;  %v3928_v21 = vsub.f32 %v3924_v16, %v3927_v22  ;;  %5259 = vpow2.f32 %v3763_v5  ;;  %v1136_v1 = vld [vmem:[%s1077_s2 + $0x8] sm:$0xff] }
 0xa0b   : > { %v6358_v8 = vpop.eup %5255  ;;  %v3929_v52 = vmul.f32 1.442695, %v3928_v21 }
 0xa0c   : > { %v3418_v34 = vsel %vm2836_vm12, %v6358_v8, 0.0  ;;  %v4093_v9 = vpop.xlane.xlu0 %4092  ;;  %v3424_v24 = vpop.permute.xlu1 %3423 }
 0xa0d   : > { %3419 = vadd.xlane.f32.xlu0 %v3418_v34  ;;  %v4094_v42 = vsub.f32 %v4090_v0, %v4093_v9  ;;  %5261 = vpow2.f32 %v3929_v52  ;;  %v1137_v34 = vld [vmem:[%s1077_s2 + $0x10] sm:$0xff] }
 0xa0e   : > { %v5044_v6 = vpack.c.bf16 %v1138_v17, %v1137_v34 }
 0xa0f   : > { %v4095_v45 = vmul.f32 1.442695, %v4094_v42  ;;  %v5258_v2 = vpop.eup %5257 }
 0xa10   : > { %v3599_v40 = vsel %vm2836_vm12, %v5258_v2, 0.0  ;;  %v3258_v7 = vpop.permute.xlu0 %3257 }
 0xa11   : > { %5263 = vpow2.f32 %v4095_v45 }
 0xa13   : > { %v6366_v32 = vpop.eup %5259 }
 0xa14   : > { %v3765_v57 = vsel %vm2836_vm12, %v6366_v32, 0.0 }
 0xa17   : > { %v6369_v23 = vpop.eup %5261 }
 0xa18   : > { %v3931_v44 = vsel %vm2836_vm12, %v6369_v23, 0.0 }
 0xa1a   : > { %3770 = vrot.lane.b32.xlu1 %v6296_v59, %s5318_s0 }
 0xa1b   : > { %v6375_v37 = vpop.eup %5263 }
 0xa1c   : > { %v4097_v54 = vsel %vm2836_vm12, %v6375_v37, 0.0 }
 0xa23   : > { %3604 = vrot.lane.b32.xlu0 %v6296_v59, %s5317_s29  ;;  %s1080_s29 = scalar_lea.vmem %s6467_s19, %s6562_s26 }
 0xa3d   : > { %v2922_v48 = vpop.xlane.xlu1 %2921 }
 0xa3e   : > { %5265 = vrcp.f32 %v2922_v48  ;;  %3600 = vadd.xlane.f32.xlu1 %v3599_v40 }
 0xa42   : > { %3932 = vadd.xlane.f32.xlu1 %v3931_v44  ;;  %3766 = vadd.xlane.f32.xlu0 %v3765_v57 }
 0xa46   : > { %4098 = vadd.xlane.f32.xlu1 %v4097_v54 }
 0xa48   : > { %v5266_v38 = vpop.eup %5265 }
 0xa49   : > { %v2924_v26 = vmul.f32 %v5266_v38, %v5250_v33  ;;  %v4686_v38 = vld [vmem:[%s1080_s29] ss:$0 sm:$0xff] }
 0xa4b   : > { %4889 = vmatmul.mubr.msk.f32.vlgmr.msra.gmra.mrb[10].mxu0 %vm2836_vm12, %v2924_v26 }
 0xa4c   : > { %4897 = vmatpush3.msra.mxu0 %v3092_v43  ;;  %4898 = vmatprep.mubr.msk.f32.mxu0 %vm5313_vm11, %v5312_v30 }
 0xa4d   : > { %4906 = vmatprep.subr.mxu0 %v5312_v30 }
 0xa57   : > { %4102 = vrot.lane.b32.xlu1 %v6296_v59, %s5319_s7 }
 0xa58   : > { %3936 = vrot.lane.b32.xlu0 %v6296_v59, %s5320_s30 }
 0xa91   : > { %v3088_v31 = vpop.xlane.xlu0 %3087 }
 0xa92   : > { %5267 = vrcp.f32 %v3088_v31 }
 0xa96   : > { %v3254_v15 = vpop.xlane.xlu1 %3253 }
 0xa97   : > { %5269 = vrcp.f32 %v3254_v15 }
 0xa9a   : > { %v3420_v18 = vpop.xlane.xlu0 %3419  ;;  %v3771_v58 = vpop.permute.xlu1 %3770 }
 0xa9b   : > { %5271 = vrcp.f32 %v3420_v18 }
 0xa9c   : > { %v5268_v27 = vpop.eup %5267 }
 0xa9d   : > { %v3090_v3 = vmul.f32 %v5268_v27, %v5252_v28 }
 0xa9e   : > { %v3605_v36 = vpop.permute.xlu0 %3604 }
 0xa9f   : > { %4899 = vmatmul.mubr.msk.f32.vlgmr.msra.gmra.mrb[12].mxu0 %vm2836_vm12, %v3090_v3 }
 0xaa0   : > { %4907 = vmatpush3.msra.mxu0 %v3258_v7  ;;  %4908 = vmatprep.mubr.msk.f32.mxu0 %vm5313_vm11, %v5312_v30 }
 0xaa1   : > { %v5270_v47 = vpop.eup %5269  ;;  %4916 = vmatprep.subr.mxu0 %v5312_v30 }
 0xaa2   : > { %v3256_v11 = vmul.f32 %v5270_v47, %v5254_v20 }
 0xaa4   : > { %4909 = vmatmul.mubr.msk.f32.vlgmr.msra.gmra.mrb[14].mxu0 %vm2836_vm12, %v3256_v11 }
 0xaa5   : > { %v5272_v59 = vpop.eup %5271  ;;  %4917 = vmatpush3.msra.mxu0 %v3424_v24  ;;  %4918 = vmatprep.mubr.msk.f32.mxu0 %vm5313_vm11, %v5312_v30 }
 0xaa6   : > { %v3422_v16 = vmul.f32 %v5272_v59, %v6358_v8  ;;  %4926 = vmatprep.subr.mxu0 %v5312_v30 }
 0xaa8   : > { %4919 = vmatmul.mubr.msk.f32.vlgmr.msra.gmra.mrb[16].mxu0 %vm2836_vm12, %v3422_v16 }
 0xaa9   : > { %4927 = vmatpush3.msra.mxu0 %v3605_v36  ;;  %4928 = vmatprep.mubr.msk.f32.mxu0 %vm5313_vm11, %v5312_v30 }
 0xaaa   : > { %4936 = vmatprep.subr.mxu0 %v5312_v30 }
 0xacb   : > { %v3601_v63 = vpop.xlane.xlu1 %3600 }
 0xacc   : > { %5273 = vrcp.f32 %v3601_v63 }
 0xacf   : > { %v3933_v0 = vpop.xlane.xlu1 %3932  ;;  %v3767_v12 = vpop.xlane.xlu0 %3766 }
 0xad0   : > { %5275 = vrcp.f32 %v3767_v12 }
 0xad1   : > { %5277 = vrcp.f32 %v3933_v0 }
 0xad3   : > { %v4099_v56 = vpop.xlane.xlu1 %4098  ;;  %v3937_v43 = vpop.permute.xlu0 %3936 }
 0xad4   : > { %5279 = vrcp.f32 %v4099_v56 }
 0xad6   : > { %v5274_v46 = vpop.eup %5273 }
 0xad7   : > { %v3603_v61 = vmul.f32 %v5274_v46, %v5258_v2  ;;  %v4103_v50 = vpop.permute.xlu1 %4102 }
 0xad9   : > { %4929 = vmatmul.mubr.msk.f32.vlgmr.msra.gmra.mrb[18].mxu0 %vm2836_vm12, %v3603_v61 }
 0xada   : > { %4937 = vmatpush3.msra.mxu0 %v3771_v58  ;;  %4938 = vmatprep.mubr.msk.f32.mxu0 %vm5313_vm11, %v5312_v30  ;;  %v5276_v10 = vpop.eup %5275 }
 0xadb   : > { %4946 = vmatprep.subr.mxu0 %v5312_v30  ;;  %v3769_v33 = vmul.f32 %v5276_v10, %v6366_v32  ;;  %v5278_v53 = vpop.eup %5277 }
 0xadc   : > { %v3935_v14 = vmul.f32 %v5278_v53, %v6369_v23 }
 0xadd   : > { %4939 = vmatmul.mubr.msk.f32.vlgmr.msra.gmra.mrb[20].mxu0 %vm2836_vm12, %v3769_v33 }
 0xade   : > { %4947 = vmatpush3.msra.mxu0 %v3937_v43  ;;  %4948 = vmatprep.mubr.msk.f32.mxu0 %vm5313_vm11, %v5312_v30  ;;  %v5280_v25 = vpop.eup %5279 }
 0xadf   : > { %4956 = vmatprep.subr.mxu0 %v5312_v30  ;;  %v4101_v39 = vmul.f32 %v5280_v25, %v6375_v37 }
 0xae1   : > { %4949 = vmatmul.mubr.msk.f32.vlgmr.msra.gmra.mrb[22].mxu0 %vm2836_vm12, %v3935_v14  ;;  %v4689_v14 = vld [vmem:[%s6470_s22] ss:$0 sm:$0xff] }
 0xae2   : > { %4957 = vmatpush3.msra.mxu0 %v4103_v50  ;;  %4958 = vmatprep.mubr.msk.f32.mxu0 %vm5313_vm11, %v5312_v30  ;;  %v1135_v30 = vld [vmem:[%s1077_s2] sm:$0xff] }
 0xae3   : > { %v5040_v8 = vpack.c.bf16 %v1136_v1, %v1135_v30  ;;  %v4690_v50 = vld [vmem:[%s6471_s23] ss:$0 sm:$0xff] }
 0xae5   : > { %4959 = vmatmul.mubr.msk.f32.vlgmr.msra.gmra.mrb[24].mxu0 %vm2836_vm12, %v4101_v39  ;;  %5041 = vmatprep.subr.bf16.mxu1 %v5040_v8 }
 0xae6   : > { %5043 = vmatpush3.bf16.msra.mxu1 %v5040_v8 }
 0xae7   : > { %5045 = vmatprep.subr.bf16.mxu1 %v5044_v6 }
 0xaea   : > { %5047 = vmatpush3.bf16.msra.mxu1 %v5044_v6 }
 0xb1e   : > { %v2997_v13 = vpop.f32.mrb[10].mxu0 }
 0xb1f   : > { %v4890_v29 = vpop.f32.mrb[11].mxu0 }
 0xb72   : > { %v3163_v55 = vpop.f32.mrb[12].mxu0 }
 0xb73   : > { %3500 = vrot.lane.b32.xlu0 %v3163_v55, %s5321_s3  ;;  %v4900_v51 = vpop.f32.mrb[13].mxu0 }
 0xb77   : > { %v3329_v60 = vpop.f32.mrb[14].mxu0 }
 0xb78   : > { %3504 = vrot.lane.b32.xlu1 %v3329_v60, %s5322_s4  ;;  %v4910_v28 = vpop.f32.mrb[15].mxu0 }
 0xb7b   : > { %v3495_v62 = vpop.f32.mrb[16].mxu0 }
 0xb7c   : > { %3508 = vrot.lane.b32.xlu1 %v3495_v62, %s5323_s25  ;;  %v4920_v20 = vpop.f32.mrb[17].mxu0 }
 0xbac   : > { %v3676_v35 = vpop.f32.mrb[18].mxu0 }
 0xbad   : > { %v4930_v22 = vpop.f32.mrb[19].mxu0 }
 0xbb0   : > { %v3842_v19 = vpop.f32.mrb[20].mxu0 }
 0xbb1   : > { %4179 = vrot.lane.b32.xlu0 %v3842_v19, %s5321_s3  ;;  %v4940_v49 = vpop.f32.mrb[21].mxu0 }
 0xbb4   : > { %v4008_v21 = vpop.f32.mrb[22].mxu0 }
 0xbb5   : > { %4183 = vrot.lane.b32.xlu0 %v4008_v21, %s5322_s4  ;;  %v4950_v9 = vpop.f32.mrb[23].mxu0 }
 0xbb8   : > { %v4174_v5 = vpop.f32.mrb[24].mxu0 }
 0xbb9   : > { %4187 = vrot.lane.b32.xlu1 %v4174_v5, %s5323_s25  ;;  %v4960_v52 = vpop.f32.mrb[25].mxu0  ;;  %s1091_s25 = scalar_lea.vmem %s6472_s24, %s5463_s28 }
 0xbe5   : > { %v3501_v42 = vpop.permute.xlu0 %3500 }
 0xbe6   : > { %v3511_v24 = vsel %vm2836_vm12, %v2997_v13, %v3501_v42 }
 0xbea   : > { %v3505_v45 = vpop.permute.xlu1 %3504 }
 0xbeb   : > { %v3513_v2 = vsel %vm3512_vm13, %v3511_v24, %v3505_v45 }
 0xbee   : > { %v3509_v32 = vpop.permute.xlu1 %3508 }
 0xbef   : > { %v3515_v48 = vsel %vm3514_vm14, %v3513_v2, %v3509_v32 }
 0xbf0   : > { %4969 = vmatprep.mubr.msk.f32.mxu1 %vm1146_vm0, %v3515_v48 }
 0xc23   : > { %v4180_v40 = vpop.permute.xlu0 %4179 }
 0xc24   : > { %v4190_v44 = vsel %vm2836_vm12, %v3676_v35, %v4180_v40 }
 0xc27   : > { %v4184_v23 = vpop.permute.xlu0 %4183 }
 0xc28   : > { %v4191_v57 = vsel %vm3512_vm13, %v4190_v44, %v4184_v23 }
 0xc2b   : > { %v4188_v37 = vpop.permute.xlu1 %4187 }
 0xc2c   : > { %v4192_v54 = vsel %vm3514_vm14, %v4191_v57, %v4188_v37 }
 0xc2d   : > { %4970 = vmatmul.mubr.msk.f32.vlgmr.msra.gmra.mrb[22].mxu1 %vm1146_vm0, %v4192_v54 }
 0xd00   : > { %v4971_v26 = vpop.f32.mrb[22].mxu1 }
 0xd01   : > { %v4277_v7 = vadd.f32 %v4971_v26, %v4686_v38  ;;  %v4271_v31 = vpop.f32.mrb[23].mxu1 }
 0xd02   : > { %v4272_v15 = vadd.f32 %v4686_v38, %v4271_v31 }
 0xd03   : > { %v4281_v18 = vadd.f32 %v4277_v7, %v6247_v4 }
 0xd04   : > { %v4280_v27 = vadd.f32 %v4272_v15, %v6243_v41 }
 0xd05   : > { %v4285_v3 = vsel %vm1146_vm0, %v4281_v18, 0.0 }
 0xd06   : > { %4286 = vadd.xlane.f32.xlu1 %v4285_v3  ;;  %v4282_v47 = vsel %vm1146_vm0, %v4280_v27, 0.0 }
 0xd07   : > { %4283 = vadd.xlane.f32.xlu0 %v4282_v47 }
 0xd93   : > { %v4287_v11 = vpop.xlane.xlu1 %4286 }
 0xd94   : > { %v4289_v59 = vmul.f32 0.03125, %v4287_v11  ;;  %v4284_v16 = vpop.xlane.xlu0 %4283 }
 0xd95   : > { %v4288_v36 = vmul.f32 0.03125, %v4284_v16 }
 0xd96   : > { %v4291_v58 = vsub.f32 %v4281_v18, %v4289_v59 }
 0xd97   : > { %v4290_v63 = vsub.f32 %v4280_v27, %v4288_v36 }
 0xd98   : > { %v4293_v56 = vmul.f32 %v4291_v58, %v4291_v58 }
 0xd99   : > { %v4292_v0 = vmul.f32 %v4290_v63, %v4290_v63 }
 0xd9a   : > { %v4297_v4 = vsel %vm1146_vm0, %v4293_v56, 0.0 }
 0xd9b   : > { %v4294_v12 = vsel %vm1146_vm0, %v4292_v0, 0.0 }
 0xd9c   : > { %4295 = vadd.xlane.f32.xlu0 %v4294_v12 }
 0xda0   : > { %4298 = vadd.xlane.f32.xlu0 %v4297_v4 }
 0xe29   : > { %v4296_v41 = vpop.xlane.xlu0 %4295 }
 0xe2a   : > { %v4300_v46 = vmul.f32 0.03125, %v4296_v41 }
 0xe2c   : > { %v4302_v61 = vadd.f32 1e-05, %v4300_v46 }
 0xe2d   : > { %v4299_v10 = vpop.xlane.xlu0 %4298 }
 0xe2e   : > { %5281 = vrsqrt.f32 %v4302_v61  ;;  %v4301_v33 = vmul.f32 0.03125, %v4299_v10 }
 0xe30   : > { %v4303_v53 = vadd.f32 1e-05, %v4301_v33 }
 0xe32   : > { %5283 = vrsqrt.f32 %v4303_v53 }
 0xe38   : > { %v5282_v43 = vpop.eup %5281 }
 0xe39   : > { %v4306_v25 = vmul.f32 %v5282_v43, %v4290_v63 }
 0xe3b   : > { %v4314_v39 = vmul.f32 %v4689_v14, %v4306_v25 }
 0xe3c   : > { %v5284_v13 = vpop.eup %5283 }
 0xe3d   : > { %v4322_v29 = vadd.f32 %v4690_v50, %v4314_v39  ;;  %v4307_v55 = vmul.f32 %v5284_v13, %v4291_v58 }
 0xe3f   : > { %4324 = vst.msk [vmem:[%s1091_s25] sm:$0xff] %vm1146_vm0, %v4322_v29  ;;  %v4315_v51 = vmul.f32 %v4689_v14, %v4307_v55 }
 0xe41   : > { %v4323_v60 = vadd.f32 %v4690_v50, %v4315_v51 }
 0xe43   : > { %4325 = vst.msk [vmem:[%s1091_s25 + $0x8] sm:$0xff] %vm1146_vm0, %v4323_v60 }
 0xe44 PF: > { %s34_s5 = sadd.s32 1, %s5293_s5  }
 0xe45   : > { %p31_p4 = scmp.ge.s32.totalorder %s34_s5, 5  }
 0xe47   :  { %33 = sbr.rel (!%p31_p4) target bundleno = 10 (0xa), region = 209 }

// kernel: cross_mambaformer_forward.7
= control target key start
LH: loop header
LB: loop body
LE: loop exit
PB: predicated region body
PF: predicated region fallthrough
CT: control target
= control target key end

     0   :  { %s6049_s6 = smov 1   ;;  %s6050_s10 = smov 2   ;;  %s7255_s0 = inlined_call_operand.smem [shape: u32[31], index: -1, kind: input, shape index: {}] }
   0x1   :  { %s6116_s5 = sld [smem:[%s7255_s0]]   ;;  %s6051_s14 = smov 3  }
   0x2   :  { %s6121_s9 = sld [smem:[%s7255_s0 + %s6049_s6]]   ;;  %s6052_s18 = smov 4  }
   0x3   :  { %s6126_s13 = sld [smem:[%s7255_s0 + %s6050_s10]]   ;;  %s6053_s22 = smov 5  }
   0x4   :  { %s6131_s17 = sld [smem:[%s7255_s0 + %s6051_s14]]   ;;  %s6054_s26 = smov 6  }
   0x5   :  { %s6136_s21 = sld [smem:[%s7255_s0 + %s6052_s18]]   ;;  %s6055_s30 = smov 7  }
   0x6   :  { %s6141_s25 = sld [smem:[%s7255_s0 + %s6053_s22]]   ;;  %s6056_s4 = smov 8  }
   0x7   :  { %s6146_s29 = sld [smem:[%s7255_s0 + %s6054_s26]]   ;;  %s6057_s10 = smov 9  }
   0x8   :  { %s6151_s3 = sld [smem:[%s7255_s0 + %s6055_s30]]   ;;  %s6058_s15 = smov 10  }
   0x9   :  { %s6156_s8 = sld [smem:[%s7255_s0 + %s6056_s4]]   ;;  %s6059_s20 = smov 11  }
   0xa   :  { %s6161_s14 = sld [smem:[%s7255_s0 + %s6057_s10]]   ;;  %s6060_s26 = smov 12  }
   0xb   :  { %s6166_s19 = sld [smem:[%s7255_s0 + %s6058_s15]]   ;;  %s6061_s1 = smov 13  }
   0xc   :  { %s6171_s24 = sld [smem:[%s7255_s0 + %s6059_s20]]   ;;  %s6062_s7 = smov 14  }
   0xd   :  { %s6176_s30 = sld [smem:[%s7255_s0 + %s6060_s26]]   ;;  %s6063_s15 = smov 15  }
   0xe   :  { %s6181_s6 = sld [smem:[%s7255_s0 + %s6061_s1]]   ;;  %s6064_s22 = smov 16  }
   0xf   :  { %s6186_s12 = sld [smem:[%s7255_s0 + %s6062_s7]]   ;;  %s6065_s28 = smov 17  }
  0x10   :  { %s6191_s20 = sld [smem:[%s7255_s0 + %s6063_s15]]   ;;  %s6066_s7 = smov 18  }
  0x11   :  { %s6196_s27 = sld [smem:[%s7255_s0 + %s6064_s22]]   ;;  %s6067_s15 = smov 19  }
  0x12   :  { %s6201_s4 = sld [smem:[%s7255_s0 + %s6065_s28]]   ;;  %s6068_s22 = smov 20  }
  0x13   :  { %s6069_s28 = smov 21  }
  0x15   :  { %7258 = sst [smem:[#allocation2_spill]] %s6186_s12 }
  0x16   :  { %7259 = sst [smem:[#allocation3_spill]] %s6191_s20 }
  0x17   :  { %7260 = sst [smem:[#allocation4_spill]] %s6196_s27 }
  0x18   :  { %7261 = sst [smem:[#allocation5_spill]] %s6201_s4 }
  0x19   :  { %s6206_s12 = sld [smem:[%s7255_s0 + %s6066_s7]]   ;;  %s6070_s7 = smov 22  }
  0x1a   :  { %s6211_s20 = sld [smem:[%s7255_s0 + %s6067_s15]]   ;;  %s6071_s15 = smov 23  }
  0x1b   :  { %s6216_s27 = sld [smem:[%s7255_s0 + %s6068_s22]]   ;;  %s6072_s22 = smov 24  }
  0x1c   :  { %s6221_s4 = sld [smem:[%s7255_s0 + %s6069_s28]]   ;;  %s6073_s28 = smov 25  }
  0x1f   :  { %7262 = sst [smem:[#allocation6_spill]] %s6206_s12 }
  0x20   :  { %7263 = sst [smem:[#allocation7_spill]] %s6211_s20 }
  0x21   :  { %7264 = sst [smem:[#allocation8_spill]] %s6216_s27 }
  0x22   :  { %7265 = sst [smem:[#allocation9_spill]] %s6221_s4 }
  0x23   :  { %s6226_s12 = sld [smem:[%s7255_s0 + %s6070_s7]]   ;;  %s6074_s7 = smov 26  }
  0x24   :  { %s6231_s20 = sld [smem:[%s7255_s0 + %s6071_s15]]   ;;  %s6075_s15 = smov 27  }
  0x25   :  { %s6236_s27 = sld [smem:[%s7255_s0 + %s6072_s22]]   ;;  %s6076_s22 = smov 28  }
  0x26   :  { %s6241_s4 = sld [smem:[%s7255_s0 + %s6073_s28]]   ;;  %s6077_s28 = smov 29  }
  0x29   :  { %7266 = sst [smem:[#allocation10_spill]] %s6226_s12 }
  0x2a   :  { %7267 = sst [smem:[#allocation11_spill]] %s6231_s20 }
  0x2b   :  { %7268 = sst [smem:[#allocation12_spill]] %s6236_s27 }
  0x2c   :  { %7269 = sst [smem:[#allocation13_spill]] %s6241_s4 }
  0x2d   :  { %s6246_s12 = sld [smem:[%s7255_s0 + %s6074_s7]]   ;;  %s6078_s7 = smov 30  }
  0x2e   :  { %s6251_s20 = sld [smem:[%s7255_s0 + %s6075_s15]]   ;;  %s6268_s15 = smov 0  }
  0x2f   :  { %s6256_s27 = sld [smem:[%s7255_s0 + %s6076_s22]]  }
  0x30   :  { %s6261_s4 = sld [smem:[%s7255_s0 + %s6077_s28]]  }
  0x33   :  { %7270 = sst [smem:[#allocation14_spill]] %s6246_s12 }
  0x34   :  { %s6266_s12 = sld [smem:[%s7255_s0 + %s6078_s7]]  }
  0x35 LB: > { %s5235_s16 = sadd.s32 4294967295, %s6047_s15   ;;  %p5239_p0 = scmp.ge.s32.totalorder %s6047_s15, 1  ;;  %s6047_s15 = sphi %s6268_s15, %s71_s15  }
  0x36   : > { %p1083_p1 = scmp.lt.s32.totalorder %s6047_s15, 4 }
  0x38   : > { %p1084_p2 = pnand %p5239_p0, %p1083_p1 }
  0x3a   : > { %1087 = sbr.rel (%p1084_p2) target bundleno = 4534 (0x11b6), region = 140 }
  0x41   : > { %p1266_p3 = scmp.lt.s32.totalorder %s5235_s16, 2  ;;  %vm1451_vm0 = vcmask 261120   ;;  %vm1551_vm1 = vcmask 1041408   ;;  %v1533_v21 = vlaneseq  ;;  %vm1541_vm2 = vcmask 1040384  }
  0x42   : > { %vm1561_vm3 = vcmask 1042432   ;;  %vm1608_vm4 = vcmask 523264   ;;  %vm1696_vm6 = vcmask 15360   ;;  %vm2790_vm7 = vcmask 1043456  }
  0x43   : > { %s7319_s16 = smov (!%p1266_p3, %s5235_s16), 2  ;;  %v6304_v22 = vshrl.u32 %v1533_v21, 7  ;;  %vm6349_vm5 = vmpackc.low %vm1608_vm4, %vm1608_vm4  ;;  %vm2792_vm8 = vcmask 1044480   ;;  %vm2794_vm9 = vcmask 1045504   ;;  %vm2796_vm10 = vcmask 1046528  }
  0x44   : > { %s6279_s0 = sshll.u32 %s7319_s16, 5  ;;  %s6282_s18 = sshll.u32 %s7319_s16, 4  ;;  %vm6097_vm11 = vmmov 0   ;;  %vm3141_vm12 = vcmask 64512   ;;  %vm3817_vm13 = vcmask 130048   ;;  %vm3819_vm14 = vcmask 195584  }
  0x45   : > { %s1275_s22 = scalar_lea.vmem %s6121_s9, %s6279_s0  ;;  %s6288_s23 = scalar_lea.vmem %s6116_s5, %s6282_s18  ;;  %v6308_v23 = vsub.s32 3, %v6304_v22  ;;  %v6311_v24 = vsub.s32 2, %v6304_v22  ;;  %v6314_v26 = vsub.s32 1, %v6304_v22  ;;  %v6321_v30 = vsub.s32 0, %v6304_v22 }
  0x46   : > { %v1381_v0 = vld [vmem:[%s1275_s22] sm:$0xff]  ;;  %v1382_v1 = vld [vmem:[%s1275_s22 + $0x8] sm:$0xff]  ;;  %v1383_v2 = vld [vmem:[%s1275_s22 + $0x10] sm:$0xff]  ;;  %s6295_s26 = sshll.u32 %s7319_s16, 6  ;;  %s5251_s1 = sshll.u32 %s7319_s16, 1 }
  0x47   : > { %v5664_v3 = vpack.c.bf16 %v1382_v1, %v1381_v0  ;;  %v1384_v4 = vld [vmem:[%s1275_s22 + $0x18] sm:$0xff]  ;;  %v1449_v6 = vld [vmem:[%s6288_s23] sm:$0xff]  ;;  %v1450_v7 = vld [vmem:[%s6288_s23 + $0x8] sm:$0xff]  ;;  %s1287_s28 = scalar_lea.vmem %s6136_s21, %s6295_s26  ;;  %s1301_s2 = scalar_lea.vmem %s6151_s3, %s5251_s1 }
  0x48   : > { %v5668_v5 = vpack.c.bf16 %v1384_v4, %v1383_v2  ;;  %5461 = vmatprep.mubr.msk.f32.mxu0 %vm1451_vm0, %v1449_v6  ;;  %v1387_v8 = vld [vmem:[%s1287_s28] sm:$0xff]  ;;  %v1388_v9 = vld [vmem:[%s1287_s28 + $0x8] sm:$0xff]  ;;  %v1389_v10 = vld [vmem:[%s1287_s28 + $0x10] sm:$0xff]  ;;  %s5244_s7 = sshll.u32 %s7319_s16, 2  ;;  %s1282_s11 = scalar_lea.vmem %s6131_s17, %s7319_s16 }
  0x49   : > { %5665 = vmatprep.subr.bf16.mxu0 %v5664_v3  ;;  %v5672_v11 = vpack.c.bf16 %v1388_v9, %v1387_v8  ;;  %v1390_v12 = vld [vmem:[%s1287_s28 + $0x18] sm:$0xff]  ;;  %v1391_v14 = vld [vmem:[%s1287_s28 + $0x20] sm:$0xff]  ;;  %v1392_v15 = vld [vmem:[%s1287_s28 + $0x28] sm:$0xff]  ;;  %s1279_s10 = scalar_lea.vmem %s6126_s13, %s5244_s7  ;;  %s1292_s22 = scalar_lea.vmem %s6141_s25, %s6282_s18 }
  0x4a   : > { %5667 = vmatpush3.bf16.msra.mxu0 %v5664_v3  ;;  %v5676_v13 = vpack.c.bf16 %v1390_v12, %v1389_v10  ;;  %v5680_v16 = vpack.c.bf16 %v1392_v15, %v1391_v14  ;;  %v1393_v17 = vld [vmem:[%s1287_s28 + $0x30] sm:$0xff]  ;;  %v1394_v18 = vld [vmem:[%s1287_s28 + $0x38] sm:$0xff]  ;;  %v1399_v20 = vld [vmem:[%s1301_s2] sm:$0x3]  ;;  %s1297_s28 = scalar_lea.vmem %s6146_s29, %s6282_s18  ;;  %s6095_s1 = smov 64  }
  0x4b   : > { %5669 = vmatprep.subr.bf16.mxu0 %v5668_v5  ;;  %5673 = vmatprep.subr.bf16.mxu1 %v5672_v11  ;;  %v5684_v19 = vpack.c.bf16 %v1394_v18, %v1393_v17  ;;  %v1385_v25 = vld [vmem:[%s1279_s10] sm:$0xf]  ;;  %v1398_v18 = vld [vmem:[%s1297_s28 + $0x8] sm:$0xff]  ;;  %s1304_s2 = scalar_lea.vmem %s6156_s8, %s7319_s16  ;;  %s1309_s7 = scalar_lea.vmem %s6161_s14, %s6282_s18 }
  0x4c   : > { %5675 = vmatpush3.bf16.msra.mxu1 %v5672_v11  ;;  %v1536_v28 = vrot.slane %v1385_v25, %v6308_v23  ;;  %v1546_v29 = vrot.slane %v1385_v25, %v6311_v24  ;;  %v1556_v35 = vrot.slane %v1385_v25, %v6314_v26  ;;  %v1566_v44 = vrot.slane %v1385_v25, %v6321_v30  ;;  %v5270_v56 = vld [vmem:[%s1282_s11] ss:$0 sm:$0xff]  ;;  %s1317_s10 = scalar_lea.vmem %s6171_s24, %s6295_s26  ;;  %s1312_s11 = scalar_lea.vmem %s6166_s19, %s7319_s16 }
  0x4d   : > { %5677 = vmatprep.subr.bf16.mxu1 %v5676_v13  ;;  %v1395_v15 = vld [vmem:[%s1292_s22] sm:$0xff] }
  0x4e   : > { %5671 = vmatpush3.bf16.msra.mxu0 %v5668_v5  ;;  %v1397_v17 = vld [vmem:[%s1297_s28] sm:$0xff]  ;;  %s7305_s28 = sld [smem:[#allocation2_spill]] }
  0x4f   : > { %5483 = vmatprep.subr.msk.mxu0 %vm1551_vm1, %v1399_v20 }
  0x50   : > { %5679 = vmatpush3.bf16.msra.mxu1 %v5676_v13 }
  0x51   : > { %5462 = vmatmul.mubr.msk.f32.vlgmr.msra.gmra.mrb[0].mxu0 %vm1451_vm0, %v1450_v7  ;;  %5681 = vmatprep.subr.bf16.mxu1 %v5680_v16 }
  0x52   : > { %5484 = vmatpush3.msk.msra.mxu0 %vm1551_vm1, %v1399_v20  ;;  %v6080_v20 = vmov 0  }
  0x53   : > { %5831 = vset.pattern.permute.xlu0 %v6080_v20 }
  0x54   : > { %5683 = vmatpush3.bf16.msra.mxu1 %v5680_v16  ;;  %v1396_v16 = vld [vmem:[%s1292_s22 + $0x8] sm:$0xff]  ;;  %s1323_s22 = scalar_lea.vmem %s6181_s6, %s7319_s16 }
  0x55   : > { %5685 = vmatprep.subr.bf16.mxu1 %v5684_v19 }
  0x58   : > { %5687 = vmatpush3.bf16.msra.mxu1 %v5684_v19  ;;  %v6079_v19 = vmov 8  }
  0x59   : > { %5832 = vset.pattern.permute.xlu1 %v6079_v19 }
 0x124   : > { %v6316_v27 = vpop.f32.mrb[0].mxu0 }
 0x125   : > { %v1571_v31 = vrot.slane %v6316_v27, 7  ;;  %v1576_v32 = vrot.slane %v6316_v27, 6  ;;  %v1581_v33 = vrot.slane %v6316_v27, 5  ;;  %v6326_v34 = vpop.f32.mrb[1].mxu0  ;;  %v1569_v41 = vmul.f32 %v6316_v27, %v1536_v28 }
 0x126   : > { %v1539_v36 = vrot.slane %v6326_v34, 7  ;;  %v1549_v37 = vrot.slane %v6326_v34, 6  ;;  %v1559_v40 = vrot.slane %v6326_v34, 5  ;;  %v1537_v46 = vmul.f32 %v1536_v28, %v6326_v34 }
 0x127   : > { %v1573_v38 = vsel %vm1541_vm2, 0.0, %v1571_v31  ;;  %v1578_v39 = vsel %vm1551_vm1, 0.0, %v1576_v32  ;;  %v1583_v45 = vsel %vm1561_vm3, 0.0, %v1581_v33  ;;  %v6081_v31 = vmov 1  }
 0x128   : > { %v1574_v42 = vmul.f32 %v1573_v38, %v1546_v29  ;;  %v1542_v43 = vsel %vm1541_vm2, 0.0, %v1539_v36  ;;  %v1552_v48 = vsel %vm1551_vm1, 0.0, %v1549_v37  ;;  %v1579_v50 = vmul.f32 %v1578_v39, %v1556_v35 }
 0x129   : > { %v1547_v47 = vmul.f32 %v1546_v29, %v1542_v43  ;;  %v1562_v51 = vsel %vm1561_vm3, 0.0, %v1559_v40  ;;  %v1557_v53 = vmul.f32 %v1556_v35, %v1552_v48  ;;  %v1584_v55 = vmul.f32 %v1583_v45, %v1566_v44 }
 0x12a   : > { %v1575_v49 = vadd.f32 %v1574_v42, %v1569_v41  ;;  %v1567_v58 = vmul.f32 %v1566_v44, %v1562_v51  ;;  %v6082_v32 = vmov 9   ;;  %v6083_v36 = vmov 2  }
 0x12b   : > { %v1548_v52 = vadd.f32 %v1547_v47, %v1537_v46  ;;  %v6084_v37 = vmov 3   ;;  %v6085_v38 = vmov 10   ;;  %v6086_v39 = vmov 12  }
 0x12c   : > { %v1580_v54 = vadd.f32 %v1579_v50, %v1575_v49  ;;  %v6087_v40 = vmov 11   ;;  %v6088_v41 = vmov 6   ;;  %v6089_v42 = vmov 4  }
 0x12d   : > { %v1558_v57 = vadd.f32 %v1557_v53, %v1548_v52  ;;  %v6090_v43 = vmov 5   ;;  %v6091_v44 = vmov 13   ;;  %v6092_v45 = vmov 14  }
 0x12e   : > { %v1585_v59 = vadd.f32 %v1584_v55, %v1580_v54  ;;  %v6093_v46 = vmov 7   ;;  %v6094_v47 = vmov 15   ;;  %v1969_v48 = vsub.f32 0.0, %v6326_v34 }
 0x12f   : > { %v1568_v60 = vadd.f32 %v1567_v58, %v1558_v57  ;;  %v1970_v11 = vsub.f32 0.0, %v6316_v27 }
 0x130   : > { %v1593_v61 = vadd.f32 %v5270_v56, %v1585_v59  ;;  %v1971_v49 = vmul.f32 1.442695, %v1969_v48  ;;  %v5273_v59 = vld [vmem:[%s1304_s2] ss:$0 sm:$0xff]  ;;  %s1328_s2 = scalar_lea.vmem %s7305_s28, %s6279_s0  ;;  %s7309_s28 = sld [smem:[#allocation3_spill]] }
 0x131   : > { %v1592_v62 = vadd.f32 %v5270_v56, %v1568_v60 }
 0x132   : > { %v1595_v63 = vsub.f32 0.0, %v1593_v61 }
 0x133   : > { %v1594_v0 = vsub.f32 0.0, %v1592_v62 }
 0x134   : > { %v1598_v1 = vmul.f32 1.442695, %v1595_v63 }
 0x135   : > { %v1596_v2 = vmul.f32 1.442695, %v1594_v0 }
 0x136   : > { %5895 = vpow2.f32 %v1598_v1 }
 0x137   : > { %5897 = vpow2.f32 %v1596_v2 }
 0x140   : > { %v5896_v3 = vpop.eup %5895 }
 0x141   : > { %v5898_v4 = vpop.eup %5897  ;;  %v1601_v5 = vadd.f32 1.0, %v5896_v3 }
 0x142   : > { %v1600_v6 = vadd.f32 1.0, %v5898_v4 }
 0x143   : > { %5899 = vrcp.f32 %v1601_v5 }
 0x144   : > { %5901 = vrcp.f32 %v1600_v6 }
 0x145   : > { %5903 = vpow2.f32 %v1971_v49 }
 0x14d   : > { %v5900_v7 = vpop.eup %5899 }
 0x14e   : > { %v5902_v8 = vpop.eup %5901  ;;  %v6343_v9 = vmul.f32 %v5900_v7, %v1593_v61 }
 0x14f   : > { %v6345_v10 = vmul.f32 %v5902_v8, %v1592_v62  ;;  %v5904_v50 = vpop.eup %5903 }
 0x150   : > { %v1975_v51 = vadd.f32 1.0, %v5904_v50 }
 0x151   : > { %7271 = vst [vmem:[#allocation15_spill] sm:$0xff] %v6345_v10  ;;  %5480 = vmatprep.mubr.msk.f32.mxu1 %vm1608_vm4, %v6345_v10  ;;  %v5688_v12 = vpack.c.bf16 %v6343_v9, %v6345_v10 }
 0x152   : > { %5481 = vmatmul.mubr.msk.f32.vlgmr.msra.gmra.mrb[0].mxu1 %vm1608_vm4, %v6343_v9  ;;  %5905 = vrcp.f32 %v1975_v51 }
 0x153   : > { %5690 = vmatprep.subr.msk.bf16.mxu0 %vm6349_vm5, %v5688_v12 }
 0x15c   : > { %v5906_v52 = vpop.eup %5905 }
 0x15d   : > { %v1981_v53 = vmul.f32 %v5906_v52, %v6326_v34 }
 0x225   : > { %v5482_v13 = vpop.f32.mrb[0].mxu1 }
 0x226   : > { %v1681_v14 = vpop.f32.mrb[1].mxu1 }
 0x227   : > { %5485 = vmatprep.mubr.msk.f32.mxu0 %vm1696_vm6, %v1681_v14  ;;  %v1973_v14 = vmul.f32 1.442695, %v1970_v11 }
 0x228   : > { %5486 = vmatmul.mubr.msk.f32.vlgmr.msra.gmra.mrb[2].mxu0 %vm1696_vm6, %v5482_v13 }
 0x229   : > { %5693 = vmatpush3.bf16.xpose.msk.msra.mxu0 %vm6349_vm5, %v5688_v12  ;;  %5492 = vmatprep.mubr.msk.f32.mxu0 %vm1608_vm4, %v1395_v15 }
 0x22a   : > { %5696 = vmatprep.subr.msk.bf16.mxu0 %vm6349_vm5, %v5688_v12 }
 0x230   : > { %5493 = vmatmul.mubr.msk.f32.vlgmr.msra.gmra.mrb[4].mxu0 %vm1608_vm4, %v1396_v16 }
 0x231   : > { %5699 = vmatpush3.bf16.xpose.msk.msra.mxu0 %vm6349_vm5, %v5688_v12  ;;  %5499 = vmatprep.mubr.msk.f32.mxu0 %vm1608_vm4, %v1397_v17 }
 0x238   : > { %5500 = vmatmul.mubr.msk.f32.vlgmr.msra.gmra.mrb[6].mxu0 %vm1608_vm4, %v1398_v18 }
 0x2fb   : > { %v6377_v21 = vpop.f32.mrb[2].mxu0 }
 0x2fc   : > { %v6379_v25 = vpop.f32.mrb[3].mxu0  ;;  %v6510_v2 = vadd.f32 %v6377_v21, %v5273_v59 }
 0x2fd   : > { %v6498_v62 = vadd.f32 %v5273_v59, %v6379_v25 }
 0x2fe   : > { %v1784_v5 = vand.u32 2147483647, %v6510_v2  ;;  %v1782_v11 = vmax.f32 %v6510_v2, 0.0 }
 0x2ff   : > { %v1783_v0 = vand.u32 2147483647, %v6498_v62  ;;  %v1781_v50 = vmax.f32 %v6498_v62, 0.0 }
 0x300   : > { %v1786_v12 = vsub.f32 0.0, %v1784_v5 }
 0x301   : > { %v1785_v3 = vsub.f32 0.0, %v1783_v0 }
 0x302   : > { %v1789_v16 = vmul.f32 1.442695, %v1786_v12 }
 0x303   : > { %v5494_v28 = vpop.f32.mrb[4].mxu0  ;;  %v1787_v7 = vmul.f32 1.442695, %v1785_v3 }
 0x304   : > { %2270 = vperm.xlu1 %5832, %v5494_v28   ;;  %2158 = vperm.xlu0 %5831, %v5494_v28   ;;  %v6381_v29 = vpop.f32.mrb[5].mxu0 }
 0x305   : > { %5907 = vpow2.f32 %v1787_v7 }
 0x306   : > { %5909 = vpow2.f32 %v1973_v14 }
 0x307   : > { %5911 = vpow2.f32 %v1789_v16 }
 0x308   : > { %5833 = vset.pattern.permute.xlu1 %v6081_v31  ;;  %5834 = vset.pattern.permute.xlu0 %v6082_v32 }
 0x309   : > { %2172 = vperm.xlu1 %5833, %v5494_v28   ;;  %2284 = vperm.xlu0 %5834, %v5494_v28  }
 0x30b   : > { %v6385_v33 = vpop.f32.mrb[6].mxu0 }
 0x30c   : > { %v6387_v35 = vpop.f32.mrb[7].mxu0 }
 0x30d   : > { %5835 = vset.pattern.permute.xlu1 %v6083_v36  ;;  %5837 = vset.pattern.permute.xlu0 %v6084_v37 }
 0x30e   : > { %2186 = vperm.xlu1 %5835, %v5494_v28   ;;  %2200 = vperm.xlu0 %5837, %v5494_v28  }
 0x312   : > { %5836 = vset.pattern.permute.xlu1 %v6085_v38  ;;  %5840 = vset.pattern.permute.xlu0 %v6086_v39 }
 0x313   : > { %2298 = vperm.xlu1 %5836, %v5494_v28   ;;  %2326 = vperm.xlu0 %5840, %v5494_v28  }
 0x317   : > { %5838 = vset.pattern.permute.xlu1 %v6087_v40  ;;  %5843 = vset.pattern.permute.xlu0 %v6088_v41 }
 0x318   : > { %2312 = vperm.xlu1 %5838, %v5494_v28   ;;  %2242 = vperm.xlu0 %5843, %v5494_v28  }
 0x31c   : > { %5839 = vset.pattern.permute.xlu1 %v6089_v42  ;;  %5847 = vset.pattern.permute.xlu0 %v6080_v20 }
 0x31d   : > { %2214 = vperm.xlu1 %5839, %v5494_v28   ;;  %2153 = vperm.xlu0 %5847, %v6381_v29  }
 0x321   : > { %5841 = vset.pattern.permute.xlu1 %v6090_v43  ;;  %5849 = vset.pattern.permute.xlu0 %v6081_v31 }
 0x322   : > { %2228 = vperm.xlu1 %5841, %v5494_v28   ;;  %2168 = vperm.xlu0 %5849, %v6381_v29  }
 0x326   : > { %5842 = vset.pattern.permute.xlu1 %v6091_v44  ;;  %5852 = vset.pattern.permute.xlu0 %v6085_v38 }
 0x327   : > { %2340 = vperm.xlu1 %5842, %v5494_v28   ;;  %2294 = vperm.xlu0 %5852, %v6381_v29  }
 0x32b   : > { %5844 = vset.pattern.permute.xlu1 %v6092_v45  ;;  %5855 = vset.pattern.permute.xlu0 %v6089_v42 }
 0x32c   : > { %2354 = vperm.xlu1 %5844, %v5494_v28   ;;  %2210 = vperm.xlu0 %5855, %v6381_v29  }
 0x330   : > { %5845 = vset.pattern.permute.xlu1 %v6093_v46  ;;  %5858 = vset.pattern.permute.xlu0 %v6091_v44 }
 0x331   : > { %2256 = vperm.xlu1 %5845, %v5494_v28   ;;  %2336 = vperm.xlu0 %5858, %v6381_v29  }
 0x335   : > { %5846 = vset.pattern.permute.xlu1 %v6094_v47  ;;  %5864 = vset.pattern.permute.xlu0 %v6081_v31 }
 0x336   : > { %2368 = vperm.xlu1 %5846, %v5494_v28   ;;  %2417 = vperm.xlu0 %5864, %v6385_v33  }
 0x33a   : > { %5848 = vset.pattern.permute.xlu1 %v6079_v19  ;;  %5867 = vset.pattern.permute.xlu0 %v6082_v32 }
 0x33b   : > { %2266 = vperm.xlu1 %5848, %v6381_v29   ;;  %2621 = vperm.xlu0 %5867, %v6385_v33  }
 0x33f   : > { %5850 = vset.pattern.permute.xlu1 %v6082_v32  ;;  %5869 = vset.pattern.permute.xlu0 %v6085_v38 }
 0x340   : > { %2280 = vperm.xlu1 %5850, %v6381_v29   ;;  %2646 = vperm.xlu0 %5869, %v6385_v33  }
 0x344   : > { %5851 = vset.pattern.permute.xlu1 %v6083_v36  ;;  %5871 = vset.pattern.permute.xlu0 %v6087_v40 }
 0x345   : > { %2182 = vperm.xlu1 %5851, %v6381_v29   ;;  %2671 = vperm.xlu0 %5871, %v6385_v33  }
 0x349   : > { %5853 = vset.pattern.permute.xlu1 %v6084_v37  ;;  %5874 = vset.pattern.permute.xlu0 %v6088_v41 }
 0x34a   : > { %2196 = vperm.xlu1 %5853, %v6381_v29   ;;  %2542 = vperm.xlu0 %5874, %v6385_v33  }
 0x34e   : > { %5854 = vset.pattern.permute.xlu1 %v6087_v40  ;;  %5877 = vset.pattern.permute.xlu0 %v6080_v20 }
 0x34f   : > { %2308 = vperm.xlu1 %5854, %v6381_v29   ;;  %2383 = vperm.xlu0 %5877, %v6387_v35  }
 0x353   : > { %5856 = vset.pattern.permute.xlu1 %v6086_v39  ;;  %5880 = vset.pattern.permute.xlu0 %v6079_v19 }
 0x354   : > { %2322 = vperm.xlu1 %5856, %v6381_v29   ;;  %2588 = vperm.xlu0 %5880, %v6387_v35  }
 0x358   : > { %5857 = vset.pattern.permute.xlu1 %v6090_v43  ;;  %5882 = vset.pattern.permute.xlu0 %v6084_v37 }
 0x359   : > { %2224 = vperm.xlu1 %5857, %v6381_v29   ;;  %2463 = vperm.xlu0 %5882, %v6387_v35  }
 0x35d   : > { %5859 = vset.pattern.permute.xlu1 %v6088_v41  ;;  %5884 = vset.pattern.permute.xlu0 %v6089_v42 }
 0x35e   : > { %2238 = vperm.xlu1 %5859, %v6381_v29   ;;  %2488 = vperm.xlu0 %5884, %v6387_v35  }
 0x362   : > { %5860 = vset.pattern.permute.xlu1 %v6092_v45  ;;  %5887 = vset.pattern.permute.xlu0 %v6086_v39 }
 0x363   : > { %2350 = vperm.xlu1 %5860, %v6381_v29   ;;  %2692 = vperm.xlu0 %5887, %v6387_v35  }
 0x367   : > { %5861 = vset.pattern.permute.xlu1 %v6093_v46  ;;  %5890 = vset.pattern.permute.xlu0 %v6093_v46 }
 0x368   : > { %2252 = vperm.xlu1 %5861, %v6381_v29   ;;  %2563 = vperm.xlu0 %5890, %v6387_v35  }
 0x36c   : > { %5862 = vset.pattern.permute.xlu1 %v6094_v47  ;;  %5891 = vset.pattern.permute.xlu0 %v6092_v45 }
 0x36d   : > { %2364 = vperm.xlu1 %5862, %v6381_v29   ;;  %2746 = vperm.xlu0 %5891, %v6385_v33  }
 0x371   : > { %5863 = vset.pattern.permute.xlu1 %v6080_v20  ;;  %2404 = vrot.lane.b32.xlu0 %v1981_v53, %s6095_s1 }
 0x372   : > { %2388 = vperm.xlu1 %5863, %v6385_v33   ;;  %5894 = vset.pattern.permute.xlu0 %v6094_v47 }
 0x376   : > { %5865 = vset.pattern.permute.xlu1 %v6083_v36 }
 0x377   : > { %2442 = vperm.xlu1 %5865, %v6385_v33  }
 0x37b   : > { %5866 = vset.pattern.permute.xlu1 %v6079_v19  ;;  %v5908_v19 = vpop.eup %5907 }
 0x37c   : > { %2592 = vperm.xlu1 %5866, %v6385_v33   ;;  %v1791_v21 = vadd.f32 1.0, %v5908_v19  ;;  %v5910_v28 = vpop.eup %5909 }
 0x37d   : > { %v5912_v29 = vpop.eup %5911 }
 0x37e   : > { %5913 = vlog2.f32 %v1791_v21 }
 0x380   : > { %5868 = vset.pattern.permute.xlu1 %v6084_v37  ;;  %v1976_v37 = vadd.f32 1.0, %v5910_v28 }
 0x381   : > { %2467 = vperm.xlu1 %5868, %v6385_v33  }
 0x382   : > { %5915 = vrcp.f32 %v1976_v37 }
 0x383   : > { %v6469_v34 = vpop.permute.xlu1 %2270  ;;  %v6485_v57 = vpop.permute.xlu0 %2158 }
 0x385   : > { %5870 = vset.pattern.permute.xlu1 %v6089_v42 }
 0x386   : > { %2492 = vperm.xlu1 %5870, %v6385_v33  }
 0x388   : > { %v6473_v54 = vpop.permute.xlu1 %2172  ;;  %v6495_v61 = vpop.permute.xlu0 %2284 }
 0x38a   : > { %5872 = vset.pattern.permute.xlu1 %v6090_v43 }
 0x38b   : > { %2517 = vperm.xlu1 %5872, %v6385_v33  }
 0x38d   : > { %v6477_v55 = vpop.permute.xlu1 %2186  ;;  %v6505_v1 = vpop.permute.xlu0 %2200 }
 0x38f   : > { %5873 = vset.pattern.permute.xlu1 %v6086_v39 }
 0x390   : > { %2696 = vperm.xlu1 %5873, %v6385_v33  }
 0x392   : > { %v6481_v56 = vpop.permute.xlu1 %2298  ;;  %v6516_v6 = vpop.permute.xlu0 %2326 }
 0x394   : > { %5875 = vset.pattern.permute.xlu1 %v6091_v44 }
 0x395   : > { %2721 = vperm.xlu1 %5875, %v6385_v33  }
 0x397   : > { %v6487_v58 = vpop.permute.xlu1 %2312  ;;  %v6524_v13 = vpop.permute.xlu0 %2242 }
 0x399   : > { %5876 = vset.pattern.permute.xlu1 %v6093_v46  ;;  %v5914_v46 = vpop.eup %5913 }
 0x39a   : > { %2567 = vperm.xlu1 %5876, %v6385_v33   ;;  %v1794_v48 = vmul.f32 0.6931472, %v5914_v46  ;;  %v5916_v51 = vpop.eup %5915  ;;  %v1404_v46 = vld [vmem:[%s1317_s10] sm:$0xff] }
 0x39b   : > { %v1982_v0 = vmul.f32 %v5916_v51, %v6316_v27 }
 0x39c   : > { %v6493_v60 = vpop.permute.xlu1 %2214  ;;  %v6530_v17 = vpop.permute.xlu0 %2153  ;;  %v6565_v53 = vadd.f32 %v1794_v48, %v1781_v50  ;;  %v1405_v48 = vld [vmem:[%s1317_s10 + $0x8] sm:$0xff]  ;;  %v1406_v50 = vld [vmem:[%s1317_s10 + $0x10] sm:$0xff] }
 0x39e   : > { %5878 = vset.pattern.permute.xlu1 %v6081_v31  ;;  %v1994_v62 = vrot.slane %v6565_v53, %v6321_v30  ;;  %v2004_v2 = vrot.slane %v6565_v53, %v6314_v26 }
 0x39f   : > { %2413 = vperm.xlu1 %5878, %v6387_v35  }
 0x3a1   : > { %v6502_v63 = vpop.permute.xlu1 %2228  ;;  %v6538_v25 = vpop.permute.xlu0 %2168 }
 0x3a3   : > { %5879 = vset.pattern.permute.xlu1 %v6083_v36 }
 0x3a4   : > { %2438 = vperm.xlu1 %5879, %v6387_v35  }
 0x3a6   : > { %v6512_v4 = vpop.permute.xlu1 %2340  ;;  %v6546_v36 = vpop.permute.xlu0 %2294 }
 0x3a8   : > { %5881 = vset.pattern.permute.xlu1 %v6082_v32  ;;  %v1402_v32 = vld [vmem:[%s1309_s7 + $0x8] sm:$0xff] }
 0x3a9   : > { %2617 = vperm.xlu1 %5881, %v6387_v35   ;;  %v1963_v39 = vmul.f32 1.442695, %v1402_v32 }
 0x3ab   : > { %v6519_v8 = vpop.permute.xlu1 %2354 }
 0x3ac   : > { %7274 = vst [vmem:[#allocation16_spill] sm:$0xff] %v6519_v8 }
 0x3ad   : > { %5883 = vset.pattern.permute.xlu1 %v6085_v38  ;;  %v1792_v38 = vadd.f32 1.0, %v5912_v29 }
 0x3ae   : > { %2642 = vperm.xlu1 %5883, %v6387_v35  }
 0x3af   : > { %5917 = vlog2.f32 %v1792_v38 }
 0x3b0   : > { %v6526_v15 = vpop.permute.xlu1 %2256  ;;  %5919 = vpow2.f32 %v1963_v39 }
 0x3b1   : > { %7275 = vst [vmem:[#allocation17_spill] sm:$0xff] %v6526_v15 }
 0x3b2   : > { %5885 = vset.pattern.permute.xlu1 %v6087_v40  ;;  %v1401_v40 = vld [vmem:[%s1309_s7] sm:$0xff] }
 0x3b3   : > { %2667 = vperm.xlu1 %5885, %v6387_v35   ;;  %v1961_v42 = vmul.f32 1.442695, %v1401_v40 }
 0x3b5   : > { %v6532_v18 = vpop.permute.xlu1 %2368  ;;  %5921 = vpow2.f32 %v1961_v42 }
 0x3b6   : > { %7276 = vst [vmem:[#allocation18_spill] sm:$0xff] %v6532_v18 }
 0x3b7   : > { %5886 = vset.pattern.permute.xlu1 %v6090_v43  ;;  %v6553_v43 = vpop.permute.xlu0 %2210 }
 0x3b8   : > { %2513 = vperm.xlu1 %5886, %v6387_v35  }
 0x3b9   : > { %v5918_v52 = vpop.eup %5917 }
 0x3ba   : > { %v6536_v20 = vpop.permute.xlu1 %2266  ;;  %v5920_v59 = vpop.eup %5919  ;;  %v1796_v3 = vmul.f32 0.6931472, %v5918_v52  ;;  %v2014_v52 = vrot.slane %v6565_v53, %v6311_v24 }
 0x3bb   : > { %v6560_v49 = vpop.permute.xlu0 %2336 }
 0x3bc   : > { %5888 = vset.pattern.permute.xlu1 %v6088_v41  ;;  %7277 = vst [vmem:[#allocation19_spill] sm:$0xff] %v6560_v49  ;;  %v6579_v12 = vadd.f32 %v1796_v3, %v1782_v11  ;;  %v1407_v3 = vld [vmem:[%s1317_s10 + $0x18] sm:$0xff] }
 0x3bd   : > { %2538 = vperm.xlu1 %5888, %v6387_v35   ;;  %v5704_v11 = vpack.c.bf16 %v1407_v3, %v1406_v50  ;;  %v1410_v50 = vld [vmem:[%s1317_s10 + $0x30] sm:$0xff]  ;;  %v1411_v3 = vld [vmem:[%s1317_s10 + $0x38] sm:$0xff] }
 0x3be   : > { %v2074_v19 = vrot.slane %v6579_v12, %v6321_v30 }
 0x3bf   : > { %v6544_v31 = vpop.permute.xlu1 %2280  ;;  %v5922_v7 = vpop.eup %5921 }
 0x3c0   : > { %v6581_v27 = vsub.f32 0.0, %v5922_v7 }
 0x3c1   : > { %5889 = vset.pattern.permute.xlu1 %v6091_v44 }
 0x3c2   : > { %2717 = vperm.xlu1 %5889, %v6387_v35   ;;  %v1995_v28 = vmul.f32 %v1994_v62, %v6581_v27  ;;  %v2075_v40 = vmul.f32 %v2074_v19, %v6581_v27 }
 0x3c4   : > { %v6550_v41 = vpop.permute.xlu1 %2182  ;;  %v1997_v38 = vmul.f32 1.442695, %v1995_v28 }
 0x3c6   : > { %5892 = vset.pattern.permute.xlu1 %v6092_v45 }
 0x3c7   : > { %2742 = vperm.xlu1 %5892, %v6387_v35  }
 0x3c9   : > { %v6556_v44 = vpop.permute.xlu1 %2196 }
 0x3cb   : > { %5893 = vset.pattern.permute.xlu1 %v6094_v47  ;;  %v6569_v47 = vpop.permute.xlu0 %2417 }
 0x3cc   : > { %2767 = vperm.xlu1 %5893, %v6387_v35   ;;  %7278 = vst [vmem:[#allocation20_spill] sm:$0xff] %v6569_v47  ;;  %v6573_v35 = vsub.f32 0.0, %v5920_v59  ;;  %v6608_v59 = vrot.slane %v6579_v12, %v6314_v26 }
 0x3ce   : > { %v6563_v45 = vpop.permute.xlu1 %2308  ;;  %v2076_v32 = vmul.f32 %v2074_v19, %v6573_v35  ;;  %v2006_v39 = vmul.f32 %v2004_v2, %v6573_v35  ;;  %v1409_v19 = vld [vmem:[%s1317_s10 + $0x28] sm:$0xff] }
 0x3cf   : > { %v6586_v16 = vpop.permute.xlu0 %2621 }
 0x3d0   : > { %2771 = vperm.xlu1 %5893, %v6385_v33   ;;  %v1996_v33 = vmul.f32 %v1994_v62, %v6573_v35  ;;  %7280 = vst [vmem:[#allocation22_spill] sm:$0xff] %v6586_v16  ;;  %v2079_v51 = vmul.f32 1.442695, %v2076_v32  ;;  %v2005_v62 = vmul.f32 %v2004_v2, %v6581_v27  ;;  %v2009_v7 = vmul.f32 1.442695, %v2006_v39 }
 0x3d1   : > { %v2077_v32 = vmul.f32 1.442695, %v2075_v40 }
 0x3d2   : > { %v1999_v21 = vmul.f32 1.442695, %v1996_v33  ;;  %v1408_v33 = vld [vmem:[%s1317_s10 + $0x20] sm:$0xff]  ;;  %v2007_v39 = vmul.f32 1.442695, %v2005_v62  ;;  %v6631_v62 = vrot.slane %v6579_v12, %v6311_v24  ;;  %s7307_s10 = sld [smem:[#allocation8_spill]] }
 0x3d3   : > { %v6571_v5 = vpop.permute.xlu1 %2322  ;;  %v6596_v37 = vpop.permute.xlu0 %2646  ;;  %v5708_v2 = vpack.c.bf16 %v1409_v19, %v1408_v33  ;;  %v5712_v33 = vpack.c.bf16 %v1411_v3, %v1410_v50  ;;  %v2015_v19 = vmul.f32 %v2014_v52, %v6581_v27 }
 0x3d4   : > { %7279 = vst [vmem:[#allocation21_spill] sm:$0xff] %v6571_v5  ;;  %2608 = vrot.lane.b32.xlu1 %v1982_v0, %s6095_s1  ;;  %7281 = vst [vmem:[#allocation23_spill] sm:$0xff] %v6596_v37  ;;  %5923 = vpow2.f32 %v1999_v21  ;;  %v5700_v0 = vpack.c.bf16 %v1405_v48, %v1404_v46  ;;  %v6613_v21 = vmul.f32 %v6565_v53, %v6345_v10  ;;  %s7306_s1 = sld [smem:[#allocation4_spill]] }
 0x3d5   : > { %5925 = vpow2.f32 %v1997_v38  ;;  %v2086_v46 = vmul.f32 %v6608_v59, %v6573_v35  ;;  %v2016_v48 = vmul.f32 %v2014_v52, %v6573_v35  ;;  %v2024_v37 = vrot.slane %v6565_v53, %v6308_v23 }
 0x3d6   : > { %5701 = vmatprep.subr.bf16.mxu0 %v5700_v0  ;;  %5927 = vpow2.f32 %v2079_v51  ;;  %v6626_v51 = vmul.f32 %v6579_v12, %v6343_v9  ;;  %v2096_v52 = vmul.f32 %v6631_v62, %v6573_v35 }
 0x3d7   : > { %v6615_v28 = vpop.permute.xlu0 %2671  ;;  %5703 = vmatpush3.bf16.msra.mxu0 %v5700_v0  ;;  %5929 = vpow2.f32 %v2009_v7  ;;  %v2026_v50 = vmul.f32 %v2024_v37, %v6573_v35 }
 0x3d8   : > { %v6584_v14 = vpop.permute.xlu1 %2224  ;;  %7283 = vst [vmem:[#allocation25_spill] sm:$0xff] %v6615_v28  ;;  %5705 = vmatprep.subr.bf16.mxu0 %v5704_v11  ;;  %5931 = vpow2.f32 %v2077_v32  ;;  %v2089_v28 = vmul.f32 1.442695, %v2086_v46  ;;  %v2019_v32 = vmul.f32 1.442695, %v2016_v48  ;;  %v6641_v46 = vsub.s32 4, %v6304_v22 }
 0x3d9   : > { %5933 = vpow2.f32 %v2007_v39  ;;  %v2276_v39 = vrot.slane %v6626_v51, %v6321_v30  ;;  %v2017_v48 = vmul.f32 1.442695, %v2015_v19  ;;  %v2099_v15 = vmul.f32 1.442695, %v2096_v52 }
 0x3da   : > { %5935 = vpow2.f32 %v2089_v28  ;;  %v2034_v19 = vrot.slane %v6565_v53, %v6641_v46  ;;  %v6675_v47 = vrot.slane %v6626_v51, %v6314_v26  ;;  %s1336_s7 = scalar_lea.vmem %s7306_s1, %s6279_s0  ;;  %s7310_s1 = sld [smem:[#allocation5_spill]] }
 0x3db   : > { %5707 = vmatpush3.bf16.msra.mxu0 %v5704_v11  ;;  %v6633_v7 = vpop.permute.xlu0 %2542  ;;  %5937 = vpow2.f32 %v2019_v32  ;;  %v6665_v32 = vsub.s32 5, %v6304_v22  ;;  %v2277_v5 = vmul.f32 %v2276_v39, %v6536_v20 }
 0x3dc   : > { %7285 = vst [vmem:[#allocation27_spill] sm:$0xff] %v6633_v7  ;;  %5709 = vmatprep.subr.bf16.mxu0 %v5708_v2  ;;  %5939 = vpow2.f32 %v2017_v48  ;;  %v2036_v48 = vmul.f32 %v2034_v19, %v6573_v35 }
 0x3dd   : > { %v6593_v29 = vpop.permute.xlu1 %2238  ;;  %5941 = vpow2.f32 %v2099_v15  ;;  %v2044_v8 = vrot.slane %v6565_v53, %v6665_v32 }
 0x3de   : > { %v5924_v40 = vpop.eup %5923 }
 0x3df   : > { %v2378_v11 = vmul.f32 0.0, %v5924_v40  ;;  %5711 = vmatpush3.bf16.msra.mxu0 %v5708_v2  ;;  %v2178_v2 = vrot.slane %v6613_v21, %v6314_v26 }
 0x3e0   : > { %5713 = vmatprep.subr.bf16.mxu0 %v5712_v33 }
 0x3e1   : > { %v2179_v26 = vmul.f32 %v2178_v2, %v6538_v25  ;;  %v2192_v25 = vrot.slane %v6613_v21, %v6311_v24 }
 0x3e2   : > { %v6602_v42 = vpop.permute.xlu1 %2350 }
 0x3e3   : > { %7282 = vst [vmem:[#allocation24_spill] sm:$0xff] %v6602_v42  ;;  %v2164_v42 = vrot.slane %v6613_v21, %v6321_v30  ;;  %v2278_v30 = vmul.f32 %v2276_v39, %v6469_v34  ;;  %5715 = vmatpush3.bf16.msra.mxu0 %v5712_v33  ;;  %v2029_v34 = vmul.f32 1.442695, %v2026_v50 }
 0x3e5   : > { %v2166_v0 = vmul.f32 %v2164_v42, %v6485_v57  ;;  %v5926_v57 = vpop.eup %5925  ;;  %v2165_v7 = vmul.f32 %v2164_v42, %v6530_v17  ;;  %v6655_v17 = vrot.slane %v6579_v12, %v6308_v23  ;;  %v6657_v42 = vpop.permute.xlu0 %2383  ;;  %5943 = vpow2.f32 %v2029_v34 }
 0x3e6   : > { %v5928_v3 = vpop.eup %5927  ;;  %v2377_v40 = vmul.f32 0.0, %v5926_v57 }
 0x3e7   : > { %v6619_v38 = vpop.permute.xlu1 %2252  ;;  %v6643_v16 = vadd.f32 %v2378_v11, %v2166_v0  ;;  %v5930_v0 = vpop.eup %5929  ;;  %v2025_v11 = vmul.f32 %v2024_v37, %v6581_v27  ;;  %v2584_v10 = vmul.f32 0.0, %v5928_v3  ;;  %v6678_v37 = vsub.s32 6, %v6304_v22 }
 0x3e8   : > { %7284 = vst [vmem:[#allocation26_spill] sm:$0xff] %v6619_v38  ;;  %v5932_v57 = vpop.eup %5931  ;;  %v6669_v18 = vadd.f32 %v2377_v40, %v2165_v7  ;;  %v2085_v7 = vmul.f32 %v6608_v59, %v6581_v27 }
 0x3e9   : > { %v2409_v38 = vmul.f32 %v5930_v0, %v6643_v16  ;;  %v5934_v33 = vpop.eup %5933  ;;  %v2586_v52 = vadd.f32 %v2584_v10, %v2278_v30  ;;  %v2583_v50 = vmul.f32 0.0, %v5932_v57  ;;  %v2027_v3 = vmul.f32 1.442695, %v2025_v11  ;;  %v2589_v0 = vpop.permute.xlu0 %2588 }
 0x3ea   : > { %v2408_v39 = vmul.f32 %v5934_v33, %v6669_v18  ;;  %v6695_v10 = vrot.slane %v6579_v12, %v6641_v46  ;;  %v5936_v30 = vpop.eup %5935  ;;  %v2087_v11 = vmul.f32 1.442695, %v2085_v7  ;;  %v2194_v33 = vmul.f32 %v2192_v25, %v6477_v55 }
 0x3eb   : > { %v6697_v59 = vadd.f32 %v2583_v50, %v2277_v5  ;;  %v5938_v15 = vpop.eup %5937  ;;  %v2613_v57 = vmul.f32 %v5936_v30, %v2586_v52  ;;  %5945 = vpow2.f32 %v2027_v3  ;;  %v6708_v5 = vrot.slane %v6626_v51, %v6311_v24 }
 0x3ec   : > { %v6638_v49 = vpop.permute.xlu1 %2364  ;;  %v6710_v50 = vadd.f32 %v2408_v39, %v2179_v26  ;;  %v2193_v3 = vmul.f32 %v2192_v25, %v6550_v41  ;;  %v2095_v55 = vmul.f32 %v6631_v62, %v6581_v27  ;;  %v2054_v41 = vrot.slane %v6565_v53, %v6678_v37 }
 0x3ed   : > { %7286 = vst [vmem:[#allocation28_spill] sm:$0xff] %v6638_v49  ;;  %v2180_v49 = vmul.f32 %v2178_v2, %v6473_v54  ;;  %v2106_v54 = vmul.f32 %v6655_v17, %v6573_v35  ;;  %v2595_v34 = vmul.f32 %v2589_v0, %v6697_v59  ;;  %v5940_v0 = vpop.eup %5939  ;;  %v2306_v62 = vmul.f32 %v6708_v5, %v6481_v56 }
 0x3ee   : > { %v6734_v25 = vrot.slane %v6579_v12, %v6665_v32  ;;  %v2206_v56 = vrot.slane %v6613_v21, %v6308_v23 }
 0x3ef   : > { %v6689_v40 = vadd.f32 %v2409_v38, %v2180_v49  ;;  %v2109_v2 = vmul.f32 1.442695, %v2106_v54  ;;  %v2035_v49 = vmul.f32 %v2034_v19, %v6581_v27  ;;  %v2292_v38 = vmul.f32 %v6675_v47, %v6495_v61 }
 0x3f0   : > { %v2039_v19 = vmul.f32 1.442695, %v2036_v48  ;;  %v2046_v61 = vmul.f32 %v2044_v8, %v6573_v35  ;;  %v2597_v39 = vsel %vm1608_vm4, %v2595_v34, 0.0 }
 0x3f1   : > { %v6659_v28 = vpop.permute.xlu1 %2388  ;;  %7288 = vst [vmem:[#allocation30_spill] sm:$0xff] %v6689_v40  ;;  %v2434_v54 = vmul.f32 %v5938_v15, %v6689_v40  ;;  %5947 = vpow2.f32 %v2109_v2  ;;  %v2037_v24 = vmul.f32 1.442695, %v2035_v49  ;;  %v6719_v26 = vadd.f32 %v2613_v57, %v2292_v38  ;;  %v5942_v49 = vpop.eup %5941 }
 0x3f2   : > { %5949 = vpow2.f32 %v2087_v11  ;;  %v2433_v15 = vmul.f32 %v5940_v0, %v6710_v50  ;;  %v2049_v57 = vmul.f32 1.442695, %v2046_v61  ;;  %v5944_v34 = vpop.eup %5943  ;;  %v6747_v0 = vsub.s32 7, %v6304_v22 }
 0x3f3   : > { %v6724_v40 = vadd.f32 %v2434_v54, %v2194_v33  ;;  %5951 = vpow2.f32 %v2039_v19  ;;  %v2638_v33 = vmul.f32 %v5942_v49, %v6719_v26  ;;  %v2097_v54 = vmul.f32 1.442695, %v2095_v55 }
 0x3f4   : > { %v6738_v38 = vadd.f32 %v2433_v15, %v2193_v3  ;;  %5953 = vpow2.f32 %v2037_v24  ;;  %v2126_v61 = vmul.f32 %v6734_v25, %v6573_v35  ;;  %v2208_v55 = vmul.f32 %v2206_v56, %v6505_v1 }
 0x3f5   : > { %v2459_v19 = vmul.f32 %v5944_v34, %v6724_v40  ;;  %v6749_v3 = vadd.f32 %v2638_v33, %v2306_v62  ;;  %v2105_v15 = vmul.f32 %v6655_v17, %v6581_v27  ;;  %v2220_v1 = vrot.slane %v6613_v21, %v6641_v46 }
 0x3f6   : > { %v6685_v20 = vpop.permute.xlu1 %2442  ;;  %v6770_v49 = vrot.slane %v6579_v12, %v6678_v37  ;;  %v2055_v33 = vmul.f32 %v2054_v41, %v6581_v27  ;;  %v2129_v17 = vmul.f32 1.442695, %v2126_v61 }
 0x3f7   : > { %7287 = vst [vmem:[#allocation29_spill] sm:$0xff] %v6685_v20  ;;  %v2116_v20 = vmul.f32 %v6695_v10, %v6573_v35 }
 0x3f8   : > { %v2057_v61 = vmul.f32 1.442695, %v2055_v33 }
 0x3f9   : > { %v2119_v2 = vmul.f32 1.442695, %v2116_v20  ;;  %v2056_v20 = vmul.f32 %v2054_v41, %v6573_v35  ;;  %v2115_v41 = vmul.f32 %v6695_v10, %v6581_v27  ;;  %v6800_v10 = vrot.slane %v6626_v51, %v6641_v46 }
 0x3fb   : > { %v2593_v7 = vpop.permute.xlu1 %2592  ;;  %5955 = vpow2.f32 %v2119_v2  ;;  %v6766_v2 = vadd.f32 %v2459_v19, %v2208_v55 }
 0x3fc   : > { %v2596_v30 = vmul.f32 %v2593_v7, %v2586_v52  ;;  %v2045_v7 = vmul.f32 %v2044_v8, %v6581_v27  ;;  %v2207_v8 = vmul.f32 %v2206_v56, %v6556_v44  ;;  %5957 = vpow2.f32 %v2049_v57 }
 0x3fd   : > { %5959 = vpow2.f32 %v2097_v54  ;;  %v2059_v44 = vmul.f32 1.442695, %v2056_v20  ;;  %v2222_v54 = vmul.f32 %v2220_v1, %v6493_v60  ;;  %v2064_v60 = vrot.slane %v6565_v53, %v6747_v0 }
 0x3fe   : > { %v2598_v48 = vsel %vm1608_vm4, %v2596_v30, 0.0  ;;  %v5946_v30 = vpop.eup %5945  ;;  %v2047_v22 = vmul.f32 1.442695, %v2045_v7  ;;  %v2291_v7 = vmul.f32 %v6675_v47, %v6544_v31  ;;  %v2136_v31 = vmul.f32 %v6770_v49, %v6573_v35 }
 0x3ff   : > { %v6728_v52 = vadd.f32 %v2598_v48, %v2597_v39  ;;  %v2458_v24 = vmul.f32 %v5946_v30, %v6738_v38  ;;  %v6760_v48 = vrot.slane %v6626_v51, %v6308_v23  ;;  %v5948_v62 = vpop.eup %5947  ;;  %v2107_v30 = vmul.f32 1.442695, %v2105_v15 }
 0x400   : > { %v6736_v11 = vpop.permute.xlu1 %2467  ;;  %v5950_v57 = vpop.eup %5949  ;;  %v2663_v34 = vmul.f32 %v5948_v62, %v6749_v3  ;;  %5961 = vpow2.f32 %v2047_v22  ;;  %v2234_v53 = vrot.slane %v6613_v21, %v6665_v32  ;;  %v2066_v33 = vmul.f32 %v2064_v60, %v6573_v35 }
 0x401   : > { %v2320_v23 = vmul.f32 %v6760_v48, %v6487_v58  ;;  %v2612_v56 = vmul.f32 %v5950_v57, %v6697_v59  ;;  %v6780_v19 = vadd.f32 %v2458_v24, %v2207_v8  ;;  %v5952_v20 = vpop.eup %5951  ;;  %5963 = vpow2.f32 %v2059_v44 }
 0x402   : > { %v2484_v58 = vmul.f32 %v5952_v20, %v6766_v2  ;;  %v5954_v47 = vpop.eup %5953  ;;  %5965 = vpow2.f32 %v2129_v17  ;;  %v2221_v44 = vmul.f32 %v2220_v1, %v6553_v43  ;;  %v2117_v57 = vmul.f32 1.442695, %v2115_v41 }
 0x403   : > { %v6791_v59 = vadd.f32 %v2663_v34, %v2320_v23  ;;  %v6795_v24 = vadd.f32 %v2612_v56, %v2291_v7  ;;  %v2483_v22 = vmul.f32 %v5954_v47, %v6780_v19  ;;  %5967 = vpow2.f32 %v2107_v30 }
 0x404   : > { %v6793_v8 = vadd.f32 %v2484_v58, %v2222_v54  ;;  %v2139_v23 = vmul.f32 1.442695, %v2136_v31  ;;  %5969 = vpow2.f32 %v2057_v61  ;;  %v2065_v46 = vmul.f32 %v2064_v60, %v6581_v27 }
 0x405   : > { %v6756_v39 = vpop.permute.xlu1 %2492  ;;  %v5956_v15 = vpop.eup %5955  ;;  %v2144_v7 = vrot.slane %v6579_v12, %v6747_v0  ;;  %v2236_v56 = vmul.f32 %v2234_v53, %v6502_v63  ;;  %v6815_v20 = vadd.f32 %v2483_v22, %v2221_v44  ;;  %v2334_v30 = vmul.f32 %v6800_v10, %v6516_v6  ;;  %v5285_v44 = vld [vmem:[%s1312_s11] ss:$0 sm:$0xff]  ;;  %s7308_s11 = sld [smem:[#allocation9_spill]] }
 0x406   : > { %v5958_v62 = vpop.eup %5957  ;;  %v2688_v17 = vmul.f32 %v5956_v15, %v6791_v59  ;;  %v6821_v58 = vrot.slane %v6626_v51, %v6665_v32  ;;  %v2125_v41 = vmul.f32 %v6734_v25, %v6581_v27  ;;  %v2305_v12 = vmul.f32 %v6708_v5, %v6546_v36 }
 0x407   : > { %v5960_v54 = vpop.eup %5959  ;;  %v2509_v43 = vmul.f32 %v5958_v62, %v6793_v8  ;;  %v2235_v63 = vmul.f32 %v2234_v53, %v6584_v14  ;;  %5971 = vpow2.f32 %v2139_v23  ;;  %v2069_v60 = vmul.f32 1.442695, %v2066_v33 }
 0x408   : > { %v2637_v1 = vmul.f32 %v5960_v54, %v6795_v24  ;;  %v6830_v47 = vadd.f32 %v2688_v17, %v2334_v30  ;;  %5973 = vpow2.f32 %v2117_v57  ;;  %v2067_v6 = vmul.f32 1.442695, %v2065_v46 }
 0x409   : > { %v2146_v32 = vmul.f32 %v2144_v7, %v6573_v35  ;;  %v6835_v22 = vadd.f32 %v2509_v43, %v2236_v56  ;;  %v2392_v36 = vmul.f32 %v6659_v28, %v6643_v16  ;;  %v2248_v5 = vrot.slane %v6613_v21, %v6678_v37  ;;  %v2464_v16 = vpop.permute.xlu0 %2463 }
 0x40a   : > { %v6782_v55 = vpop.permute.xlu1 %2517  ;;  %v5962_v31 = vpop.eup %5961  ;;  %v6838_v15 = vadd.f32 %v2637_v1, %v2305_v12  ;;  %v2348_v53 = vmul.f32 %v6821_v58, %v6512_v4  ;;  %v2319_v35 = vmul.f32 %v6760_v48, %v6563_v45  ;;  %v2391_v57 = vmul.f32 %v6657_v42, %v6669_v18 }
 0x40b   : > { %v2508_v25 = vmul.f32 %v5962_v31, %v6815_v20  ;;  %v5964_v14 = vpop.eup %5963  ;;  %5975 = vpow2.f32 %v2069_v60  ;;  %v2127_v54 = vmul.f32 1.442695, %v2125_v41  ;;  %v2135_v4 = vmul.f32 %v6770_v49, %v6581_v27 }
 0x40c   : > { %v5966_v62 = vpop.eup %5965  ;;  %5977 = vpow2.f32 %v2067_v6  ;;  %v2534_v17 = vmul.f32 %v5964_v14, %v6835_v22  ;;  %v2394_v45 = vsel %vm1608_vm4, %v2392_v36, 0.0  ;;  %v2149_v18 = vmul.f32 1.442695, %v2146_v32  ;;  %v7290_v14 = vld [vmem:[#allocation30_spill] sm:$0xff] }
 0x40d   : > { %v6850_v23 = vadd.f32 %v2508_v25, %v2235_v63  ;;  %v5968_v33 = vpop.eup %5967  ;;  %v2713_v28 = vmul.f32 %v5966_v62, %v6830_v47  ;;  %v6861_v56 = vmul.f32 %v5285_v44, %v6343_v9  ;;  %v2250_v43 = vmul.f32 %v2248_v5, %v6524_v13  ;;  %v7289_v25 = vld [vmem:[#allocation16_spill] sm:$0xff] }
 0x40e   : > { %v2662_v46 = vmul.f32 %v5968_v33, %v6838_v15  ;;  %v5970_v42 = vpop.eup %5969  ;;  %v2393_v30 = vsel %vm1608_vm4, %v2391_v57, 0.0  ;;  %v2249_v49 = vmul.f32 %v2248_v5, %v6593_v29  ;;  %v6873_v63 = vrot.slane %v6626_v51, %v6678_v37  ;;  %v7291_v5 = vld [vmem:[#allocation20_spill] sm:$0xff]  ;;  %v7292_v57 = vld [vmem:[#allocation21_spill] sm:$0xff] }
 0x40f   : > { %v6805_v34 = vpop.permute.xlu1 %2696  ;;  %v6864_v1 = vadd.f32 %v2713_v28, %v2348_v53  ;;  %v2533_v12 = vmul.f32 %v5970_v42, %v6850_v23  ;;  %v2262_v9 = vrot.slane %v6613_v21, %v6747_v0  ;;  %v2395_v60 = vadd.f32 %v2394_v45, %v2393_v30  ;;  %v2489_v53 = vpop.permute.xlu0 %2488  ;;  %v7294_v45 = vld [vmem:[#allocation17_spill] sm:$0xff] }
 0x410   : > { %v6868_v41 = vadd.f32 %v2662_v46, %v2319_v35  ;;  %5979 = vpow2.f32 %v2127_v54  ;;  %v6877_v31 = vadd.f32 %v2534_v17, %v2250_v43  ;;  %v2137_v6 = vmul.f32 1.442695, %v2135_v4  ;;  %v7293_v54 = vld [vmem:[#allocation15_spill] sm:$0xff] }
 0x411   : > { %v5972_v13 = vpop.eup %5971  ;;  %v2145_v32 = vmul.f32 %v2144_v7, %v6581_v27  ;;  %5981 = vpow2.f32 %v2149_v18  ;;  %v2362_v36 = vmul.f32 %v6873_v63, %v7289_v25  ;;  %v2421_v37 = vmul.f32 %v7291_v5, %v7290_v14 }
 0x412   : > { %v5974_v29 = vpop.eup %5973  ;;  %v2738_v62 = vmul.f32 %v5972_v13, %v6864_v1  ;;  %v2471_v21 = vmul.f32 %v6736_v11, %v6766_v2  ;;  %v2333_v33 = vmul.f32 %v6800_v10, %v7292_v57  ;;  %v6890_v7 = vadd.f32 %v2533_v12, %v2249_v49  ;;  %v7295_v10 = vld [vmem:[#allocation26_spill] sm:$0xff] }
 0x413   : > { %v2687_v27 = vmul.f32 %v5974_v29, %v6868_v41  ;;  %v6894_v4 = vmul.f32 %v5285_v44, %v7293_v54  ;;  %v6898_v17 = vrot.slane %v6626_v51, %v6747_v0  ;;  %v2470_v46 = vmul.f32 %v2464_v16, %v6780_v19  ;;  %v7297_v57 = vld [vmem:[#allocation18_spill] sm:$0xff] }
 0x414   : > { %v6832_v61 = vpop.permute.xlu1 %2721  ;;  %v2396_v11 = vrot.slane %v2395_v60, 4  ;;  %v2264_v18 = vmul.f32 %v2262_v9, %v7294_v45  ;;  %v2263_v42 = vmul.f32 %v2262_v9, %v7295_v10  ;;  %v2147_v30 = vmul.f32 1.442695, %v2145_v32  ;;  %v2693_v32 = vpop.permute.xlu0 %2692  ;;  %v7299_v10 = vld [vmem:[#allocation19_spill] sm:$0xff] }
 0x415   : > { %v5976_v2 = vpop.eup %5975  ;;  %v2473_v12 = vsel %vm1608_vm4, %v2471_v21, 0.0  ;;  %5983 = vpow2.f32 %v2137_v6  ;;  %v2423_v0 = vsel %vm1608_vm4, %v2421_v37, 0.0  ;;  %v2689_v19 = vadd.f32 %v2687_v27, %v2333_v33 }
 0x416   : > { %v5978_v49 = vpop.eup %5977  ;;  %v2559_v51 = vmul.f32 %v5976_v2, %v6877_v31  ;;  %v6910_v13 = vadd.f32 %v2738_v62, %v2362_v36  ;;  %v2472_v29 = vsel %vm1608_vm4, %v2470_v46, 0.0  ;;  %v2397_v25 = vadd.f32 %v2396_v11, %v2395_v60  ;;  %v7298_v36 = vld [vmem:[#allocation22_spill] sm:$0xff] }
 0x417   : > { %v2558_v16 = vmul.f32 %v5978_v49, %v6890_v7  ;;  %v2474_v21 = vadd.f32 %v2473_v12, %v2472_v29  ;;  %v2496_v6 = vmul.f32 %v6756_v39, %v6793_v8  ;;  %v2376_v33 = vmul.f32 %v6898_v17, %v7297_v57 }
 0x418   : > { %v2625_v62 = vmul.f32 %v7298_v36, %v6719_v26  ;;  %v2564_v39 = vpop.permute.xlu0 %2563  ;;  %v2398_v8 = vrot.slane %v2397_v25, 2  ;;  %5985 = vpow2.f32 %v2147_v30  ;;  %v2347_v26 = vmul.f32 %v6821_v58, %v7299_v10 }
 0x419   : > { %v6858_v48 = vpop.permute.xlu1 %2567  ;;  %v2560_v5 = vadd.f32 %v2558_v16, %v2263_v42  ;;  %v2498_v49 = vsel %vm1608_vm4, %v2496_v6, 0.0  ;;  %v2600_v30 = vrot.slane %v6728_v52, 4  ;;  %v7301_v16 = vld [vmem:[#allocation25_spill] sm:$0xff]  ;;  %v7302_v6 = vld [vmem:[#allocation24_spill] sm:$0xff]  ;;  %v2700_v36 = vmul.f32 %v6805_v34, %v6830_v47 }
 0x41a   : > { %v5980_v37 = vpop.eup %5979  ;;  %v2399_v29 = vadd.f32 %v2398_v8, %v2397_v25 }
 0x41b   : > { %v2712_v11 = vmul.f32 %v5980_v37, %v2689_v19  ;;  %v2570_v42 = vmul.f32 %v2564_v39, %v2560_v5 }
 0x41c   : > { %v2747_v10 = vpop.permute.xlu0 %2746 }
 0x41e   : > { %v2414_v35 = vpop.permute.xlu1 %2413 }
 0x41f   : > { %v2420_v28 = vmul.f32 %v2414_v35, %v6710_v50  ;;  %v7296_v50 = vld [vmem:[#allocation29_spill] sm:$0xff]  ;;  %v2561_v35 = vadd.f32 %v2559_v51, %v2264_v18 }
 0x420   : > { %v2446_v44 = vmul.f32 %v7296_v50, %v6724_v40 }
 0x421   : > { %v2422_v43 = vsel %vm1608_vm4, %v2420_v28, 0.0  ;;  %v5982_v28 = vpop.eup %5981  ;;  %v2571_v54 = vmul.f32 %v6858_v48, %v2561_v35  ;;  %v7300_v48 = vld [vmem:[#allocation23_spill] sm:$0xff]  ;;  %v2572_v35 = vsel %vm1608_vm4, %v2570_v42, 0.0 }
 0x422   : > { %v2424_v14 = vadd.f32 %v2423_v0, %v2422_v43  ;;  %v2448_v27 = vsel %vm1608_vm4, %v2446_v44, 0.0  ;;  %v2763_v18 = vmul.f32 %v5982_v28, %v6910_v13  ;;  %v2475_v43 = vrot.slane %v2474_v21, 4  ;;  %v5984_v58 = vpop.eup %5983 }
 0x423   : > { %v2439_v9 = vpop.permute.xlu1 %2438  ;;  %v2573_v51 = vsel %vm1608_vm4, %v2571_v54, 0.0  ;;  %v6936_v0 = vadd.f32 %v2712_v11, %v2347_v26  ;;  %v2601_v28 = vadd.f32 %v2600_v30, %v6728_v52 }
 0x424   : > { %v2445_v40 = vmul.f32 %v2439_v9, %v6738_v38  ;;  %v2495_v38 = vmul.f32 %v2489_v53, %v6815_v20  ;;  %v2425_v2 = vrot.slane %v2424_v14, 4  ;;  %v2627_v20 = vsel %vm1608_vm4, %v2625_v62, 0.0 }
 0x425   : > { %v2650_v53 = vmul.f32 %v7300_v48, %v6749_v3  ;;  %v6931_v44 = vadd.f32 %v2763_v18, %v2376_v33  ;;  %v2675_v9 = vmul.f32 %v7301_v16, %v6791_v59  ;;  %v2361_v3 = vmul.f32 %v6873_v63, %v7302_v6  ;;  %v7303_v59 = vld [vmem:[#allocation27_spill] sm:$0xff] }
 0x426   : > { %v2447_v60 = vsel %vm1608_vm4, %v2445_v40, 0.0  ;;  %v2497_v12 = vsel %vm1608_vm4, %v2495_v38, 0.0  ;;  %v2426_v5 = vadd.f32 %v2425_v2, %v2424_v14  ;;  %v2476_v37 = vadd.f32 %v2475_v43, %v2474_v21 }
 0x427   : > { %v2449_v46 = vadd.f32 %v2448_v27, %v2447_v60  ;;  %v2499_v40 = vadd.f32 %v2498_v49, %v2497_v12  ;;  %v2574_v62 = vadd.f32 %v2573_v51, %v2572_v35  ;;  %v2546_v25 = vmul.f32 %v7303_v59, %v6877_v31 }
 0x428   : > { %v2618_v45 = vpop.permute.xlu1 %2617  ;;  %v2699_v14 = vmul.f32 %v2693_v32, %v2689_v19  ;;  %v2737_v63 = vmul.f32 %v5984_v58, %v6936_v0  ;;  %v2652_v21 = vsel %vm1608_vm4, %v2650_v53, 0.0  ;;  %v2400_v38 = vrot.slane %v2399_v29, 1 }
 0x429   : > { %v2450_v50 = vrot.slane %v2449_v46, 4  ;;  %v2624_v57 = vmul.f32 %v2618_v45, %v6795_v24  ;;  %v2500_v24 = vrot.slane %v2499_v40, 4  ;;  %v2427_v54 = vrot.slane %v2426_v5, 2 }
 0x42a   : > { %v2677_v11 = vsel %vm1608_vm4, %v2675_v9, 0.0  ;;  %v2477_v34 = vrot.slane %v2476_v37, 2  ;;  %v2702_v31 = vsel %vm1608_vm4, %v2700_v36, 0.0  ;;  %v2575_v19 = vrot.slane %v2574_v62, 4  ;;  %v7304_v9 = vld [vmem:[#allocation28_spill] sm:$0xff] }
 0x42b   : > { %v2451_v27 = vadd.f32 %v2450_v50, %v2449_v46  ;;  %v2626_v47 = vsel %vm1608_vm4, %v2624_v57, 0.0  ;;  %v6954_v46 = vadd.f32 %v2737_v63, %v2361_v3  ;;  %v2548_v8 = vsel %vm1608_vm4, %v2546_v25, 0.0 }
 0x42c   : > { %v2701_v2 = vsel %vm1608_vm4, %v2699_v14, 0.0  ;;  %v2602_v45 = vrot.slane %v2601_v28, 2  ;;  %v2401_v26 = vadd.f32 %v2400_v38, %v2399_v29  ;;  %v2501_v42 = vadd.f32 %v2500_v24, %v2499_v40  ;;  %v6977_v38 = vpop.permute.xlu0 %2404 }
 0x42d   : > { %v2643_v33 = vpop.permute.xlu1 %2642  ;;  %v2452_v32 = vrot.slane %v2451_v27, 2  ;;  %v2428_v43 = vadd.f32 %v2427_v54, %v2426_v5  ;;  %v2628_v49 = vadd.f32 %v2627_v20, %v2626_v47  ;;  %v2521_v48 = vmul.f32 %v6782_v55, %v6835_v22 }
 0x42e   : > { %v2649_v60 = vmul.f32 %v2643_v33, %v6838_v15  ;;  %v5986_v15 = vpop.eup %5985  ;;  %v2703_v53 = vadd.f32 %v2702_v31, %v2701_v2  ;;  %v2478_v30 = vadd.f32 %v2477_v34, %v2476_v37  ;;  %v2576_v51 = vadd.f32 %v2575_v19, %v2574_v62 }
 0x42f   : > { %v2453_v58 = vadd.f32 %v2452_v32, %v2451_v27  ;;  %v2762_v16 = vmul.f32 %v5986_v15, %v6954_v46  ;;  %v2750_v29 = vmul.f32 %v2747_v10, %v6910_v13  ;;  %v2603_v40 = vadd.f32 %v2602_v45, %v2601_v28 }
 0x430   : > { %v2651_v52 = vsel %vm1608_vm4, %v2649_v60, 0.0  ;;  %v2502_v6 = vrot.slane %v2501_v42, 2  ;;  %v2429_v3 = vrot.slane %v2428_v43, 1  ;;  %v2629_v55 = vrot.slane %v2628_v49, 4 }
 0x431   : > { %v2653_v50 = vadd.f32 %v2652_v21, %v2651_v52  ;;  %v2402_v35 = vadd.f32 %v2401_v26, %v6894_v4  ;;  %v2523_v37 = vsel %vm1608_vm4, %v2521_v48, 0.0  ;;  %v2704_v57 = vrot.slane %v2703_v53, 4 }
 0x432   : > { %v2668_v39 = vpop.permute.xlu1 %2667  ;;  %v2479_v36 = vrot.slane %v2478_v30, 1  ;;  %v2577_v62 = vrot.slane %v2576_v51, 2  ;;  %v2454_v27 = vrot.slane %v2453_v58, 1  ;;  %v6973_v13 = vsel %vm1608_vm4, %v2750_v29, 0.0 }
 0x433   : > { %v2674_v18 = vmul.f32 %v2668_v39, %v6868_v41  ;;  %v2375_v41 = vmul.f32 %v6898_v17, %v7304_v9  ;;  %v2654_v33 = vrot.slane %v2653_v50, 4  ;;  %v2604_v14 = vrot.slane %v2603_v40, 1 }
 0x434   : > { %v2430_v28 = vadd.f32 %v2429_v3, %v2428_v43  ;;  %v2630_v63 = vadd.f32 %v2629_v55, %v2628_v49  ;;  %v2705_v24 = vadd.f32 %v2704_v57, %v2703_v53  ;;  %v2407_v47 = vmul.f32 %v6977_v38, %v2402_v35 }
 0x435   : > { %v2676_v12 = vsel %vm1608_vm4, %v2674_v18, 0.0  ;;  %v6975_v25 = vadd.f32 %v2762_v16, %v2375_v41  ;;  %v2655_v54 = vadd.f32 %v2654_v33, %v2653_v50  ;;  %v2480_v15 = vadd.f32 %v2479_v36, %v2478_v30 }
 0x436   : > { %v2678_v5 = vadd.f32 %v2677_v11, %v2676_v12  ;;  %v2578_v31 = vadd.f32 %v2577_v62, %v2576_v51  ;;  %v2455_v19 = vadd.f32 %v2454_v27, %v2453_v58  ;;  %v2725_v32 = vmul.f32 %v6832_v61, %v6864_v1 }
 0x437   : > { %v2514_v20 = vpop.permute.xlu1 %2513  ;;  %v2605_v45 = vadd.f32 %v2604_v14, %v2603_v40  ;;  %v2431_v18 = vadd.f32 %v2430_v28, %v6894_v4  ;;  %v2631_v10 = vrot.slane %v2630_v63, 2  ;;  %v2706_v43 = vrot.slane %v2705_v24, 2 }
 0x438   : > { %v2520_v22 = vmul.f32 %v2514_v20, %v6850_v23  ;;  %v2679_v60 = vrot.slane %v2678_v5, 4  ;;  %v2503_v23 = vadd.f32 %v2502_v6, %v2501_v42  ;;  %v2579_v53 = vrot.slane %v2578_v31, 1 }
 0x439   : > { %v2456_v50 = vadd.f32 %v2455_v19, %v6894_v4  ;;  %v2481_v1 = vadd.f32 %v2480_v15, %v6894_v4  ;;  %v2727_v30 = vsel %vm1608_vm4, %v2725_v32, 0.0  ;;  %v2432_v16 = vmul.f32 %v2431_v18, %v6977_v38 }
 0x43a   : > { %v2522_v17 = vsel %vm1608_vm4, %v2520_v22, 0.0  ;;  %v2680_v52 = vadd.f32 %v2679_v60, %v2678_v5  ;;  %v2504_v42 = vrot.slane %v2503_v23, 1  ;;  %v2707_v6 = vadd.f32 %v2706_v43, %v2705_v24 }
 0x43b   : > { %v2524_v59 = vadd.f32 %v2523_v37, %v2522_v17  ;;  %v2580_v3 = vadd.f32 %v2579_v53, %v2578_v31  ;;  %v2482_v36 = vmul.f32 %v2481_v1, %v6977_v38  ;;  %v2787_v17 = vsel %vm1541_vm2, %v2407_v47, %v2432_v16 }
 0x43c   : > { %v2539_v21 = vpop.permute.xlu1 %2538  ;;  %v2681_v51 = vrot.slane %v2680_v52, 2  ;;  %v2505_v29 = vadd.f32 %v2504_v42, %v2503_v23  ;;  %v2708_v24 = vrot.slane %v2707_v6, 1  ;;  %v2606_v15 = vadd.f32 %v2605_v45, %v6861_v56 }
 0x43d   : > { %v2525_v11 = vrot.slane %v2524_v59, 4  ;;  %v2545_v34 = vmul.f32 %v2539_v21, %v6890_v7  ;;  %v2656_v7 = vrot.slane %v2655_v54, 2  ;;  %v2581_v47 = vadd.f32 %v2580_v3, %v6894_v4 }
 0x43e   : > { %v2682_v35 = vadd.f32 %v2681_v51, %v2680_v52  ;;  %v2506_v28 = vadd.f32 %v2505_v29, %v6894_v4  ;;  %v2709_v43 = vadd.f32 %v2708_v24, %v2707_v6 }
 0x43f   : > { %v2526_v39 = vadd.f32 %v2525_v11, %v2524_v59  ;;  %v2547_v2 = vsel %vm1608_vm4, %v2545_v34, 0.0  ;;  %v2657_v40 = vadd.f32 %v2656_v7, %v2655_v54 }
 0x440   : > { %v2549_v26 = vadd.f32 %v2548_v8, %v2547_v2  ;;  %v2632_v8 = vadd.f32 %v2631_v10, %v2630_v63  ;;  %v2683_v54 = vrot.slane %v2682_v35, 1  ;;  %v2710_v3 = vadd.f32 %v2709_v43, %v6861_v56 }
 0x441   : > { %v2527_v49 = vrot.slane %v2526_v39, 2  ;;  %v2718_v48 = vpop.permute.xlu1 %2717  ;;  %v2658_v60 = vrot.slane %v2657_v40, 1 }
 0x442   : > { %v2550_v12 = vrot.slane %v2549_v26, 4  ;;  %v2724_v61 = vmul.f32 %v2718_v48, %v6936_v0  ;;  %v2457_v0 = vmul.f32 %v2456_v50, %v6977_v38  ;;  %v2633_v62 = vrot.slane %v2632_v8, 1 }
 0x443   : > { %v2528_v58 = vadd.f32 %v2527_v49, %v2526_v39  ;;  %v2659_v52 = vadd.f32 %v2658_v60, %v2657_v40  ;;  %v2684_v7 = vadd.f32 %v2683_v54, %v2682_v35  ;;  %v2582_v48 = vmul.f32 %v2581_v47, %v6977_v38 }
 0x444   : > { %v2551_v9 = vadd.f32 %v2550_v12, %v2549_v26  ;;  %v2726_v41 = vsel %vm1608_vm4, %v2724_v61, 0.0  ;;  %v2634_v31 = vadd.f32 %v2633_v62, %v2632_v8 }
 0x445   : > { %v2529_v5 = vrot.slane %v2528_v58, 1  ;;  %v2728_v20 = vadd.f32 %v2727_v30, %v2726_v41 }
 0x446   : > { %v2552_v55 = vrot.slane %v2551_v9, 2  ;;  %v2743_v22 = vpop.permute.xlu1 %2742  ;;  %v2635_v1 = vadd.f32 %v2634_v31, %v6861_v56  ;;  %v6040_v31 = vld [vmem:[%s6288_s23] sm:$0xff] }
 0x447   : > { %v2530_v37 = vadd.f32 %v2529_v5, %v2528_v58  ;;  %v2729_v57 = vrot.slane %v2728_v20, 4  ;;  %v2749_v33 = vmul.f32 %v2743_v22, %v6954_v46  ;;  %v2788_v46 = vsel %vm1551_vm1, %v2787_v17, %v2457_v0 }
 0x448   : > { %v2553_v27 = vadd.f32 %v2552_v55, %v2551_v9  ;;  %v2789_v18 = vsel %vm1561_vm3, %v2788_v46, %v2482_v36 }
 0x449   : > { %v2531_v59 = vadd.f32 %v2530_v37, %v6894_v4  ;;  %v2730_v14 = vadd.f32 %v2729_v57, %v2728_v20  ;;  %v2751_v23 = vsel %vm1608_vm4, %v2749_v33, 0.0 }
 0x44a   : > { %v2554_v63 = vrot.slane %v2553_v27, 1  ;;  %v2753_v21 = vadd.f32 %v6973_v13, %v2751_v23  ;;  %v2507_v13 = vmul.f32 %v2506_v28, %v6977_v38 }
 0x44b   : > { %v2731_v11 = vrot.slane %v2730_v14, 2  ;;  %v2768_v34 = vpop.permute.xlu1 %2767  ;;  %v2532_v2 = vmul.f32 %v2531_v59, %v6977_v38 }
 0x44c   : > { %v2555_v19 = vadd.f32 %v2554_v63, %v2553_v27  ;;  %v2754_v32 = vrot.slane %v2753_v21, 4  ;;  %v2774_v42 = vmul.f32 %v2768_v34, %v6975_v25  ;;  %v2791_v61 = vsel %vm2790_vm7, %v2789_v18, %v2507_v13  ;;  %v6039_v34 = vld [vmem:[%s6288_s23 + $0x8] sm:$0xff]  ;;  %s1320_s23 = scalar_lea.vmem %s6176_s30, %s7319_s16 }
 0x44d   : > { %v2732_v39 = vadd.f32 %v2731_v11, %v2730_v14  ;;  %v2793_v25 = vsel %vm2792_vm8, %v2791_v61, %v2532_v2 }
 0x44e   : > { %v2556_v10 = vadd.f32 %v2555_v19, %v6894_v4  ;;  %v2755_v26 = vadd.f32 %v2754_v32, %v2753_v21  ;;  %v2660_v4 = vadd.f32 %v2659_v52, %v6861_v56  ;;  %v2776_v58 = vsel %vm1608_vm4, %v2774_v42, 0.0 }
 0x44f   : > { %v2733_v49 = vrot.slane %v2732_v39, 1  ;;  %v2772_v45 = vpop.permute.xlu1 %2771 }
 0x450   : > { %v2756_v53 = vrot.slane %v2755_v26, 2  ;;  %v2775_v50 = vmul.f32 %v2772_v45, %v6931_v44  ;;  %v2557_v12 = vmul.f32 %v2556_v10, %v6977_v38  ;;  %v2685_v44 = vadd.f32 %v2684_v7, %v6861_v56 }
 0x451   : > { %v2734_v30 = vadd.f32 %v2733_v49, %v2732_v39 }
 0x452   : > { %v2757_v51 = vadd.f32 %v2756_v53, %v2755_v26  ;;  %v2777_v16 = vsel %vm1608_vm4, %v2775_v50, 0.0  ;;  %v2795_v8 = vsel %vm2794_vm9, %v2793_v25, %v2557_v12 }
 0x453   : > { %v2735_v38 = vadd.f32 %v2734_v30, %v6861_v56  ;;  %v2778_v9 = vadd.f32 %v2777_v16, %v2776_v58  ;;  %v2609_v41 = vpop.permute.xlu1 %2608  ;;  %v2797_v29 = vsel %vm2796_vm10, %v2795_v8, %v2582_v48  ;;  %v5289_v30 = vld [vmem:[%s1323_s22] ss:$0 sm:$0xff]  ;;  %s1353_s22 = scalar_lea.vmem %s7308_s11, %s7319_s16  ;;  %s6099_s11 = smov 104  }
 0x454   : > { %v2758_v40 = vrot.slane %v2757_v51, 1  ;;  %v2611_v5 = vmul.f32 %v2609_v41, %v2606_v15  ;;  %v2636_v20 = vmul.f32 %v2635_v1, %v2609_v41  ;;  %v2661_v6 = vmul.f32 %v2660_v4, %v2609_v41  ;;  %5518 = vmatprep.mubr.msk.f32.mxu0 %vm1608_vm4, %v2797_v29  ;;  %v5288_v1 = vld [vmem:[%s1320_s23] ss:$0 sm:$0xff]  ;;  %s1350_s23 = scalar_lea.vmem %s7307_s10, %s7319_s16  ;;  %s1339_s10 = scalar_lea.vmem %s7310_s1, %s7319_s16 }
 0x455   : > { %v2779_v0 = vrot.slane %v2778_v9, 4  ;;  %v2686_v22 = vmul.f32 %v2685_v44, %v2609_v41  ;;  %v2711_v57 = vmul.f32 %v2710_v3, %v2609_v41  ;;  %v2736_v62 = vmul.f32 %v2735_v38, %v2609_v41  ;;  %s6103_s1 = smov 72  }
 0x456   : > { %v2759_v55 = vadd.f32 %v2758_v40, %v2757_v51  ;;  %v2798_v35 = vsel %vm1541_vm2, %v2611_v5, %v2636_v20 }
 0x457   : > { %v2780_v37 = vadd.f32 %v2779_v0, %v2778_v9  ;;  %v2799_v33 = vsel %vm1551_vm1, %v2798_v35, %v2661_v6  ;;  %v1414_v35 = vld [vmem:[%s1328_s2] sm:$0xff] }
 0x458   : > { %v2760_v36 = vadd.f32 %v2759_v55, %v6861_v56  ;;  %v2800_v27 = vsel %vm1561_vm3, %v2799_v33, %v2686_v22 }
 0x459   : > { %v2781_v17 = vrot.slane %v2780_v37, 2  ;;  %v2801_v60 = vsel %vm2790_vm7, %v2800_v27, %v2711_v57  ;;  %v1416_v57 = vld [vmem:[%s1328_s2 + $0x10] sm:$0xff]  ;;  %v1419_v27 = vld [vmem:[%s1336_s7] sm:$0xff] }
 0x45a   : > { %v2761_v59 = vmul.f32 %v2760_v36, %v2609_v41  ;;  %v2802_v14 = vsel %vm2792_vm8, %v2801_v60, %v2736_v62  ;;  %v1417_v36 = vld [vmem:[%s1328_s2 + $0x18] sm:$0xff] }
 0x45b   : > { %v2782_v23 = vadd.f32 %v2781_v17, %v2780_v37  ;;  %v1415_v37 = vld [vmem:[%s1328_s2 + $0x8] sm:$0xff]  ;;  %v5720_v62 = vpack.c.bf16 %v1417_v36, %v1416_v57  ;;  %s1331_s2 = scalar_lea.vmem %s7309_s28, %s7319_s16  ;;  %s6102_s28 = smov 88  }
 0x45c   : > { %v2803_v28 = vsel %vm2794_vm9, %v2802_v14, %v2761_v59  ;;  %v5716_v33 = vpack.c.bf16 %v1415_v37, %v1414_v35  ;;  %v1420_v17 = vld [vmem:[%s1336_s7 + $0x8] sm:$0xff] }
 0x45d   : > { %v2783_v63 = vrot.slane %v2782_v23, 1  ;;  %v5724_v60 = vpack.c.bf16 %v1420_v17, %v1419_v27 }
 0x45e   : > { %5717 = vmatprep.subr.bf16.mxu1 %v5716_v33 }
 0x45f   : > { %v2784_v21 = vadd.f32 %v2783_v63, %v2782_v23  ;;  %5719 = vmatpush3.bf16.msra.mxu1 %v5716_v33 }
 0x460   : > { %5721 = vmatprep.subr.bf16.mxu1 %v5720_v62 }
 0x461   : > { %v2785_v46 = vadd.f32 %v2784_v21, %v6861_v56 }
 0x463   : > { %v2786_v24 = vmul.f32 %v2785_v46, %v2609_v41  ;;  %5723 = vmatpush3.bf16.msra.mxu1 %v5720_v62 }
 0x464   : > { %5725 = vmatprep.subr.bf16.mxu1 %v5724_v60 }
 0x465   : > { %v2804_v54 = vsel %vm2796_vm10, %v2803_v28, %v2786_v24  ;;  %v5290_v24 = vld [vmem:[%s1350_s23] ss:$0 sm:$0xff]  ;;  %s6100_s23 = smov 112  }
 0x466   : > { %5519 = vmatmul.mubr.msk.f32.vlgmr.msra.gmra.mrb[8].mxu0 %vm1608_vm4, %v2804_v54 }
 0x539   : > { %v5520_v11 = vpop.f32.mrb[8].mxu0 }
 0x53a   : > { %v2887_v47 = vadd.f32 %v6039_v34, %v5520_v11  ;;  %v2877_v15 = vpop.f32.mrb[9].mxu0  ;;  %v5291_v11 = vld [vmem:[%s1353_s22] ss:$0 sm:$0xff]  ;;  %s6101_s22 = smov 96  }
 0x53b   : > { %v2886_v19 = vadd.f32 %v6040_v31, %v2877_v15 }
 0x53c   : > { %v2891_v32 = vsel %vm1451_vm0, %v2887_v47, 0.0 }
 0x53d   : > { %2892 = vadd.xlane.f32.xlu1 %v2891_v32  ;;  %v2888_v52 = vsel %vm1451_vm0, %v2886_v19, 0.0  ;;  %v1422_v32 = vld [vmem:[%s1336_s7 + $0x18] sm:$0xff] }
 0x53e   : > { %2889 = vadd.xlane.f32.xlu0 %v2888_v52 }
 0x5ca   : > { %v2893_v39 = vpop.xlane.xlu1 %2892 }
 0x5cb   : > { %v2896_v2 = vmul.f32 0.03125, %v2893_v39  ;;  %v2890_v56 = vpop.xlane.xlu0 %2889 }
 0x5cc   : > { %v2895_v18 = vmul.f32 0.03125, %v2890_v56  ;;  %v6096_v56 = vmov 0.0  }
 0x5cd   : > { %v2898_v13 = vsub.f32 %v2887_v47, %v2896_v2  ;;  %5543 = vmatprep.subr.mxu0 %v6096_v56  ;;  %5545 = vmatprep.mubr.msk.f32.mxu0 %vm6097_vm11, %v6096_v56 }
 0x5ce   : > { %v2897_v10 = vsub.f32 %v2886_v19, %v2895_v18  ;;  %v1421_v19 = vld [vmem:[%s1336_s7 + $0x10] sm:$0xff]  ;;  %v5292_v18 = vld [vmem:[%s1331_s2] ss:$0 sm:$0xff]  ;;  %s6098_s7 = smov 120   ;;  %s6104_s2 = smov 80  }
 0x5cf   : > { %v2900_v43 = vmul.f32 %v2898_v13, %v2898_v13  ;;  %v5728_v2 = vpack.c.bf16 %v1422_v32, %v1421_v19 }
 0x5d0   : > { %v2899_v26 = vmul.f32 %v2897_v10, %v2897_v10 }
 0x5d1   : > { %v2904_v7 = vsel %vm1451_vm0, %v2900_v43, 0.0 }
 0x5d2   : > { %v2901_v42 = vsel %vm1451_vm0, %v2899_v26, 0.0 }
 0x5d3   : > { %2902 = vadd.xlane.f32.xlu0 %v2901_v42  ;;  %v5295_v42 = vld [vmem:[%s1339_s10] ss:$0 sm:$0xff]  ;;  %s6105_s10 = smov 8  }
 0x5d7   : > { %2905 = vadd.xlane.f32.xlu0 %v2904_v7 }
 0x660   : > { %v2903_v49 = vpop.xlane.xlu0 %2902 }
 0x661   : > { %v2907_v45 = vmul.f32 0.03125, %v2903_v49 }
 0x663   : > { %v2909_v48 = vadd.f32 1e-05, %v2907_v45 }
 0x664   : > { %v2906_v53 = vpop.xlane.xlu0 %2905 }
 0x665   : > { %5987 = vrsqrt.f32 %v2909_v48  ;;  %v2908_v50 = vmul.f32 0.03125, %v2906_v53 }
 0x667   : > { %v2910_v12 = vadd.f32 1e-05, %v2908_v50 }
 0x669   : > { %5989 = vrsqrt.f32 %v2910_v12 }
 0x66f   : > { %v5988_v61 = vpop.eup %5987 }
 0x670   : > { %v2913_v4 = vmul.f32 %v5988_v61, %v2897_v10 }
 0x672   : > { %v2921_v25 = vmul.f32 %v5288_v1, %v2913_v4 }
 0x673   : > { %v5990_v51 = vpop.eup %5989 }
 0x674   : > { %v7042_v58 = vadd.f32 %v5289_v30, %v2921_v25  ;;  %v2914_v16 = vmul.f32 %v5990_v51, %v2898_v13 }
 0x676   : > { %v2931_v8 = vsel %vm1451_vm0, %v7042_v58, 0.0  ;;  %v2922_v44 = vmul.f32 %v5288_v1, %v2914_v16 }
 0x677   : > { %2932 = vadd.xlane.f32.xlu1 %v2931_v8 }
 0x678   : > { %v7046_v38 = vadd.f32 %v5289_v30, %v2922_v44 }
 0x67a   : > { %v2934_v9 = vsel %vm1451_vm0, %v7046_v38, 0.0 }
 0x67b   : > { %2935 = vadd.xlane.f32.xlu0 %v2934_v9 }
 0x704   : > { %v2933_v41 = vpop.xlane.xlu1 %2932 }
 0x705   : > { %v2937_v29 = vmul.f32 0.03125, %v2933_v41 }
 0x707   : > { %v2939_v40 = vsub.f32 %v7042_v58, %v2937_v29 }
 0x708   : > { %v2936_v5 = vpop.xlane.xlu0 %2935 }
 0x709   : > { %v2938_v20 = vmul.f32 0.03125, %v2936_v5  ;;  %v2941_v6 = vmul.f32 %v2939_v40, %v2939_v40 }
 0x70b   : > { %v2940_v3 = vsub.f32 %v7046_v38, %v2938_v20  ;;  %v2943_v0 = vsel %vm1451_vm0, %v2941_v6, 0.0 }
 0x70c   : > { %2944 = vadd.xlane.f32.xlu1 %v2943_v0 }
 0x70d   : > { %v2942_v55 = vmul.f32 %v2940_v3, %v2940_v3 }
 0x70f   : > { %v2946_v22 = vsel %vm1451_vm0, %v2942_v55, 0.0 }
 0x710   : > { %2947 = vadd.xlane.f32.xlu0 %v2946_v22 }
 0x799   : > { %v2945_v59 = vpop.xlane.xlu1 %2944 }
 0x79a   : > { %v2949_v14 = vmul.f32 0.03125, %v2945_v59 }
 0x79c   : > { %v2951_v23 = vadd.f32 1e-05, %v2949_v14 }
 0x79d   : > { %v2948_v28 = vpop.xlane.xlu0 %2947 }
 0x79e   : > { %5991 = vrsqrt.f32 %v2951_v23  ;;  %v2950_v63 = vmul.f32 0.03125, %v2948_v28 }
 0x7a0   : > { %v2952_v21 = vadd.f32 1e-05, %v2950_v63 }
 0x7a2   : > { %5993 = vrsqrt.f32 %v2952_v21 }
 0x7a8   : > { %v5992_v46 = vpop.eup %5991 }
 0x7a9   : > { %v2955_v54 = vmul.f32 %v5992_v46, %v2939_v40 }
 0x7ab   : > { %v2963_v34 = vmul.f32 %v5290_v24, %v2955_v54 }
 0x7ac   : > { %v5994_v47 = vpop.eup %5993 }
 0x7ad   : > { %v2956_v15 = vmul.f32 %v5994_v47, %v2940_v3  ;;  %v2971_v31 = vadd.f32 %v5291_v11, %v2963_v34 }
 0x7af   : > { %v2964_v52 = vmul.f32 %v5290_v24, %v2956_v15  ;;  %5529 = vmatprep.mubr.msk.f32.mxu1 %vm1451_vm0, %v2971_v31 }
 0x7b1   : > { %v2972_v39 = vadd.f32 %v5291_v11, %v2964_v52 }
 0x7b3   : > { %5530 = vmatmul.mubr.msk.f32.vlgmr.msra.gmra.mrb[2].mxu1 %vm1451_vm0, %v2972_v39 }
 0x7b4   : > { %5727 = vmatpush3.bf16.msra.mxu1 %v5724_v60  ;;  %5540 = vmatprep.mubr.msk.f32.mxu1 %vm1451_vm0, %v2971_v31 }
 0x7b5   : > { %5729 = vmatprep.subr.bf16.mxu1 %v5728_v2 }
 0x7b8   : > { %5731 = vmatpush3.bf16.msra.mxu1 %v5728_v2 }
 0x7b9   : > { %5553 = vmatprep.subr.mxu1 %v6096_v56 }
 0x7bb   : > { %5541 = vmatmul.mubr.msk.f32.vlgmr.msra.gmra.mrb[4].mxu1 %vm1451_vm0, %v2972_v39 }
 0x7bc   : > { %5555 = vmatprep.mubr.msk.f32.mxu1 %vm6097_vm11, %v6096_v56 }
 0x886   : > { %v5531_v13 = vpop.f32.mrb[2].mxu1 }
 0x887   : > { %v3051_v10 = vpop.f32.mrb[3].mxu1  ;;  %v3057_v48 = vadd.f32 %v5531_v13, %v5292_v18 }
 0x888   : > { %v3052_v26 = vadd.f32 %v5292_v18, %v3051_v10 }
 0x88a   : > { %3306 = vrot.lane.b32.xlu0 %v3052_v26, %s6098_s7 }
 0x88e   : > { %v5542_v43 = vpop.f32.mrb[4].mxu1 }
 0x88f   : > { %v3132_v7 = vpop.f32.mrb[5].mxu1  ;;  %v7083_v45 = vadd.f32 %v5542_v43, %v5295_v42 }
 0x890   : > { %v7076_v49 = vadd.f32 %v5295_v42, %v3132_v7 }
 0x892   : > { %3308 = vrot.lane.b32.xlu1 %v7076_v49, %s6098_s7  ;;  %5544 = vmatpush3.xpose.msk.msra.mxu0 %vm3141_vm12, %v7076_v49 }
 0x893   : > { %3640 = vrot.lane.b32.xlu0 %v7076_v49, %s6099_s11  ;;  %5548 = vmatprep.subr.mxu0 %v6096_v56 }
 0x895   : > { %5546 = vmatmul.mubr.msk.f32.vlgmr.msra.gmra.mrb[10].mxu0 %vm3141_vm12, %v3052_v26 }
 0x896   : > { %3474 = vrot.lane.b32.xlu1 %v7076_v49, %s6100_s23  ;;  %5550 = vmatprep.mubr.msk.f32.mxu0 %vm6097_vm11, %v6096_v56 }
 0x897   : > { %3987 = vrot.lane.b32.xlu0 %v7083_v45, %s6098_s7 }
 0x89a   : > { %3472 = vrot.lane.b32.xlu1 %v3052_v26, %s6100_s23 }
 0x89b   : > { %4153 = vrot.lane.b32.xlu0 %v7083_v45, %s6100_s23 }
 0x89e   : > { %3638 = vrot.lane.b32.xlu1 %v3052_v26, %s6099_s11 }
 0x89f   : > { %4319 = vrot.lane.b32.xlu0 %v7083_v45, %s6099_s11 }
 0x8a2   : > { %3985 = vrot.lane.b32.xlu1 %v3057_v48, %s6098_s7  ;;  %s7311_s7 = sld [smem:[#allocation6_spill]] }
 0x8a3   : > { %3230 = vrot.lane.b32.xlu0 %v7076_v49, %s6101_s22 }
 0x8a6   : > { %4151 = vrot.lane.b32.xlu1 %v3057_v48, %s6100_s23  ;;  %s6107_s23 = smov 24  }
 0x8aa   : > { %4317 = vrot.lane.b32.xlu1 %v3057_v48, %s6099_s11  ;;  %s6106_s11 = smov 16  }
 0x8ae   : > { %3396 = vrot.lane.b32.xlu1 %v7076_v49, %s6102_s28 }
 0x8fc   : > { %v3307_v53 = vpop.permute.xlu0 %3306 }
 0x904   : > { %v3309_v50 = vpop.permute.xlu1 %3308 }
 0x905   : > { %v3641_v12 = vpop.permute.xlu0 %3640  ;;  %5554 = vmatpush3.xpose.msk.msra.mxu1 %vm3141_vm12, %v3309_v50 }
 0x906   : > { %5563 = vmatprep.subr.mxu1 %v6096_v56 }
 0x908   : > { %v3475_v61 = vpop.permute.xlu1 %3474  ;;  %5556 = vmatmul.mubr.msk.f32.vlgmr.msra.gmra.mrb[6].mxu1 %vm3141_vm12, %v3307_v53 }
 0x909   : > { %v3988_v1 = vpop.permute.xlu0 %3987  ;;  %5564 = vmatpush3.xpose.msk.msra.mxu1 %vm3141_vm12, %v3475_v61  ;;  %5565 = vmatprep.mubr.msk.f32.mxu1 %vm6097_vm11, %v6096_v56 }
 0x90a   : > { %5573 = vmatprep.subr.mxu1 %v6096_v56 }
 0x90c   : > { %v3473_v4 = vpop.permute.xlu1 %3472 }
 0x90d   : > { %v4154_v30 = vpop.permute.xlu0 %4153  ;;  %5566 = vmatmul.mubr.msk.f32.vlgmr.msra.gmra.mrb[8].mxu1 %vm3141_vm12, %v3473_v4 }
 0x90e   : > { %5574 = vmatpush3.xpose.msk.msra.mxu1 %vm3141_vm12, %v3641_v12  ;;  %5575 = vmatprep.mubr.msk.f32.mxu1 %vm6097_vm11, %v6096_v56 }
 0x90f   : > { %5583 = vmatprep.subr.mxu1 %v6096_v56 }
 0x910   : > { %v3639_v25 = vpop.permute.xlu1 %3638 }
 0x911   : > { %v4320_v51 = vpop.permute.xlu0 %4319  ;;  %5576 = vmatmul.mubr.msk.f32.vlgmr.msra.gmra.mrb[10].mxu1 %vm3141_vm12, %v3639_v25 }
 0x912   : > { %5584 = vmatpush3.xpose.msk.msra.mxu1 %vm3141_vm12, %v7083_v45  ;;  %5585 = vmatprep.mubr.msk.f32.mxu1 %vm6097_vm11, %v6096_v56 }
 0x913   : > { %5593 = vmatprep.subr.mxu1 %v6096_v56 }
 0x914   : > { %v3986_v16 = vpop.permute.xlu1 %3985 }
 0x915   : > { %v3231_v8 = vpop.permute.xlu0 %3230  ;;  %5586 = vmatmul.mubr.msk.f32.vlgmr.msra.gmra.mrb[12].mxu1 %vm3141_vm12, %v3057_v48 }
 0x916   : > { %5549 = vmatpush3.msra.mxu0 %v3231_v8  ;;  %5594 = vmatpush3.xpose.msk.msra.mxu1 %vm3141_vm12, %v3988_v1 }
 0x917   : > { %5595 = vmatprep.mubr.msk.f32.mxu1 %vm6097_vm11, %v6096_v56  ;;  %5603 = vmatprep.subr.mxu1 %v6096_v56 }
 0x918   : > { %5558 = vmatprep.subr.mxu0 %v6096_v56  ;;  %v4152_v44 = vpop.permute.xlu1 %4151 }
 0x919   : > { %5596 = vmatmul.mubr.msk.f32.vlgmr.msra.gmra.mrb[14].mxu1 %vm3141_vm12, %v3986_v16 }
 0x91a   : > { %5604 = vmatpush3.xpose.msk.msra.mxu1 %vm3141_vm12, %v4154_v30  ;;  %5605 = vmatprep.mubr.msk.f32.mxu1 %vm6097_vm11, %v6096_v56 }
 0x91b   : > { %5613 = vmatprep.subr.mxu1 %v6096_v56 }
 0x91c   : > { %v4318_v9 = vpop.permute.xlu1 %4317 }
 0x91d   : > { %5606 = vmatmul.mubr.msk.f32.vlgmr.msra.gmra.mrb[16].mxu1 %vm3141_vm12, %v4152_v44 }
 0x91e   : > { %5614 = vmatpush3.xpose.msk.msra.mxu1 %vm3141_vm12, %v4320_v51  ;;  %5615 = vmatprep.mubr.msk.f32.mxu1 %vm6097_vm11, %v6096_v56 }
 0x920   : > { %v3397_v2 = vpop.permute.xlu1 %3396 }
 0x921   : > { %5616 = vmatmul.mubr.msk.f32.vlgmr.msra.gmra.mrb[18].mxu1 %vm3141_vm12, %v4318_v9 }
 0x968   : > { %v3214_v41 = vpop.f32.mrb[10].mxu0 }
 0x969   : > { %v3218_v29 = vmul.f32 0.35355338, %v3214_v41  ;;  %v5547_v40 = vpop.f32.mrb[11].mxu0 }
 0x96b   : > { %v3219_v5 = vsel %vm3141_vm12, %v3218_v29, -inf }
 0x96c   : > { %3220 = vmax.xlane.f32.xlu0 %v3219_v5 }
 0x9db   : > { %v3380_v20 = vpop.f32.mrb[6].mxu1 }
 0x9dc   : > { %v3384_v6 = vmul.f32 0.35355338, %v3380_v20  ;;  %v5557_v3 = vpop.f32.mrb[7].mxu1 }
 0x9de   : > { %v3385_v0 = vsel %vm3141_vm12, %v3384_v6, -inf }
 0x9df   : > { %3386 = vmax.xlane.f32.xlu1 %v3385_v0 }
 0x9e0   : > { %v3546_v55 = vpop.f32.mrb[8].mxu1 }
 0x9e1   : > { %v3550_v22 = vmul.f32 0.35355338, %v3546_v55  ;;  %v5567_v35 = vpop.f32.mrb[9].mxu1 }
 0x9e3   : > { %v3551_v37 = vsel %vm3141_vm12, %v3550_v22, -inf }
 0x9e4   : > { %v3712_v57 = vpop.f32.mrb[10].mxu1  ;;  %3552 = vmax.xlane.f32.xlu0 %v3551_v37 }
 0x9e5   : > { %v3716_v33 = vmul.f32 0.35355338, %v3712_v57  ;;  %v5577_v36 = vpop.f32.mrb[11].mxu1 }
 0x9e7   : > { %v3717_v62 = vsel %vm3141_vm12, %v3716_v33, -inf }
 0x9e8   : > { %v3893_v27 = vpop.f32.mrb[12].mxu1  ;;  %3718 = vmax.xlane.f32.xlu0 %v3717_v62 }
 0x9e9   : > { %v3897_v17 = vmul.f32 0.35355338, %v3893_v27  ;;  %v5587_v60 = vpop.f32.mrb[13].mxu1 }
 0x9eb   : > { %v3898_v59 = vsel %vm3141_vm12, %v3897_v17, -inf }
 0x9ec   : > { %3899 = vmax.xlane.f32.xlu1 %v3898_v59  ;;  %v4059_v14 = vpop.f32.mrb[14].mxu1 }
 0x9ed   : > { %v4063_v23 = vmul.f32 0.35355338, %v4059_v14  ;;  %v5597_v28 = vpop.f32.mrb[15].mxu1 }
 0x9ef   : > { %v4064_v63 = vsel %vm3141_vm12, %v4063_v23, -inf }
 0x9f0   : > { %v4225_v21 = vpop.f32.mrb[16].mxu1  ;;  %4065 = vmax.xlane.f32.xlu0 %v4064_v63 }
 0x9f1   : > { %v4229_v46 = vmul.f32 0.35355338, %v4225_v21  ;;  %v5607_v24 = vpop.f32.mrb[17].mxu1 }
 0x9f3   : > { %v4230_v54 = vsel %vm3141_vm12, %v4229_v46, -inf }
 0x9f4   : > { %4231 = vmax.xlane.f32.xlu1 %v4230_v54  ;;  %v4391_v11 = vpop.f32.mrb[18].mxu1 }
 0x9f5   : > { %v4395_v34 = vmul.f32 0.35355338, %v4391_v11  ;;  %v5617_v47 = vpop.f32.mrb[19].mxu1 }
 0x9f7   : > { %v4396_v15 = vsel %vm3141_vm12, %v4395_v34, -inf }
 0x9f8   : > { %4397 = vmax.xlane.f32.xlu0 %v4396_v15 }
 0x9f9   : > { %v3221_v31 = vpop.xlane.xlu0 %3220 }
 0x9fa   : > { %v3222_v19 = vsub.f32 %v3218_v29, %v3221_v31 }
 0x9fc   : > { %v3223_v32 = vmul.f32 1.442695, %v3222_v19 }
 0x9fe   : > { %5995 = vpow2.f32 %v3223_v32 }
 0xa05   : > { %3728 = vrot.lane.b32.xlu1 %v7076_v49, %s6103_s1 }
 0xa08   : > { %v5996_v52 = vpop.eup %5995 }
 0xa09   : > { %v3225_v39 = vsel %vm3141_vm12, %v5996_v52, 0.0 }
 0xa0e   : > { %3562 = vrot.lane.b32.xlu0 %v7076_v49, %s6104_s2 }
 0xa29   : > { %3226 = vadd.xlane.f32.xlu1 %v3225_v39 }
 0xa6c   : > { %v3387_v18 = vpop.xlane.xlu1 %3386 }
 0xa6d   : > { %v3388_v13 = vsub.f32 %v3384_v6, %v3387_v18 }
 0xa6f   : > { %v3389_v10 = vmul.f32 1.442695, %v3388_v13 }
 0xa71   : > { %5997 = vpow2.f32 %v3389_v10  ;;  %v3553_v26 = vpop.xlane.xlu0 %3552 }
 0xa72   : > { %v3554_v42 = vsub.f32 %v3550_v22, %v3553_v26 }
 0xa74   : > { %v3555_v43 = vmul.f32 1.442695, %v3554_v42 }
 0xa75   : > { %v3719_v7 = vpop.xlane.xlu0 %3718 }
 0xa76   : > { %5999 = vpow2.f32 %v3555_v43  ;;  %v3720_v48 = vsub.f32 %v3716_v33, %v3719_v7 }
 0xa78   : > { %v3721_v49 = vmul.f32 1.442695, %v3720_v48 }
 0xa79   : > { %v3900_v30 = vpop.xlane.xlu1 %3899 }
 0xa7a   : > { %6001 = vpow2.f32 %v3721_v49  ;;  %v3901_v25 = vsub.f32 %v3897_v17, %v3900_v30 }
 0xa7b   : > { %v5998_v53 = vpop.eup %5997 }
 0xa7c   : > { %v3391_v50 = vsel %vm3141_vm12, %v5998_v53, 0.0  ;;  %v3902_v44 = vmul.f32 1.442695, %v3901_v25 }
 0xa7d   : > { %3392 = vadd.xlane.f32.xlu0 %v3391_v50  ;;  %v4066_v51 = vpop.xlane.xlu0 %4065 }
 0xa7e   : > { %v4067_v8 = vsub.f32 %v4063_v23, %v4066_v51  ;;  %6003 = vpow2.f32 %v3902_v44 }
 0xa80   : > { %v6000_v12 = vpop.eup %5999  ;;  %v4068_v29 = vmul.f32 1.442695, %v4067_v8 }
 0xa81   : > { %v3557_v61 = vsel %vm3141_vm12, %v6000_v12, 0.0  ;;  %v4232_v16 = vpop.xlane.xlu1 %4231 }
 0xa82   : > { %3558 = vadd.xlane.f32.xlu1 %v3557_v61  ;;  %v4233_v9 = vsub.f32 %v4229_v46, %v4232_v16  ;;  %6005 = vpow2.f32 %v4068_v29 }
 0xa84   : > { %v7145_v1 = vpop.eup %6001  ;;  %v4234_v40 = vmul.f32 1.442695, %v4233_v9 }
 0xa85   : > { %v3723_v4 = vsel %vm3141_vm12, %v7145_v1, 0.0  ;;  %v4398_v41 = vpop.xlane.xlu0 %4397  ;;  %v3729_v6 = vpop.permute.xlu1 %3728 }
 0xa86   : > { %3724 = vadd.xlane.f32.xlu0 %v3723_v4  ;;  %v4399_v5 = vsub.f32 %v4395_v34, %v4398_v41  ;;  %6007 = vpow2.f32 %v4234_v40 }
 0xa88   : > { %v4400_v20 = vmul.f32 1.442695, %v4399_v5  ;;  %v6004_v3 = vpop.eup %6003 }
 0xa89   : > { %v3904_v22 = vsel %vm3141_vm12, %v6004_v3, 0.0  ;;  %v3563_v17 = vpop.permute.xlu0 %3562 }
 0xa8a   : > { %6009 = vpow2.f32 %v4400_v20 }
 0xa8c   : > { %v7153_v0 = vpop.eup %6005 }
 0xa8d   : > { %v4070_v57 = vsel %vm3141_vm12, %v7153_v0, 0.0 }
 0xa90   : > { %v7156_v35 = vpop.eup %6007 }
 0xa91   : > { %v4236_v37 = vsel %vm3141_vm12, %v7156_v35, 0.0 }
 0xa93   : > { %4075 = vrot.lane.b32.xlu1 %v7083_v45, %s6102_s28  ;;  %s7312_s28 = sld [smem:[#allocation7_spill]] }
 0xa94   : > { %v7162_v33 = vpop.eup %6009 }
 0xa95   : > { %v4402_v36 = vsel %vm3141_vm12, %v7162_v33, 0.0 }
 0xa9c   : > { %3909 = vrot.lane.b32.xlu0 %v7083_v45, %s6101_s22  ;;  %s1344_s22 = scalar_lea.vmem %s7311_s7, %s6279_s0  ;;  %s7314_s7 = sld [smem:[#allocation14_spill]] }
 0xa9d   : > { %v1425_v61 = vld [vmem:[%s1344_s22 + $0x8] sm:$0xff]  ;;  %v1426_v4 = vld [vmem:[%s1344_s22 + $0x10] sm:$0xff]  ;;  %v1427_v30 = vld [vmem:[%s1344_s22 + $0x18] sm:$0xff] }
 0xa9e   : > { %v5736_v25 = vpack.c.bf16 %v1427_v30, %v1426_v4 }
 0xab6   : > { %v3227_v55 = vpop.xlane.xlu1 %3226 }
 0xab7   : > { %6011 = vrcp.f32 %v3227_v55  ;;  %3905 = vadd.xlane.f32.xlu1 %v3904_v22 }
 0xabb   : > { %4237 = vadd.xlane.f32.xlu1 %v4236_v37  ;;  %4071 = vadd.xlane.f32.xlu0 %v4070_v57 }
 0xabf   : > { %4403 = vadd.xlane.f32.xlu1 %v4402_v36 }
 0xac1   : > { %v6012_v62 = vpop.eup %6011 }
 0xac2   : > { %v3229_v27 = vmul.f32 %v6012_v62, %v5996_v52 }
 0xac4   : > { %5551 = vmatmul.mubr.msk.f32.vlgmr.msra.gmra.mrb[12].mxu0 %vm3141_vm12, %v3229_v27 }
 0xac5   : > { %5559 = vmatpush3.msra.mxu0 %v3397_v2  ;;  %5560 = vmatprep.mubr.msk.f32.mxu0 %vm6097_vm11, %v6096_v56 }
 0xac6   : > { %5568 = vmatprep.subr.mxu0 %v6096_v56 }
 0xad0   : > { %4407 = vrot.lane.b32.xlu1 %v7083_v45, %s6103_s1  ;;  %s1347_s1 = scalar_lea.vmem %s7312_s28, %s7319_s16  ;;  %s1369_s28 = scalar_lea.vmem %s6251_s20, %s7319_s16 }
 0xad1   : > { %4241 = vrot.lane.b32.xlu0 %v7083_v45, %s6104_s2  ;;  %v5322_v62 = vld [vmem:[%s1347_s1] ss:$0 sm:$0xff]  ;;  %s7313_s2 = sld [smem:[#allocation12_spill]]  ;;  %s1372_s1 = scalar_lea.vmem %s6256_s27, %s7319_s16 }
 0xb0a   : > { %v3393_v60 = vpop.xlane.xlu0 %3392 }
 0xb0b   : > { %6013 = vrcp.f32 %v3393_v60 }
 0xb0f   : > { %v3559_v59 = vpop.xlane.xlu1 %3558 }
 0xb10   : > { %6015 = vrcp.f32 %v3559_v59 }
 0xb13   : > { %v3725_v14 = vpop.xlane.xlu0 %3724  ;;  %v4076_v54 = vpop.permute.xlu1 %4075 }
 0xb14   : > { %6017 = vrcp.f32 %v3725_v14 }
 0xb15   : > { %v6014_v23 = vpop.eup %6013 }
 0xb16   : > { %v3395_v28 = vmul.f32 %v6014_v23, %v5998_v53 }
 0xb17   : > { %v3910_v24 = vpop.permute.xlu0 %3909 }
 0xb18   : > { %5561 = vmatmul.mubr.msk.f32.vlgmr.msra.gmra.mrb[14].mxu0 %vm3141_vm12, %v3395_v28 }
 0xb19   : > { %5569 = vmatpush3.msra.mxu0 %v3563_v17  ;;  %5570 = vmatprep.mubr.msk.f32.mxu0 %vm6097_vm11, %v6096_v56 }
 0xb1a   : > { %v6016_v63 = vpop.eup %6015  ;;  %5578 = vmatprep.subr.mxu0 %v6096_v56 }
 0xb1b   : > { %v3561_v21 = vmul.f32 %v6016_v63, %v6000_v12  ;;  %v1424_v12 = vld [vmem:[%s1344_s22] sm:$0xff] }
 0xb1d   : > { %5571 = vmatmul.mubr.msk.f32.vlgmr.msra.gmra.mrb[16].mxu0 %vm3141_vm12, %v3561_v21 }
 0xb1e   : > { %v6018_v45 = vpop.eup %6017  ;;  %5579 = vmatpush3.msra.mxu0 %v3729_v6  ;;  %5580 = vmatprep.mubr.msk.f32.mxu0 %vm6097_vm11, %v6096_v56 }
 0xb1f   : > { %v3727_v46 = vmul.f32 %v6018_v45, %v7145_v1  ;;  %5588 = vmatprep.subr.mxu0 %v6096_v56  ;;  %v5732_v1 = vpack.c.bf16 %v1425_v61, %v1424_v12 }
 0xb21   : > { %5581 = vmatmul.mubr.msk.f32.vlgmr.msra.gmra.mrb[18].mxu0 %vm3141_vm12, %v3727_v46  ;;  %5733 = vmatprep.subr.bf16.mxu1 %v5732_v1 }
 0xb22   : > { %5589 = vmatpush3.msra.mxu0 %v3910_v24  ;;  %5590 = vmatprep.mubr.msk.f32.mxu0 %vm6097_vm11, %v6096_v56 }
 0xb23   : > { %5598 = vmatprep.subr.mxu0 %v6096_v56  ;;  %5735 = vmatpush3.bf16.msra.mxu1 %v5732_v1 }
 0xb24   : > { %5737 = vmatprep.subr.bf16.mxu1 %v5736_v25 }
 0xb27   : > { %5739 = vmatpush3.bf16.msra.mxu1 %v5736_v25 }
 0xb44   : > { %v3906_v11 = vpop.xlane.xlu1 %3905 }
 0xb45   : > { %6019 = vrcp.f32 %v3906_v11 }
 0xb48   : > { %v4238_v34 = vpop.xlane.xlu1 %4237  ;;  %v4072_v47 = vpop.xlane.xlu0 %4071 }
 0xb49   : > { %6021 = vrcp.f32 %v4072_v47 }
 0xb4a   : > { %6023 = vrcp.f32 %v4238_v34 }
 0xb4c   : > { %v4404_v15 = vpop.xlane.xlu1 %4403  ;;  %v4242_v2 = vpop.permute.xlu0 %4241 }
 0xb4d   : > { %6025 = vrcp.f32 %v4404_v15 }
 0xb4f   : > { %v6020_v31 = vpop.eup %6019 }
 0xb50   : > { %v3908_v19 = vmul.f32 %v6020_v31, %v6004_v3  ;;  %v4408_v10 = vpop.permute.xlu1 %4407 }
 0xb52   : > { %5591 = vmatmul.mubr.msk.f32.vlgmr.msra.gmra.mrb[20].mxu0 %vm3141_vm12, %v3908_v19 }
 0xb53   : > { %5599 = vmatpush3.msra.mxu0 %v4076_v54  ;;  %5600 = vmatprep.mubr.msk.f32.mxu0 %vm6097_vm11, %v6096_v56  ;;  %v6022_v32 = vpop.eup %6021 }
 0xb54   : > { %5608 = vmatprep.subr.mxu0 %v6096_v56  ;;  %v4074_v52 = vmul.f32 %v6022_v32, %v7153_v0  ;;  %v6024_v39 = vpop.eup %6023 }
 0xb55   : > { %v4240_v18 = vmul.f32 %v6024_v39, %v7156_v35 }
 0xb56   : > { %5601 = vmatmul.mubr.msk.f32.vlgmr.msra.gmra.mrb[22].mxu0 %vm3141_vm12, %v4074_v52 }
 0xb57   : > { %5609 = vmatpush3.msra.mxu0 %v4242_v2  ;;  %5610 = vmatprep.mubr.msk.f32.mxu0 %vm6097_vm11, %v6096_v56  ;;  %v6026_v13 = vpop.eup %6025 }
 0xb58   : > { %5618 = vmatprep.subr.mxu0 %v6096_v56  ;;  %v4406_v26 = vmul.f32 %v6026_v13, %v7162_v33 }
 0xb5a   : > { %5611 = vmatmul.mubr.msk.f32.vlgmr.msra.gmra.mrb[24].mxu0 %vm3141_vm12, %v4240_v18 }
 0xb5b   : > { %5619 = vmatpush3.msra.mxu0 %v4408_v10  ;;  %5620 = vmatprep.mubr.msk.f32.mxu0 %vm6097_vm11, %v6096_v56 }
 0xb5e   : > { %5621 = vmatmul.mubr.msk.f32.vlgmr.msra.gmra.mrb[26].mxu0 %vm3141_vm12, %v4406_v26 }
 0xb97   : > { %v3302_v42 = vpop.f32.mrb[12].mxu0 }
 0xb98   : > { %v5552_v43 = vpop.f32.mrb[13].mxu0 }
 0xbeb   : > { %v3468_v7 = vpop.f32.mrb[14].mxu0 }
 0xbec   : > { %3805 = vrot.lane.b32.xlu0 %v3468_v7, %s6105_s10  ;;  %v5562_v48 = vpop.f32.mrb[15].mxu0 }
 0xbf0   : > { %v3634_v49 = vpop.f32.mrb[16].mxu0 }
 0xbf1   : > { %3809 = vrot.lane.b32.xlu1 %v3634_v49, %s6106_s11  ;;  %v5572_v53 = vpop.f32.mrb[17].mxu0 }
 0xbf4   : > { %v3800_v50 = vpop.f32.mrb[18].mxu0 }
 0xbf5   : > { %3813 = vrot.lane.b32.xlu1 %v3800_v50, %s6107_s23  ;;  %v5582_v56 = vpop.f32.mrb[19].mxu0 }
 0xc25   : > { %v3981_v51 = vpop.f32.mrb[20].mxu0 }
 0xc26   : > { %v5592_v16 = vpop.f32.mrb[21].mxu0 }
 0xc29   : > { %v4147_v8 = vpop.f32.mrb[22].mxu0 }
 0xc2a   : > { %4484 = vrot.lane.b32.xlu0 %v4147_v8, %s6105_s10  ;;  %v5602_v44 = vpop.f32.mrb[23].mxu0  ;;  %s1358_s10 = scalar_lea.vmem %s7313_s2, %s6279_s0  ;;  %s7315_s0 = sld [smem:[#allocation10_spill]] }
 0xc2b   : > { %v1433_v15 = vld [vmem:[%s1358_s10] sm:$0xff]  ;;  %v1434_v31 = vld [vmem:[%s1358_s10 + $0x8] sm:$0xff]  ;;  %v1435_v19 = vld [vmem:[%s1358_s10 + $0x10] sm:$0xff]  ;;  %s1375_s2 = scalar_lea.vmem %s6261_s4, %s7319_s16 }
 0xc2c   : > { %v5740_v32 = vpack.c.bf16 %v1434_v31, %v1433_v15  ;;  %v1436_v52 = vld [vmem:[%s1358_s10 + $0x18] sm:$0xff] }
 0xc2d   : > { %v4313_v9 = vpop.f32.mrb[24].mxu0  ;;  %v5744_v39 = vpack.c.bf16 %v1436_v52, %v1435_v19 }
 0xc2e   : > { %4488 = vrot.lane.b32.xlu0 %v4313_v9, %s6106_s11  ;;  %v5612_v41 = vpop.f32.mrb[25].mxu0  ;;  %5741 = vmatprep.subr.bf16.mxu0 %v5740_v32  ;;  %s7220_s11 = scalar_lea.vmem %s7314_s7, %s6295_s26  ;;  %s7316_s26 = sld [smem:[#allocation11_spill]] }
 0xc2f   : > { %5743 = vmatpush3.bf16.msra.mxu0 %v5740_v32  ;;  %v1438_v2 = vld [vmem:[%s7220_s11] sm:$0xff]  ;;  %v1439_v18 = vld [vmem:[%s7220_s11 + $0x8] sm:$0xff]  ;;  %v1440_v13 = vld [vmem:[%s7220_s11 + $0x10] sm:$0xff]  ;;  %s1380_s7 = scalar_lea.vmem %s6266_s12, %s6282_s18 }
 0xc30   : > { %5745 = vmatprep.subr.bf16.mxu0 %v5744_v39  ;;  %v5748_v10 = vpack.c.bf16 %v1439_v18, %v1438_v2  ;;  %v1441_v26 = vld [vmem:[%s7220_s11 + $0x18] sm:$0xff]  ;;  %v1442_v43 = vld [vmem:[%s7220_s11 + $0x20] sm:$0xff]  ;;  %v1443_v7 = vld [vmem:[%s7220_s11 + $0x28] sm:$0xff] }
 0xc31   : > { %v4479_v29 = vpop.f32.mrb[26].mxu0  ;;  %v5756_v48 = vpack.c.bf16 %v1443_v7, %v1442_v43  ;;  %v5325_v4 = vld [vmem:[%s7315_s0] ss:$0 sm:$0xff] }
 0xc32   : > { %4492 = vrot.lane.b32.xlu1 %v4479_v29, %s6107_s23  ;;  %v5622_v40 = vpop.f32.mrb[27].mxu0  ;;  %5749 = vmatprep.subr.bf16.mxu1 %v5748_v10  ;;  %s7317_s23 = sld [smem:[#allocation13_spill]]  ;;  %v1444_v29 = vld [vmem:[%s7220_s11 + $0x30] sm:$0xff]  ;;  %v5333_v43 = vld [vmem:[%s1372_s1] ss:$0 sm:$0xff] }
 0xc33   : > { %5747 = vmatpush3.bf16.msra.mxu0 %v5744_v39  ;;  %v1445_v40 = vld [vmem:[%s7220_s11 + $0x38] sm:$0xff] }
 0xc34   : > { %v5326_v25 = vld [vmem:[%s7316_s26] ss:$0 sm:$0xff] }
 0xc38   : > { %s1361_s22 = scalar_lea.vmem %s7317_s23, %s7319_s16 }
 0xc5e   : > { %v3806_v5 = vpop.permute.xlu0 %3805 }
 0xc5f   : > { %v3816_v6 = vsel %vm3141_vm12, %v3302_v42, %v3806_v5  ;;  %v5752_v42 = vpack.c.bf16 %v1441_v26, %v1440_v13  ;;  %v5760_v5 = vpack.c.bf16 %v1445_v40, %v1444_v29 }
 0xc63   : > { %v3810_v20 = vpop.permute.xlu1 %3809 }
 0xc64   : > { %v3818_v3 = vsel %vm3817_vm13, %v3816_v6, %v3810_v20  ;;  %v5327_v20 = vld [vmem:[%s1361_s22] ss:$0 sm:$0xff] }
 0xc67   : > { %v3814_v0 = vpop.permute.xlu1 %3813 }
 0xc68   : > { %v3820_v55 = vsel %vm3819_vm14, %v3818_v3, %v3814_v0 }
 0xc69   : > { %5631 = vmatprep.mubr.msk.f32.mxu1 %vm1451_vm0, %v3820_v55 }
 0xc9c   : > { %v4485_v22 = vpop.permute.xlu0 %4484 }
 0xc9d   : > { %v4495_v37 = vsel %vm3141_vm12, %v3981_v51, %v4485_v22 }
 0xca0   : > { %v4489_v35 = vpop.permute.xlu0 %4488 }
 0xca1   : > { %v4496_v57 = vsel %vm3817_vm13, %v4495_v37, %v4489_v35  ;;  %v5332_v37 = vld [vmem:[%s1369_s28] ss:$0 sm:$0xff] }
 0xca4   : > { %v4493_v33 = vpop.permute.xlu1 %4492 }
 0xca5   : > { %v4497_v36 = vsel %vm3819_vm14, %v4496_v57, %v4493_v33 }
 0xca6   : > { %5632 = vmatmul.mubr.msk.f32.vlgmr.msra.gmra.mrb[20].mxu1 %vm1451_vm0, %v4497_v36 }
 0xca7   : > { %5751 = vmatpush3.bf16.msra.mxu1 %v5748_v10 }
 0xca8   : > { %5753 = vmatprep.subr.bf16.mxu1 %v5752_v42 }
 0xcab   : > { %5755 = vmatpush3.bf16.msra.mxu1 %v5752_v42 }
 0xcac   : > { %5757 = vmatprep.subr.bf16.mxu1 %v5756_v48 }
 0xcaf   : > { %5759 = vmatpush3.bf16.msra.mxu1 %v5756_v48 }
 0xcb0   : > { %5761 = vmatprep.subr.bf16.mxu1 %v5760_v5 }
 0xcb3   : > { %5763 = vmatpush3.bf16.msra.mxu1 %v5760_v5 }
 0xd79   : > { %v5633_v27 = vpop.f32.mrb[20].mxu1 }
 0xd7a   : > { %v4582_v17 = vadd.f32 %v5633_v27, %v5322_v62  ;;  %v4576_v60 = vpop.f32.mrb[21].mxu1 }
 0xd7b   : > { %v4577_v59 = vadd.f32 %v5322_v62, %v4576_v60 }
 0xd7c   : > { %v4586_v14 = vadd.f32 %v4582_v17, %v7046_v38 }
 0xd7d   : > { %v4585_v23 = vadd.f32 %v4577_v59, %v7042_v58 }
 0xd7e   : > { %v4590_v28 = vsel %vm1451_vm0, %v4586_v14, 0.0 }
 0xd7f   : > { %4591 = vadd.xlane.f32.xlu1 %v4590_v28  ;;  %v4587_v63 = vsel %vm1451_vm0, %v4585_v23, 0.0 }
 0xd80   : > { %4588 = vadd.xlane.f32.xlu0 %v4587_v63 }
 0xe0c   : > { %v4592_v21 = vpop.xlane.xlu1 %4591 }
 0xe0d   : > { %v4594_v45 = vmul.f32 0.03125, %v4592_v21  ;;  %v4589_v46 = vpop.xlane.xlu0 %4588 }
 0xe0e   : > { %v4593_v24 = vmul.f32 0.03125, %v4589_v46 }
 0xe0f   : > { %v4596_v54 = vsub.f32 %v4586_v14, %v4594_v45 }
 0xe10   : > { %v4595_v11 = vsub.f32 %v4585_v23, %v4593_v24 }
 0xe11   : > { %v4598_v58 = vmul.f32 %v4596_v54, %v4596_v54 }
 0xe12   : > { %v4597_v34 = vmul.f32 %v4595_v11, %v4595_v11 }
 0xe13   : > { %v4602_v47 = vsel %vm1451_vm0, %v4598_v58, 0.0 }
 0xe14   : > { %v4599_v38 = vsel %vm1451_vm0, %v4597_v34, 0.0 }
 0xe15   : > { %4600 = vadd.xlane.f32.xlu0 %v4599_v38 }
 0xe19   : > { %4603 = vadd.xlane.f32.xlu0 %v4602_v47 }
 0xea2   : > { %v4601_v49 = vpop.xlane.xlu0 %4600 }
 0xea3   : > { %v4605_v53 = vmul.f32 0.03125, %v4601_v49 }
 0xea5   : > { %v4607_v50 = vadd.f32 1e-05, %v4605_v53  ;;  %v5334_v53 = vld [vmem:[%s1375_s2] ss:$0 sm:$0xff] }
 0xea6   : > { %v4604_v56 = vpop.xlane.xlu0 %4603 }
 0xea7   : > { %6027 = vrsqrt.f32 %v4607_v50  ;;  %v4606_v12 = vmul.f32 0.03125, %v4604_v56 }
 0xea9   : > { %v4608_v61 = vadd.f32 1e-05, %v4606_v12 }
 0xeab   : > { %6029 = vrsqrt.f32 %v4608_v61 }
 0xeb1   : > { %v6028_v1 = vpop.eup %6027 }
 0xeb2   : > { %v4611_v30 = vmul.f32 %v6028_v1, %v4595_v11 }
 0xeb4   : > { %v4619_v51 = vmul.f32 %v5325_v4, %v4611_v30 }
 0xeb5   : > { %v6030_v16 = vpop.eup %6029 }
 0xeb6   : > { %v4612_v8 = vmul.f32 %v6030_v16, %v4596_v54  ;;  %v4627_v44 = vadd.f32 %v5326_v25, %v4619_v51 }
 0xeb8   : > { %v4620_v9 = vmul.f32 %v5325_v4, %v4612_v8  ;;  %5642 = vmatprep.mubr.msk.f32.mxu0 %vm1451_vm0, %v4627_v44 }
 0xeba   : > { %v4628_v41 = vadd.f32 %v5326_v25, %v4620_v9 }
 0xebc   : > { %5643 = vmatmul.mubr.msk.f32.vlgmr.msra.gmra.mrb[28].mxu0 %vm1451_vm0, %v4628_v41 }
 0xf8f   : > { %v5644_v6 = vpop.f32.mrb[28].mxu0 }
 0xf90   : > { %v4713_v3 = vadd.f32 %v5644_v6, %v5327_v20  ;;  %v4707_v0 = vpop.f32.mrb[29].mxu0 }
 0xf91   : > { %v4708_v55 = vadd.f32 %v5327_v20, %v4707_v0 }
 0xf92   : > { %v4717_v35 = vmax.f32 %v4713_v3, 0.0 }
 0xf93   : > { %v4716_v22 = vmax.f32 %v4708_v55, 0.0 }
 0xf95   : > { %5661 = vmatprep.mubr.msk.f32.mxu1 %vm1608_vm4, %v4716_v22 }
 0xf96   : > { %5662 = vmatmul.mubr.msk.f32.vlgmr.msra.gmra.mrb[22].mxu1 %vm1608_vm4, %v4717_v35 }
0x1069   : > { %v5663_v57 = vpop.f32.mrb[22].mxu1 }
0x106a   : > { %v4800_v33 = vadd.f32 %v5663_v57, %v4628_v41  ;;  %v4790_v36 = vpop.f32.mrb[23].mxu1 }
0x106b   : > { %v4799_v62 = vadd.f32 %v4790_v36, %v4627_v44 }
0x106c   : > { %v4808_v27 = vadd.f32 %v5332_v37, %v4800_v33 }
0x106d   : > { %v4807_v17 = vadd.f32 %v5332_v37, %v4799_v62 }
0x106e   : > { %v4812_v60 = vsel %vm1451_vm0, %v4808_v27, 0.0 }
0x106f   : > { %4813 = vadd.xlane.f32.xlu0 %v4812_v60  ;;  %v4809_v59 = vsel %vm1451_vm0, %v4807_v17, 0.0 }
0x1070   : > { %4810 = vadd.xlane.f32.xlu1 %v4809_v59 }
0x10fc   : > { %v4814_v14 = vpop.xlane.xlu0 %4813 }
0x10fd   : > { %v4816_v23 = vmul.f32 0.03125, %v4814_v14  ;;  %v4811_v28 = vpop.xlane.xlu1 %4810 }
0x10fe   : > { %v4815_v63 = vmul.f32 0.03125, %v4811_v28 }
0x10ff   : > { %v4818_v21 = vsub.f32 %v4808_v27, %v4816_v23 }
0x1100   : > { %v4817_v45 = vsub.f32 %v4807_v17, %v4815_v63 }
0x1101   : > { %v4820_v46 = vmul.f32 %v4818_v21, %v4818_v21  ;;  %v4837_v7 = vmul.f32 %v5333_v43, %v4818_v21 }
0x1102   : > { %v4819_v24 = vmul.f32 %v4817_v45, %v4817_v45  ;;  %v4836_v49 = vmul.f32 %v5333_v43, %v4817_v45 }
0x1103   : > { %v4824_v54 = vsel %vm1451_vm0, %v4820_v46, 0.0 }
0x1104   : > { %4825 = vadd.xlane.f32.xlu0 %v4824_v54  ;;  %v4821_v11 = vsel %vm1451_vm0, %v4819_v24, 0.0 }
0x1105   : > { %4822 = vadd.xlane.f32.xlu1 %v4821_v11 }
0x1191   : > { %v4826_v34 = vpop.xlane.xlu0 %4825 }
0x1192   : > { %v4829_v38 = vmul.f32 0.032258064, %v4826_v34  ;;  %v4823_v58 = vpop.xlane.xlu1 %4822 }
0x1193   : > { %v4828_v47 = vmul.f32 0.032258064, %v4823_v58 }
0x1194   : > { %6031 = vrsqrt.f32 %v4829_v38  ;;  %vm4847_vm15 = vcmp.eq.f32.partialorder %v4829_v38, inf  ;;  %v4850_v32 = vand.u32 2147483648, %v4829_v38  ;;  %vm4849_vm1 = vcmp.eq.f32.partialorder %v4829_v38, 0.0 }
0x1195   : > { %6033 = vrsqrt.f32 %v4828_v47  ;;  %vm4840_vm2 = vcmp.eq.f32.partialorder %v4828_v47, inf  ;;  %v4843_v2 = vand.u32 2147483648, %v4828_v47  ;;  %vm4842_vm3 = vcmp.eq.f32.partialorder %v4828_v47, 0.0 }
0x119e   : > { %v6032_v15 = vpop.eup %6031 }
0x119f   : > { %v6034_v31 = vpop.eup %6033  ;;  %v4846_v19 = vmul.f32 %v6032_v15, %v4829_v38 }
0x11a0   : > { %v4839_v52 = vmul.f32 %v6034_v31, %v4828_v47 }
0x11a1   : > { %v4848_v39 = vsel %vm4847_vm15, %v4829_v38, %v4846_v19 }
0x11a2   : > { %v4851_v18 = vsel %vm4849_vm1, %v4850_v32, %v4848_v39  ;;  %v4841_v13 = vsel %vm4840_vm2, %v4828_v47, %v4839_v52 }
0x11a3   : > { %v4853_v10 = vadd.f32 1e-06, %v4851_v18  ;;  %v4844_v26 = vsel %vm4842_vm3, %v4843_v2, %v4841_v13 }
0x11a4   : > { %v4852_v42 = vadd.f32 1e-06, %v4844_v26 }
0x11a5   : > { %6035 = vrcp.f32 %v4853_v10 }
0x11a6   : > { %6037 = vrcp.f32 %v4852_v42 }
0x11af   : > { %v6036_v48 = vpop.eup %6035 }
0x11b0   : > { %v6038_v50 = vpop.eup %6037  ;;  %v4857_v56 = vmul.f32 %v6036_v48, %v4837_v7 }
0x11b1   : > { %v4855_v12 = vmul.f32 %v6038_v50, %v4836_v49 }
0x11b2   : > { %v4865_v61 = vadd.f32 %v5334_v53, %v4857_v56 }
0x11b3   : > { %v4864_v1 = vadd.f32 %v5334_v53, %v4855_v12 }
0x11b4   : > { %4867 = vst.msk [vmem:[%s1380_s7 + $0x8] sm:$0xff] %vm1451_vm0, %v4865_v61 }
0x11b5   : > { %4866 = vst.msk [vmem:[%s1380_s7] sm:$0xff] %vm1451_vm0, %v4864_v1 }
0x11b6 PF: > { %s71_s15 = sadd.s32 1, %s6047_s15  }
0x11b7   : > { %p68_p4 = scmp.ge.s32.totalorder %s71_s15, 5  }
0x11b9   :  { %70 = sbr.rel (!%p68_p4) target bundleno = 53 (0x35), region = 281 }

</bundles_post_ra>
